<compile_context>
chip_gen: v7x
topology: tpu7x:2x2x1
jax: 0.10.0
libtpu: 0.0.40
codegen_flags: <defaults>
</compile_context>

<pallas_src>
import jax
import jax.numpy as jnp
from jax.experimental import pallas as pl
from jax.experimental.pallas import tpu as pltpu

_EPS = 1e-6
_SQRT2 = 1.4142135623730951


def _vmem_limit(est_bytes):
    # Explicit scoped-VMEM budget with headroom; stays under v7x's 64 MiB physical.
    return int(min(48 * 1024 * 1024, max(16 * 1024 * 1024, 2 * int(est_bytes))))


# ---------------------------------------------------------------------------
# Kernel 1: downsample = per-pixel channel LayerNorm + 2x2/stride-2 conv.
# Input pre-im2col'ed in the wrapper to (P, 4*Cin), tiled over P on the grid.
# LayerNorm stats come from a matmul with a block-diagonal averaging matrix
# (keeps the tiny-C reduction off the XLU); the conv is one fused MXU dot.
# ---------------------------------------------------------------------------
def _downsample_kernel(xcol_ref, avg_ref, lng_ref, lnb_ref, w_ref, b_ref, out_ref):
    x = xcol_ref[...]                                            # (TP, 4*Cin) f32
    mu = jnp.dot(x, avg_ref[...], preferred_element_type=jnp.float32)
    dev = x - mu
    var = jnp.dot(dev * dev, avg_ref[...], preferred_element_type=jnp.float32)
    xn = dev * jax.lax.rsqrt(var + _EPS) * lng_ref[...] + lnb_ref[...]
    # 2x2/stride-2 conv == single matmul over the flattened (tap, cin) axis.
    out_ref[...] = (jnp.dot(xn, w_ref[...], preferred_element_type=jnp.float32)
                    + b_ref[...])


def pallas_downsample(x_nhwc, ln_g, ln_b, w_hwio, bias, *, tile_rows=512):
    N, H, W, Cin = x_nhwc.shape
    Ho, Wo = H // 2, W // 2
    Cout = w_hwio.shape[-1]
    assert w_hwio.shape == (2, 2, Cin, Cout), "downsample weight must be HWIO (2,2,Cin,Cout)"
    K = 4 * Cin
    P = N * Ho * Wo

    # im2col (layout glue, XLA): (N,H,W,Cin) -> (P, 4*Cin), taps in (kh,kw) order.
    xcol = (x_nhwc.reshape(N, Ho, 2, Wo, 2, Cin)
            .transpose(0, 1, 3, 2, 4, 5)
            .reshape(P, K))

    # Pad the pixel dim so the grid divides evenly (junk rows are sliced off).
    tp = max(8, min(tile_rows, ((P + 7) // 8) * 8))
    Ppad = ((P + tp - 1) // tp) * tp
    if Ppad != P:
        xcol = jnp.pad(xcol, ((0, Ppad - P), (0, 0)))

    # Block-diagonal averaging matrix: one (Cin x Cin)/Cin block per 2x2 tap.
    avg = jnp.kron(jnp.eye(4, dtype=jnp.float32),
                   jnp.full((Cin, Cin), 1.0 / Cin, jnp.float32))
    lng_t = jnp.tile(ln_g, 4).reshape(1, K)
    lnb_t = jnp.tile(ln_b, 4).reshape(1, K)
    w2d = w_hwio.reshape(K, Cout)
    b2d = bias.reshape(1, Cout)

    full = lambda a: pl.BlockSpec(a.shape, lambda i, _a=a: (0,) * _a.ndim)
    est = 4 * (tp * K + tp * Cout) * 4 + (K * K + 2 * K + K * Cout + Cout) * 4

    out = pl.pallas_call(
        _downsample_kernel,
        out_shape=jax.ShapeDtypeStruct((Ppad, Cout), jnp.float32),
        grid=(Ppad // tp,),
        in_specs=[pl.BlockSpec((tp, K), lambda i: (i, 0)),
                  full(avg), full(lng_t), full(lnb_t), full(w2d), full(b2d)],
        out_specs=pl.BlockSpec((tp, Cout), lambda i: (i, 0)),
        compiler_params=pltpu.CompilerParams(
            dimension_semantics=("parallel",),
            vmem_limit_bytes=_vmem_limit(est)),
    )(xcol, avg, lng_t, lnb_t, w2d, b2d)
    return out[:P].reshape(N, Ho, Wo, Cout)


# ---------------------------------------------------------------------------
# Kernel 2: the full stack of ConvNeXt blocks, fused, gridded over the batch.
# Per grid step (one image): pad once into a VMEM scratch, then run all blocks
# back-to-back from that scratch (residual read from the scratch center, no
# extra HBM traffic between blocks).
# ---------------------------------------------------------------------------
def _blocks_kernel(x_ref, dww_ref, dwb_ref, lng_ref, lnb_ref,
                   w1_ref, b1_ref, w2_ref, b2_ref, gamma_ref,
                   out_ref, xpad_ref):
    _, H, W, C = x_ref.shape
    depth = dww_ref.shape[0]

    # hoisted constants (avoid broadcasts inside the loop)
    jc = jnp.full((C, C), 1.0 / C, jnp.float32)   # channel-averaging matrix (MXU reduce)

    # Stage the image into the zero-padded scratch (halo = 3 for the 7x7 dwconv).
    xpad_ref[...] = jnp.zeros_like(xpad_ref)
    xpad_ref[3:3 + H, 3:3 + W, :] = x_ref[0]

    for blk in range(depth):                                 # depth is small & static
        xp = xpad_ref[...]                                   # (H+6, W+6, C) f32
        res = xp[3:3 + H, 3:3 + W, :].reshape(H * W, C)      # residual (shortcut=identity)

        # ---- depthwise 7x7 conv: 7 sublane (W) shifts, 49 cheap row (H) shifts ----
        wk = dww_ref[blk]                                    # (49, C)
        acc = jnp.zeros((H, W, C), jnp.float32) + dwb_ref[blk]
        for dx in range(7):
            slab = xp[:, dx:dx + W, :]                       # one W-shifted slab live at a time
            for dy in range(7):
                acc = acc + slab[dy:dy + H] * wk[dy * 7 + dx]

        # ---- channels-last LayerNorm (channel reduce via MXU ones-matmul) ----
        a2 = acc.reshape(H * W, C)
        mu = jnp.dot(a2, jc, preferred_element_type=jnp.float32)
        dev = a2 - mu
        var = jnp.dot(dev * dev, jc, preferred_element_type=jnp.float32)
        xn = dev * jax.lax.rsqrt(var + _EPS) * lng_ref[blk] + lnb_ref[blk]

        # ---- MLP: Linear -> exact GELU -> Linear (bf16 MXU operands, f32 accum) ----
        h = jnp.dot(xn.astype(jnp.bfloat16), w1_ref[blk],
                    preferred_element_type=jnp.float32) + b1_ref[blk]
        h = 0.5 * h * (1.0 + jax.lax.erf(h / _SQRT2))        # exact GELU (nn.GELU default)
        y = jnp.dot(h.astype(jnp.bfloat16), w2_ref[blk],
                    preferred_element_type=jnp.float32) + b2_ref[blk]

        # ---- layer-scale + residual (drop_path p=0 -> identity) ----
        y = (y * gamma_ref[blk] + res).reshape(H, W, C)
        if blk + 1 < depth:
            xpad_ref[3:3 + H, 3:3 + W, :] = y                # next block reads from scratch
        else:
            out_ref[0] = y


def pallas_blocks(x_nhwc, blocks):
    N, H, W, C = x_nhwc.shape
    depth = len(blocks)
    hidden = blocks[0]["w1"].shape[-1]
    for b in blocks:
        assert b["dw_w"].shape == (7, 7, C), "dw_w must be (7,7,C) (permute torch (C,1,7,7))"
        assert b["w1"].shape == (C, hidden) and b["w2"].shape == (hidden, C), \
            "w1/w2 must be (in,out) (transpose torch Linear weights)"

    stack = lambda name, dt=jnp.float32: jnp.stack([b[name].astype(dt) for b in blocks])
    dww = stack("dw_w").reshape(depth, 49, C)
    dwb = stack("dw_b")
    lng, lnb = stack("ln_g"), stack("ln_b")
    w1 = stack("w1", jnp.bfloat16)           # bf16 MXU operands (f32 accumulate in-kernel)
    w2 = stack("w2", jnp.bfloat16)
    b1, b2 = stack("b1"), stack("b2")
    gamma = stack("gamma")

    full = lambda a: pl.BlockSpec(a.shape, lambda n, _a=a: (0,) * _a.ndim)

    pad_b = (H + 6) * (W + 6) * C * 4
    tile_b = H * W * C * 4
    hid_b = H * W * hidden * 4
    wgt_b = sum(int(a.size) * a.dtype.itemsize
                for a in (dww, dwb, lng, lnb, w1, b1, w2, b2, gamma))
    est = pad_b + 4 * tile_b + 2 * hid_b + 2 * wgt_b

    # NOTE: tiling is per-image (grid over N). For very large spatial extents a
    # further row-tiling with a 3-row halo would shrink the per-step footprint.
    return pl.pallas_call(
        _blocks_kernel,
        out_shape=jax.ShapeDtypeStruct((N, H, W, C), jnp.float32),
        grid=(N,),
        in_specs=[pl.BlockSpec((1, H, W, C), lambda n: (n, 0, 0, 0)),
                  full(dww), full(dwb), full(lng), full(lnb),
                  full(w1), full(b1), full(w2), full(b2), full(gamma)],
        out_specs=pl.BlockSpec((1, H, W, C), lambda n: (n, 0, 0, 0)),
        scratch_shapes=[pltpu.VMEM((H + 6, W + 6, C), jnp.float32)],
        compiler_params=pltpu.CompilerParams(
            dimension_semantics=("parallel",),
            vmem_limit_bytes=_vmem_limit(est)),
    )(x_nhwc, dww, dwb, lng, lnb, w1, b1, w2, b2, gamma)


# ---------------------------------------------------------------------------
# Full stage (NCHW in / NCHW out, matching the PyTorch module)
# ---------------------------------------------------------------------------
def convnext_stage(x_nchw, params):
    x = jnp.transpose(x_nchw, (0, 2, 3, 1))            # NCHW -> NHWC (layout glue)
    ds = params["downsample"]
    x = pallas_downsample(x, ds["ln_g"], ds["ln_b"], ds["w"], ds["b"])
    x = pallas_blocks(x, params["blocks"])
    return jnp.transpose(x, (0, 3, 1, 2))              # NHWC -> NCHW


def init_params(key, in_chs=4, out_chs=8, depth=2, mlp_ratio=4, ls_init_value=1.0):
    hidden = int(mlp_ratio * out_chs)
    keys = jax.random.split(key, 4 + depth * 8)
    ki = iter(range(len(keys)))
    params = {
        "downsample": {
            "ln_g": 1.0 + 0.1 * jax.random.normal(keys[next(ki)], (in_chs,), jnp.float32),
            "ln_b": 0.1 * jax.random.normal(keys[next(ki)], (in_chs,), jnp.float32),
            "w": 0.2 * jax.random.normal(keys[next(ki)], (2, 2, in_chs, out_chs), jnp.float32),
            "b": 0.1 * jax.random.normal(keys[next(ki)], (out_chs,), jnp.float32),
        },
        "blocks": [],
    }
    for _ in range(depth):
        params["blocks"].append({
            "dw_w": 0.1 * jax.random.normal(keys[next(ki)], (7, 7, out_chs), jnp.float32),
            "dw_b": 0.1 * jax.random.normal(keys[next(ki)], (out_chs,), jnp.float32),
            "ln_g": 1.0 + 0.1 * jax.random.normal(keys[next(ki)], (out_chs,), jnp.float32),
            "ln_b": 0.1 * jax.random.normal(keys[next(ki)], (out_chs,), jnp.float32),
            "w1": 0.2 * jax.random.normal(keys[next(ki)], (out_chs, hidden), jnp.float32),
            "b1": 0.1 * jax.random.normal(keys[next(ki)], (hidden,), jnp.float32),
            "w2": 0.2 * jax.random.normal(keys[next(ki)], (hidden, out_chs), jnp.float32),
            "b2": 0.1 * jax.random.normal(keys[next(ki)], (out_chs,), jnp.float32),
            "gamma": ls_init_value * jnp.ones((out_chs,), jnp.float32),
        })
    return params


if __name__ == "__main__":
    key = jax.random.PRNGKey(0)
    kx, kp = jax.random.split(key)
    # PyTorch-convention NCHW input: batch=2, in_chs=4, spatial 16x16
    x = jax.random.normal(kx, (2, 4, 16, 16), jnp.float32)
    params = init_params(kp, in_chs=4, out_chs=8, depth=2)

    out = jax.jit(convnext_stage)(x, params)           # -> (2, 8, 8, 8) NCHW
    jax.block_until_ready(out)
    assert out.shape == (2, 8, 8, 8)
    # TODO(synk): grad-checkpointing (checkpoint_seq) is a training-time autograd
    # feature with no forward-pass effect; not represented in the kernel.
    print("KERNEL_OK")
</pallas_src>

<mosaic_0001>
module attributes {stable_mosaic.version = 11 : i64} {
  func.func @_downsample_kernel(%arg0: i32, %arg1: memref<128x16xf32, #tpu.memory_space<vmem>>, %arg2: memref<16x16xf32, #tpu.memory_space<vmem>>, %arg3: memref<1x16xf32, #tpu.memory_space<vmem>>, %arg4: memref<1x16xf32, #tpu.memory_space<vmem>>, %arg5: memref<16x8xf32, #tpu.memory_space<vmem>>, %arg6: memref<1x8xf32, #tpu.memory_space<vmem>>, %arg7: memref<128x8xf32, #tpu.memory_space<vmem>>) attributes {dimension_semantics = [#tpu.dimension_semantics<parallel>], iteration_bounds = array<i64: 1>, scalar_prefetch = 0 : i64, scratch_operands = 0 : i64, tpu.core_type = #tpu.core_type<tc>, window_params = [{transform_indices = @transform_0, window_bounds = array<i64: 128, 16>}, {pipeline_mode = #tpu.pipeline_mode<synchronous>, transform_indices = @transform_1, window_bounds = array<i64: 16, 16>}, {pipeline_mode = #tpu.pipeline_mode<synchronous>, transform_indices = @transform_2, window_bounds = array<i64: 1, 16>}, {pipeline_mode = #tpu.pipeline_mode<synchronous>, transform_indices = @transform_3, window_bounds = array<i64: 1, 16>}, {pipeline_mode = #tpu.pipeline_mode<synchronous>, transform_indices = @transform_4, window_bounds = array<i64: 16, 8>}, {pipeline_mode = #tpu.pipeline_mode<synchronous>, transform_indices = @transform_5, window_bounds = array<i64: 1, 8>}, {transform_indices = @transform_6, window_bounds = array<i64: 128, 8>}]} {
    %c0 = arith.constant 0 : index
    %c0_0 = arith.constant 0 : index
    %0 = vector.load %arg1[%c0, %c0_0] : memref<128x16xf32, #tpu.memory_space<vmem>>, vector<128x16xf32>
    %c0_1 = arith.constant 0 : index
    %c0_2 = arith.constant 0 : index
    %1 = vector.load %arg2[%c0_1, %c0_2] : memref<16x16xf32, #tpu.memory_space<vmem>>, vector<16x16xf32>
    %cst = arith.constant dense<0.000000e+00> : vector<128x16xf32>
    %2 = tpu.matmul %0, %1, %cst {dimension_numbers = #tpu.dot_dimension_numbers<[1], [0], [0], [1], [0, 0, 1, 1], [], []>} : vector<128x16xf32>, vector<16x16xf32>, vector<128x16xf32> -> vector<128x16xf32>
    %3 = arith.subf %0, %2 : vector<128x16xf32>
    %4 = arith.mulf %3, %3 : vector<128x16xf32>
    %c0_3 = arith.constant 0 : index
    %c0_4 = arith.constant 0 : index
    %5 = vector.load %arg2[%c0_3, %c0_4] : memref<16x16xf32, #tpu.memory_space<vmem>>, vector<16x16xf32>
    %cst_5 = arith.constant dense<0.000000e+00> : vector<128x16xf32>
    %6 = tpu.matmul %4, %5, %cst_5 {dimension_numbers = #tpu.dot_dimension_numbers<[1], [0], [0], [1], [0, 0, 1, 1], [], []>} : vector<128x16xf32>, vector<16x16xf32>, vector<128x16xf32> -> vector<128x16xf32>
    %cst_6 = arith.constant 9.99999997E-7 : f32
    %7 = vector.broadcast %cst_6 : f32 to vector<128x16xf32>
    %8 = arith.addf %6, %7 : vector<128x16xf32>
    %9 = math.rsqrt %8 : vector<128x16xf32>
    %10 = arith.mulf %3, %9 : vector<128x16xf32>
    %c0_7 = arith.constant 0 : index
    %c0_8 = arith.constant 0 : index
    %11 = vector.load %arg3[%c0_7, %c0_8] : memref<1x16xf32, #tpu.memory_space<vmem>>, vector<1x16xf32>
    %12 = vector.broadcast %11 : vector<1x16xf32> to vector<128x16xf32>
    %13 = arith.mulf %10, %12 : vector<128x16xf32>
    %c0_9 = arith.constant 0 : index
    %c0_10 = arith.constant 0 : index
    %14 = vector.load %arg4[%c0_9, %c0_10] : memref<1x16xf32, #tpu.memory_space<vmem>>, vector<1x16xf32>
    %15 = vector.broadcast %14 : vector<1x16xf32> to vector<128x16xf32>
    %16 = arith.addf %13, %15 : vector<128x16xf32>
    %c0_11 = arith.constant 0 : index
    %c0_12 = arith.constant 0 : index
    %17 = vector.load %arg5[%c0_11, %c0_12] : memref<16x8xf32, #tpu.memory_space<vmem>>, vector<16x8xf32>
    %cst_13 = arith.constant dense<0.000000e+00> : vector<128x8xf32>
    %18 = tpu.matmul %16, %17, %cst_13 {dimension_numbers = #tpu.dot_dimension_numbers<[1], [0], [0], [1], [0, 0, 1, 1], [], []>} : vector<128x16xf32>, vector<16x8xf32>, vector<128x8xf32> -> vector<128x8xf32>
    %c0_14 = arith.constant 0 : index
    %c0_15 = arith.constant 0 : index
    %19 = vector.load %arg6[%c0_14, %c0_15] : memref<1x8xf32, #tpu.memory_space<vmem>>, vector<1x8xf32>
    %20 = vector.broadcast %19 : vector<1x8xf32> to vector<128x8xf32>
    %21 = arith.addf %18, %20 : vector<128x8xf32>
    %c0_16 = arith.constant 0 : index
    %c0_17 = arith.constant 0 : index
    %22 = vector.load %arg7[%c0_16, %c0_17] : memref<128x8xf32, #tpu.memory_space<vmem>>, vector<128x8xf32>
    tpu.vector_store %arg7[%c0_16, %c0_17], %21 {strides = array<i32>} : memref<128x8xf32, #tpu.memory_space<vmem>>, vector<128x8xf32>,
    return
  }
  func.func @transform_0(%arg0: i32) -> (i32, i32) {
    %c0_i32 = arith.constant 0 : i32
    %c0_i32_0 = arith.constant 0 : i32
    return %arg0, %c0_i32 : i32, i32
  }
  func.func @transform_1(%arg0: i32) -> (i32, i32) {
    %c0_i32 = arith.constant 0 : i32
    %c0_i32_0 = arith.constant 0 : i32
    %c0_i32_1 = arith.constant 0 : i32
    return %c0_i32, %c0_i32_0 : i32, i32
  }
  func.func @transform_2(%arg0: i32) -> (i32, i32) {
    %c0_i32 = arith.constant 0 : i32
    %c0_i32_0 = arith.constant 0 : i32
    %c0_i32_1 = arith.constant 0 : i32
    return %c0_i32, %c0_i32_0 : i32, i32
  }
  func.func @transform_3(%arg0: i32) -> (i32, i32) {
    %c0_i32 = arith.constant 0 : i32
    %c0_i32_0 = arith.constant 0 : i32
    %c0_i32_1 = arith.constant 0 : i32
    return %c0_i32, %c0_i32_0 : i32, i32
  }
  func.func @transform_4(%arg0: i32) -> (i32, i32) {
    %c0_i32 = arith.constant 0 : i32
    %c0_i32_0 = arith.constant 0 : i32
    %c0_i32_1 = arith.constant 0 : i32
    return %c0_i32, %c0_i32_0 : i32, i32
  }
  func.func @transform_5(%arg0: i32) -> (i32, i32) {
    %c0_i32 = arith.constant 0 : i32
    %c0_i32_0 = arith.constant 0 : i32
    %c0_i32_1 = arith.constant 0 : i32
    return %c0_i32, %c0_i32_0 : i32, i32
  }
  func.func @transform_6(%arg0: i32) -> (i32, i32) {
    %c0_i32 = arith.constant 0 : i32
    %c0_i32_0 = arith.constant 0 : i32
    return %arg0, %c0_i32 : i32, i32
  }
}

module attributes {stable_mosaic.version = 11 : i64} {
  func.func @_blocks_kernel(%arg0: i32, %arg1: memref<1x8x8x8xf32, #tpu.memory_space<vmem>>, %arg2: memref<2x49x8xf32, #tpu.memory_space<vmem>>, %arg3: memref<2x8xf32, #tpu.memory_space<vmem>>, %arg4: memref<2x8xf32, #tpu.memory_space<vmem>>, %arg5: memref<2x8xf32, #tpu.memory_space<vmem>>, %arg6: memref<2x8x32xbf16, #tpu.memory_space<vmem>>, %arg7: memref<2x32xf32, #tpu.memory_space<vmem>>, %arg8: memref<2x32x8xbf16, #tpu.memory_space<vmem>>, %arg9: memref<2x8xf32, #tpu.memory_space<vmem>>, %arg10: memref<2x8xf32, #tpu.memory_space<vmem>>, %arg11: memref<1x8x8x8xf32, #tpu.memory_space<vmem>>, %arg12: memref<14x14x8xf32, #tpu.memory_space<vmem>>) attributes {dimension_semantics = [#tpu.dimension_semantics<parallel>], iteration_bounds = array<i64: 2>, scalar_prefetch = 0 : i64, scratch_operands = 1 : i64, tpu.core_type = #tpu.core_type<tc>, window_params = [{transform_indices = @transform_0, window_bounds = array<i64: 1, 8, 8, 8>}, {pipeline_mode = #tpu.pipeline_mode<synchronous>, transform_indices = @transform_1, window_bounds = array<i64: 2, 49, 8>}, {pipeline_mode = #tpu.pipeline_mode<synchronous>, transform_indices = @transform_2, window_bounds = array<i64: 2, 8>}, {pipeline_mode = #tpu.pipeline_mode<synchronous>, transform_indices = @transform_3, window_bounds = array<i64: 2, 8>}, {pipeline_mode = #tpu.pipeline_mode<synchronous>, transform_indices = @transform_4, window_bounds = array<i64: 2, 8>}, {pipeline_mode = #tpu.pipeline_mode<synchronous>, transform_indices = @transform_5, window_bounds = array<i64: 2, 8, 32>}, {pipeline_mode = #tpu.pipeline_mode<synchronous>, transform_indices = @transform_6, window_bounds = array<i64: 2, 32>}, {pipeline_mode = #tpu.pipeline_mode<synchronous>, transform_indices = @transform_7, window_bounds = array<i64: 2, 32, 8>}, {pipeline_mode = #tpu.pipeline_mode<synchronous>, transform_indices = @transform_8, window_bounds = array<i64: 2, 8>}, {pipeline_mode = #tpu.pipeline_mode<synchronous>, transform_indices = @transform_9, window_bounds = array<i64: 2, 8>}, {transform_indices = @transform_10, window_bounds = array<i64: 1, 8, 8, 8>}]} {
    %cst = arith.constant 1.250000e-01 : f32
    %0 = vector.broadcast %cst : f32 to vector<8x8xf32>
    %cst_0 = arith.constant 0.000000e+00 : f32
    %1 = vector.broadcast %cst_0 : f32 to vector<14x14x8xf32>
    %c0 = arith.constant 0 : index
    %c0_1 = arith.constant 0 : index
    %c0_2 = arith.constant 0 : index
    %2 = vector.load %arg12[%c0, %c0_1, %c0_2] : memref<14x14x8xf32, #tpu.memory_space<vmem>>, vector<14x14x8xf32>
    tpu.vector_store %arg12[%c0, %c0_1, %c0_2], %1 {strides = array<i32>} : memref<14x14x8xf32, #tpu.memory_space<vmem>>, vector<14x14x8xf32>,
    %c0_3 = arith.constant 0 : index
    %c0_4 = arith.constant 0 : index
    %c0_5 = arith.constant 0 : index
    %c0_6 = arith.constant 0 : index
    %3 = vector.load %arg1[%c0_3, %c0_4, %c0_5, %c0_6] : memref<1x8x8x8xf32, #tpu.memory_space<vmem>>, vector<1x8x8x8xf32>
    %4 = vector.shape_cast %3 : vector<1x8x8x8xf32> to vector<8x8x8xf32>
    %c3 = arith.constant 3 : index
    %c3_7 = arith.constant 3 : index
    %c0_8 = arith.constant 0 : index
    %5 = vector.load %arg12[%c3, %c3_7, %c0_8] : memref<14x14x8xf32, #tpu.memory_space<vmem>>, vector<8x8x8xf32>
    tpu.vector_store %arg12[%c3, %c3_7, %c0_8], %4 {strides = array<i32>} : memref<14x14x8xf32, #tpu.memory_space<vmem>>, vector<8x8x8xf32>,
    %c0_9 = arith.constant 0 : index
    %c0_10 = arith.constant 0 : index
    %c0_11 = arith.constant 0 : index
    %6 = vector.load %arg12[%c0_9, %c0_10, %c0_11] : memref<14x14x8xf32, #tpu.memory_space<vmem>>, vector<14x14x8xf32>
    %7 = vector.extract_strided_slice %6 {offsets = [3, 3, 0], sizes = [8, 8, 8], strides = [1, 1, 1]} : vector<14x14x8xf32> to vector<8x8x8xf32>
    %8 = vector.shape_cast %7 : vector<8x8x8xf32> to vector<64x8xf32>
    %c0_12 = arith.constant 0 : index
    %c0_13 = arith.constant 0 : index
    %c0_14 = arith.constant 0 : index
    %9 = vector.load %arg2[%c0_12, %c0_13, %c0_14] : memref<2x49x8xf32, #tpu.memory_space<vmem>>, vector<1x49x8xf32>
    %10 = vector.shape_cast %9 : vector<1x49x8xf32> to vector<49x8xf32>
    %cst_15 = arith.constant 0.000000e+00 : f32
    %11 = vector.broadcast %cst_15 : f32 to vector<8x8x8xf32>
    %c0_16 = arith.constant 0 : index
    %c0_17 = arith.constant 0 : index
    %12 = vector.load %arg3[%c0_16, %c0_17] : memref<2x8xf32, #tpu.memory_space<vmem>>, vector<1x8xf32>
    %13 = vector.shape_cast %12 : vector<1x8xf32> to vector<8xf32>
    %14 = vector.shape_cast %13 : vector<8xf32> to vector<1x1x8xf32>
    %15 = vector.broadcast %14 : vector<1x1x8xf32> to vector<8x8x8xf32>
    %16 = arith.addf %11, %15 : vector<8x8x8xf32>
    %17 = vector.extract_strided_slice %6 {offsets = [0, 0, 0], sizes = [14, 8, 8], strides = [1, 1, 1]} : vector<14x14x8xf32> to vector<14x8x8xf32>
    %18 = vector.extract_strided_slice %17 {offsets = [0, 0, 0], sizes = [8, 8, 8], strides = [1, 1, 1]} : vector<14x8x8xf32> to vector<8x8x8xf32>
    %19 = vector.extract_strided_slice %10 {offsets = [0, 0], sizes = [1, 8], strides = [1, 1]} : vector<49x8xf32> to vector<1x8xf32>
    %20 = vector.shape_cast %19 : vector<1x8xf32> to vector<8xf32>
    %21 = vector.shape_cast %20 : vector<8xf32> to vector<1x1x8xf32>
    %22 = vector.broadcast %21 : vector<1x1x8xf32> to vector<8x8x8xf32>
    %23 = arith.mulf %18, %22 : vector<8x8x8xf32>
    %24 = arith.addf %16, %23 : vector<8x8x8xf32>
    %25 = vector.extract_strided_slice %17 {offsets = [1, 0, 0], sizes = [8, 8, 8], strides = [1, 1, 1]} : vector<14x8x8xf32> to vector<8x8x8xf32>
    %26 = vector.extract_strided_slice %10 {offsets = [7, 0], sizes = [1, 8], strides = [1, 1]} : vector<49x8xf32> to vector<1x8xf32>
    %27 = vector.shape_cast %26 : vector<1x8xf32> to vector<8xf32>
    %28 = vector.shape_cast %27 : vector<8xf32> to vector<1x1x8xf32>
    %29 = vector.broadcast %28 : vector<1x1x8xf32> to vector<8x8x8xf32>
    %30 = arith.mulf %25, %29 : vector<8x8x8xf32>
    %31 = arith.addf %24, %30 : vector<8x8x8xf32>
    %32 = vector.extract_strided_slice %17 {offsets = [2, 0, 0], sizes = [8, 8, 8], strides = [1, 1, 1]} : vector<14x8x8xf32> to vector<8x8x8xf32>
    %33 = vector.extract_strided_slice %10 {offsets = [14, 0], sizes = [1, 8], strides = [1, 1]} : vector<49x8xf32> to vector<1x8xf32>
    %34 = vector.shape_cast %33 : vector<1x8xf32> to vector<8xf32>
    %35 = vector.shape_cast %34 : vector<8xf32> to vector<1x1x8xf32>
    %36 = vector.broadcast %35 : vector<1x1x8xf32> to vector<8x8x8xf32>
    %37 = arith.mulf %32, %36 : vector<8x8x8xf32>
    %38 = arith.addf %31, %37 : vector<8x8x8xf32>
    %39 = vector.extract_strided_slice %17 {offsets = [3, 0, 0], sizes = [8, 8, 8], strides = [1, 1, 1]} : vector<14x8x8xf32> to vector<8x8x8xf32>
    %40 = vector.extract_strided_slice %10 {offsets = [21, 0], sizes = [1, 8], strides = [1, 1]} : vector<49x8xf32> to vector<1x8xf32>
    %41 = vector.shape_cast %40 : vector<1x8xf32> to vector<8xf32>
    %42 = vector.shape_cast %41 : vector<8xf32> to vector<1x1x8xf32>
    %43 = vector.broadcast %42 : vector<1x1x8xf32> to vector<8x8x8xf32>
    %44 = arith.mulf %39, %43 : vector<8x8x8xf32>
    %45 = arith.addf %38, %44 : vector<8x8x8xf32>
    %46 = vector.extract_strided_slice %17 {offsets = [4, 0, 0], sizes = [8, 8, 8], strides = [1, 1, 1]} : vector<14x8x8xf32> to vector<8x8x8xf32>
    %47 = vector.extract_strided_slice %10 {offsets = [28, 0], sizes = [1, 8], strides = [1, 1]} : vector<49x8xf32> to vector<1x8xf32>
    %48 = vector.shape_cast %47 : vector<1x8xf32> to vector<8xf32>
    %49 = vector.shape_cast %48 : vector<8xf32> to vector<1x1x8xf32>
    %50 = vector.broadcast %49 : vector<1x1x8xf32> to vector<8x8x8xf32>
    %51 = arith.mulf %46, %50 : vector<8x8x8xf32>
    %52 = arith.addf %45, %51 : vector<8x8x8xf32>
    %53 = vector.extract_strided_slice %17 {offsets = [5, 0, 0], sizes = [8, 8, 8], strides = [1, 1, 1]} : vector<14x8x8xf32> to vector<8x8x8xf32>
    %54 = vector.extract_strided_slice %10 {offsets = [35, 0], sizes = [1, 8], strides = [1, 1]} : vector<49x8xf32> to vector<1x8xf32>
    %55 = vector.shape_cast %54 : vector<1x8xf32> to vector<8xf32>
    %56 = vector.shape_cast %55 : vector<8xf32> to vector<1x1x8xf32>
    %57 = vector.broadcast %56 : vector<1x1x8xf32> to vector<8x8x8xf32>
    %58 = arith.mulf %53, %57 : vector<8x8x8xf32>
    %59 = arith.addf %52, %58 : vector<8x8x8xf32>
    %60 = vector.extract_strided_slice %17 {offsets = [6, 0, 0], sizes = [8, 8, 8], strides = [1, 1, 1]} : vector<14x8x8xf32> to vector<8x8x8xf32>
    %61 = vector.extract_strided_slice %10 {offsets = [42, 0], sizes = [1, 8], strides = [1, 1]} : vector<49x8xf32> to vector<1x8xf32>
    %62 = vector.shape_cast %61 : vector<1x8xf32> to vector<8xf32>
    %63 = vector.shape_cast %62 : vector<8xf32> to vector<1x1x8xf32>
    %64 = vector.broadcast %63 : vector<1x1x8xf32> to vector<8x8x8xf32>
    %65 = arith.mulf %60, %64 : vector<8x8x8xf32>
    %66 = arith.addf %59, %65 : vector<8x8x8xf32>
    %67 = vector.extract_strided_slice %6 {offsets = [0, 1, 0], sizes = [14, 8, 8], strides = [1, 1, 1]} : vector<14x14x8xf32> to vector<14x8x8xf32>
    %68 = vector.extract_strided_slice %67 {offsets = [0, 0, 0], sizes = [8, 8, 8], strides = [1, 1, 1]} : vector<14x8x8xf32> to vector<8x8x8xf32>
    %69 = vector.extract_strided_slice %10 {offsets = [1, 0], sizes = [1, 8], strides = [1, 1]} : vector<49x8xf32> to vector<1x8xf32>
    %70 = vector.shape_cast %69 : vector<1x8xf32> to vector<8xf32>
    %71 = vector.shape_cast %70 : vector<8xf32> to vector<1x1x8xf32>
    %72 = vector.broadcast %71 : vector<1x1x8xf32> to vector<8x8x8xf32>
    %73 = arith.mulf %68, %72 : vector<8x8x8xf32>
    %74 = arith.addf %66, %73 : vector<8x8x8xf32>
    %75 = vector.extract_strided_slice %67 {offsets = [1, 0, 0], sizes = [8, 8, 8], strides = [1, 1, 1]} : vector<14x8x8xf32> to vector<8x8x8xf32>
    %76 = vector.extract_strided_slice %10 {offsets = [8, 0], sizes = [1, 8], strides = [1, 1]} : vector<49x8xf32> to vector<1x8xf32>
    %77 = vector.shape_cast %76 : vector<1x8xf32> to vector<8xf32>
    %78 = vector.shape_cast %77 : vector<8xf32> to vector<1x1x8xf32>
    %79 = vector.broadcast %78 : vector<1x1x8xf32> to vector<8x8x8xf32>
    %80 = arith.mulf %75, %79 : vector<8x8x8xf32>
    %81 = arith.addf %74, %80 : vector<8x8x8xf32>
    %82 = vector.extract_strided_slice %67 {offsets = [2, 0, 0], sizes = [8, 8, 8], strides = [1, 1, 1]} : vector<14x8x8xf32> to vector<8x8x8xf32>
    %83 = vector.extract_strided_slice %10 {offsets = [15, 0], sizes = [1, 8], strides = [1, 1]} : vector<49x8xf32> to vector<1x8xf32>
    %84 = vector.shape_cast %83 : vector<1x8xf32> to vector<8xf32>
    %85 = vector.shape_cast %84 : vector<8xf32> to vector<1x1x8xf32>
    %86 = vector.broadcast %85 : vector<1x1x8xf32> to vector<8x8x8xf32>
    %87 = arith.mulf %82, %86 : vector<8x8x8xf32>
    %88 = arith.addf %81, %87 : vector<8x8x8xf32>
    %89 = vector.extract_strided_slice %67 {offsets = [3, 0, 0], sizes = [8, 8, 8], strides = [1, 1, 1]} : vector<14x8x8xf32> to vector<8x8x8xf32>
    %90 = vector.extract_strided_slice %10 {offsets = [22, 0], sizes = [1, 8], strides = [1, 1]} : vector<49x8xf32> to vector<1x8xf32>
    %91 = vector.shape_cast %90 : vector<1x8xf32> to vector<8xf32>
    %92 = vector.shape_cast %91 : vector<8xf32> to vector<1x1x8xf32>
    %93 = vector.broadcast %92 : vector<1x1x8xf32> to vector<8x8x8xf32>
    %94 = arith.mulf %89, %93 : vector<8x8x8xf32>
    %95 = arith.addf %88, %94 : vector<8x8x8xf32>
    %96 = vector.extract_strided_slice %67 {offsets = [4, 0, 0], sizes = [8, 8, 8], strides = [1, 1, 1]} : vector<14x8x8xf32> to vector<8x8x8xf32>
    %97 = vector.extract_strided_slice %10 {offsets = [29, 0], sizes = [1, 8], strides = [1, 1]} : vector<49x8xf32> to vector<1x8xf32>
    %98 = vector.shape_cast %97 : vector<1x8xf32> to vector<8xf32>
    %99 = vector.shape_cast %98 : vector<8xf32> to vector<1x1x8xf32>
    %100 = vector.broadcast %99 : vector<1x1x8xf32> to vector<8x8x8xf32>
    %101 = arith.mulf %96, %100 : vector<8x8x8xf32>
    %102 = arith.addf %95, %101 : vector<8x8x8xf32>
    %103 = vector.extract_strided_slice %67 {offsets = [5, 0, 0], sizes = [8, 8, 8], strides = [1, 1, 1]} : vector<14x8x8xf32> to vector<8x8x8xf32>
    %104 = vector.extract_strided_slice %10 {offsets = [36, 0], sizes = [1, 8], strides = [1, 1]} : vector<49x8xf32> to vector<1x8xf32>
    %105 = vector.shape_cast %104 : vector<1x8xf32> to vector<8xf32>
    %106 = vector.shape_cast %105 : vector<8xf32> to vector<1x1x8xf32>
    %107 = vector.broadcast %106 : vector<1x1x8xf32> to vector<8x8x8xf32>
    %108 = arith.mulf %103, %107 : vector<8x8x8xf32>
    %109 = arith.addf %102, %108 : vector<8x8x8xf32>
    %110 = vector.extract_strided_slice %67 {offsets = [6, 0, 0], sizes = [8, 8, 8], strides = [1, 1, 1]} : vector<14x8x8xf32> to vector<8x8x8xf32>
    %111 = vector.extract_strided_slice %10 {offsets = [43, 0], sizes = [1, 8], strides = [1, 1]} : vector<49x8xf32> to vector<1x8xf32>
    %112 = vector.shape_cast %111 : vector<1x8xf32> to vector<8xf32>
    %113 = vector.shape_cast %112 : vector<8xf32> to vector<1x1x8xf32>
    %114 = vector.broadcast %113 : vector<1x1x8xf32> to vector<8x8x8xf32>
    %115 = arith.mulf %110, %114 : vector<8x8x8xf32>
    %116 = arith.addf %109, %115 : vector<8x8x8xf32>
    %117 = vector.extract_strided_slice %6 {offsets = [0, 2, 0], sizes = [14, 8, 8], strides = [1, 1, 1]} : vector<14x14x8xf32> to vector<14x8x8xf32>
    %118 = vector.extract_strided_slice %117 {offsets = [0, 0, 0], sizes = [8, 8, 8], strides = [1, 1, 1]} : vector<14x8x8xf32> to vector<8x8x8xf32>
    %119 = vector.extract_strided_slice %10 {offsets = [2, 0], sizes = [1, 8], strides = [1, 1]} : vector<49x8xf32> to vector<1x8xf32>
    %120 = vector.shape_cast %119 : vector<1x8xf32> to vector<8xf32>
    %121 = vector.shape_cast %120 : vector<8xf32> to vector<1x1x8xf32>
    %122 = vector.broadcast %121 : vector<1x1x8xf32> to vector<8x8x8xf32>
    %123 = arith.mulf %118, %122 : vector<8x8x8xf32>
    %124 = arith.addf %116, %123 : vector<8x8x8xf32>
    %125 = vector.extract_strided_slice %117 {offsets = [1, 0, 0], sizes = [8, 8, 8], strides = [1, 1, 1]} : vector<14x8x8xf32> to vector<8x8x8xf32>
    %126 = vector.extract_strided_slice %10 {offsets = [9, 0], sizes = [1, 8], strides = [1, 1]} : vector<49x8xf32> to vector<1x8xf32>
    %127 = vector.shape_cast %126 : vector<1x8xf32> to vector<8xf32>
    %128 = vector.shape_cast %127 : vector<8xf32> to vector<1x1x8xf32>
    %129 = vector.broadcast %128 : vector<1x1x8xf32> to vector<8x8x8xf32>
    %130 = arith.mulf %125, %129 : vector<8x8x8xf32>
    %131 = arith.addf %124, %130 : vector<8x8x8xf32>
    %132 = vector.extract_strided_slice %117 {offsets = [2, 0, 0], sizes = [8, 8, 8], strides = [1, 1, 1]} : vector<14x8x8xf32> to vector<8x8x8xf32>
    %133 = vector.extract_strided_slice %10 {offsets = [16, 0], sizes = [1, 8], strides = [1, 1]} : vector<49x8xf32> to vector<1x8xf32>
    %134 = vector.shape_cast %133 : vector<1x8xf32> to vector<8xf32>
    %135 = vector.shape_cast %134 : vector<8xf32> to vector<1x1x8xf32>
    %136 = vector.broadcast %135 : vector<1x1x8xf32> to vector<8x8x8xf32>
    %137 = arith.mulf %132, %136 : vector<8x8x8xf32>
    %138 = arith.addf %131, %137 : vector<8x8x8xf32>
    %139 = vector.extract_strided_slice %117 {offsets = [3, 0, 0], sizes = [8, 8, 8], strides = [1, 1, 1]} : vector<14x8x8xf32> to vector<8x8x8xf32>
    %140 = vector.extract_strided_slice %10 {offsets = [23, 0], sizes = [1, 8], strides = [1, 1]} : vector<49x8xf32> to vector<1x8xf32>
    %141 = vector.shape_cast %140 : vector<1x8xf32> to vector<8xf32>
    %142 = vector.shape_cast %141 : vector<8xf32> to vector<1x1x8xf32>
    %143 = vector.broadcast %142 : vector<1x1x8xf32> to vector<8x8x8xf32>
    %144 = arith.mulf %139, %143 : vector<8x8x8xf32>
    %145 = arith.addf %138, %144 : vector<8x8x8xf32>
    %146 = vector.extract_strided_slice %117 {offsets = [4, 0, 0], sizes = [8, 8, 8], strides = [1, 1, 1]} : vector<14x8x8xf32> to vector<8x8x8xf32>
    %147 = vector.extract_strided_slice %10 {offsets = [30, 0], sizes = [1, 8], strides = [1, 1]} : vector<49x8xf32> to vector<1x8xf32>
    %148 = vector.shape_cast %147 : vector<1x8xf32> to vector<8xf32>
    %149 = vector.shape_cast %148 : vector<8xf32> to vector<1x1x8xf32>
    %150 = vector.broadcast %149 : vector<1x1x8xf32> to vector<8x8x8xf32>
    %151 = arith.mulf %146, %150 : vector<8x8x8xf32>
    %152 = arith.addf %145, %151 : vector<8x8x8xf32>
    %153 = vector.extract_strided_slice %117 {offsets = [5, 0, 0], sizes = [8, 8, 8], strides = [1, 1, 1]} : vector<14x8x8xf32> to vector<8x8x8xf32>
    %154 = vector.extract_strided_slice %10 {offsets = [37, 0], sizes = [1, 8], strides = [1, 1]} : vector<49x8xf32> to vector<1x8xf32>
    %155 = vector.shape_cast %154 : vector<1x8xf32> to vector<8xf32>
    %156 = vector.shape_cast %155 : vector<8xf32> to vector<1x1x8xf32>
    %157 = vector.broadcast %156 : vector<1x1x8xf32> to vector<8x8x8xf32>
    %158 = arith.mulf %153, %157 : vector<8x8x8xf32>
    %159 = arith.addf %152, %158 : vector<8x8x8xf32>
    %160 = vector.extract_strided_slice %117 {offsets = [6, 0, 0], sizes = [8, 8, 8], strides = [1, 1, 1]} : vector<14x8x8xf32> to vector<8x8x8xf32>
    %161 = vector.extract_strided_slice %10 {offsets = [44, 0], sizes = [1, 8], strides = [1, 1]} : vector<49x8xf32> to vector<1x8xf32>
    %162 = vector.shape_cast %161 : vector<1x8xf32> to vector<8xf32>
    %163 = vector.shape_cast %162 : vector<8xf32> to vector<1x1x8xf32>
    %164 = vector.broadcast %163 : vector<1x1x8xf32> to vector<8x8x8xf32>
    %165 = arith.mulf %160, %164 : vector<8x8x8xf32>
    %166 = arith.addf %159, %165 : vector<8x8x8xf32>
    %167 = vector.extract_strided_slice %6 {offsets = [0, 3, 0], sizes = [14, 8, 8], strides = [1, 1, 1]} : vector<14x14x8xf32> to vector<14x8x8xf32>
    %168 = vector.extract_strided_slice %167 {offsets = [0, 0, 0], sizes = [8, 8, 8], strides = [1, 1, 1]} : vector<14x8x8xf32> to vector<8x8x8xf32>
    %169 = vector.extract_strided_slice %10 {offsets = [3, 0], sizes = [1, 8], strides = [1, 1]} : vector<49x8xf32> to vector<1x8xf32>
    %170 = vector.shape_cast %169 : vector<1x8xf32> to vector<8xf32>
    %171 = vector.shape_cast %170 : vector<8xf32> to vector<1x1x8xf32>
    %172 = vector.broadcast %171 : vector<1x1x8xf32> to vector<8x8x8xf32>
    %173 = arith.mulf %168, %172 : vector<8x8x8xf32>
    %174 = arith.addf %166, %173 : vector<8x8x8xf32>
    %175 = vector.extract_strided_slice %167 {offsets = [1, 0, 0], sizes = [8, 8, 8], strides = [1, 1, 1]} : vector<14x8x8xf32> to vector<8x8x8xf32>
    %176 = vector.extract_strided_slice %10 {offsets = [10, 0], sizes = [1, 8], strides = [1, 1]} : vector<49x8xf32> to vector<1x8xf32>
    %177 = vector.shape_cast %176 : vector<1x8xf32> to vector<8xf32>
    %178 = vector.shape_cast %177 : vector<8xf32> to vector<1x1x8xf32>
    %179 = vector.broadcast %178 : vector<1x1x8xf32> to vector<8x8x8xf32>
    %180 = arith.mulf %175, %179 : vector<8x8x8xf32>
    %181 = arith.addf %174, %180 : vector<8x8x8xf32>
    %182 = vector.extract_strided_slice %167 {offsets = [2, 0, 0], sizes = [8, 8, 8], strides = [1, 1, 1]} : vector<14x8x8xf32> to vector<8x8x8xf32>
    %183 = vector.extract_strided_slice %10 {offsets = [17, 0], sizes = [1, 8], strides = [1, 1]} : vector<49x8xf32> to vector<1x8xf32>
    %184 = vector.shape_cast %183 : vector<1x8xf32> to vector<8xf32>
    %185 = vector.shape_cast %184 : vector<8xf32> to vector<1x1x8xf32>
    %186 = vector.broadcast %185 : vector<1x1x8xf32> to vector<8x8x8xf32>
    %187 = arith.mulf %182, %186 : vector<8x8x8xf32>
    %188 = arith.addf %181, %187 : vector<8x8x8xf32>
    %189 = vector.extract_strided_slice %167 {offsets = [3, 0, 0], sizes = [8, 8, 8], strides = [1, 1, 1]} : vector<14x8x8xf32> to vector<8x8x8xf32>
    %190 = vector.extract_strided_slice %10 {offsets = [24, 0], sizes = [1, 8], strides = [1, 1]} : vector<49x8xf32> to vector<1x8xf32>
    %191 = vector.shape_cast %190 : vector<1x8xf32> to vector<8xf32>
    %192 = vector.shape_cast %191 : vector<8xf32> to vector<1x1x8xf32>
    %193 = vector.broadcast %192 : vector<1x1x8xf32> to vector<8x8x8xf32>
    %194 = arith.mulf %189, %193 : vector<8x8x8xf32>
    %195 = arith.addf %188, %194 : vector<8x8x8xf32>
    %196 = vector.extract_strided_slice %167 {offsets = [4, 0, 0], sizes = [8, 8, 8], strides = [1, 1, 1]} : vector<14x8x8xf32> to vector<8x8x8xf32>
    %197 = vector.extract_strided_slice %10 {offsets = [31, 0], sizes = [1, 8], strides = [1, 1]} : vector<49x8xf32> to vector<1x8xf32>
    %198 = vector.shape_cast %197 : vector<1x8xf32> to vector<8xf32>
    %199 = vector.shape_cast %198 : vector<8xf32> to vector<1x1x8xf32>
    %200 = vector.broadcast %199 : vector<1x1x8xf32> to vector<8x8x8xf32>
    %201 = arith.mulf %196, %200 : vector<8x8x8xf32>
    %202 = arith.addf %195, %201 : vector<8x8x8xf32>
    %203 = vector.extract_strided_slice %167 {offsets = [5, 0, 0], sizes = [8, 8, 8], strides = [1, 1, 1]} : vector<14x8x8xf32> to vector<8x8x8xf32>
    %204 = vector.extract_strided_slice %10 {offsets = [38, 0], sizes = [1, 8], strides = [1, 1]} : vector<49x8xf32> to vector<1x8xf32>
    %205 = vector.shape_cast %204 : vector<1x8xf32> to vector<8xf32>
    %206 = vector.shape_cast %205 : vector<8xf32> to vector<1x1x8xf32>
    %207 = vector.broadcast %206 : vector<1x1x8xf32> to vector<8x8x8xf32>
    %208 = arith.mulf %203, %207 : vector<8x8x8xf32>
    %209 = arith.addf %202, %208 : vector<8x8x8xf32>
    %210 = vector.extract_strided_slice %167 {offsets = [6, 0, 0], sizes = [8, 8, 8], strides = [1, 1, 1]} : vector<14x8x8xf32> to vector<8x8x8xf32>
    %211 = vector.extract_strided_slice %10 {offsets = [45, 0], sizes = [1, 8], strides = [1, 1]} : vector<49x8xf32> to vector<1x8xf32>
    %212 = vector.shape_cast %211 : vector<1x8xf32> to vector<8xf32>
    %213 = vector.shape_cast %212 : vector<8xf32> to vector<1x1x8xf32>
    %214 = vector.broadcast %213 : vector<1x1x8xf32> to vector<8x8x8xf32>
    %215 = arith.mulf %210, %214 : vector<8x8x8xf32>
    %216 = arith.addf %209, %215 : vector<8x8x8xf32>
    %217 = vector.extract_strided_slice %6 {offsets = [0, 4, 0], sizes = [14, 8, 8], strides = [1, 1, 1]} : vector<14x14x8xf32> to vector<14x8x8xf32>
    %218 = vector.extract_strided_slice %217 {offsets = [0, 0, 0], sizes = [8, 8, 8], strides = [1, 1, 1]} : vector<14x8x8xf32> to vector<8x8x8xf32>
    %219 = vector.extract_strided_slice %10 {offsets = [4, 0], sizes = [1, 8], strides = [1, 1]} : vector<49x8xf32> to vector<1x8xf32>
    %220 = vector.shape_cast %219 : vector<1x8xf32> to vector<8xf32>
    %221 = vector.shape_cast %220 : vector<8xf32> to vector<1x1x8xf32>
    %222 = vector.broadcast %221 : vector<1x1x8xf32> to vector<8x8x8xf32>
    %223 = arith.mulf %218, %222 : vector<8x8x8xf32>
    %224 = arith.addf %216, %223 : vector<8x8x8xf32>
    %225 = vector.extract_strided_slice %217 {offsets = [1, 0, 0], sizes = [8, 8, 8], strides = [1, 1, 1]} : vector<14x8x8xf32> to vector<8x8x8xf32>
    %226 = vector.extract_strided_slice %10 {offsets = [11, 0], sizes = [1, 8], strides = [1, 1]} : vector<49x8xf32> to vector<1x8xf32>
    %227 = vector.shape_cast %226 : vector<1x8xf32> to vector<8xf32>
    %228 = vector.shape_cast %227 : vector<8xf32> to vector<1x1x8xf32>
    %229 = vector.broadcast %228 : vector<1x1x8xf32> to vector<8x8x8xf32>
    %230 = arith.mulf %225, %229 : vector<8x8x8xf32>
    %231 = arith.addf %224, %230 : vector<8x8x8xf32>
    %232 = vector.extract_strided_slice %217 {offsets = [2, 0, 0], sizes = [8, 8, 8], strides = [1, 1, 1]} : vector<14x8x8xf32> to vector<8x8x8xf32>
    %233 = vector.extract_strided_slice %10 {offsets = [18, 0], sizes = [1, 8], strides = [1, 1]} : vector<49x8xf32> to vector<1x8xf32>
    %234 = vector.shape_cast %233 : vector<1x8xf32> to vector<8xf32>
    %235 = vector.shape_cast %234 : vector<8xf32> to vector<1x1x8xf32>
    %236 = vector.broadcast %235 : vector<1x1x8xf32> to vector<8x8x8xf32>
    %237 = arith.mulf %232, %236 : vector<8x8x8xf32>
    %238 = arith.addf %231, %237 : vector<8x8x8xf32>
    %239 = vector.extract_strided_slice %217 {offsets = [3, 0, 0], sizes = [8, 8, 8], strides = [1, 1, 1]} : vector<14x8x8xf32> to vector<8x8x8xf32>
    %240 = vector.extract_strided_slice %10 {offsets = [25, 0], sizes = [1, 8], strides = [1, 1]} : vector<49x8xf32> to vector<1x8xf32>
    %241 = vector.shape_cast %240 : vector<1x8xf32> to vector<8xf32>
    %242 = vector.shape_cast %241 : vector<8xf32> to vector<1x1x8xf32>
    %243 = vector.broadcast %242 : vector<1x1x8xf32> to vector<8x8x8xf32>
    %244 = arith.mulf %239, %243 : vector<8x8x8xf32>
    %245 = arith.addf %238, %244 : vector<8x8x8xf32>
    %246 = vector.extract_strided_slice %217 {offsets = [4, 0, 0], sizes = [8, 8, 8], strides = [1, 1, 1]} : vector<14x8x8xf32> to vector<8x8x8xf32>
    %247 = vector.extract_strided_slice %10 {offsets = [32, 0], sizes = [1, 8], strides = [1, 1]} : vector<49x8xf32> to vector<1x8xf32>
    %248 = vector.shape_cast %247 : vector<1x8xf32> to vector<8xf32>
    %249 = vector.shape_cast %248 : vector<8xf32> to vector<1x1x8xf32>
    %250 = vector.broadcast %249 : vector<1x1x8xf32> to vector<8x8x8xf32>
    %251 = arith.mulf %246, %250 : vector<8x8x8xf32>
    %252 = arith.addf %245, %251 : vector<8x8x8xf32>
    %253 = vector.extract_strided_slice %217 {offsets = [5, 0, 0], sizes = [8, 8, 8], strides = [1, 1, 1]} : vector<14x8x8xf32> to vector<8x8x8xf32>
    %254 = vector.extract_strided_slice %10 {offsets = [39, 0], sizes = [1, 8], strides = [1, 1]} : vector<49x8xf32> to vector<1x8xf32>
    %255 = vector.shape_cast %254 : vector<1x8xf32> to vector<8xf32>
    %256 = vector.shape_cast %255 : vector<8xf32> to vector<1x1x8xf32>
    %257 = vector.broadcast %256 : vector<1x1x8xf32> to vector<8x8x8xf32>
    %258 = arith.mulf %253, %257 : vector<8x8x8xf32>
    %259 = arith.addf %252, %258 : vector<8x8x8xf32>
    %260 = vector.extract_strided_slice %217 {offsets = [6, 0, 0], sizes = [8, 8, 8], strides = [1, 1, 1]} : vector<14x8x8xf32> to vector<8x8x8xf32>
    %261 = vector.extract_strided_slice %10 {offsets = [46, 0], sizes = [1, 8], strides = [1, 1]} : vector<49x8xf32> to vector<1x8xf32>
    %262 = vector.shape_cast %261 : vector<1x8xf32> to vector<8xf32>
    %263 = vector.shape_cast %262 : vector<8xf32> to vector<1x1x8xf32>
    %264 = vector.broadcast %263 : vector<1x1x8xf32> to vector<8x8x8xf32>
    %265 = arith.mulf %260, %264 : vector<8x8x8xf32>
    %266 = arith.addf %259, %265 : vector<8x8x8xf32>
    %267 = vector.extract_strided_slice %6 {offsets = [0, 5, 0], sizes = [14, 8, 8], strides = [1, 1, 1]} : vector<14x14x8xf32> to vector<14x8x8xf32>
    %268 = vector.extract_strided_slice %267 {offsets = [0, 0, 0], sizes = [8, 8, 8], strides = [1, 1, 1]} : vector<14x8x8xf32> to vector<8x8x8xf32>
    %269 = vector.extract_strided_slice %10 {offsets = [5, 0], sizes = [1, 8], strides = [1, 1]} : vector<49x8xf32> to vector<1x8xf32>
    %270 = vector.shape_cast %269 : vector<1x8xf32> to vector<8xf32>
    %271 = vector.shape_cast %270 : vector<8xf32> to vector<1x1x8xf32>
    %272 = vector.broadcast %271 : vector<1x1x8xf32> to vector<8x8x8xf32>
    %273 = arith.mulf %268, %272 : vector<8x8x8xf32>
    %274 = arith.addf %266, %273 : vector<8x8x8xf32>
    %275 = vector.extract_strided_slice %267 {offsets = [1, 0, 0], sizes = [8, 8, 8], strides = [1, 1, 1]} : vector<14x8x8xf32> to vector<8x8x8xf32>
    %276 = vector.extract_strided_slice %10 {offsets = [12, 0], sizes = [1, 8], strides = [1, 1]} : vector<49x8xf32> to vector<1x8xf32>
    %277 = vector.shape_cast %276 : vector<1x8xf32> to vector<8xf32>
    %278 = vector.shape_cast %277 : vector<8xf32> to vector<1x1x8xf32>
    %279 = vector.broadcast %278 : vector<1x1x8xf32> to vector<8x8x8xf32>
    %280 = arith.mulf %275, %279 : vector<8x8x8xf32>
    %281 = arith.addf %274, %280 : vector<8x8x8xf32>
    %282 = vector.extract_strided_slice %267 {offsets = [2, 0, 0], sizes = [8, 8, 8], strides = [1, 1, 1]} : vector<14x8x8xf32> to vector<8x8x8xf32>
    %283 = vector.extract_strided_slice %10 {offsets = [19, 0], sizes = [1, 8], strides = [1, 1]} : vector<49x8xf32> to vector<1x8xf32>
    %284 = vector.shape_cast %283 : vector<1x8xf32> to vector<8xf32>
    %285 = vector.shape_cast %284 : vector<8xf32> to vector<1x1x8xf32>
    %286 = vector.broadcast %285 : vector<1x1x8xf32> to vector<8x8x8xf32>
    %287 = arith.mulf %282, %286 : vector<8x8x8xf32>
    %288 = arith.addf %281, %287 : vector<8x8x8xf32>
    %289 = vector.extract_strided_slice %267 {offsets = [3, 0, 0], sizes = [8, 8, 8], strides = [1, 1, 1]} : vector<14x8x8xf32> to vector<8x8x8xf32>
    %290 = vector.extract_strided_slice %10 {offsets = [26, 0], sizes = [1, 8], strides = [1, 1]} : vector<49x8xf32> to vector<1x8xf32>
    %291 = vector.shape_cast %290 : vector<1x8xf32> to vector<8xf32>
    %292 = vector.shape_cast %291 : vector<8xf32> to vector<1x1x8xf32>
    %293 = vector.broadcast %292 : vector<1x1x8xf32> to vector<8x8x8xf32>
    %294 = arith.mulf %289, %293 : vector<8x8x8xf32>
    %295 = arith.addf %288, %294 : vector<8x8x8xf32>
    %296 = vector.extract_strided_slice %267 {offsets = [4, 0, 0], sizes = [8, 8, 8], strides = [1, 1, 1]} : vector<14x8x8xf32> to vector<8x8x8xf32>
    %297 = vector.extract_strided_slice %10 {offsets = [33, 0], sizes = [1, 8], strides = [1, 1]} : vector<49x8xf32> to vector<1x8xf32>
    %298 = vector.shape_cast %297 : vector<1x8xf32> to vector<8xf32>
    %299 = vector.shape_cast %298 : vector<8xf32> to vector<1x1x8xf32>
    %300 = vector.broadcast %299 : vector<1x1x8xf32> to vector<8x8x8xf32>
    %301 = arith.mulf %296, %300 : vector<8x8x8xf32>
    %302 = arith.addf %295, %301 : vector<8x8x8xf32>
    %303 = vector.extract_strided_slice %267 {offsets = [5, 0, 0], sizes = [8, 8, 8], strides = [1, 1, 1]} : vector<14x8x8xf32> to vector<8x8x8xf32>
    %304 = vector.extract_strided_slice %10 {offsets = [40, 0], sizes = [1, 8], strides = [1, 1]} : vector<49x8xf32> to vector<1x8xf32>
    %305 = vector.shape_cast %304 : vector<1x8xf32> to vector<8xf32>
    %306 = vector.shape_cast %305 : vector<8xf32> to vector<1x1x8xf32>
    %307 = vector.broadcast %306 : vector<1x1x8xf32> to vector<8x8x8xf32>
    %308 = arith.mulf %303, %307 : vector<8x8x8xf32>
    %309 = arith.addf %302, %308 : vector<8x8x8xf32>
    %310 = vector.extract_strided_slice %267 {offsets = [6, 0, 0], sizes = [8, 8, 8], strides = [1, 1, 1]} : vector<14x8x8xf32> to vector<8x8x8xf32>
    %311 = vector.extract_strided_slice %10 {offsets = [47, 0], sizes = [1, 8], strides = [1, 1]} : vector<49x8xf32> to vector<1x8xf32>
    %312 = vector.shape_cast %311 : vector<1x8xf32> to vector<8xf32>
    %313 = vector.shape_cast %312 : vector<8xf32> to vector<1x1x8xf32>
    %314 = vector.broadcast %313 : vector<1x1x8xf32> to vector<8x8x8xf32>
    %315 = arith.mulf %310, %314 : vector<8x8x8xf32>
    %316 = arith.addf %309, %315 : vector<8x8x8xf32>
    %317 = vector.extract_strided_slice %6 {offsets = [0, 6, 0], sizes = [14, 8, 8], strides = [1, 1, 1]} : vector<14x14x8xf32> to vector<14x8x8xf32>
    %318 = vector.extract_strided_slice %317 {offsets = [0, 0, 0], sizes = [8, 8, 8], strides = [1, 1, 1]} : vector<14x8x8xf32> to vector<8x8x8xf32>
    %319 = vector.extract_strided_slice %10 {offsets = [6, 0], sizes = [1, 8], strides = [1, 1]} : vector<49x8xf32> to vector<1x8xf32>
    %320 = vector.shape_cast %319 : vector<1x8xf32> to vector<8xf32>
    %321 = vector.shape_cast %320 : vector<8xf32> to vector<1x1x8xf32>
    %322 = vector.broadcast %321 : vector<1x1x8xf32> to vector<8x8x8xf32>
    %323 = arith.mulf %318, %322 : vector<8x8x8xf32>
    %324 = arith.addf %316, %323 : vector<8x8x8xf32>
    %325 = vector.extract_strided_slice %317 {offsets = [1, 0, 0], sizes = [8, 8, 8], strides = [1, 1, 1]} : vector<14x8x8xf32> to vector<8x8x8xf32>
    %326 = vector.extract_strided_slice %10 {offsets = [13, 0], sizes = [1, 8], strides = [1, 1]} : vector<49x8xf32> to vector<1x8xf32>
    %327 = vector.shape_cast %326 : vector<1x8xf32> to vector<8xf32>
    %328 = vector.shape_cast %327 : vector<8xf32> to vector<1x1x8xf32>
    %329 = vector.broadcast %328 : vector<1x1x8xf32> to vector<8x8x8xf32>
    %330 = arith.mulf %325, %329 : vector<8x8x8xf32>
    %331 = arith.addf %324, %330 : vector<8x8x8xf32>
    %332 = vector.extract_strided_slice %317 {offsets = [2, 0, 0], sizes = [8, 8, 8], strides = [1, 1, 1]} : vector<14x8x8xf32> to vector<8x8x8xf32>
    %333 = vector.extract_strided_slice %10 {offsets = [20, 0], sizes = [1, 8], strides = [1, 1]} : vector<49x8xf32> to vector<1x8xf32>
    %334 = vector.shape_cast %333 : vector<1x8xf32> to vector<8xf32>
    %335 = vector.shape_cast %334 : vector<8xf32> to vector<1x1x8xf32>
    %336 = vector.broadcast %335 : vector<1x1x8xf32> to vector<8x8x8xf32>
    %337 = arith.mulf %332, %336 : vector<8x8x8xf32>
    %338 = arith.addf %331, %337 : vector<8x8x8xf32>
    %339 = vector.extract_strided_slice %317 {offsets = [3, 0, 0], sizes = [8, 8, 8], strides = [1, 1, 1]} : vector<14x8x8xf32> to vector<8x8x8xf32>
    %340 = vector.extract_strided_slice %10 {offsets = [27, 0], sizes = [1, 8], strides = [1, 1]} : vector<49x8xf32> to vector<1x8xf32>
    %341 = vector.shape_cast %340 : vector<1x8xf32> to vector<8xf32>
    %342 = vector.shape_cast %341 : vector<8xf32> to vector<1x1x8xf32>
    %343 = vector.broadcast %342 : vector<1x1x8xf32> to vector<8x8x8xf32>
    %344 = arith.mulf %339, %343 : vector<8x8x8xf32>
    %345 = arith.addf %338, %344 : vector<8x8x8xf32>
    %346 = vector.extract_strided_slice %317 {offsets = [4, 0, 0], sizes = [8, 8, 8], strides = [1, 1, 1]} : vector<14x8x8xf32> to vector<8x8x8xf32>
    %347 = vector.extract_strided_slice %10 {offsets = [34, 0], sizes = [1, 8], strides = [1, 1]} : vector<49x8xf32> to vector<1x8xf32>
    %348 = vector.shape_cast %347 : vector<1x8xf32> to vector<8xf32>
    %349 = vector.shape_cast %348 : vector<8xf32> to vector<1x1x8xf32>
    %350 = vector.broadcast %349 : vector<1x1x8xf32> to vector<8x8x8xf32>
    %351 = arith.mulf %346, %350 : vector<8x8x8xf32>
    %352 = arith.addf %345, %351 : vector<8x8x8xf32>
    %353 = vector.extract_strided_slice %317 {offsets = [5, 0, 0], sizes = [8, 8, 8], strides = [1, 1, 1]} : vector<14x8x8xf32> to vector<8x8x8xf32>
    %354 = vector.extract_strided_slice %10 {offsets = [41, 0], sizes = [1, 8], strides = [1, 1]} : vector<49x8xf32> to vector<1x8xf32>
    %355 = vector.shape_cast %354 : vector<1x8xf32> to vector<8xf32>
    %356 = vector.shape_cast %355 : vector<8xf32> to vector<1x1x8xf32>
    %357 = vector.broadcast %356 : vector<1x1x8xf32> to vector<8x8x8xf32>
    %358 = arith.mulf %353, %357 : vector<8x8x8xf32>
    %359 = arith.addf %352, %358 : vector<8x8x8xf32>
    %360 = vector.extract_strided_slice %317 {offsets = [6, 0, 0], sizes = [8, 8, 8], strides = [1, 1, 1]} : vector<14x8x8xf32> to vector<8x8x8xf32>
    %361 = vector.extract_strided_slice %10 {offsets = [48, 0], sizes = [1, 8], strides = [1, 1]} : vector<49x8xf32> to vector<1x8xf32>
    %362 = vector.shape_cast %361 : vector<1x8xf32> to vector<8xf32>
    %363 = vector.shape_cast %362 : vector<8xf32> to vector<1x1x8xf32>
    %364 = vector.broadcast %363 : vector<1x1x8xf32> to vector<8x8x8xf32>
    %365 = arith.mulf %360, %364 : vector<8x8x8xf32>
    %366 = arith.addf %359, %365 : vector<8x8x8xf32>
    %367 = vector.shape_cast %366 : vector<8x8x8xf32> to vector<64x8xf32>
    %cst_18 = arith.constant dense<0.000000e+00> : vector<64x8xf32>
    %368 = tpu.matmul %367, %0, %cst_18 {dimension_numbers = #tpu.dot_dimension_numbers<[1], [0], [0], [1], [0, 0, 1, 1], [], []>} : vector<64x8xf32>, vector<8x8xf32>, vector<64x8xf32> -> vector<64x8xf32>
    %369 = arith.subf %367, %368 : vector<64x8xf32>
    %370 = arith.mulf %369, %369 : vector<64x8xf32>
    %cst_19 = arith.constant dense<0.000000e+00> : vector<64x8xf32>
    %371 = tpu.matmul %370, %0, %cst_19 {dimension_numbers = #tpu.dot_dimension_numbers<[1], [0], [0], [1], [0, 0, 1, 1], [], []>} : vector<64x8xf32>, vector<8x8xf32>, vector<64x8xf32> -> vector<64x8xf32>
    %cst_20 = arith.constant 9.99999997E-7 : f32
    %372 = vector.broadcast %cst_20 : f32 to vector<64x8xf32>
    %373 = arith.addf %371, %372 : vector<64x8xf32>
    %374 = math.rsqrt %373 : vector<64x8xf32>
    %375 = arith.mulf %369, %374 : vector<64x8xf32>
    %c0_21 = arith.constant 0 : index
    %c0_22 = arith.constant 0 : index
    %376 = vector.load %arg4[%c0_21, %c0_22] : memref<2x8xf32, #tpu.memory_space<vmem>>, vector<1x8xf32>
    %377 = vector.shape_cast %376 : vector<1x8xf32> to vector<8xf32>
    %378 = vector.shape_cast %377 : vector<8xf32> to vector<1x8xf32>
    %379 = vector.broadcast %378 : vector<1x8xf32> to vector<64x8xf32>
    %380 = arith.mulf %375, %379 : vector<64x8xf32>
    %c0_23 = arith.constant 0 : index
    %c0_24 = arith.constant 0 : index
    %381 = vector.load %arg5[%c0_23, %c0_24] : memref<2x8xf32, #tpu.memory_space<vmem>>, vector<1x8xf32>
    %382 = vector.shape_cast %381 : vector<1x8xf32> to vector<8xf32>
    %383 = vector.shape_cast %382 : vector<8xf32> to vector<1x8xf32>
    %384 = vector.broadcast %383 : vector<1x8xf32> to vector<64x8xf32>
    %385 = arith.addf %380, %384 : vector<64x8xf32>
    %386 = arith.truncf %385 : vector<64x8xf32> to vector<64x8xbf16>
    %c0_25 = arith.constant 0 : index
    %c0_26 = arith.constant 0 : index
    %c0_27 = arith.constant 0 : index
    %387 = vector.load %arg6[%c0_25, %c0_26, %c0_27] : memref<2x8x32xbf16, #tpu.memory_space<vmem>>, vector<1x8x32xbf16>
    %388 = vector.shape_cast %387 : vector<1x8x32xbf16> to vector<8x32xbf16>
    %cst_28 = arith.constant dense<0.000000e+00> : vector<64x32xf32>
    %389 = tpu.matmul %386, %388, %cst_28 {dimension_numbers = #tpu.dot_dimension_numbers<[1], [0], [0], [1], [0, 0, 1, 1], [], []>} : vector<64x8xbf16>, vector<8x32xbf16>, vector<64x32xf32> -> vector<64x32xf32>
    %c0_29 = arith.constant 0 : index
    %c0_30 = arith.constant 0 : index
    %390 = vector.load %arg7[%c0_29, %c0_30] : memref<2x32xf32, #tpu.memory_space<vmem>>, vector<1x32xf32>
    %391 = vector.shape_cast %390 : vector<1x32xf32> to vector<32xf32>
    %392 = vector.shape_cast %391 : vector<32xf32> to vector<1x32xf32>
    %393 = vector.broadcast %392 : vector<1x32xf32> to vector<64x32xf32>
    %394 = arith.addf %389, %393 : vector<64x32xf32>
    %cst_31 = arith.constant 5.000000e-01 : f32
    %395 = vector.broadcast %cst_31 : f32 to vector<64x32xf32>
    %396 = arith.mulf %395, %394 : vector<64x32xf32>
    %cst_32 = arith.constant 1.41421354 : f32
    %397 = vector.broadcast %cst_32 : f32 to vector<64x32xf32>
    %398 = arith.divf %394, %397 : vector<64x32xf32>
    %399 = math.erf %398 : vector<64x32xf32>
    %cst_33 = arith.constant 1.000000e+00 : f32
    %400 = vector.broadcast %cst_33 : f32 to vector<64x32xf32>
    %401 = arith.addf %400, %399 : vector<64x32xf32>
    %402 = arith.mulf %396, %401 : vector<64x32xf32>
    %403 = arith.truncf %402 : vector<64x32xf32> to vector<64x32xbf16>
    %c0_34 = arith.constant 0 : index
    %c0_35 = arith.constant 0 : index
    %c0_36 = arith.constant 0 : index
    %404 = vector.load %arg8[%c0_34, %c0_35, %c0_36] : memref<2x32x8xbf16, #tpu.memory_space<vmem>>, vector<1x32x8xbf16>
    %405 = vector.shape_cast %404 : vector<1x32x8xbf16> to vector<32x8xbf16>
    %cst_37 = arith.constant dense<0.000000e+00> : vector<64x8xf32>
    %406 = tpu.matmul %403, %405, %cst_37 {dimension_numbers = #tpu.dot_dimension_numbers<[1], [0], [0], [1], [0, 0, 1, 1], [], []>} : vector<64x32xbf16>, vector<32x8xbf16>, vector<64x8xf32> -> vector<64x8xf32>
    %c0_38 = arith.constant 0 : index
    %c0_39 = arith.constant 0 : index
    %407 = vector.load %arg9[%c0_38, %c0_39] : memref<2x8xf32, #tpu.memory_space<vmem>>, vector<1x8xf32>
    %408 = vector.shape_cast %407 : vector<1x8xf32> to vector<8xf32>
    %409 = vector.shape_cast %408 : vector<8xf32> to vector<1x8xf32>
    %410 = vector.broadcast %409 : vector<1x8xf32> to vector<64x8xf32>
    %411 = arith.addf %406, %410 : vector<64x8xf32>
    %c0_40 = arith.constant 0 : index
    %c0_41 = arith.constant 0 : index
    %412 = vector.load %arg10[%c0_40, %c0_41] : memref<2x8xf32, #tpu.memory_space<vmem>>, vector<1x8xf32>
    %413 = vector.shape_cast %412 : vector<1x8xf32> to vector<8xf32>
    %414 = vector.shape_cast %413 : vector<8xf32> to vector<1x8xf32>
    %415 = vector.broadcast %414 : vector<1x8xf32> to vector<64x8xf32>
    %416 = arith.mulf %411, %415 : vector<64x8xf32>
    %417 = arith.addf %416, %8 : vector<64x8xf32>
    %418 = vector.shape_cast %417 : vector<64x8xf32> to vector<8x8x8xf32>
    %c3_42 = arith.constant 3 : index
    %c3_43 = arith.constant 3 : index
    %c0_44 = arith.constant 0 : index
    %419 = vector.load %arg12[%c3_42, %c3_43, %c0_44] : memref<14x14x8xf32, #tpu.memory_space<vmem>>, vector<8x8x8xf32>
    tpu.vector_store %arg12[%c3_42, %c3_43, %c0_44], %418 {strides = array<i32>} : memref<14x14x8xf32, #tpu.memory_space<vmem>>, vector<8x8x8xf32>,
    %c0_45 = arith.constant 0 : index
    %c0_46 = arith.constant 0 : index
    %c0_47 = arith.constant 0 : index
    %420 = vector.load %arg12[%c0_45, %c0_46, %c0_47] : memref<14x14x8xf32, #tpu.memory_space<vmem>>, vector<14x14x8xf32>
    %421 = vector.extract_strided_slice %420 {offsets = [3, 3, 0], sizes = [8, 8, 8], strides = [1, 1, 1]} : vector<14x14x8xf32> to vector<8x8x8xf32>
    %422 = vector.shape_cast %421 : vector<8x8x8xf32> to vector<64x8xf32>
    %c1 = arith.constant 1 : index
    %c0_48 = arith.constant 0 : index
    %c0_49 = arith.constant 0 : index
    %423 = vector.load %arg2[%c1, %c0_48, %c0_49] : memref<2x49x8xf32, #tpu.memory_space<vmem>>, vector<1x49x8xf32>
    %424 = vector.shape_cast %423 : vector<1x49x8xf32> to vector<49x8xf32>
    %cst_50 = arith.constant 0.000000e+00 : f32
    %425 = vector.broadcast %cst_50 : f32 to vector<8x8x8xf32>
    %c1_51 = arith.constant 1 : index
    %c0_52 = arith.constant 0 : index
    %426 = vector.load %arg3[%c1_51, %c0_52] : memref<2x8xf32, #tpu.memory_space<vmem>>, vector<1x8xf32>
    %427 = vector.shape_cast %426 : vector<1x8xf32> to vector<8xf32>
    %428 = vector.shape_cast %427 : vector<8xf32> to vector<1x1x8xf32>
    %429 = vector.broadcast %428 : vector<1x1x8xf32> to vector<8x8x8xf32>
    %430 = arith.addf %425, %429 : vector<8x8x8xf32>
    %431 = vector.extract_strided_slice %420 {offsets = [0, 0, 0], sizes = [14, 8, 8], strides = [1, 1, 1]} : vector<14x14x8xf32> to vector<14x8x8xf32>
    %432 = vector.extract_strided_slice %431 {offsets = [0, 0, 0], sizes = [8, 8, 8], strides = [1, 1, 1]} : vector<14x8x8xf32> to vector<8x8x8xf32>
    %433 = vector.extract_strided_slice %424 {offsets = [0, 0], sizes = [1, 8], strides = [1, 1]} : vector<49x8xf32> to vector<1x8xf32>
    %434 = vector.shape_cast %433 : vector<1x8xf32> to vector<8xf32>
    %435 = vector.shape_cast %434 : vector<8xf32> to vector<1x1x8xf32>
    %436 = vector.broadcast %435 : vector<1x1x8xf32> to vector<8x8x8xf32>
    %437 = arith.mulf %432, %436 : vector<8x8x8xf32>
    %438 = arith.addf %430, %437 : vector<8x8x8xf32>
    %439 = vector.extract_strided_slice %431 {offsets = [1, 0, 0], sizes = [8, 8, 8], strides = [1, 1, 1]} : vector<14x8x8xf32> to vector<8x8x8xf32>
    %440 = vector.extract_strided_slice %424 {offsets = [7, 0], sizes = [1, 8], strides = [1, 1]} : vector<49x8xf32> to vector<1x8xf32>
    %441 = vector.shape_cast %440 : vector<1x8xf32> to vector<8xf32>
    %442 = vector.shape_cast %441 : vector<8xf32> to vector<1x1x8xf32>
    %443 = vector.broadcast %442 : vector<1x1x8xf32> to vector<8x8x8xf32>
    %444 = arith.mulf %439, %443 : vector<8x8x8xf32>
    %445 = arith.addf %438, %444 : vector<8x8x8xf32>
    %446 = vector.extract_strided_slice %431 {offsets = [2, 0, 0], sizes = [8, 8, 8], strides = [1, 1, 1]} : vector<14x8x8xf32> to vector<8x8x8xf32>
    %447 = vector.extract_strided_slice %424 {offsets = [14, 0], sizes = [1, 8], strides = [1, 1]} : vector<49x8xf32> to vector<1x8xf32>
    %448 = vector.shape_cast %447 : vector<1x8xf32> to vector<8xf32>
    %449 = vector.shape_cast %448 : vector<8xf32> to vector<1x1x8xf32>
    %450 = vector.broadcast %449 : vector<1x1x8xf32> to vector<8x8x8xf32>
    %451 = arith.mulf %446, %450 : vector<8x8x8xf32>
    %452 = arith.addf %445, %451 : vector<8x8x8xf32>
    %453 = vector.extract_strided_slice %431 {offsets = [3, 0, 0], sizes = [8, 8, 8], strides = [1, 1, 1]} : vector<14x8x8xf32> to vector<8x8x8xf32>
    %454 = vector.extract_strided_slice %424 {offsets = [21, 0], sizes = [1, 8], strides = [1, 1]} : vector<49x8xf32> to vector<1x8xf32>
    %455 = vector.shape_cast %454 : vector<1x8xf32> to vector<8xf32>
    %456 = vector.shape_cast %455 : vector<8xf32> to vector<1x1x8xf32>
    %457 = vector.broadcast %456 : vector<1x1x8xf32> to vector<8x8x8xf32>
    %458 = arith.mulf %453, %457 : vector<8x8x8xf32>
    %459 = arith.addf %452, %458 : vector<8x8x8xf32>
    %460 = vector.extract_strided_slice %431 {offsets = [4, 0, 0], sizes = [8, 8, 8], strides = [1, 1, 1]} : vector<14x8x8xf32> to vector<8x8x8xf32>
    %461 = vector.extract_strided_slice %424 {offsets = [28, 0], sizes = [1, 8], strides = [1, 1]} : vector<49x8xf32> to vector<1x8xf32>
    %462 = vector.shape_cast %461 : vector<1x8xf32> to vector<8xf32>
    %463 = vector.shape_cast %462 : vector<8xf32> to vector<1x1x8xf32>
    %464 = vector.broadcast %463 : vector<1x1x8xf32> to vector<8x8x8xf32>
    %465 = arith.mulf %460, %464 : vector<8x8x8xf32>
    %466 = arith.addf %459, %465 : vector<8x8x8xf32>
    %467 = vector.extract_strided_slice %431 {offsets = [5, 0, 0], sizes = [8, 8, 8], strides = [1, 1, 1]} : vector<14x8x8xf32> to vector<8x8x8xf32>
    %468 = vector.extract_strided_slice %424 {offsets = [35, 0], sizes = [1, 8], strides = [1, 1]} : vector<49x8xf32> to vector<1x8xf32>
    %469 = vector.shape_cast %468 : vector<1x8xf32> to vector<8xf32>
    %470 = vector.shape_cast %469 : vector<8xf32> to vector<1x1x8xf32>
    %471 = vector.broadcast %470 : vector<1x1x8xf32> to vector<8x8x8xf32>
    %472 = arith.mulf %467, %471 : vector<8x8x8xf32>
    %473 = arith.addf %466, %472 : vector<8x8x8xf32>
    %474 = vector.extract_strided_slice %431 {offsets = [6, 0, 0], sizes = [8, 8, 8], strides = [1, 1, 1]} : vector<14x8x8xf32> to vector<8x8x8xf32>
    %475 = vector.extract_strided_slice %424 {offsets = [42, 0], sizes = [1, 8], strides = [1, 1]} : vector<49x8xf32> to vector<1x8xf32>
    %476 = vector.shape_cast %475 : vector<1x8xf32> to vector<8xf32>
    %477 = vector.shape_cast %476 : vector<8xf32> to vector<1x1x8xf32>
    %478 = vector.broadcast %477 : vector<1x1x8xf32> to vector<8x8x8xf32>
    %479 = arith.mulf %474, %478 : vector<8x8x8xf32>
    %480 = arith.addf %473, %479 : vector<8x8x8xf32>
    %481 = vector.extract_strided_slice %420 {offsets = [0, 1, 0], sizes = [14, 8, 8], strides = [1, 1, 1]} : vector<14x14x8xf32> to vector<14x8x8xf32>
    %482 = vector.extract_strided_slice %481 {offsets = [0, 0, 0], sizes = [8, 8, 8], strides = [1, 1, 1]} : vector<14x8x8xf32> to vector<8x8x8xf32>
    %483 = vector.extract_strided_slice %424 {offsets = [1, 0], sizes = [1, 8], strides = [1, 1]} : vector<49x8xf32> to vector<1x8xf32>
    %484 = vector.shape_cast %483 : vector<1x8xf32> to vector<8xf32>
    %485 = vector.shape_cast %484 : vector<8xf32> to vector<1x1x8xf32>
    %486 = vector.broadcast %485 : vector<1x1x8xf32> to vector<8x8x8xf32>
    %487 = arith.mulf %482, %486 : vector<8x8x8xf32>
    %488 = arith.addf %480, %487 : vector<8x8x8xf32>
    %489 = vector.extract_strided_slice %481 {offsets = [1, 0, 0], sizes = [8, 8, 8], strides = [1, 1, 1]} : vector<14x8x8xf32> to vector<8x8x8xf32>
    %490 = vector.extract_strided_slice %424 {offsets = [8, 0], sizes = [1, 8], strides = [1, 1]} : vector<49x8xf32> to vector<1x8xf32>
    %491 = vector.shape_cast %490 : vector<1x8xf32> to vector<8xf32>
    %492 = vector.shape_cast %491 : vector<8xf32> to vector<1x1x8xf32>
    %493 = vector.broadcast %492 : vector<1x1x8xf32> to vector<8x8x8xf32>
    %494 = arith.mulf %489, %493 : vector<8x8x8xf32>
    %495 = arith.addf %488, %494 : vector<8x8x8xf32>
    %496 = vector.extract_strided_slice %481 {offsets = [2, 0, 0], sizes = [8, 8, 8], strides = [1, 1, 1]} : vector<14x8x8xf32> to vector<8x8x8xf32>
    %497 = vector.extract_strided_slice %424 {offsets = [15, 0], sizes = [1, 8], strides = [1, 1]} : vector<49x8xf32> to vector<1x8xf32>
    %498 = vector.shape_cast %497 : vector<1x8xf32> to vector<8xf32>
    %499 = vector.shape_cast %498 : vector<8xf32> to vector<1x1x8xf32>
    %500 = vector.broadcast %499 : vector<1x1x8xf32> to vector<8x8x8xf32>
    %501 = arith.mulf %496, %500 : vector<8x8x8xf32>
    %502 = arith.addf %495, %501 : vector<8x8x8xf32>
    %503 = vector.extract_strided_slice %481 {offsets = [3, 0, 0], sizes = [8, 8, 8], strides = [1, 1, 1]} : vector<14x8x8xf32> to vector<8x8x8xf32>
    %504 = vector.extract_strided_slice %424 {offsets = [22, 0], sizes = [1, 8], strides = [1, 1]} : vector<49x8xf32> to vector<1x8xf32>
    %505 = vector.shape_cast %504 : vector<1x8xf32> to vector<8xf32>
    %506 = vector.shape_cast %505 : vector<8xf32> to vector<1x1x8xf32>
    %507 = vector.broadcast %506 : vector<1x1x8xf32> to vector<8x8x8xf32>
    %508 = arith.mulf %503, %507 : vector<8x8x8xf32>
    %509 = arith.addf %502, %508 : vector<8x8x8xf32>
    %510 = vector.extract_strided_slice %481 {offsets = [4, 0, 0], sizes = [8, 8, 8], strides = [1, 1, 1]} : vector<14x8x8xf32> to vector<8x8x8xf32>
    %511 = vector.extract_strided_slice %424 {offsets = [29, 0], sizes = [1, 8], strides = [1, 1]} : vector<49x8xf32> to vector<1x8xf32>
    %512 = vector.shape_cast %511 : vector<1x8xf32> to vector<8xf32>
    %513 = vector.shape_cast %512 : vector<8xf32> to vector<1x1x8xf32>
    %514 = vector.broadcast %513 : vector<1x1x8xf32> to vector<8x8x8xf32>
    %515 = arith.mulf %510, %514 : vector<8x8x8xf32>
    %516 = arith.addf %509, %515 : vector<8x8x8xf32>
    %517 = vector.extract_strided_slice %481 {offsets = [5, 0, 0], sizes = [8, 8, 8], strides = [1, 1, 1]} : vector<14x8x8xf32> to vector<8x8x8xf32>
    %518 = vector.extract_strided_slice %424 {offsets = [36, 0], sizes = [1, 8], strides = [1, 1]} : vector<49x8xf32> to vector<1x8xf32>
    %519 = vector.shape_cast %518 : vector<1x8xf32> to vector<8xf32>
    %520 = vector.shape_cast %519 : vector<8xf32> to vector<1x1x8xf32>
    %521 = vector.broadcast %520 : vector<1x1x8xf32> to vector<8x8x8xf32>
    %522 = arith.mulf %517, %521 : vector<8x8x8xf32>
    %523 = arith.addf %516, %522 : vector<8x8x8xf32>
    %524 = vector.extract_strided_slice %481 {offsets = [6, 0, 0], sizes = [8, 8, 8], strides = [1, 1, 1]} : vector<14x8x8xf32> to vector<8x8x8xf32>
    %525 = vector.extract_strided_slice %424 {offsets = [43, 0], sizes = [1, 8], strides = [1, 1]} : vector<49x8xf32> to vector<1x8xf32>
    %526 = vector.shape_cast %525 : vector<1x8xf32> to vector<8xf32>
    %527 = vector.shape_cast %526 : vector<8xf32> to vector<1x1x8xf32>
    %528 = vector.broadcast %527 : vector<1x1x8xf32> to vector<8x8x8xf32>
    %529 = arith.mulf %524, %528 : vector<8x8x8xf32>
    %530 = arith.addf %523, %529 : vector<8x8x8xf32>
    %531 = vector.extract_strided_slice %420 {offsets = [0, 2, 0], sizes = [14, 8, 8], strides = [1, 1, 1]} : vector<14x14x8xf32> to vector<14x8x8xf32>
    %532 = vector.extract_strided_slice %531 {offsets = [0, 0, 0], sizes = [8, 8, 8], strides = [1, 1, 1]} : vector<14x8x8xf32> to vector<8x8x8xf32>
    %533 = vector.extract_strided_slice %424 {offsets = [2, 0], sizes = [1, 8], strides = [1, 1]} : vector<49x8xf32> to vector<1x8xf32>
    %534 = vector.shape_cast %533 : vector<1x8xf32> to vector<8xf32>
    %535 = vector.shape_cast %534 : vector<8xf32> to vector<1x1x8xf32>
    %536 = vector.broadcast %535 : vector<1x1x8xf32> to vector<8x8x8xf32>
    %537 = arith.mulf %532, %536 : vector<8x8x8xf32>
    %538 = arith.addf %530, %537 : vector<8x8x8xf32>
    %539 = vector.extract_strided_slice %531 {offsets = [1, 0, 0], sizes = [8, 8, 8], strides = [1, 1, 1]} : vector<14x8x8xf32> to vector<8x8x8xf32>
    %540 = vector.extract_strided_slice %424 {offsets = [9, 0], sizes = [1, 8], strides = [1, 1]} : vector<49x8xf32> to vector<1x8xf32>
    %541 = vector.shape_cast %540 : vector<1x8xf32> to vector<8xf32>
    %542 = vector.shape_cast %541 : vector<8xf32> to vector<1x1x8xf32>
    %543 = vector.broadcast %542 : vector<1x1x8xf32> to vector<8x8x8xf32>
    %544 = arith.mulf %539, %543 : vector<8x8x8xf32>
    %545 = arith.addf %538, %544 : vector<8x8x8xf32>
    %546 = vector.extract_strided_slice %531 {offsets = [2, 0, 0], sizes = [8, 8, 8], strides = [1, 1, 1]} : vector<14x8x8xf32> to vector<8x8x8xf32>
    %547 = vector.extract_strided_slice %424 {offsets = [16, 0], sizes = [1, 8], strides = [1, 1]} : vector<49x8xf32> to vector<1x8xf32>
    %548 = vector.shape_cast %547 : vector<1x8xf32> to vector<8xf32>
    %549 = vector.shape_cast %548 : vector<8xf32> to vector<1x1x8xf32>
    %550 = vector.broadcast %549 : vector<1x1x8xf32> to vector<8x8x8xf32>
    %551 = arith.mulf %546, %550 : vector<8x8x8xf32>
    %552 = arith.addf %545, %551 : vector<8x8x8xf32>
    %553 = vector.extract_strided_slice %531 {offsets = [3, 0, 0], sizes = [8, 8, 8], strides = [1, 1, 1]} : vector<14x8x8xf32> to vector<8x8x8xf32>
    %554 = vector.extract_strided_slice %424 {offsets = [23, 0], sizes = [1, 8], strides = [1, 1]} : vector<49x8xf32> to vector<1x8xf32>
    %555 = vector.shape_cast %554 : vector<1x8xf32> to vector<8xf32>
    %556 = vector.shape_cast %555 : vector<8xf32> to vector<1x1x8xf32>
    %557 = vector.broadcast %556 : vector<1x1x8xf32> to vector<8x8x8xf32>
    %558 = arith.mulf %553, %557 : vector<8x8x8xf32>
    %559 = arith.addf %552, %558 : vector<8x8x8xf32>
    %560 = vector.extract_strided_slice %531 {offsets = [4, 0, 0], sizes = [8, 8, 8], strides = [1, 1, 1]} : vector<14x8x8xf32> to vector<8x8x8xf32>
    %561 = vector.extract_strided_slice %424 {offsets = [30, 0], sizes = [1, 8], strides = [1, 1]} : vector<49x8xf32> to vector<1x8xf32>
    %562 = vector.shape_cast %561 : vector<1x8xf32> to vector<8xf32>
    %563 = vector.shape_cast %562 : vector<8xf32> to vector<1x1x8xf32>
    %564 = vector.broadcast %563 : vector<1x1x8xf32> to vector<8x8x8xf32>
    %565 = arith.mulf %560, %564 : vector<8x8x8xf32>
    %566 = arith.addf %559, %565 : vector<8x8x8xf32>
    %567 = vector.extract_strided_slice %531 {offsets = [5, 0, 0], sizes = [8, 8, 8], strides = [1, 1, 1]} : vector<14x8x8xf32> to vector<8x8x8xf32>
    %568 = vector.extract_strided_slice %424 {offsets = [37, 0], sizes = [1, 8], strides = [1, 1]} : vector<49x8xf32> to vector<1x8xf32>
    %569 = vector.shape_cast %568 : vector<1x8xf32> to vector<8xf32>
    %570 = vector.shape_cast %569 : vector<8xf32> to vector<1x1x8xf32>
    %571 = vector.broadcast %570 : vector<1x1x8xf32> to vector<8x8x8xf32>
    %572 = arith.mulf %567, %571 : vector<8x8x8xf32>
    %573 = arith.addf %566, %572 : vector<8x8x8xf32>
    %574 = vector.extract_strided_slice %531 {offsets = [6, 0, 0], sizes = [8, 8, 8], strides = [1, 1, 1]} : vector<14x8x8xf32> to vector<8x8x8xf32>
    %575 = vector.extract_strided_slice %424 {offsets = [44, 0], sizes = [1, 8], strides = [1, 1]} : vector<49x8xf32> to vector<1x8xf32>
    %576 = vector.shape_cast %575 : vector<1x8xf32> to vector<8xf32>
    %577 = vector.shape_cast %576 : vector<8xf32> to vector<1x1x8xf32>
    %578 = vector.broadcast %577 : vector<1x1x8xf32> to vector<8x8x8xf32>
    %579 = arith.mulf %574, %578 : vector<8x8x8xf32>
    %580 = arith.addf %573, %579 : vector<8x8x8xf32>
    %581 = vector.extract_strided_slice %420 {offsets = [0, 3, 0], sizes = [14, 8, 8], strides = [1, 1, 1]} : vector<14x14x8xf32> to vector<14x8x8xf32>
    %582 = vector.extract_strided_slice %581 {offsets = [0, 0, 0], sizes = [8, 8, 8], strides = [1, 1, 1]} : vector<14x8x8xf32> to vector<8x8x8xf32>
    %583 = vector.extract_strided_slice %424 {offsets = [3, 0], sizes = [1, 8], strides = [1, 1]} : vector<49x8xf32> to vector<1x8xf32>
    %584 = vector.shape_cast %583 : vector<1x8xf32> to vector<8xf32>
    %585 = vector.shape_cast %584 : vector<8xf32> to vector<1x1x8xf32>
    %586 = vector.broadcast %585 : vector<1x1x8xf32> to vector<8x8x8xf32>
    %587 = arith.mulf %582, %586 : vector<8x8x8xf32>
    %588 = arith.addf %580, %587 : vector<8x8x8xf32>
    %589 = vector.extract_strided_slice %581 {offsets = [1, 0, 0], sizes = [8, 8, 8], strides = [1, 1, 1]} : vector<14x8x8xf32> to vector<8x8x8xf32>
    %590 = vector.extract_strided_slice %424 {offsets = [10, 0], sizes = [1, 8], strides = [1, 1]} : vector<49x8xf32> to vector<1x8xf32>
    %591 = vector.shape_cast %590 : vector<1x8xf32> to vector<8xf32>
    %592 = vector.shape_cast %591 : vector<8xf32> to vector<1x1x8xf32>
    %593 = vector.broadcast %592 : vector<1x1x8xf32> to vector<8x8x8xf32>
    %594 = arith.mulf %589, %593 : vector<8x8x8xf32>
    %595 = arith.addf %588, %594 : vector<8x8x8xf32>
    %596 = vector.extract_strided_slice %581 {offsets = [2, 0, 0], sizes = [8, 8, 8], strides = [1, 1, 1]} : vector<14x8x8xf32> to vector<8x8x8xf32>
    %597 = vector.extract_strided_slice %424 {offsets = [17, 0], sizes = [1, 8], strides = [1, 1]} : vector<49x8xf32> to vector<1x8xf32>
    %598 = vector.shape_cast %597 : vector<1x8xf32> to vector<8xf32>
    %599 = vector.shape_cast %598 : vector<8xf32> to vector<1x1x8xf32>
    %600 = vector.broadcast %599 : vector<1x1x8xf32> to vector<8x8x8xf32>
    %601 = arith.mulf %596, %600 : vector<8x8x8xf32>
    %602 = arith.addf %595, %601 : vector<8x8x8xf32>
    %603 = vector.extract_strided_slice %581 {offsets = [3, 0, 0], sizes = [8, 8, 8], strides = [1, 1, 1]} : vector<14x8x8xf32> to vector<8x8x8xf32>
    %604 = vector.extract_strided_slice %424 {offsets = [24, 0], sizes = [1, 8], strides = [1, 1]} : vector<49x8xf32> to vector<1x8xf32>
    %605 = vector.shape_cast %604 : vector<1x8xf32> to vector<8xf32>
    %606 = vector.shape_cast %605 : vector<8xf32> to vector<1x1x8xf32>
    %607 = vector.broadcast %606 : vector<1x1x8xf32> to vector<8x8x8xf32>
    %608 = arith.mulf %603, %607 : vector<8x8x8xf32>
    %609 = arith.addf %602, %608 : vector<8x8x8xf32>
    %610 = vector.extract_strided_slice %581 {offsets = [4, 0, 0], sizes = [8, 8, 8], strides = [1, 1, 1]} : vector<14x8x8xf32> to vector<8x8x8xf32>
    %611 = vector.extract_strided_slice %424 {offsets = [31, 0], sizes = [1, 8], strides = [1, 1]} : vector<49x8xf32> to vector<1x8xf32>
    %612 = vector.shape_cast %611 : vector<1x8xf32> to vector<8xf32>
    %613 = vector.shape_cast %612 : vector<8xf32> to vector<1x1x8xf32>
    %614 = vector.broadcast %613 : vector<1x1x8xf32> to vector<8x8x8xf32>
    %615 = arith.mulf %610, %614 : vector<8x8x8xf32>
    %616 = arith.addf %609, %615 : vector<8x8x8xf32>
    %617 = vector.extract_strided_slice %581 {offsets = [5, 0, 0], sizes = [8, 8, 8], strides = [1, 1, 1]} : vector<14x8x8xf32> to vector<8x8x8xf32>
    %618 = vector.extract_strided_slice %424 {offsets = [38, 0], sizes = [1, 8], strides = [1, 1]} : vector<49x8xf32> to vector<1x8xf32>
    %619 = vector.shape_cast %618 : vector<1x8xf32> to vector<8xf32>
    %620 = vector.shape_cast %619 : vector<8xf32> to vector<1x1x8xf32>
    %621 = vector.broadcast %620 : vector<1x1x8xf32> to vector<8x8x8xf32>
    %622 = arith.mulf %617, %621 : vector<8x8x8xf32>
    %623 = arith.addf %616, %622 : vector<8x8x8xf32>
    %624 = vector.extract_strided_slice %581 {offsets = [6, 0, 0], sizes = [8, 8, 8], strides = [1, 1, 1]} : vector<14x8x8xf32> to vector<8x8x8xf32>
    %625 = vector.extract_strided_slice %424 {offsets = [45, 0], sizes = [1, 8], strides = [1, 1]} : vector<49x8xf32> to vector<1x8xf32>
    %626 = vector.shape_cast %625 : vector<1x8xf32> to vector<8xf32>
    %627 = vector.shape_cast %626 : vector<8xf32> to vector<1x1x8xf32>
    %628 = vector.broadcast %627 : vector<1x1x8xf32> to vector<8x8x8xf32>
    %629 = arith.mulf %624, %628 : vector<8x8x8xf32>
    %630 = arith.addf %623, %629 : vector<8x8x8xf32>
    %631 = vector.extract_strided_slice %420 {offsets = [0, 4, 0], sizes = [14, 8, 8], strides = [1, 1, 1]} : vector<14x14x8xf32> to vector<14x8x8xf32>
    %632 = vector.extract_strided_slice %631 {offsets = [0, 0, 0], sizes = [8, 8, 8], strides = [1, 1, 1]} : vector<14x8x8xf32> to vector<8x8x8xf32>
    %633 = vector.extract_strided_slice %424 {offsets = [4, 0], sizes = [1, 8], strides = [1, 1]} : vector<49x8xf32> to vector<1x8xf32>
    %634 = vector.shape_cast %633 : vector<1x8xf32> to vector<8xf32>
    %635 = vector.shape_cast %634 : vector<8xf32> to vector<1x1x8xf32>
    %636 = vector.broadcast %635 : vector<1x1x8xf32> to vector<8x8x8xf32>
    %637 = arith.mulf %632, %636 : vector<8x8x8xf32>
    %638 = arith.addf %630, %637 : vector<8x8x8xf32>
    %639 = vector.extract_strided_slice %631 {offsets = [1, 0, 0], sizes = [8, 8, 8], strides = [1, 1, 1]} : vector<14x8x8xf32> to vector<8x8x8xf32>
    %640 = vector.extract_strided_slice %424 {offsets = [11, 0], sizes = [1, 8], strides = [1, 1]} : vector<49x8xf32> to vector<1x8xf32>
    %641 = vector.shape_cast %640 : vector<1x8xf32> to vector<8xf32>
    %642 = vector.shape_cast %641 : vector<8xf32> to vector<1x1x8xf32>
    %643 = vector.broadcast %642 : vector<1x1x8xf32> to vector<8x8x8xf32>
    %644 = arith.mulf %639, %643 : vector<8x8x8xf32>
    %645 = arith.addf %638, %644 : vector<8x8x8xf32>
    %646 = vector.extract_strided_slice %631 {offsets = [2, 0, 0], sizes = [8, 8, 8], strides = [1, 1, 1]} : vector<14x8x8xf32> to vector<8x8x8xf32>
    %647 = vector.extract_strided_slice %424 {offsets = [18, 0], sizes = [1, 8], strides = [1, 1]} : vector<49x8xf32> to vector<1x8xf32>
    %648 = vector.shape_cast %647 : vector<1x8xf32> to vector<8xf32>
    %649 = vector.shape_cast %648 : vector<8xf32> to vector<1x1x8xf32>
    %650 = vector.broadcast %649 : vector<1x1x8xf32> to vector<8x8x8xf32>
    %651 = arith.mulf %646, %650 : vector<8x8x8xf32>
    %652 = arith.addf %645, %651 : vector<8x8x8xf32>
    %653 = vector.extract_strided_slice %631 {offsets = [3, 0, 0], sizes = [8, 8, 8], strides = [1, 1, 1]} : vector<14x8x8xf32> to vector<8x8x8xf32>
    %654 = vector.extract_strided_slice %424 {offsets = [25, 0], sizes = [1, 8], strides = [1, 1]} : vector<49x8xf32> to vector<1x8xf32>
    %655 = vector.shape_cast %654 : vector<1x8xf32> to vector<8xf32>
    %656 = vector.shape_cast %655 : vector<8xf32> to vector<1x1x8xf32>
    %657 = vector.broadcast %656 : vector<1x1x8xf32> to vector<8x8x8xf32>
    %658 = arith.mulf %653, %657 : vector<8x8x8xf32>
    %659 = arith.addf %652, %658 : vector<8x8x8xf32>
    %660 = vector.extract_strided_slice %631 {offsets = [4, 0, 0], sizes = [8, 8, 8], strides = [1, 1, 1]} : vector<14x8x8xf32> to vector<8x8x8xf32>
    %661 = vector.extract_strided_slice %424 {offsets = [32, 0], sizes = [1, 8], strides = [1, 1]} : vector<49x8xf32> to vector<1x8xf32>
    %662 = vector.shape_cast %661 : vector<1x8xf32> to vector<8xf32>
    %663 = vector.shape_cast %662 : vector<8xf32> to vector<1x1x8xf32>
    %664 = vector.broadcast %663 : vector<1x1x8xf32> to vector<8x8x8xf32>
    %665 = arith.mulf %660, %664 : vector<8x8x8xf32>
    %666 = arith.addf %659, %665 : vector<8x8x8xf32>
    %667 = vector.extract_strided_slice %631 {offsets = [5, 0, 0], sizes = [8, 8, 8], strides = [1, 1, 1]} : vector<14x8x8xf32> to vector<8x8x8xf32>
    %668 = vector.extract_strided_slice %424 {offsets = [39, 0], sizes = [1, 8], strides = [1, 1]} : vector<49x8xf32> to vector<1x8xf32>
    %669 = vector.shape_cast %668 : vector<1x8xf32> to vector<8xf32>
    %670 = vector.shape_cast %669 : vector<8xf32> to vector<1x1x8xf32>
    %671 = vector.broadcast %670 : vector<1x1x8xf32> to vector<8x8x8xf32>
    %672 = arith.mulf %667, %671 : vector<8x8x8xf32>
    %673 = arith.addf %666, %672 : vector<8x8x8xf32>
    %674 = vector.extract_strided_slice %631 {offsets = [6, 0, 0], sizes = [8, 8, 8], strides = [1, 1, 1]} : vector<14x8x8xf32> to vector<8x8x8xf32>
    %675 = vector.extract_strided_slice %424 {offsets = [46, 0], sizes = [1, 8], strides = [1, 1]} : vector<49x8xf32> to vector<1x8xf32>
    %676 = vector.shape_cast %675 : vector<1x8xf32> to vector<8xf32>
    %677 = vector.shape_cast %676 : vector<8xf32> to vector<1x1x8xf32>
    %678 = vector.broadcast %677 : vector<1x1x8xf32> to vector<8x8x8xf32>
    %679 = arith.mulf %674, %678 : vector<8x8x8xf32>
    %680 = arith.addf %673, %679 : vector<8x8x8xf32>
    %681 = vector.extract_strided_slice %420 {offsets = [0, 5, 0], sizes = [14, 8, 8], strides = [1, 1, 1]} : vector<14x14x8xf32> to vector<14x8x8xf32>
    %682 = vector.extract_strided_slice %681 {offsets = [0, 0, 0], sizes = [8, 8, 8], strides = [1, 1, 1]} : vector<14x8x8xf32> to vector<8x8x8xf32>
    %683 = vector.extract_strided_slice %424 {offsets = [5, 0], sizes = [1, 8], strides = [1, 1]} : vector<49x8xf32> to vector<1x8xf32>
    %684 = vector.shape_cast %683 : vector<1x8xf32> to vector<8xf32>
    %685 = vector.shape_cast %684 : vector<8xf32> to vector<1x1x8xf32>
    %686 = vector.broadcast %685 : vector<1x1x8xf32> to vector<8x8x8xf32>
    %687 = arith.mulf %682, %686 : vector<8x8x8xf32>
    %688 = arith.addf %680, %687 : vector<8x8x8xf32>
    %689 = vector.extract_strided_slice %681 {offsets = [1, 0, 0], sizes = [8, 8, 8], strides = [1, 1, 1]} : vector<14x8x8xf32> to vector<8x8x8xf32>
    %690 = vector.extract_strided_slice %424 {offsets = [12, 0], sizes = [1, 8], strides = [1, 1]} : vector<49x8xf32> to vector<1x8xf32>
    %691 = vector.shape_cast %690 : vector<1x8xf32> to vector<8xf32>
    %692 = vector.shape_cast %691 : vector<8xf32> to vector<1x1x8xf32>
    %693 = vector.broadcast %692 : vector<1x1x8xf32> to vector<8x8x8xf32>
    %694 = arith.mulf %689, %693 : vector<8x8x8xf32>
    %695 = arith.addf %688, %694 : vector<8x8x8xf32>
    %696 = vector.extract_strided_slice %681 {offsets = [2, 0, 0], sizes = [8, 8, 8], strides = [1, 1, 1]} : vector<14x8x8xf32> to vector<8x8x8xf32>
    %697 = vector.extract_strided_slice %424 {offsets = [19, 0], sizes = [1, 8], strides = [1, 1]} : vector<49x8xf32> to vector<1x8xf32>
    %698 = vector.shape_cast %697 : vector<1x8xf32> to vector<8xf32>
    %699 = vector.shape_cast %698 : vector<8xf32> to vector<1x1x8xf32>
    %700 = vector.broadcast %699 : vector<1x1x8xf32> to vector<8x8x8xf32>
    %701 = arith.mulf %696, %700 : vector<8x8x8xf32>
    %702 = arith.addf %695, %701 : vector<8x8x8xf32>
    %703 = vector.extract_strided_slice %681 {offsets = [3, 0, 0], sizes = [8, 8, 8], strides = [1, 1, 1]} : vector<14x8x8xf32> to vector<8x8x8xf32>
    %704 = vector.extract_strided_slice %424 {offsets = [26, 0], sizes = [1, 8], strides = [1, 1]} : vector<49x8xf32> to vector<1x8xf32>
    %705 = vector.shape_cast %704 : vector<1x8xf32> to vector<8xf32>
    %706 = vector.shape_cast %705 : vector<8xf32> to vector<1x1x8xf32>
    %707 = vector.broadcast %706 : vector<1x1x8xf32> to vector<8x8x8xf32>
    %708 = arith.mulf %703, %707 : vector<8x8x8xf32>
    %709 = arith.addf %702, %708 : vector<8x8x8xf32>
    %710 = vector.extract_strided_slice %681 {offsets = [4, 0, 0], sizes = [8, 8, 8], strides = [1, 1, 1]} : vector<14x8x8xf32> to vector<8x8x8xf32>
    %711 = vector.extract_strided_slice %424 {offsets = [33, 0], sizes = [1, 8], strides = [1, 1]} : vector<49x8xf32> to vector<1x8xf32>
    %712 = vector.shape_cast %711 : vector<1x8xf32> to vector<8xf32>
    %713 = vector.shape_cast %712 : vector<8xf32> to vector<1x1x8xf32>
    %714 = vector.broadcast %713 : vector<1x1x8xf32> to vector<8x8x8xf32>
    %715 = arith.mulf %710, %714 : vector<8x8x8xf32>
    %716 = arith.addf %709, %715 : vector<8x8x8xf32>
    %717 = vector.extract_strided_slice %681 {offsets = [5, 0, 0], sizes = [8, 8, 8], strides = [1, 1, 1]} : vector<14x8x8xf32> to vector<8x8x8xf32>
    %718 = vector.extract_strided_slice %424 {offsets = [40, 0], sizes = [1, 8], strides = [1, 1]} : vector<49x8xf32> to vector<1x8xf32>
    %719 = vector.shape_cast %718 : vector<1x8xf32> to vector<8xf32>
    %720 = vector.shape_cast %719 : vector<8xf32> to vector<1x1x8xf32>
    %721 = vector.broadcast %720 : vector<1x1x8xf32> to vector<8x8x8xf32>
    %722 = arith.mulf %717, %721 : vector<8x8x8xf32>
    %723 = arith.addf %716, %722 : vector<8x8x8xf32>
    %724 = vector.extract_strided_slice %681 {offsets = [6, 0, 0], sizes = [8, 8, 8], strides = [1, 1, 1]} : vector<14x8x8xf32> to vector<8x8x8xf32>
    %725 = vector.extract_strided_slice %424 {offsets = [47, 0], sizes = [1, 8], strides = [1, 1]} : vector<49x8xf32> to vector<1x8xf32>
    %726 = vector.shape_cast %725 : vector<1x8xf32> to vector<8xf32>
    %727 = vector.shape_cast %726 : vector<8xf32> to vector<1x1x8xf32>
    %728 = vector.broadcast %727 : vector<1x1x8xf32> to vector<8x8x8xf32>
    %729 = arith.mulf %724, %728 : vector<8x8x8xf32>
    %730 = arith.addf %723, %729 : vector<8x8x8xf32>
    %731 = vector.extract_strided_slice %420 {offsets = [0, 6, 0], sizes = [14, 8, 8], strides = [1, 1, 1]} : vector<14x14x8xf32> to vector<14x8x8xf32>
    %732 = vector.extract_strided_slice %731 {offsets = [0, 0, 0], sizes = [8, 8, 8], strides = [1, 1, 1]} : vector<14x8x8xf32> to vector<8x8x8xf32>
    %733 = vector.extract_strided_slice %424 {offsets = [6, 0], sizes = [1, 8], strides = [1, 1]} : vector<49x8xf32> to vector<1x8xf32>
    %734 = vector.shape_cast %733 : vector<1x8xf32> to vector<8xf32>
    %735 = vector.shape_cast %734 : vector<8xf32> to vector<1x1x8xf32>
    %736 = vector.broadcast %735 : vector<1x1x8xf32> to vector<8x8x8xf32>
    %737 = arith.mulf %732, %736 : vector<8x8x8xf32>
    %738 = arith.addf %730, %737 : vector<8x8x8xf32>
    %739 = vector.extract_strided_slice %731 {offsets = [1, 0, 0], sizes = [8, 8, 8], strides = [1, 1, 1]} : vector<14x8x8xf32> to vector<8x8x8xf32>
    %740 = vector.extract_strided_slice %424 {offsets = [13, 0], sizes = [1, 8], strides = [1, 1]} : vector<49x8xf32> to vector<1x8xf32>
    %741 = vector.shape_cast %740 : vector<1x8xf32> to vector<8xf32>
    %742 = vector.shape_cast %741 : vector<8xf32> to vector<1x1x8xf32>
    %743 = vector.broadcast %742 : vector<1x1x8xf32> to vector<8x8x8xf32>
    %744 = arith.mulf %739, %743 : vector<8x8x8xf32>
    %745 = arith.addf %738, %744 : vector<8x8x8xf32>
    %746 = vector.extract_strided_slice %731 {offsets = [2, 0, 0], sizes = [8, 8, 8], strides = [1, 1, 1]} : vector<14x8x8xf32> to vector<8x8x8xf32>
    %747 = vector.extract_strided_slice %424 {offsets = [20, 0], sizes = [1, 8], strides = [1, 1]} : vector<49x8xf32> to vector<1x8xf32>
    %748 = vector.shape_cast %747 : vector<1x8xf32> to vector<8xf32>
    %749 = vector.shape_cast %748 : vector<8xf32> to vector<1x1x8xf32>
    %750 = vector.broadcast %749 : vector<1x1x8xf32> to vector<8x8x8xf32>
    %751 = arith.mulf %746, %750 : vector<8x8x8xf32>
    %752 = arith.addf %745, %751 : vector<8x8x8xf32>
    %753 = vector.extract_strided_slice %731 {offsets = [3, 0, 0], sizes = [8, 8, 8], strides = [1, 1, 1]} : vector<14x8x8xf32> to vector<8x8x8xf32>
    %754 = vector.extract_strided_slice %424 {offsets = [27, 0], sizes = [1, 8], strides = [1, 1]} : vector<49x8xf32> to vector<1x8xf32>
    %755 = vector.shape_cast %754 : vector<1x8xf32> to vector<8xf32>
    %756 = vector.shape_cast %755 : vector<8xf32> to vector<1x1x8xf32>
    %757 = vector.broadcast %756 : vector<1x1x8xf32> to vector<8x8x8xf32>
    %758 = arith.mulf %753, %757 : vector<8x8x8xf32>
    %759 = arith.addf %752, %758 : vector<8x8x8xf32>
    %760 = vector.extract_strided_slice %731 {offsets = [4, 0, 0], sizes = [8, 8, 8], strides = [1, 1, 1]} : vector<14x8x8xf32> to vector<8x8x8xf32>
    %761 = vector.extract_strided_slice %424 {offsets = [34, 0], sizes = [1, 8], strides = [1, 1]} : vector<49x8xf32> to vector<1x8xf32>
    %762 = vector.shape_cast %761 : vector<1x8xf32> to vector<8xf32>
    %763 = vector.shape_cast %762 : vector<8xf32> to vector<1x1x8xf32>
    %764 = vector.broadcast %763 : vector<1x1x8xf32> to vector<8x8x8xf32>
    %765 = arith.mulf %760, %764 : vector<8x8x8xf32>
    %766 = arith.addf %759, %765 : vector<8x8x8xf32>
    %767 = vector.extract_strided_slice %731 {offsets = [5, 0, 0], sizes = [8, 8, 8], strides = [1, 1, 1]} : vector<14x8x8xf32> to vector<8x8x8xf32>
    %768 = vector.extract_strided_slice %424 {offsets = [41, 0], sizes = [1, 8], strides = [1, 1]} : vector<49x8xf32> to vector<1x8xf32>
    %769 = vector.shape_cast %768 : vector<1x8xf32> to vector<8xf32>
    %770 = vector.shape_cast %769 : vector<8xf32> to vector<1x1x8xf32>
    %771 = vector.broadcast %770 : vector<1x1x8xf32> to vector<8x8x8xf32>
    %772 = arith.mulf %767, %771 : vector<8x8x8xf32>
    %773 = arith.addf %766, %772 : vector<8x8x8xf32>
    %774 = vector.extract_strided_slice %731 {offsets = [6, 0, 0], sizes = [8, 8, 8], strides = [1, 1, 1]} : vector<14x8x8xf32> to vector<8x8x8xf32>
    %775 = vector.extract_strided_slice %424 {offsets = [48, 0], sizes = [1, 8], strides = [1, 1]} : vector<49x8xf32> to vector<1x8xf32>
    %776 = vector.shape_cast %775 : vector<1x8xf32> to vector<8xf32>
    %777 = vector.shape_cast %776 : vector<8xf32> to vector<1x1x8xf32>
    %778 = vector.broadcast %777 : vector<1x1x8xf32> to vector<8x8x8xf32>
    %779 = arith.mulf %774, %778 : vector<8x8x8xf32>
    %780 = arith.addf %773, %779 : vector<8x8x8xf32>
    %781 = vector.shape_cast %780 : vector<8x8x8xf32> to vector<64x8xf32>
    %cst_53 = arith.constant dense<0.000000e+00> : vector<64x8xf32>
    %782 = tpu.matmul %781, %0, %cst_53 {dimension_numbers = #tpu.dot_dimension_numbers<[1], [0], [0], [1], [0, 0, 1, 1], [], []>} : vector<64x8xf32>, vector<8x8xf32>, vector<64x8xf32> -> vector<64x8xf32>
    %783 = arith.subf %781, %782 : vector<64x8xf32>
    %784 = arith.mulf %783, %783 : vector<64x8xf32>
    %cst_54 = arith.constant dense<0.000000e+00> : vector<64x8xf32>
    %785 = tpu.matmul %784, %0, %cst_54 {dimension_numbers = #tpu.dot_dimension_numbers<[1], [0], [0], [1], [0, 0, 1, 1], [], []>} : vector<64x8xf32>, vector<8x8xf32>, vector<64x8xf32> -> vector<64x8xf32>
    %cst_55 = arith.constant 9.99999997E-7 : f32
    %786 = vector.broadcast %cst_55 : f32 to vector<64x8xf32>
    %787 = arith.addf %785, %786 : vector<64x8xf32>
    %788 = math.rsqrt %787 : vector<64x8xf32>
    %789 = arith.mulf %783, %788 : vector<64x8xf32>
    %c1_56 = arith.constant 1 : index
    %c0_57 = arith.constant 0 : index
    %790 = vector.load %arg4[%c1_56, %c0_57] : memref<2x8xf32, #tpu.memory_space<vmem>>, vector<1x8xf32>
    %791 = vector.shape_cast %790 : vector<1x8xf32> to vector<8xf32>
    %792 = vector.shape_cast %791 : vector<8xf32> to vector<1x8xf32>
    %793 = vector.broadcast %792 : vector<1x8xf32> to vector<64x8xf32>
    %794 = arith.mulf %789, %793 : vector<64x8xf32>
    %c1_58 = arith.constant 1 : index
    %c0_59 = arith.constant 0 : index
    %795 = vector.load %arg5[%c1_58, %c0_59] : memref<2x8xf32, #tpu.memory_space<vmem>>, vector<1x8xf32>
    %796 = vector.shape_cast %795 : vector<1x8xf32> to vector<8xf32>
    %797 = vector.shape_cast %796 : vector<8xf32> to vector<1x8xf32>
    %798 = vector.broadcast %797 : vector<1x8xf32> to vector<64x8xf32>
    %799 = arith.addf %794, %798 : vector<64x8xf32>
    %800 = arith.truncf %799 : vector<64x8xf32> to vector<64x8xbf16>
    %c1_60 = arith.constant 1 : index
    %c0_61 = arith.constant 0 : index
    %c0_62 = arith.constant 0 : index
    %801 = vector.load %arg6[%c1_60, %c0_61, %c0_62] : memref<2x8x32xbf16, #tpu.memory_space<vmem>>, vector<1x8x32xbf16>
    %802 = vector.shape_cast %801 : vector<1x8x32xbf16> to vector<8x32xbf16>
    %cst_63 = arith.constant dense<0.000000e+00> : vector<64x32xf32>
    %803 = tpu.matmul %800, %802, %cst_63 {dimension_numbers = #tpu.dot_dimension_numbers<[1], [0], [0], [1], [0, 0, 1, 1], [], []>} : vector<64x8xbf16>, vector<8x32xbf16>, vector<64x32xf32> -> vector<64x32xf32>
    %c1_64 = arith.constant 1 : index
    %c0_65 = arith.constant 0 : index
    %804 = vector.load %arg7[%c1_64, %c0_65] : memref<2x32xf32, #tpu.memory_space<vmem>>, vector<1x32xf32>
    %805 = vector.shape_cast %804 : vector<1x32xf32> to vector<32xf32>
    %806 = vector.shape_cast %805 : vector<32xf32> to vector<1x32xf32>
    %807 = vector.broadcast %806 : vector<1x32xf32> to vector<64x32xf32>
    %808 = arith.addf %803, %807 : vector<64x32xf32>
    %cst_66 = arith.constant 5.000000e-01 : f32
    %809 = vector.broadcast %cst_66 : f32 to vector<64x32xf32>
    %810 = arith.mulf %809, %808 : vector<64x32xf32>
    %cst_67 = arith.constant 1.41421354 : f32
    %811 = vector.broadcast %cst_67 : f32 to vector<64x32xf32>
    %812 = arith.divf %808, %811 : vector<64x32xf32>
    %813 = math.erf %812 : vector<64x32xf32>
    %cst_68 = arith.constant 1.000000e+00 : f32
    %814 = vector.broadcast %cst_68 : f32 to vector<64x32xf32>
    %815 = arith.addf %814, %813 : vector<64x32xf32>
    %816 = arith.mulf %810, %815 : vector<64x32xf32>
    %817 = arith.truncf %816 : vector<64x32xf32> to vector<64x32xbf16>
    %c1_69 = arith.constant 1 : index
    %c0_70 = arith.constant 0 : index
    %c0_71 = arith.constant 0 : index
    %818 = vector.load %arg8[%c1_69, %c0_70, %c0_71] : memref<2x32x8xbf16, #tpu.memory_space<vmem>>, vector<1x32x8xbf16>
    %819 = vector.shape_cast %818 : vector<1x32x8xbf16> to vector<32x8xbf16>
    %cst_72 = arith.constant dense<0.000000e+00> : vector<64x8xf32>
    %820 = tpu.matmul %817, %819, %cst_72 {dimension_numbers = #tpu.dot_dimension_numbers<[1], [0], [0], [1], [0, 0, 1, 1], [], []>} : vector<64x32xbf16>, vector<32x8xbf16>, vector<64x8xf32> -> vector<64x8xf32>
    %c1_73 = arith.constant 1 : index
    %c0_74 = arith.constant 0 : index
    %821 = vector.load %arg9[%c1_73, %c0_74] : memref<2x8xf32, #tpu.memory_space<vmem>>, vector<1x8xf32>
    %822 = vector.shape_cast %821 : vector<1x8xf32> to vector<8xf32>
    %823 = vector.shape_cast %822 : vector<8xf32> to vector<1x8xf32>
    %824 = vector.broadcast %823 : vector<1x8xf32> to vector<64x8xf32>
    %825 = arith.addf %820, %824 : vector<64x8xf32>
    %c1_75 = arith.constant 1 : index
    %c0_76 = arith.constant 0 : index
    %826 = vector.load %arg10[%c1_75, %c0_76] : memref<2x8xf32, #tpu.memory_space<vmem>>, vector<1x8xf32>
    %827 = vector.shape_cast %826 : vector<1x8xf32> to vector<8xf32>
    %828 = vector.shape_cast %827 : vector<8xf32> to vector<1x8xf32>
    %829 = vector.broadcast %828 : vector<1x8xf32> to vector<64x8xf32>
    %830 = arith.mulf %825, %829 : vector<64x8xf32>
    %831 = arith.addf %830, %422 : vector<64x8xf32>
    %832 = vector.shape_cast %831 : vector<64x8xf32> to vector<8x8x8xf32>
    %c0_77 = arith.constant 0 : index
    %c0_78 = arith.constant 0 : index
    %c0_79 = arith.constant 0 : index
    %c0_80 = arith.constant 0 : index
    %833 = vector.load %arg11[%c0_77, %c0_78, %c0_79, %c0_80] : memref<1x8x8x8xf32, #tpu.memory_space<vmem>>, vector<1x8x8x8xf32>
    %834 = vector.shape_cast %833 : vector<1x8x8x8xf32> to vector<8x8x8xf32>
    %835 = vector.shape_cast %832 : vector<8x8x8xf32> to vector<1x8x8x8xf32>
    tpu.vector_store %arg11[%c0_77, %c0_78, %c0_79, %c0_80], %835 {strides = array<i32>} : memref<1x8x8x8xf32, #tpu.memory_space<vmem>>, vector<1x8x8x8xf32>,
    return
  }
  func.func @transform_0(%arg0: i32) -> (i32, i32, i32, i32) {
    %c0_i32 = arith.constant 0 : i32
    %c0_i32_0 = arith.constant 0 : i32
    %c0_i32_1 = arith.constant 0 : i32
    %c0_i32_2 = arith.constant 0 : i32
    return %arg0, %c0_i32, %c0_i32_0, %c0_i32_1 : i32, i32, i32, i32
  }
  func.func @transform_1(%arg0: i32) -> (i32, i32, i32) {
    %c0_i32 = arith.constant 0 : i32
    %c0_i32_0 = arith.constant 0 : i32
    %c0_i32_1 = arith.constant 0 : i32
    %c0_i32_2 = arith.constant 0 : i32
    return %c0_i32, %c0_i32_0, %c0_i32_1 : i32, i32, i32
  }
  func.func @transform_2(%arg0: i32) -> (i32, i32) {
    %c0_i32 = arith.constant 0 : i32
    %c0_i32_0 = arith.constant 0 : i32
    %c0_i32_1 = arith.constant 0 : i32
    return %c0_i32, %c0_i32_0 : i32, i32
  }
  func.func @transform_3(%arg0: i32) -> (i32, i32) {
    %c0_i32 = arith.constant 0 : i32
    %c0_i32_0 = arith.constant 0 : i32
    %c0_i32_1 = arith.constant 0 : i32
    return %c0_i32, %c0_i32_0 : i32, i32
  }
  func.func @transform_4(%arg0: i32) -> (i32, i32) {
    %c0_i32 = arith.constant 0 : i32
    %c0_i32_0 = arith.constant 0 : i32
    %c0_i32_1 = arith.constant 0 : i32
    return %c0_i32, %c0_i32_0 : i32, i32
  }
  func.func @transform_5(%arg0: i32) -> (i32, i32, i32) {
    %c0_i32 = arith.constant 0 : i32
    %c0_i32_0 = arith.constant 0 : i32
    %c0_i32_1 = arith.constant 0 : i32
    %c0_i32_2 = arith.constant 0 : i32
    return %c0_i32, %c0_i32_0, %c0_i32_1 : i32, i32, i32
  }
  func.func @transform_6(%arg0: i32) -> (i32, i32) {
    %c0_i32 = arith.constant 0 : i32
    %c0_i32_0 = arith.constant 0 : i32
    %c0_i32_1 = arith.constant 0 : i32
    return %c0_i32, %c0_i32_0 : i32, i32
  }
  func.func @transform_7(%arg0: i32) -> (i32, i32, i32) {
    %c0_i32 = arith.constant 0 : i32
    %c0_i32_0 = arith.constant 0 : i32
    %c0_i32_1 = arith.constant 0 : i32
    %c0_i32_2 = arith.constant 0 : i32
    return %c0_i32, %c0_i32_0, %c0_i32_1 : i32, i32, i32
  }
  func.func @transform_8(%arg0: i32) -> (i32, i32) {
    %c0_i32 = arith.constant 0 : i32
    %c0_i32_0 = arith.constant 0 : i32
    %c0_i32_1 = arith.constant 0 : i32
    return %c0_i32, %c0_i32_0 : i32, i32
  }
  func.func @transform_9(%arg0: i32) -> (i32, i32) {
    %c0_i32 = arith.constant 0 : i32
    %c0_i32_0 = arith.constant 0 : i32
    %c0_i32_1 = arith.constant 0 : i32
    return %c0_i32, %c0_i32_0 : i32, i32
  }
  func.func @transform_10(%arg0: i32) -> (i32, i32, i32, i32) {
    %c0_i32 = arith.constant 0 : i32
    %c0_i32_0 = arith.constant 0 : i32
    %c0_i32_1 = arith.constant 0 : i32
    %c0_i32_2 = arith.constant 0 : i32
    return %arg0, %c0_i32, %c0_i32_0, %c0_i32_1 : i32, i32, i32, i32
  }
}

</mosaic_0001>

<bundles_post_ra>
// kernel: tile.13
= control target key start
LH: loop header
LB: loop body
LE: loop exit
PB: predicated region body
PF: predicated region fallthrough
CT: control target
= control target key end

     0   :  { %s22_s0 = inlined_call_operand.vmem [shape: f32[4], index: 0, kind: input, shape index: {}]   ;;  %s23_s1 = inlined_call_operand.vmem [shape: f32[4,4], index: 1, kind: output, shape index: {}]  }
   0x1   :  { %v4_v0 = vld [vmem:[%s22_s0] ss:$0 sm:$0xff] }
   0x2   :  { %5 = vst [vmem:[%s23_s1] sm:$0xf] %v4_v0 }

// kernel: tile.14
= control target key start
LH: loop header
LB: loop body
LE: loop exit
PB: predicated region body
PF: predicated region fallthrough
CT: control target
= control target key end

     0   :  { %vm7_vm0 = vcmask 31744   ;;  %s37_s8 = smov 4   ;;  %s38_s9 = smov 8   ;;  %vm13_vm1 = vcmask 130144   ;;  %vm19_vm2 = vcmask 97344   ;;  %vm25_vm3 = vcmask 64544   ;;  %s55_s0 = inlined_call_operand.vmem [shape: f32[4,4], index: 0, kind: input, shape index: {}]   ;;  %s56_s1 = inlined_call_operand.vmem [shape: f32[1,16], index: 1, kind: output, shape index: {}]  }
   0x1   :  { %v4_v0 = vld [vmem:[%s55_s0] sm:$0xf]  ;;  %s36_s0 = smov 12  }
   0x2   :  { %5 = vst [vmem:[#allocation1] sm:$0xf] %v4_v0 }
   0x9   :  { %v10_v1 = vld [vmem:[#allocation1 + $0x3] sm:$0x1]   ;;  %v22_v2 = vld [vmem:[#allocation1 + $0x1] sm:$0x1]   ;;  %v6_v3 = vld [vmem:[#allocation1] sm:$0x1]  }
   0xa   :  { %11 = vrot.lane.b32.xlu0 %v10_v1, %s36_s0  ;;  %23 = vrot.lane.b32.xlu1 %v22_v2, %s37_s8  ;;  %v16_v4 = vld [vmem:[#allocation1 + $0x2] sm:$0x1]   ;;  %8 = vst.msk [vmem:[#allocation0] sm:$0x1] %vm7_vm0, %v6_v3  }
   0xe   :  { %17 = vrot.lane.b32.xlu0 %v16_v4, %s38_s9 }
  0x7c   :  { %v12_v5 = vpop.permute.xlu0 %11   ;;  %v24_v6 = vpop.permute.xlu1 %23  }
  0x7d   :  { %14 = vst.msk [vmem:[#allocation0] sm:$0x1] %vm13_vm1, %v12_v5  }
  0x80   :  { %v18_v7 = vpop.permute.xlu0 %17  }
  0x81   :  { %20 = vst.msk [vmem:[#allocation0] sm:$0x1] %vm19_vm2, %v18_v7  }
  0x82   :  { %26 = vst.msk [vmem:[#allocation0] sm:$0x1] %vm25_vm3, %v24_v6  }
  0x89   :  { %v30_v8 = vld [vmem:[#allocation0] sm:$0x1] }
  0x8a   :  { %32 = vst [vmem:[%s56_s1] sm:$0x1] %v30_v8 }

// kernel: convnext_stage.2
= control target key start
LH: loop header
LB: loop body
LE: loop exit
PB: predicated region body
PF: predicated region fallthrough
CT: control target
= control target key end

     0   :  { %vm41_vm0 = vcmask 130048   ;;  %vm740_vm1 = vcmask 64512   ;;  %s1348_s1 = inlined_call_operand.vmem [shape: f32[16,16], index: 1, kind: input, shape index: {}]   ;;  %s1349_s0 = inlined_call_operand.vmem [shape: f32[128,16], index: 0, kind: input, shape index: {}]   ;;  %s1350_s4 = inlined_call_operand.vmem [shape: f32[16,8], index: 4, kind: input, shape index: {}]   ;;  %s1351_s2 = inlined_call_operand.vmem [shape: f32[1,16], index: 2, kind: input, shape index: {}]   ;;  %s1352_s3 = inlined_call_operand.vmem [shape: f32[1,16], index: 3, kind: input, shape index: {}]   ;;  %s1353_s5 = inlined_call_operand.vmem [shape: f32[1,8], index: 5, kind: input, shape index: {}]   ;;  %s1354_s6 = inlined_call_operand.vmem [shape: f32[128,8], index: 6, kind: output, shape index: {}]  }
   0x1   :  { %v39_v0 = vld [vmem:[%s1348_s1] sm:$0xff]  ;;  %v40_v1 = vld [vmem:[%s1348_s1 + $0x8] sm:$0xff]  ;;  %v25_v7 = vld [vmem:[%s1349_s0 + $0x10] sm:$0xff] }
   0x2   :  { %v23_v2 = vld [vmem:[%s1349_s0] sm:$0xff]  ;;  %v950_v3 = vpack.c.bf16 %v40_v1, %v39_v0  ;;  %v24_v5 = vld [vmem:[%s1349_s0 + $0x8] sm:$0xff]  ;;  %v1059_v8 = vld [vmem:[%s1349_s0 + $0x50] sm:$0xff] }
   0x3   :  { %870 = vmatprep.mubr.msk.f32.mxu0 %vm41_vm0, %v23_v2  ;;  %v31_v4 = vld [vmem:[%s1349_s0 + $0x40] sm:$0xff]  ;;  %v1050_v6 = vld [vmem:[%s1349_s0 + $0x48] sm:$0xff]  ;;  %v26_v9 = vld [vmem:[%s1349_s0 + $0x18] sm:$0xff] }
   0x4   :  { %951 = vmatprep.subr.bf16.mxu0 %v950_v3  ;;  %962 = vmatprep.subr.bf16.mxu1 %v950_v3  ;;  %v1073_v10 = vld [vmem:[%s1349_s0 + $0x58] sm:$0xff]  ;;  %v27_v11 = vld [vmem:[%s1349_s0 + $0x20] sm:$0xff]  ;;  %v28_v13 = vld [vmem:[%s1349_s0 + $0x28] sm:$0xff] }
   0x5   :  { %953 = vmatpush3.bf16.msra.mxu0 %v950_v3  ;;  %963 = vmatpush3.bf16.msra.mxu1 %v950_v3  ;;  %v1081_v12 = vld [vmem:[%s1349_s0 + $0x60] sm:$0xff]  ;;  %v1095_v14 = vld [vmem:[%s1349_s0 + $0x68] sm:$0xff]  ;;  %v29_v15 = vld [vmem:[%s1349_s0 + $0x30] sm:$0xff] }
   0x6   :  { %882 = vmatprep.mubr.msk.f32.mxu1 %vm41_vm0, %v31_v4  ;;  %955 = vmatprep.subr.bf16.mxu1 %v950_v3  ;;  %v37_v16 = vld [vmem:[%s1349_s0 + $0x70] sm:$0xff]  ;;  %v30_v17 = vld [vmem:[%s1349_s0 + $0x38] sm:$0xff] }
   0x7   :  { %v38_v18 = vld [vmem:[%s1349_s0 + $0x78] sm:$0xff] }
   0x8   :  { %871 = vmatmul.mubr.msk.f32.vlgmr.msra.gmra.mrb[0].mxu0 %vm41_vm0, %v24_v5  ;;  %883 = vmatmul.mubr.msk.f32.vlgmr.msra.gmra.mrb[0].mxu1 %vm41_vm0, %v1050_v6 }
   0x9   :  { %873 = vmatprep.mubr.msk.f32.mxu0 %vm41_vm0, %v25_v7  ;;  %885 = vmatprep.mubr.msk.f32.mxu1 %vm41_vm0, %v1059_v8 }
   0xa   :  { %957 = vmatpush3.bf16.msra.mxu1 %v950_v3  ;;  %v538_v3 = vld [vmem:[%s1350_s4] sm:$0xff] }
   0xc   :  { %874 = vmatmul.mubr.msk.f32.gmra.mrb[2].mxu0 %vm41_vm0, %v26_v9  ;;  %886 = vmatmul.mubr.msk.f32.gmra.mrb[2].mxu1 %vm41_vm0, %v1073_v10 }
   0xd   :  { %876 = vmatprep.mubr.msk.f32.mxu0 %vm41_vm0, %v27_v11  ;;  %888 = vmatprep.mubr.msk.f32.mxu1 %vm41_vm0, %v1081_v12 }
  0x10   :  { %877 = vmatmul.mubr.msk.f32.gmra.mrb[4].mxu0 %vm41_vm0, %v28_v13  ;;  %889 = vmatmul.mubr.msk.f32.gmra.mrb[4].mxu1 %vm41_vm0, %v1095_v14 }
  0x11   :  { %879 = vmatprep.mubr.msk.f32.mxu0 %vm41_vm0, %v29_v15  ;;  %891 = vmatprep.mubr.msk.f32.mxu1 %vm41_vm0, %v37_v16 }
  0x14   :  { %880 = vmatmul.mubr.msk.f32.gmra.mrb[6].mxu0 %vm41_vm0, %v30_v17  ;;  %892 = vmatmul.mubr.msk.f32.gmra.mrb[6].mxu1 %vm41_vm0, %v38_v18 }
  0xdb   :  { %v872_v19 = vpop.f32.mrb[0].mxu0  ;;  %v884_v20 = vpop.f32.mrb[0].mxu1 }
  0xdc   :  { %v1116_v21 = vsub.f32 %v24_v5, %v872_v19  ;;  %v156_v22 = vpop.f32.mrb[1].mxu0  ;;  %v196_v23 = vpop.f32.mrb[1].mxu1  ;;  %v1162_v54 = vsub.f32 %v1050_v6, %v884_v20  ;;  %v1210_v20 = vld [vmem:[%s1351_s2] ss:$0 sm:$0xff] }
  0xdd   :  { %v1118_v24 = vsub.f32 %v23_v2, %v156_v22  ;;  %v1142_v43 = vsub.f32 %v31_v4, %v196_v23  ;;  %v539_v4 = vld [vmem:[%s1350_s4 + $0x8] sm:$0xff] }
  0xde   :  { %v252_v28 = vmul.f32 %v1116_v21, %v1116_v21  ;;  %v260_v57 = vmul.f32 %v1162_v54, %v1162_v54  ;;  %v958_v5 = vpack.c.bf16 %v539_v4, %v538_v3 }
  0xdf   :  { %v251_v25 = vmul.f32 %v1118_v24, %v1118_v24  ;;  %v875_v26 = vpop.f32.mrb[2].mxu0  ;;  %v887_v27 = vpop.f32.mrb[2].mxu1  ;;  %v259_v51 = vmul.f32 %v1142_v43, %v1142_v43 }
  0xe0   :  { %v1124_v29 = vsub.f32 %v26_v9, %v875_v26  ;;  %v166_v30 = vpop.f32.mrb[3].mxu0  ;;  %v206_v31 = vpop.f32.mrb[3].mxu1  ;;  %v1175_v58 = vsub.f32 %v1073_v10, %v887_v27  ;;  %959 = vmatprep.subr.bf16.mxu0 %v958_v5 }
  0xe1   :  { %v1126_v32 = vsub.f32 %v25_v7, %v166_v30  ;;  %898 = vmatprep.mubr.msk.f32.mxu1 %vm41_vm0, %v251_v25  ;;  %v1157_v52 = vsub.f32 %v1059_v8, %v206_v31  ;;  %961 = vmatpush3.bf16.msra.mxu0 %v958_v5  ;;  %v1218_v31 = vld [vmem:[%s1352_s3] ss:$0 sm:$0xff] }
  0xe2   :  { %899 = vmatmul.mubr.msk.f32.vlgmr.msra.gmra.mrb[8].mxu1 %vm41_vm0, %v252_v28  ;;  %v254_v36 = vmul.f32 %v1124_v29, %v1124_v29  ;;  %v262_v61 = vmul.f32 %v1175_v58, %v1175_v58 }
  0xe3   :  { %v253_v33 = vmul.f32 %v1126_v32, %v1126_v32  ;;  %v878_v34 = vpop.f32.mrb[4].mxu0  ;;  %v890_v35 = vpop.f32.mrb[4].mxu1  ;;  %v261_v55 = vmul.f32 %v1157_v52, %v1157_v52 }
  0xe4   :  { %v1134_v37 = vsub.f32 %v28_v13, %v878_v34  ;;  %v176_v38 = vpop.f32.mrb[5].mxu0  ;;  %v216_v39 = vpop.f32.mrb[5].mxu1  ;;  %v1186_v62 = vsub.f32 %v1095_v14, %v890_v35 }
  0xe5   :  { %v1136_v40 = vsub.f32 %v27_v11, %v176_v38  ;;  %901 = vmatprep.mubr.msk.f32.mxu1 %vm41_vm0, %v253_v33  ;;  %v1170_v56 = vsub.f32 %v1081_v12, %v216_v39 }
  0xe6   :  { %902 = vmatmul.mubr.msk.f32.gmra.mrb[10].mxu1 %vm41_vm0, %v254_v36  ;;  %v256_v45 = vmul.f32 %v1134_v37, %v1134_v37  ;;  %v264_v0 = vmul.f32 %v1186_v62, %v1186_v62 }
  0xe7   :  { %v255_v41 = vmul.f32 %v1136_v40, %v1136_v40  ;;  %v881_v42 = vpop.f32.mrb[6].mxu0  ;;  %v893_v44 = vpop.f32.mrb[6].mxu1  ;;  %v263_v59 = vmul.f32 %v1170_v56, %v1170_v56 }
  0xe8   :  { %v1146_v46 = vsub.f32 %v30_v17, %v881_v42  ;;  %v186_v47 = vpop.f32.mrb[7].mxu0  ;;  %v226_v48 = vpop.f32.mrb[7].mxu1  ;;  %v1194_v1 = vsub.f32 %v38_v18, %v893_v44 }
  0xe9   :  { %v1148_v49 = vsub.f32 %v29_v15, %v186_v47  ;;  %904 = vmatprep.mubr.msk.f32.mxu1 %vm41_vm0, %v255_v41  ;;  %v1181_v60 = vsub.f32 %v37_v16, %v226_v48 }
  0xea   :  { %905 = vmatmul.mubr.msk.f32.gmra.mrb[12].mxu1 %vm41_vm0, %v256_v45  ;;  %v258_v53 = vmul.f32 %v1146_v46, %v1146_v46  ;;  %v266_v2 = vmul.f32 %v1194_v1, %v1194_v1 }
  0xeb   :  { %v257_v50 = vmul.f32 %v1148_v49, %v1148_v49  ;;  %v265_v63 = vmul.f32 %v1181_v60, %v1181_v60 }
  0xed   :  { %907 = vmatprep.mubr.msk.f32.mxu1 %vm41_vm0, %v257_v50 }
  0xee   :  { %908 = vmatmul.mubr.msk.f32.gmra.mrb[14].mxu1 %vm41_vm0, %v258_v53 }
  0xef   :  { %910 = vmatprep.mubr.msk.f32.mxu1 %vm41_vm0, %v259_v51 }
  0xf2   :  { %911 = vmatmul.mubr.msk.f32.gmra.mrb[16].mxu1 %vm41_vm0, %v260_v57 }
  0xf3   :  { %913 = vmatprep.mubr.msk.f32.mxu1 %vm41_vm0, %v261_v55 }
  0xf6   :  { %914 = vmatmul.mubr.msk.f32.gmra.mrb[18].mxu1 %vm41_vm0, %v262_v61 }
  0xf7   :  { %916 = vmatprep.mubr.msk.f32.mxu1 %vm41_vm0, %v263_v59 }
  0xfa   :  { %917 = vmatmul.mubr.msk.f32.gmra.mrb[20].mxu1 %vm41_vm0, %v264_v0 }
  0xfb   :  { %919 = vmatprep.mubr.msk.f32.mxu1 %vm41_vm0, %v265_v63 }
  0xfe   :  { %920 = vmatmul.mubr.msk.f32.gmra.mrb[22].mxu1 %vm41_vm0, %v266_v2 }
 0x1b5   :  { %v900_v6 = vpop.f32.mrb[8].mxu1 }
 0x1b6   :  { %v387_v7 = vadd.f32 1e-06, %v900_v6  ;;  %v381_v8 = vpop.f32.mrb[9].mxu1 }
 0x1b7   :  { %v382_v9 = vadd.f32 1e-06, %v381_v8 }
 0x1b8   :  { %964 = vrsqrt.f32 %v387_v7 }
 0x1b9   :  { %966 = vrsqrt.f32 %v382_v9  ;;  %v903_v10 = vpop.f32.mrb[10].mxu1 }
 0x1ba   :  { %v397_v11 = vadd.f32 1e-06, %v903_v10  ;;  %v391_v12 = vpop.f32.mrb[11].mxu1 }
 0x1bb   :  { %v392_v13 = vadd.f32 1e-06, %v391_v12 }
 0x1bc   :  { %968 = vrsqrt.f32 %v397_v11 }
 0x1bd   :  { %970 = vrsqrt.f32 %v392_v13  ;;  %v906_v14 = vpop.f32.mrb[12].mxu1 }
 0x1be   :  { %v407_v15 = vadd.f32 1e-06, %v906_v14  ;;  %v401_v16 = vpop.f32.mrb[13].mxu1 }
 0x1bf   :  { %v402_v17 = vadd.f32 1e-06, %v401_v16 }
 0x1c0   :  { %972 = vrsqrt.f32 %v407_v15 }
 0x1c1   :  { %974 = vrsqrt.f32 %v402_v17  ;;  %v909_v18 = vpop.f32.mrb[14].mxu1 }
 0x1c2   :  { %v965_v19 = vpop.eup %964  ;;  %v417_v22 = vadd.f32 1e-06, %v909_v18  ;;  %v411_v23 = vpop.f32.mrb[15].mxu1 }
 0x1c3   :  { %v967_v25 = vpop.eup %966  ;;  %v477_v26 = vmul.f32 %v965_v19, %v1116_v21  ;;  %v412_v27 = vadd.f32 1e-06, %v411_v23 }
 0x1c4   :  { %976 = vrsqrt.f32 %v417_v22  ;;  %v476_v28 = vmul.f32 %v967_v25, %v1118_v24 }
 0x1c5   :  { %v500_v30 = vmul.f32 %v1210_v20, %v477_v26  ;;  %978 = vrsqrt.f32 %v412_v27  ;;  %v912_v33 = vpop.f32.mrb[16].mxu1 }
 0x1c6   :  { %v969_v34 = vpop.eup %968  ;;  %v427_v35 = vadd.f32 1e-06, %v912_v33  ;;  %v421_v36 = vpop.f32.mrb[17].mxu1  ;;  %v499_v38 = vmul.f32 %v1210_v20, %v476_v28 }
 0x1c7   :  { %v971_v39 = vpop.eup %970  ;;  %v422_v21 = vadd.f32 1e-06, %v421_v36  ;;  %v479_v41 = vmul.f32 %v969_v34, %v1124_v29  ;;  %v523_v44 = vadd.f32 %v1218_v31, %v500_v30 }
 0x1c8   :  { %980 = vrsqrt.f32 %v427_v35  ;;  %v522_v24 = vadd.f32 %v1218_v31, %v499_v38  ;;  %v478_v42 = vmul.f32 %v971_v39, %v1126_v32 }
 0x1c9   :  { %982 = vrsqrt.f32 %v422_v21  ;;  %v915_v45 = vpop.f32.mrb[18].mxu1  ;;  %v502_v47 = vmul.f32 %v1210_v20, %v479_v41 }
 0x1ca   :  { %v973_v48 = vpop.eup %972  ;;  %v437_v50 = vadd.f32 1e-06, %v915_v45  ;;  %v431_v51 = vpop.f32.mrb[19].mxu1  ;;  %926 = vmatprep.mubr.msk.f32.mxu0 %vm41_vm0, %v522_v24  ;;  %v501_v53 = vmul.f32 %v1210_v20, %v478_v42 }
 0x1cb   :  { %v975_v55 = vpop.eup %974  ;;  %v432_v29 = vadd.f32 1e-06, %v431_v51  ;;  %927 = vmatmul.mubr.msk.f32.vlgmr.msra.gmra.mrb[8].mxu0 %vm41_vm0, %v523_v44  ;;  %v481_v57 = vmul.f32 %v973_v48, %v1134_v37  ;;  %v525_v63 = vadd.f32 %v1218_v31, %v502_v47 }
 0x1cc   :  { %984 = vrsqrt.f32 %v437_v50  ;;  %v524_v32 = vadd.f32 %v1218_v31, %v501_v53  ;;  %v480_v59 = vmul.f32 %v975_v55, %v1136_v40 }
 0x1cd   :  { %986 = vrsqrt.f32 %v432_v29  ;;  %v918_v61 = vpop.f32.mrb[20].mxu1  ;;  %v504_v0 = vmul.f32 %v1210_v20, %v481_v57 }
 0x1ce   :  { %v977_v2 = vpop.eup %976  ;;  %v447_v3 = vadd.f32 1e-06, %v918_v61  ;;  %v441_v4 = vpop.f32.mrb[21].mxu1  ;;  %929 = vmatprep.mubr.msk.f32.mxu0 %vm41_vm0, %v524_v32  ;;  %v503_v5 = vmul.f32 %v1210_v20, %v480_v59 }
 0x1cf   :  { %v979_v6 = vpop.eup %978  ;;  %v442_v37 = vadd.f32 1e-06, %v441_v4  ;;  %930 = vmatmul.mubr.msk.f32.gmra.mrb[10].mxu0 %vm41_vm0, %v525_v63  ;;  %v483_v7 = vmul.f32 %v977_v2, %v1146_v46  ;;  %v527_v10 = vadd.f32 %v1218_v31, %v504_v0 }
 0x1d0   :  { %988 = vrsqrt.f32 %v447_v3  ;;  %v526_v40 = vadd.f32 %v1218_v31, %v503_v5  ;;  %v482_v8 = vmul.f32 %v979_v6, %v1148_v49 }
 0x1d1   :  { %990 = vrsqrt.f32 %v442_v37  ;;  %v921_v9 = vpop.f32.mrb[22].mxu1  ;;  %v506_v11 = vmul.f32 %v1210_v20, %v483_v7 }
 0x1d2   :  { %v981_v12 = vpop.eup %980  ;;  %v457_v13 = vadd.f32 1e-06, %v921_v9  ;;  %v451_v14 = vpop.f32.mrb[23].mxu1  ;;  %932 = vmatprep.mubr.msk.f32.mxu0 %vm41_vm0, %v526_v40  ;;  %v505_v15 = vmul.f32 %v1210_v20, %v482_v8 }
 0x1d3   :  { %v983_v16 = vpop.eup %982  ;;  %v452_v46 = vadd.f32 1e-06, %v451_v14  ;;  %933 = vmatmul.mubr.msk.f32.gmra.mrb[12].mxu0 %vm41_vm0, %v527_v10  ;;  %v485_v17 = vmul.f32 %v981_v12, %v1162_v54  ;;  %v529_v19 = vadd.f32 %v1218_v31, %v506_v11 }
 0x1d4   :  { %992 = vrsqrt.f32 %v457_v13  ;;  %v528_v49 = vadd.f32 %v1218_v31, %v505_v15  ;;  %v484_v18 = vmul.f32 %v983_v16, %v1142_v43 }
 0x1d5   :  { %994 = vrsqrt.f32 %v452_v46  ;;  %v508_v22 = vmul.f32 %v1210_v20, %v485_v17 }
 0x1d6   :  { %v985_v23 = vpop.eup %984  ;;  %935 = vmatprep.mubr.msk.f32.mxu0 %vm41_vm0, %v528_v49  ;;  %v507_v25 = vmul.f32 %v1210_v20, %v484_v18 }
 0x1d7   :  { %v987_v26 = vpop.eup %986  ;;  %936 = vmatmul.mubr.msk.f32.gmra.mrb[14].mxu0 %vm41_vm0, %v529_v19  ;;  %v487_v54 = vmul.f32 %v985_v23, %v1175_v58  ;;  %v531_v43 = vadd.f32 %v1218_v31, %v508_v22 }
 0x1d8   :  { %v530_v27 = vadd.f32 %v1218_v31, %v507_v25  ;;  %v486_v28 = vmul.f32 %v987_v26, %v1157_v52 }
 0x1d9   :  { %v510_v30 = vmul.f32 %v1210_v20, %v487_v54 }
 0x1da   :  { %v989_v33 = vpop.eup %988  ;;  %938 = vmatprep.mubr.msk.f32.mxu0 %vm41_vm0, %v530_v27  ;;  %v509_v34 = vmul.f32 %v1210_v20, %v486_v28 }
 0x1db   :  { %v991_v35 = vpop.eup %990  ;;  %939 = vmatmul.mubr.msk.f32.gmra.mrb[16].mxu0 %vm41_vm0, %v531_v43  ;;  %v489_v36 = vmul.f32 %v989_v33, %v1186_v62  ;;  %v533_v52 = vadd.f32 %v1218_v31, %v510_v30 }
 0x1dc   :  { %v532_v58 = vadd.f32 %v1218_v31, %v509_v34  ;;  %v488_v38 = vmul.f32 %v991_v35, %v1170_v56 }
 0x1dd   :  { %v512_v39 = vmul.f32 %v1210_v20, %v489_v36 }
 0x1de   :  { %v993_v21 = vpop.eup %992  ;;  %941 = vmatprep.mubr.msk.f32.mxu0 %vm41_vm0, %v532_v58  ;;  %v511_v41 = vmul.f32 %v1210_v20, %v488_v38 }
 0x1df   :  { %v995_v24 = vpop.eup %994  ;;  %942 = vmatmul.mubr.msk.f32.gmra.mrb[18].mxu0 %vm41_vm0, %v533_v52  ;;  %v491_v42 = vmul.f32 %v993_v21, %v1194_v1  ;;  %v535_v56 = vadd.f32 %v1218_v31, %v512_v39 }
 0x1e0   :  { %v490_v62 = vmul.f32 %v995_v24, %v1181_v60  ;;  %v534_v44 = vadd.f32 %v1218_v31, %v511_v41  ;;  %v795_v60 = vld [vmem:[%s1353_s5] ss:$0 sm:$0xff] }
 0x1e1   :  { %v514_v45 = vmul.f32 %v1210_v20, %v491_v42 }
 0x1e2   :  { %944 = vmatprep.mubr.msk.f32.mxu0 %vm41_vm0, %v534_v44  ;;  %v513_v47 = vmul.f32 %v1210_v20, %v490_v62 }
 0x1e3   :  { %945 = vmatmul.mubr.msk.f32.gmra.mrb[20].mxu0 %vm41_vm0, %v535_v56  ;;  %v537_v50 = vadd.f32 %v1218_v31, %v514_v45 }
 0x1e4   :  { %v536_v48 = vadd.f32 %v1218_v31, %v513_v47 }
 0x1e6   :  { %947 = vmatprep.mubr.msk.f32.mxu0 %vm41_vm0, %v536_v48 }
 0x1e7   :  { %948 = vmatmul.mubr.msk.f32.gmra.mrb[22].mxu0 %vm41_vm0, %v537_v50 }
 0x29e   :  { %v928_v1 = vpop.f32.mrb[8].mxu0 }
 0x29f   :  { %v667_v51 = vadd.f32 %v928_v1, %v795_v60  ;;  %v661_v53 = vpop.f32.mrb[9].mxu0 }
 0x2a0   :  { %v662_v55 = vadd.f32 %v795_v60, %v661_v53 }
 0x2a1   :  { %742 = vst.msk [vmem:[%s1354_s6 + $0x8] sm:$0xff] %vm740_vm1, %v667_v51 }
 0x2a2   :  { %741 = vst.msk [vmem:[%s1354_s6] sm:$0xff] %vm740_vm1, %v662_v55  ;;  %v931_v20 = vpop.f32.mrb[10].mxu0 }
 0x2a3   :  { %v677_v31 = vadd.f32 %v931_v20, %v795_v60  ;;  %v671_v29 = vpop.f32.mrb[11].mxu0 }
 0x2a4   :  { %v672_v57 = vadd.f32 %v795_v60, %v671_v29 }
 0x2a5   :  { %744 = vst.msk [vmem:[%s1354_s6 + $0x18] sm:$0xff] %vm740_vm1, %v677_v31 }
 0x2a6   :  { %743 = vst.msk [vmem:[%s1354_s6 + $0x10] sm:$0xff] %vm740_vm1, %v672_v57  ;;  %v934_v32 = vpop.f32.mrb[12].mxu0 }
 0x2a7   :  { %v687_v59 = vadd.f32 %v934_v32, %v795_v60  ;;  %v681_v61 = vpop.f32.mrb[13].mxu0 }
 0x2a8   :  { %v682_v63 = vadd.f32 %v795_v60, %v681_v61 }
 0x2a9   :  { %746 = vst.msk [vmem:[%s1354_s6 + $0x28] sm:$0xff] %vm740_vm1, %v687_v59 }
 0x2aa   :  { %745 = vst.msk [vmem:[%s1354_s6 + $0x20] sm:$0xff] %vm740_vm1, %v682_v63  ;;  %v937_v0 = vpop.f32.mrb[14].mxu0 }
 0x2ab   :  { %v697_v2 = vadd.f32 %v937_v0, %v795_v60  ;;  %v691_v3 = vpop.f32.mrb[15].mxu0 }
 0x2ac   :  { %v692_v4 = vadd.f32 %v795_v60, %v691_v3 }
 0x2ad   :  { %748 = vst.msk [vmem:[%s1354_s6 + $0x38] sm:$0xff] %vm740_vm1, %v697_v2 }
 0x2ae   :  { %747 = vst.msk [vmem:[%s1354_s6 + $0x30] sm:$0xff] %vm740_vm1, %v692_v4  ;;  %v940_v5 = vpop.f32.mrb[16].mxu0 }
 0x2af   :  { %v707_v6 = vadd.f32 %v940_v5, %v795_v60  ;;  %v701_v37 = vpop.f32.mrb[17].mxu0 }
 0x2b0   :  { %v702_v7 = vadd.f32 %v795_v60, %v701_v37 }
 0x2b1   :  { %750 = vst.msk [vmem:[%s1354_s6 + $0x48] sm:$0xff] %vm740_vm1, %v707_v6 }
 0x2b2   :  { %749 = vst.msk [vmem:[%s1354_s6 + $0x40] sm:$0xff] %vm740_vm1, %v702_v7  ;;  %v943_v40 = vpop.f32.mrb[18].mxu0 }
 0x2b3   :  { %v717_v8 = vadd.f32 %v943_v40, %v795_v60  ;;  %v711_v9 = vpop.f32.mrb[19].mxu0 }
 0x2b4   :  { %v712_v10 = vadd.f32 %v795_v60, %v711_v9 }
 0x2b5   :  { %752 = vst.msk [vmem:[%s1354_s6 + $0x58] sm:$0xff] %vm740_vm1, %v717_v8 }
 0x2b6   :  { %751 = vst.msk [vmem:[%s1354_s6 + $0x50] sm:$0xff] %vm740_vm1, %v712_v10  ;;  %v946_v11 = vpop.f32.mrb[20].mxu0 }
 0x2b7   :  { %v727_v12 = vadd.f32 %v946_v11, %v795_v60  ;;  %v721_v13 = vpop.f32.mrb[21].mxu0 }
 0x2b8   :  { %v722_v14 = vadd.f32 %v795_v60, %v721_v13 }
 0x2b9   :  { %754 = vst.msk [vmem:[%s1354_s6 + $0x68] sm:$0xff] %vm740_vm1, %v727_v12 }
 0x2ba   :  { %753 = vst.msk [vmem:[%s1354_s6 + $0x60] sm:$0xff] %vm740_vm1, %v722_v14  ;;  %v949_v15 = vpop.f32.mrb[22].mxu0 }
 0x2bb   :  { %v737_v16 = vadd.f32 %v949_v15, %v795_v60  ;;  %v731_v46 = vpop.f32.mrb[23].mxu0 }
 0x2bc   :  { %v732_v17 = vadd.f32 %v795_v60, %v731_v46 }
 0x2bd   :  { %756 = vst.msk [vmem:[%s1354_s6 + $0x78] sm:$0xff] %vm740_vm1, %v737_v16 }
 0x2be   :  { %755 = vst.msk [vmem:[%s1354_s6 + $0x70] sm:$0xff] %vm740_vm1, %v732_v17 }

// kernel: convnext_stage.3
= control target key start
LH: loop header
LB: loop body
LE: loop exit
PB: predicated region body
PF: predicated region fallthrough
CT: control target
= control target key end

     0   :  { %s8986_s13 = smov 0   ;;  %s14270_s0 = inlined_call_operand.vmem [shape: f32[2,8,8,8], index: 0, kind: input, shape index: {}]   ;;  %s14271_s1 = inlined_call_operand.vmem [shape: f32[2,49,8], index: 1, kind: input, shape index: {}]   ;;  %s14272_s2 = inlined_call_operand.vmem [shape: f32[2,8], index: 2, kind: input, shape index: {}]   ;;  %s14273_s3 = inlined_call_operand.vmem [shape: f32[2,8], index: 3, kind: input, shape index: {}]   ;;  %s14274_s4 = inlined_call_operand.vmem [shape: f32[2,8], index: 4, kind: input, shape index: {}]   ;;  %s14275_s5 = inlined_call_operand.vmem [shape: bf16[2,8,32], index: 5, kind: input, shape index: {}]   ;;  %s14276_s6 = inlined_call_operand.vmem [shape: f32[2,32], index: 6, kind: input, shape index: {}]   ;;  %s14277_s7 = inlined_call_operand.vmem [shape: bf16[2,32,8], index: 7, kind: input, shape index: {}]   ;;  %s14278_s8 = inlined_call_operand.vmem [shape: f32[2,8], index: 8, kind: input, shape index: {}]   ;;  %s14279_s9 = inlined_call_operand.vmem [shape: f32[2,8], index: 9, kind: input, shape index: {}]   ;;  %s14280_s10 = inlined_call_operand.vmem [shape: f32[2,8,8,8], index: 10, kind: output, shape index: {}]  }
   0x1 LB: > { %s8470_s14 = sadd.s32 4294967295, %s8927_s13   ;;  %p8474_p0 = scmp.ge.s32.totalorder %s8927_s13, 1  ;;  %s8927_s13 = sphi %s8986_s13, %s20_s13  }
   0x2   : > { %p312_p1 = scmp.lt.s32.totalorder %s8927_s13, 3 }
   0x4   : > { %p313_p2 = pnand %p8474_p0, %p312_p1 }
   0x6   : > { %316 = sbr.rel (%p313_p2) target bundleno = 2867 (0xb33), region = 60 }
   0xd   : > { %p8996_p3 = scmp.lt.s32.totalorder %s8470_s14, 1  ;;  %vm361_vm0 = vcmask 64512   ;;  %vm363_vm1 = vcmask 62464   ;;  %v14281_v0 = vmov 0.125   ;;  %v8930_v1 = vmov 0.0   ;;  %v9040_v3 = vld [vmem:[%s14271_s1] sm:$0xff] }
   0xe   : > { %8619 = vmatprep.subr.mxu0 %v14281_v0  ;;  %362 = vst.msk [vmem:[#allocation2] sm:$0xff] %vm361_vm0, %v8930_v1  ;;  %365 = vst.msk [vmem:[#allocation2 + $0x10] sm:$0xff] %vm361_vm0, %v8930_v1  ;;  %v498_v2 = vlaneseq  ;;  %8633 = vmatprep.subr.mxu1 %v14281_v0  ;;  %v9046_v4 = vld [vmem:[%s14271_s1 + $0x8] sm:$0xff]  ;;  %v9051_v5 = vld [vmem:[%s14271_s1 + $0x10] sm:$0xff]  ;;  %vm674_vm2 = vcmask 1046528   ;;  %vm1207_vm3 = vcmask 1045504  }
   0xf   : > { %364 = vst.msk [vmem:[#allocation2 + $0x8] sm:$0x3f] %vm363_vm1, %v8930_v1  ;;  %366 = vst.msk [vmem:[#allocation2 + $0x18] sm:$0x3f] %vm363_vm1, %v8930_v1  ;;  %8620 = vmatpush3.msra.mxu0 %v14281_v0  ;;  %s15344_s14 = smov (!%p8996_p3, %s8470_s14), 1  ;;  %8634 = vmatpush3.msra.mxu1 %v14281_v0  ;;  %v9056_v6 = vld [vmem:[%s14271_s1 + $0x18] sm:$0xff] }
  0x10   : > { %367 = vst.msk [vmem:[#allocation2 + $0x20] sm:$0xff] %vm361_vm0, %v8930_v1  ;;  %369 = vst.msk [vmem:[#allocation2 + $0x30] sm:$0xff] %vm361_vm0, %v8930_v1  ;;  %v499_v7 = vshrl.u32 %v498_v2, 7  ;;  %s8559_s24 = sshll.u32 %s15344_s14, 6  ;;  %v9062_v8 = vld [vmem:[%s14271_s1 + $0x20] sm:$0xff]  ;;  %v9067_v9 = vld [vmem:[%s14271_s1 + $0x28] sm:$0xff] }
  0x11   : > { %368 = vst.msk [vmem:[#allocation2 + $0x28] sm:$0x3f] %vm363_vm1, %v8930_v1  ;;  %370 = vst.msk [vmem:[#allocation2 + $0x38] sm:$0x3f] %vm363_vm1, %v8930_v1  ;;  %s354_s11 = scalar_lea.vmem %s14270_s0, %s8559_s24  ;;  %v9085_v17 = vld [vmem:[%s14272_s2] ss:$0 sm:$0xff]  ;;  %s14224_s18 = scalar_lea.vmem %s14280_s10, %s8559_s24 }
  0x12   : > { %371 = vst.msk [vmem:[#allocation2 + $0x40] sm:$0xff] %vm361_vm0, %v8930_v1  ;;  %373 = vst.msk [vmem:[#allocation2 + $0x50] sm:$0xff] %vm361_vm0, %v8930_v1  ;;  %v9074_v10 = vsub.s32 0, %v499_v7  ;;  %v9076_v11 = vsub.s32 7, %v499_v7  ;;  %v9078_v12 = vsub.s32 6, %v499_v7  ;;  %v9080_v13 = vsub.s32 5, %v499_v7 }
  0x13   : > { %372 = vst.msk [vmem:[#allocation2 + $0x48] sm:$0x3f] %vm363_vm1, %v8930_v1  ;;  %374 = vst.msk [vmem:[#allocation2 + $0x58] sm:$0x3f] %vm363_vm1, %v8930_v1  ;;  %v391_v14 = vld [vmem:[%s354_s11] sm:$0xff]  ;;  %v392_v15 = vld [vmem:[%s354_s11 + $0x8] sm:$0xff] }
  0x14   : > { %375 = vst.msk [vmem:[#allocation2 + $0x60] sm:$0xff] %vm361_vm0, %v8930_v1  ;;  %377 = vst.msk [vmem:[#allocation2 + $0x70] sm:$0xff] %vm361_vm0, %v8930_v1  ;;  %v393_v16 = vld [vmem:[%s354_s11 + $0x10] sm:$0xff]  ;;  %v9087_v18 = vsub.s32 4, %v499_v7  ;;  %v9089_v19 = vsub.s32 3, %v499_v7  ;;  %v9091_v20 = vsub.s32 2, %v499_v7  ;;  %v9098_v24 = vrot.slane %v9040_v3, %v9074_v10 }
  0x15   : > { %376 = vst.msk [vmem:[#allocation2 + $0x68] sm:$0x3f] %vm363_vm1, %v8930_v1  ;;  %378 = vst.msk [vmem:[#allocation2 + $0x78] sm:$0x3f] %vm363_vm1, %v8930_v1  ;;  %v394_v21 = vld [vmem:[%s354_s11 + $0x18] sm:$0xff]  ;;  %v395_v22 = vld [vmem:[%s354_s11 + $0x20] sm:$0xff]  ;;  %v9102_v25 = vrot.slane %v9040_v3, %v9076_v11  ;;  %v9111_v29 = vrot.slane %v9046_v4, %v9078_v12  ;;  %v9115_v30 = vrot.slane %v9051_v5, %v9080_v13 }
  0x16   : > { %379 = vst.msk [vmem:[#allocation2 + $0x80] sm:$0xff] %vm361_vm0, %v8930_v1  ;;  %381 = vst.msk [vmem:[#allocation2 + $0x90] sm:$0xff] %vm361_vm0, %v8930_v1  ;;  %v396_v23 = vld [vmem:[%s354_s11 + $0x28] sm:$0xff]  ;;  %v397_v26 = vld [vmem:[%s354_s11 + $0x30] sm:$0xff]  ;;  %v9119_v31 = vrot.slane %v9056_v6, %v9087_v18  ;;  %v9121_v32 = vsub.s32 1, %v499_v7  ;;  %v9133_v36 = vrot.slane %v9062_v8, %v9089_v19  ;;  %v9137_v37 = vrot.slane %v9067_v9, %v9091_v20 }
  0x17   : > { %380 = vst.msk [vmem:[#allocation2 + $0x88] sm:$0x3f] %vm363_vm1, %v8930_v1  ;;  %382 = vst.msk [vmem:[#allocation2 + $0x98] sm:$0x3f] %vm363_vm1, %v8930_v1  ;;  %v398_v27 = vld [vmem:[%s354_s11 + $0x38] sm:$0xff]  ;;  %v9107_v28 = vld [vmem:[#allocation2] sm:$0xff]  ;;  %v9141_v38 = vrot.slane %v9046_v4, %v9074_v10  ;;  %v9157_v45 = vrot.slane %v9046_v4, %v9076_v11  ;;  %v9166_v49 = vrot.slane %v9051_v5, %v9078_v12 }
  0x18   : > { %383 = vst.msk [vmem:[#allocation2 + $0xa0] sm:$0xff] %vm361_vm0, %v8930_v1  ;;  %385 = vst.msk [vmem:[#allocation2 + $0xb0] sm:$0xff] %vm361_vm0, %v8930_v1  ;;  %v9125_v33 = vld [vmem:[#allocation2 + $0x8] sm:$0x3f]  ;;  %v9127_v34 = vld [vmem:[#allocation2 + $0x10] sm:$0xff]  ;;  %v502_v35 = vmul.f32 %v9098_v24, %v9107_v28  ;;  %v9153_v44 = vrot.slane %v9040_v3, %v9121_v32  ;;  %v9177_v53 = vrot.slane %v9056_v6, %v9080_v13  ;;  %vm452_vm4 = vcmask 1044480  }
  0x19   : > { %384 = vst.msk [vmem:[#allocation2 + $0xa8] sm:$0x3f] %vm363_vm1, %v8930_v1  ;;  %386 = vst.msk [vmem:[#allocation2 + $0xb8] sm:$0x3f] %vm363_vm1, %v8930_v1  ;;  %v9143_v39 = vld [vmem:[#allocation2 + $0x18] sm:$0x3f]  ;;  %v503_v42 = vmul.f32 %v9098_v24, %v9127_v34  ;;  %v522_v43 = vmul.f32 %v9102_v25, %v9127_v34 }
  0x1a   : > { %387 = vst.msk [vmem:[#allocation2 + $0xc0] sm:$0xff] %vm361_vm0, %v8930_v1  ;;  %389 = vst.msk [vmem:[#allocation2 + $0xd0] sm:$0xff] %vm361_vm0, %v8930_v1  ;;  %v9145_v40 = vld [vmem:[#allocation2 + $0x20] sm:$0xff]  ;;  %v510_v47 = vadd.f32 %v9085_v17, %v502_v35  ;;  %v9173_v52 = vmul.f32 %v9153_v44, %v9107_v28  ;;  %v9192_v61 = vmul.f32 %v9153_v44, %v9125_v33  ;;  %vm2272_vm5 = vcmask 1043456  }
  0x1b   : > { %388 = vst.msk [vmem:[#allocation2 + $0xc8] sm:$0x3f] %vm363_vm1, %v8930_v1  ;;  %390 = vst.msk [vmem:[#allocation2 + $0xd8] sm:$0x3f] %vm363_vm1, %v8930_v1  ;;  %v504_v46 = vmul.f32 %v9098_v24, %v9145_v40  ;;  %v523_v48 = vmul.f32 %v9102_v25, %v9145_v40  ;;  %v511_v50 = vadd.f32 %v9085_v17, %v503_v42  ;;  %vm2805_vm6 = vcmask 1042432  }
  0x1c   : > { %14744 = vst [vmem:[#allocation3_spill] sm:$0xff] %v9056_v6  ;;  %14745 = vst [vmem:[#allocation4_spill] sm:$0xff] %v9074_v10  ;;  %v542_v51 = vmul.f32 %v9111_v29, %v9145_v40  ;;  %v530_v55 = vadd.f32 %v522_v43, %v510_v47  ;;  %v9196_v62 = vmul.f32 %v9153_v44, %v9143_v39  ;;  %vm3338_vm7 = vcmask 1041408  }
  0x1d   : > { %14746 = vst [vmem:[#allocation5_spill] sm:$0xff] %v9076_v11  ;;  %14747 = vst [vmem:[#allocation6_spill] sm:$0xff] %v9078_v12  ;;  %v512_v54 = vadd.f32 %v9085_v17, %v504_v46  ;;  %v531_v60 = vadd.f32 %v523_v48, %v511_v50  ;;  %vm4307_vm8 = vcmask 261120  }
  0x1e   : > { %14748 = vst [vmem:[#allocation7_spill] sm:$0xff] %v9080_v13  ;;  %14749 = vst [vmem:[#allocation8_spill] sm:$0xff] %v9087_v18  ;;  %v550_v13 = vadd.f32 %v542_v51, %v530_v55 }
  0x1f   : > { %14750 = vst [vmem:[#allocation9_spill] sm:$0xff] %v9089_v19  ;;  %14751 = vst [vmem:[#allocation10_spill] sm:$0xff] %v9091_v20  ;;  %v430_v41 = vld [vmem:[#allocation2 + $0xb0] sm:$0xff] }
  0x20   : > { %400 = vst.msk [vmem:[#allocation2 + $0x33] sm:$0xff] %vm361_vm0, %v391_v14  ;;  %401 = vst.msk [vmem:[#allocation2 + $0x43] sm:$0xff] %vm361_vm0, %v392_v15  ;;  %v9181_v56 = vmul.f32 %v9133_v36, %v430_v41  ;;  %v9184_v57 = vmul.f32 %v9137_v37, %v430_v41 }
  0x21   : > { %402 = vst.msk [vmem:[#allocation2 + $0x53] sm:$0xff] %vm361_vm0, %v393_v16  ;;  %14752 = vst [vmem:[#allocation11_spill] sm:$0xff] %v9098_v24 }
  0x22   : > { %14753 = vst [vmem:[#allocation12_spill] sm:$0xff] %v9102_v25  ;;  %403 = vst.msk [vmem:[#allocation2 + $0x63] sm:$0xff] %vm361_vm0, %v394_v21 }
  0x23   : > { %404 = vst.msk [vmem:[#allocation2 + $0x73] sm:$0xff] %vm361_vm0, %v395_v22  ;;  %405 = vst.msk [vmem:[#allocation2 + $0x83] sm:$0xff] %vm361_vm0, %v396_v23 }
  0x24   : > { %14754 = vst [vmem:[#allocation13_spill] sm:$0xff] %v9111_v29  ;;  %14755 = vst [vmem:[#allocation14_spill] sm:$0xff] %v9115_v30 }
  0x25   : > { %14756 = vst [vmem:[#allocation15_spill] sm:$0xff] %v9119_v31  ;;  %14757 = vst [vmem:[#allocation16_spill] sm:$0xff] %v9121_v32 }
  0x26   : > { %406 = vst.msk [vmem:[#allocation2 + $0x93] sm:$0xff] %vm361_vm0, %v397_v26  ;;  %407 = vst.msk [vmem:[#allocation2 + $0xa3] sm:$0xff] %vm361_vm0, %v398_v27 }
  0x27   : > { %14758 = vst [vmem:[#allocation17_spill] sm:$0xff] %v9133_v36  ;;  %14759 = vst [vmem:[#allocation18_spill] sm:$0xff] %v9137_v37  ;;  %v9186_v58 = vld [vmem:[#allocation2 + $0x30] sm:$0xff]  ;;  %v9188_v59 = vld [vmem:[#allocation2 + $0x40] sm:$0xff] }
  0x28   : > { %14760 = vst [vmem:[#allocation19_spill] sm:$0xff] %v9141_v38  ;;  %14761 = vst [vmem:[#allocation20_spill] sm:$0xff] %v9153_v44  ;;  %v9199_v1 = vld [vmem:[#allocation2 + $0x50] sm:$0xff]  ;;  %v505_v2 = vmul.f32 %v9098_v24, %v9186_v58  ;;  %v506_v7 = vmul.f32 %v9098_v24, %v9188_v59  ;;  %v524_v14 = vmul.f32 %v9102_v25, %v9186_v58 }
  0x29   : > { %14762 = vst [vmem:[#allocation21_spill] sm:$0xff] %v9157_v45  ;;  %14763 = vst [vmem:[#allocation22_spill] sm:$0xff] %v9166_v49  ;;  %v525_v15 = vmul.f32 %v9102_v25, %v9188_v59  ;;  %v9209_v16 = vld [vmem:[#allocation2 + $0x60] sm:$0xff]  ;;  %v507_v22 = vmul.f32 %v9098_v24, %v9199_v1  ;;  %v526_v23 = vmul.f32 %v9102_v25, %v9199_v1 }
  0x2a   : > { %14764 = vst [vmem:[#allocation23_spill] sm:$0xff] %v9177_v53  ;;  %14765 = vst [vmem:[#allocation24_spill] sm:$0xff] %v9181_v56  ;;  %v9211_v21 = vld [vmem:[#allocation2 + $0x70] sm:$0xff]  ;;  %v543_v26 = vmul.f32 %v9111_v29, %v9186_v58  ;;  %v544_v27 = vmul.f32 %v9111_v29, %v9188_v59  ;;  %v9221_v35 = vld [vmem:[#allocation2 + $0x80] sm:$0xff]  ;;  %v508_v41 = vmul.f32 %v9098_v24, %v9209_v16 }
  0x2b   : > { %v513_v42 = vadd.f32 %v9085_v17, %v505_v2  ;;  %v514_v43 = vadd.f32 %v9085_v17, %v506_v7  ;;  %v527_v46 = vmul.f32 %v9102_v25, %v9209_v16  ;;  %v515_v47 = vadd.f32 %v9085_v17, %v507_v22 }
  0x2c   : > { %v528_v48 = vmul.f32 %v9102_v25, %v9211_v21  ;;  %v532_v50 = vadd.f32 %v524_v14, %v512_v54  ;;  %v545_v0 = vmul.f32 %v9111_v29, %v9199_v1  ;;  %v516_v63 = vadd.f32 %v9085_v17, %v508_v41 }
  0x2d   : > { %v533_v56 = vadd.f32 %v525_v15, %v513_v42  ;;  %v534_v24 = vadd.f32 %v526_v23, %v514_v43  ;;  %v546_v2 = vmul.f32 %v9111_v29, %v9209_v16  ;;  %v535_v7 = vadd.f32 %v527_v46, %v515_v47  ;;  %v426_v25 = vld [vmem:[#allocation2 + $0x90] sm:$0xff] }
  0x2e   : > { %v547_v44 = vmul.f32 %v9111_v29, %v9211_v21  ;;  %v548_v22 = vmul.f32 %v9111_v29, %v9221_v35  ;;  %v536_v54 = vadd.f32 %v528_v48, %v516_v63  ;;  %v551_v14 = vadd.f32 %v543_v26, %v531_v60  ;;  %v428_v60 = vld [vmem:[#allocation2 + $0xa0] sm:$0xff] }
  0x2f   : > { %v552_v6 = vadd.f32 %v544_v27, %v532_v50  ;;  %v553_v12 = vadd.f32 %v545_v0, %v533_v56  ;;  %v554_v11 = vadd.f32 %v546_v2, %v534_v24  ;;  %v562_v15 = vmul.f32 %v9115_v30, %v9186_v58 }
  0x30   : > { %v555_v17 = vadd.f32 %v547_v44, %v535_v7  ;;  %v563_v23 = vmul.f32 %v9115_v30, %v9188_v59  ;;  %v556_v41 = vadd.f32 %v548_v22, %v536_v54  ;;  %v564_v42 = vmul.f32 %v9115_v30, %v9199_v1 }
  0x31   : > { %v565_v51 = vmul.f32 %v9115_v30, %v9209_v16  ;;  %v566_v55 = vmul.f32 %v9115_v30, %v9211_v21  ;;  %v567_v0 = vmul.f32 %v9115_v30, %v9221_v35  ;;  %v568_v24 = vmul.f32 %v9115_v30, %v426_v25 }
  0x32   : > { %v570_v44 = vadd.f32 %v562_v15, %v550_v13  ;;  %v571_v56 = vadd.f32 %v563_v23, %v551_v14  ;;  %v572_v63 = vadd.f32 %v564_v42, %v552_v6  ;;  %v582_v43 = vmul.f32 %v9119_v31, %v9188_v59 }
  0x33   : > { %v573_v26 = vadd.f32 %v565_v51, %v553_v12  ;;  %v574_v27 = vadd.f32 %v566_v55, %v554_v11  ;;  %v575_v46 = vadd.f32 %v567_v0, %v555_v17  ;;  %v576_v47 = vadd.f32 %v568_v24, %v556_v41 }
  0x34   : > { %v583_v48 = vmul.f32 %v9119_v31, %v9199_v1  ;;  %v584_v50 = vmul.f32 %v9119_v31, %v9209_v16  ;;  %v585_v2 = vmul.f32 %v9119_v31, %v9211_v21  ;;  %v586_v6 = vmul.f32 %v9119_v31, %v9221_v35 }
  0x35   : > { %v587_v11 = vmul.f32 %v9119_v31, %v426_v25  ;;  %v588_v12 = vmul.f32 %v9119_v31, %v428_v60  ;;  %v590_v13 = vadd.f32 %v582_v43, %v570_v44  ;;  %v602_v54 = vmul.f32 %v9133_v36, %v9199_v1 }
  0x36   : > { %v591_v7 = vadd.f32 %v583_v48, %v571_v56  ;;  %v592_v22 = vadd.f32 %v584_v50, %v572_v63  ;;  %v593_v14 = vadd.f32 %v585_v2, %v573_v26  ;;  %v594_v17 = vadd.f32 %v586_v6, %v574_v27  ;;  %v9289_v6 = vld [vmem:[#allocation2 + $0x28] sm:$0x3f] }
  0x37   : > { %v595_v15 = vadd.f32 %v587_v11, %v575_v46  ;;  %v719_v23 = vmul.f32 %v9141_v38, %v9127_v34  ;;  %v603_v41 = vmul.f32 %v9133_v36, %v9209_v16  ;;  %v604_v42 = vmul.f32 %v9133_v36, %v9211_v21 }
  0x38   : > { %v605_v51 = vmul.f32 %v9133_v36, %v9221_v35  ;;  %v606_v55 = vmul.f32 %v9133_v36, %v426_v25  ;;  %v607_v0 = vmul.f32 %v9133_v36, %v428_v60  ;;  %v610_v24 = vadd.f32 %v602_v54, %v590_v13 }
  0x39   : > { %v622_v44 = vmul.f32 %v9137_v37, %v9209_v16  ;;  %v720_v56 = vmul.f32 %v9141_v38, %v9143_v39  ;;  %v9282_v63 = vadd.f32 %v588_v12, %v576_v47  ;;  %v611_v26 = vadd.f32 %v603_v41, %v591_v7  ;;  %v9297_v7 = vld [vmem:[#allocation2 + $0x38] sm:$0x3f] }
  0x3a   : > { %v612_v27 = vadd.f32 %v604_v42, %v592_v22  ;;  %v613_v43 = vadd.f32 %v605_v51, %v593_v14  ;;  %v615_v46 = vadd.f32 %v607_v0, %v595_v15  ;;  %v623_v48 = vmul.f32 %v9137_v37, %v9211_v21  ;;  %v9299_v22 = vld [vmem:[#allocation2 + $0x48] sm:$0x3f] }
  0x3b   : > { %14766 = vst [vmem:[#allocation25_spill] sm:$0xff] %v9282_v63  ;;  %v624_v50 = vmul.f32 %v9137_v37, %v9221_v35  ;;  %v625_v2 = vmul.f32 %v9137_v37, %v426_v25  ;;  %v9291_v11 = vadd.f32 %v606_v55, %v594_v17  ;;  %v9294_v13 = vmul.f32 %v9137_v37, %v428_v60 }
  0x3c   : > { %v630_v47 = vadd.f32 %v622_v44, %v610_v24  ;;  %v676_v12 = vrot.slane %v9192_v61, 1  ;;  %v9301_v54 = vadd.f32 %v623_v48, %v611_v26  ;;  %v9309_v17 = vadd.f32 %v9184_v57, %v615_v46  ;;  %v9327_v44 = vld [vmem:[#allocation2 + $0x58] sm:$0x3f]  ;;  %v9329_v46 = vld [vmem:[#allocation2 + $0x68] sm:$0x3f] }
  0x3d   : > { %14767 = vst [vmem:[#allocation26_spill] sm:$0xff] %v9291_v11  ;;  %14768 = vst [vmem:[#allocation27_spill] sm:$0xff] %v9294_v13  ;;  %v9303_v14 = vadd.f32 %v624_v50, %v612_v27  ;;  %v9305_v35 = vadd.f32 %v625_v2, %v613_v43  ;;  %v14772_v60 = vrot.slane %v9173_v52, 1  ;;  %v751_v61 = vrot.slane %v719_v23, 1 }
  0x3e   : > { %14771 = vst [vmem:[#allocation30_spill] sm:$0xff] %v9309_v17  ;;  %v752_v41 = vrot.slane %v720_v56, 1  ;;  %v795_v51 = vmul.f32 %v9157_v45, %v9145_v40  ;;  %v796_v55 = vmul.f32 %v9157_v45, %v9289_v6  ;;  %v871_v0 = vmul.f32 %v9166_v49, %v9186_v58 }
  0x3f   : > { %14769 = vst [vmem:[#allocation28_spill] sm:$0xff] %v9303_v14  ;;  %14770 = vst [vmem:[#allocation29_spill] sm:$0xff] %v9305_v35  ;;  %v677_v15 = vsel %vm674_vm2, %v14772_v60, %v676_v12  ;;  %v872_v52 = vmul.f32 %v9166_v49, %v9297_v7  ;;  %v947_v23 = vmul.f32 %v9177_v53, %v9188_v59  ;;  %v14780_v14 = vld [vmem:[#allocation7_spill] sm:$0xff] }
  0x40   : > { %v707_v42 = vadd.f32 %v677_v15, %v630_v47  ;;  %v753_v57 = vsel %vm674_vm2, %v751_v61, %v752_v41  ;;  %v948_v24 = vmul.f32 %v9177_v53, %v9299_v22  ;;  %v827_v26 = vrot.slane %v795_v51, 1 }
  0x41   : > { %v828_v27 = vrot.slane %v796_v55, 1  ;;  %v903_v43 = vrot.slane %v871_v0, 1  ;;  %v904_v48 = vrot.slane %v872_v52, 1  ;;  %v979_v50 = vrot.slane %v947_v23, 1 }
  0x42   : > { %v783_v56 = vadd.f32 %v753_v57, %v707_v42  ;;  %v980_v2 = vrot.slane %v948_v24, 1  ;;  %v9333_v47 = vrot.slane %v9062_v8, %v9087_v18  ;;  %v9338_v60 = vrot.slane %v9067_v9, %v9089_v19 }
  0x43   : > { %v829_v12 = vsel %vm674_vm2, %v827_v26, %v828_v27  ;;  %v9342_v15 = vrot.slane %v9040_v3, %v9091_v20  ;;  %v9346_v61 = vrot.slane %v9046_v4, %v9121_v32  ;;  %v905_v42 = vsel %vm674_vm2, %v903_v43, %v904_v48 }
  0x44   : > { %v859_v41 = vadd.f32 %v829_v12, %v783_v56  ;;  %v981_v51 = vsel %vm674_vm2, %v979_v50, %v980_v2  ;;  %v1023_v55 = vmul.f32 %v9333_v47, %v9199_v1  ;;  %v1024_v0 = vmul.f32 %v9333_v47, %v9327_v44 }
  0x45   : > { %14773 = vst [vmem:[#allocation31_spill] sm:$0xff] %v9346_v61  ;;  %v1099_v57 = vmul.f32 %v9338_v60, %v9209_v16  ;;  %v1100_v52 = vmul.f32 %v9338_v60, %v9329_v46  ;;  %v1175_v23 = vmul.f32 %v9342_v15, %v9107_v28  ;;  %v1176_v26 = vmul.f32 %v9342_v15, %v9125_v33 }
  0x46   : > { %v935_v24 = vadd.f32 %v905_v42, %v859_v41  ;;  %v1055_v56 = vrot.slane %v1023_v55, 1  ;;  %v1252_v27 = vmul.f32 %v9346_v61, %v9127_v34  ;;  %v1056_v43 = vrot.slane %v1024_v0, 1  ;;  %v14775_v55 = vld [vmem:[#allocation5_spill] sm:$0xff] }
  0x47   : > { %v1131_v48 = vrot.slane %v1099_v57, 1  ;;  %v1132_v50 = vrot.slane %v1100_v52, 1  ;;  %v1208_v2 = vrot.slane %v1175_v23, 2  ;;  %v1209_v25 = vrot.slane %v1176_v26, 2  ;;  %v14777_v23 = vld [vmem:[#allocation6_spill] sm:$0xff] }
  0x48   : > { %v1011_v12 = vadd.f32 %v981_v51, %v935_v24  ;;  %v1253_v36 = vmul.f32 %v9346_v61, %v9143_v39  ;;  %v1284_v31 = vrot.slane %v1252_v27, 2  ;;  %v1057_v30 = vsel %vm674_vm2, %v1055_v56, %v1056_v43  ;;  %v14778_v24 = vld [vmem:[#allocation3_spill] sm:$0xff] }
  0x49   : > { %v1133_v41 = vsel %vm674_vm2, %v1131_v48, %v1132_v50  ;;  %v9370_v42 = vrot.slane %v9051_v5, %v9074_v10  ;;  %v9374_v0 = vrot.slane %v9051_v5, %v14775_v55  ;;  %v1210_v51 = vsel %vm1207_vm3, %v1208_v2, %v1209_v25 }
  0x4a   : > { %v1087_v57 = vadd.f32 %v1057_v30, %v1011_v12  ;;  %v1285_v52 = vrot.slane %v1253_v36, 2  ;;  %v9379_v26 = vrot.slane %v14778_v24, %v14777_v23  ;;  %v9396_v13 = vrot.slane %v9062_v8, %v14780_v14 }
  0x4b   : > { %14774 = vst [vmem:[#allocation32_spill] sm:$0xff] %v9370_v42  ;;  %14776 = vst [vmem:[#allocation33_spill] sm:$0xff] %v9374_v0  ;;  %v1328_v56 = vmul.f32 %v9370_v42, %v9145_v40  ;;  %v1329_v27 = vmul.f32 %v9370_v42, %v9289_v6  ;;  %v1404_v43 = vmul.f32 %v9374_v0, %v9186_v58 }
  0x4c   : > { %14779 = vst [vmem:[#allocation3_spill] sm:$0xff] %v9379_v26  ;;  %v1405_v48 = vmul.f32 %v9374_v0, %v9297_v7  ;;  %v1163_v30 = vadd.f32 %v1133_v41, %v1087_v57  ;;  %v1286_v25 = vsel %vm1207_vm3, %v1284_v31, %v1285_v52  ;;  %v1480_v36 = vmul.f32 %v9379_v26, %v9188_v59 }
  0x4d   : > { %v1481_v50 = vmul.f32 %v9379_v26, %v9299_v22  ;;  %v1360_v2 = vrot.slane %v1328_v56, 2  ;;  %v1361_v12 = vrot.slane %v1329_v27, 2  ;;  %v1436_v29 = vrot.slane %v1404_v43, 2  ;;  %14781 = vst [vmem:[#allocation34_spill] sm:$0xff] %v9396_v13 }
  0x4e   : > { %v1437_v37 = vrot.slane %v1405_v48, 2  ;;  %v1240_v63 = vadd.f32 %v1210_v51, %v1163_v30  ;;  %v1512_v17 = vrot.slane %v1480_v36, 2  ;;  %v9402_v57 = vrot.slane %v9067_v9, %v9087_v18 }
  0x4f   : > { %v1513_v35 = vrot.slane %v1481_v50, 2  ;;  %v1362_v41 = vsel %vm1207_vm3, %v1360_v2, %v1361_v12  ;;  %v9406_v52 = vrot.slane %v9040_v3, %v9089_v19  ;;  %v1556_v27 = vmul.f32 %v9396_v13, %v9199_v1 }
  0x50   : > { %v1438_v31 = vsel %vm1207_vm3, %v1436_v29, %v1437_v37  ;;  %14782 = vst [vmem:[#allocation35_spill] sm:$0xff] %v9402_v57  ;;  %v1316_v56 = vadd.f32 %v1286_v25, %v1240_v63  ;;  %v1557_v43 = vmul.f32 %v9396_v13, %v9327_v44  ;;  %v1632_v29 = vmul.f32 %v9402_v57, %v9209_v16 }
  0x51   : > { %14783 = vst [vmem:[#allocation36_spill] sm:$0xff] %v9406_v52  ;;  %v1514_v51 = vsel %vm1207_vm3, %v1512_v17, %v1513_v35  ;;  %v1633_v37 = vmul.f32 %v9402_v57, %v9329_v46  ;;  %v1708_v48 = vmul.f32 %v9406_v52, %v9107_v28  ;;  %v1709_v63 = vmul.f32 %v9406_v52, %v9125_v33 }
  0x52   : > { %v1392_v30 = vadd.f32 %v1362_v41, %v1316_v56  ;;  %v1588_v35 = vrot.slane %v1556_v27, 2  ;;  %v1589_v17 = vrot.slane %v1557_v43, 2  ;;  %v9423_v25 = vrot.slane %v9046_v4, %v9091_v20 }
  0x53   : > { %v1664_v36 = vrot.slane %v1632_v29, 2  ;;  %v1665_v50 = vrot.slane %v1633_v37, 2  ;;  %v1740_v2 = vrot.slane %v1708_v48, 3  ;;  %v1741_v12 = vrot.slane %v1709_v63, 3 }
  0x54   : > { %14784 = vst [vmem:[#allocation37_spill] sm:$0xff] %v9423_v25  ;;  %v1468_v13 = vadd.f32 %v1438_v31, %v1392_v30  ;;  %v1590_v57 = vsel %vm1207_vm3, %v1588_v35, %v1589_v17  ;;  %v1784_v26 = vmul.f32 %v9423_v25, %v9127_v34  ;;  %v1785_v52 = vmul.f32 %v9423_v25, %v9143_v39 }
  0x55   : > { %v1666_v41 = vsel %vm1207_vm3, %v1664_v36, %v1665_v50  ;;  %v1742_v56 = vsel %vm452_vm4, %v1740_v2, %v1741_v12  ;;  %v9434_v27 = vrot.slane %v9051_v5, %v9121_v32  ;;  %v9438_v43 = vrot.slane %v14778_v24, %v9074_v10 }
  0x56   : > { %v1544_v31 = vadd.f32 %v1514_v51, %v1468_v13  ;;  %v1816_v29 = vrot.slane %v1784_v26, 3  ;;  %v1817_v37 = vrot.slane %v1785_v52, 3  ;;  %v9442_v48 = vrot.slane %v14778_v24, %v14775_v55 }
  0x57   : > { %14785 = vst [vmem:[#allocation38_spill] sm:$0xff] %v9434_v27  ;;  %14786 = vst [vmem:[#allocation39_spill] sm:$0xff] %v9438_v43  ;;  %v1860_v63 = vmul.f32 %v9434_v27, %v9145_v40  ;;  %v1861_v30 = vmul.f32 %v9434_v27, %v9289_v6  ;;  %v1936_v35 = vmul.f32 %v9438_v43, %v9186_v58 }
  0x58   : > { %14787 = vst [vmem:[#allocation40_spill] sm:$0xff] %v9442_v48  ;;  %v1937_v17 = vmul.f32 %v9438_v43, %v9297_v7  ;;  %v1620_v13 = vadd.f32 %v1590_v57, %v1544_v31  ;;  %v1818_v26 = vsel %vm452_vm4, %v1816_v29, %v1817_v37  ;;  %v2012_v52 = vmul.f32 %v9442_v48, %v9188_v59 }
  0x59   : > { %v2013_v51 = vmul.f32 %v9442_v48, %v9299_v22  ;;  %v1892_v36 = vrot.slane %v1860_v63, 3  ;;  %v1893_v50 = vrot.slane %v1861_v30, 3  ;;  %v1968_v2 = vrot.slane %v1936_v35, 3 }
  0x5a   : > { %v1969_v12 = vrot.slane %v1937_v17, 3  ;;  %v1696_v27 = vadd.f32 %v1666_v41, %v1620_v13  ;;  %v2044_v25 = vrot.slane %v2012_v52, 3  ;;  %v9459_v0 = vrot.slane %v9062_v8, %v14777_v23 }
  0x5b   : > { %v2045_v11 = vrot.slane %v2013_v51, 3  ;;  %v1894_v57 = vsel %vm452_vm4, %v1892_v36, %v1893_v50  ;;  %v9465_v29 = vrot.slane %v9067_v9, %v14780_v14  ;;  %v9469_v37 = vrot.slane %v9040_v3, %v9087_v18 }
  0x5c   : > { %14788 = vst [vmem:[#allocation41_spill] sm:$0xff] %v9459_v0  ;;  %v1970_v31 = vsel %vm452_vm4, %v1968_v2, %v1969_v12  ;;  %v1772_v63 = vadd.f32 %v1742_v56, %v1696_v27  ;;  %v2088_v30 = vmul.f32 %v9459_v0, %v9199_v1  ;;  %v2089_v35 = vmul.f32 %v9459_v0, %v9327_v44 }
  0x5d   : > { %14789 = vst [vmem:[#allocation42_spill] sm:$0xff] %v9465_v29  ;;  %14790 = vst [vmem:[#allocation43_spill] sm:$0xff] %v9469_v37  ;;  %v2046_v41 = vsel %vm452_vm4, %v2044_v25, %v2045_v11  ;;  %v2164_v17 = vmul.f32 %v9465_v29, %v9209_v16  ;;  %v2165_v13 = vmul.f32 %v9465_v29, %v9329_v46 }
  0x5e   : > { %v2240_v52 = vmul.f32 %v9469_v37, %v9107_v28  ;;  %v2241_v56 = vmul.f32 %v9469_v37, %v9125_v33  ;;  %v1848_v27 = vadd.f32 %v1818_v26, %v1772_v63  ;;  %v2120_v11 = vrot.slane %v2088_v30, 3 }
  0x5f   : > { %v2121_v25 = vrot.slane %v2089_v35, 3  ;;  %v9486_v51 = vrot.slane %v9046_v4, %v9089_v19  ;;  %v2196_v36 = vrot.slane %v2164_v17, 3  ;;  %v2197_v50 = vrot.slane %v2165_v13, 3 }
  0x60   : > { %v2273_v2 = vrot.slane %v2240_v52, 4  ;;  %v2274_v12 = vrot.slane %v2241_v56, 4  ;;  %v1924_v0 = vadd.f32 %v1894_v57, %v1848_v27  ;;  %v9497_v30 = vrot.slane %v9051_v5, %v9091_v20 }
  0x61   : > { %14791 = vst [vmem:[#allocation44_spill] sm:$0xff] %v9486_v51  ;;  %v2122_v29 = vsel %vm452_vm4, %v2120_v11, %v2121_v25  ;;  %v2317_v48 = vmul.f32 %v9486_v51, %v9127_v34  ;;  %v2318_v37 = vmul.f32 %v9486_v51, %v9143_v39  ;;  %v2198_v26 = vsel %vm452_vm4, %v2196_v36, %v2197_v50 }
  0x62   : > { %v2275_v63 = vsel %vm2272_vm5, %v2273_v2, %v2274_v12  ;;  %14792 = vst [vmem:[#allocation45_spill] sm:$0xff] %v9497_v30  ;;  %v9501_v35 = vrot.slane %v14778_v24, %v9121_v32  ;;  %v2000_v57 = vadd.f32 %v1970_v31, %v1924_v0  ;;  %v9505_v52 = vrot.slane %v9062_v8, %v9074_v10 }
  0x63   : > { %v2349_v17 = vrot.slane %v2317_v48, 4  ;;  %v2350_v13 = vrot.slane %v2318_v37, 4  ;;  %v2393_v56 = vmul.f32 %v9497_v30, %v9145_v40  ;;  %v2394_v27 = vmul.f32 %v9497_v30, %v9289_v6 }
  0x64   : > { %14793 = vst [vmem:[#allocation46_spill] sm:$0xff] %v9501_v35  ;;  %14794 = vst [vmem:[#allocation47_spill] sm:$0xff] %v9505_v52  ;;  %v2469_v11 = vmul.f32 %v9501_v35, %v9186_v58  ;;  %v2470_v25 = vmul.f32 %v9501_v35, %v9297_v7  ;;  %v2076_v0 = vadd.f32 %v2046_v41, %v2000_v57 }
  0x65   : > { %v2351_v48 = vsel %vm2272_vm5, %v2349_v17, %v2350_v13  ;;  %v2545_v31 = vmul.f32 %v9505_v52, %v9188_v59  ;;  %v2546_v37 = vmul.f32 %v9505_v52, %v9299_v22  ;;  %v2425_v36 = vrot.slane %v2393_v56, 4 }
  0x66   : > { %v2426_v50 = vrot.slane %v2394_v27, 4  ;;  %v2501_v2 = vrot.slane %v2469_v11, 4  ;;  %v2502_v12 = vrot.slane %v2470_v25, 4  ;;  %v2152_v30 = vadd.f32 %v2122_v29, %v2076_v0 }
  0x67   : > { %v2577_v51 = vrot.slane %v2545_v31, 4  ;;  %v2578_v43 = vrot.slane %v2546_v37, 4  ;;  %v9522_v42 = vrot.slane %v9062_v8, %v14775_v55  ;;  %v9528_v17 = vrot.slane %v9067_v9, %v14777_v23 }
  0x68   : > { %v2427_v41 = vsel %vm2272_vm5, %v2425_v36, %v2426_v50  ;;  %v2503_v57 = vsel %vm2272_vm5, %v2501_v2, %v2502_v12  ;;  %v9532_v13 = vrot.slane %v9040_v3, %v14780_v14  ;;  %v2228_v56 = vadd.f32 %v2198_v26, %v2152_v30 }
  0x69   : > { %14795 = vst [vmem:[#allocation48_spill] sm:$0xff] %v9522_v42  ;;  %14796 = vst [vmem:[#allocation49_spill] sm:$0xff] %v9528_v17  ;;  %v2579_v29 = vsel %vm2272_vm5, %v2577_v51, %v2578_v43  ;;  %v2621_v27 = vmul.f32 %v9522_v42, %v9199_v1  ;;  %v2622_v11 = vmul.f32 %v9522_v42, %v9327_v44 }
  0x6a   : > { %14797 = vst [vmem:[#allocation50_spill] sm:$0xff] %v9532_v13  ;;  %v2697_v25 = vmul.f32 %v9528_v17, %v9209_v16  ;;  %v2698_v0 = vmul.f32 %v9528_v17, %v9329_v46  ;;  %v2773_v31 = vmul.f32 %v9532_v13, %v9107_v28  ;;  %v2774_v26 = vmul.f32 %v9532_v13, %v9125_v33 }
  0x6b   : > { %v2305_v30 = vadd.f32 %v2275_v63, %v2228_v56  ;;  %v2653_v43 = vrot.slane %v2621_v27, 4  ;;  %v2654_v51 = vrot.slane %v2622_v11, 4  ;;  %v9549_v37 = vrot.slane %v9046_v4, %v9087_v18 }
  0x6c   : > { %v2729_v36 = vrot.slane %v2697_v25, 4  ;;  %v2730_v50 = vrot.slane %v2698_v0, 4  ;;  %v2806_v2 = vrot.slane %v2773_v31, 5  ;;  %v2807_v12 = vrot.slane %v2774_v26, 5 }
  0x6d   : > { %14798 = vst [vmem:[#allocation51_spill] sm:$0xff] %v9549_v37  ;;  %v2381_v42 = vadd.f32 %v2351_v48, %v2305_v30  ;;  %v2655_v17 = vsel %vm2272_vm5, %v2653_v43, %v2654_v51  ;;  %v2850_v52 = vmul.f32 %v9549_v37, %v9127_v34  ;;  %v2851_v13 = vmul.f32 %v9549_v37, %v9143_v39 }
  0x6e   : > { %v2731_v63 = vsel %vm2272_vm5, %v2729_v36, %v2730_v50  ;;  %v2808_v56 = vsel %vm2805_vm6, %v2806_v2, %v2807_v12  ;;  %v9560_v27 = vrot.slane %v9051_v5, %v9089_v19  ;;  %v9564_v11 = vrot.slane %v14778_v24, %v9091_v20 }
  0x6f   : > { %v2457_v48 = vadd.f32 %v2427_v41, %v2381_v42  ;;  %v2882_v25 = vrot.slane %v2850_v52, 5  ;;  %v2883_v0 = vrot.slane %v2851_v13, 5  ;;  %v9568_v31 = vrot.slane %v9062_v8, %v9121_v32 }
  0x70   : > { %14799 = vst [vmem:[#allocation52_spill] sm:$0xff] %v9560_v27  ;;  %14800 = vst [vmem:[#allocation53_spill] sm:$0xff] %v9564_v11  ;;  %v2926_v26 = vmul.f32 %v9560_v27, %v9145_v40  ;;  %v2927_v30 = vmul.f32 %v9560_v27, %v9289_v6  ;;  %v3002_v43 = vmul.f32 %v9564_v11, %v9186_v58 }
  0x71   : > { %14801 = vst [vmem:[#allocation54_spill] sm:$0xff] %v9568_v31  ;;  %v3003_v51 = vmul.f32 %v9564_v11, %v9297_v7  ;;  %v2533_v42 = vadd.f32 %v2503_v57, %v2457_v48  ;;  %v2884_v52 = vsel %vm2805_vm6, %v2882_v25, %v2883_v0  ;;  %v3078_v41 = vmul.f32 %v9568_v31, %v9188_v59 }
  0x72   : > { %v3079_v13 = vmul.f32 %v9568_v31, %v9299_v22  ;;  %v2958_v36 = vrot.slane %v2926_v26, 5  ;;  %v2959_v50 = vrot.slane %v2927_v30, 5  ;;  %v3034_v2 = vrot.slane %v3002_v43, 5 }
  0x73   : > { %v3035_v12 = vrot.slane %v3003_v51, 5  ;;  %v2609_v27 = vadd.f32 %v2579_v29, %v2533_v42  ;;  %v3110_v37 = vrot.slane %v3078_v41, 5  ;;  %v9585_v61 = vrot.slane %v9067_v9, %v9074_v10 }
  0x74   : > { %v3111_v35 = vrot.slane %v3079_v13, 5  ;;  %v2960_v57 = vsel %vm2805_vm6, %v2958_v36, %v2959_v50  ;;  %v9591_v25 = vrot.slane %v9067_v9, %v14775_v55  ;;  %v9595_v0 = vrot.slane %v9040_v3, %v14777_v23 }
  0x75   : > { %14802 = vst [vmem:[#allocation55_spill] sm:$0xff] %v9585_v61  ;;  %v3036_v48 = vsel %vm2805_vm6, %v3034_v2, %v3035_v12  ;;  %v2685_v26 = vadd.f32 %v2655_v17, %v2609_v27  ;;  %v3154_v30 = vmul.f32 %v9585_v61, %v9199_v1  ;;  %v3155_v43 = vmul.f32 %v9585_v61, %v9327_v44 }
  0x76   : > { %14803 = vst [vmem:[#allocation56_spill] sm:$0xff] %v9591_v25  ;;  %14804 = vst [vmem:[#allocation57_spill] sm:$0xff] %v9595_v0  ;;  %v3112_v29 = vsel %vm2805_vm6, %v3110_v37, %v3111_v35  ;;  %v3230_v51 = vmul.f32 %v9591_v25, %v9209_v16  ;;  %v3231_v42 = vmul.f32 %v9591_v25, %v9329_v46 }
  0x77   : > { %v3306_v41 = vmul.f32 %v9595_v0, %v9107_v28  ;;  %v3307_v3 = vmul.f32 %v9595_v0, %v9125_v33  ;;  %v2761_v17 = vadd.f32 %v2731_v63, %v2685_v26  ;;  %v3186_v35 = vrot.slane %v3154_v30, 5 }
  0x78   : > { %v3187_v37 = vrot.slane %v3155_v43, 5  ;;  %v9612_v27 = vrot.slane %v9046_v4, %v14780_v14  ;;  %v3262_v13 = vrot.slane %v3230_v51, 5  ;;  %v3263_v36 = vrot.slane %v3231_v42, 5 }
  0x79   : > { %v3339_v50 = vrot.slane %v3306_v41, 6  ;;  %v3340_v2 = vrot.slane %v3307_v3, 6  ;;  %v2838_v12 = vadd.f32 %v2808_v56, %v2761_v17  ;;  %v9623_v4 = vrot.slane %v9051_v5, %v9087_v18 }
  0x7a   : > { %14805 = vst [vmem:[#allocation58_spill] sm:$0xff] %v9612_v27  ;;  %v3188_v23 = vsel %vm2805_vm6, %v3186_v35, %v3187_v37  ;;  %v3383_v28 = vmul.f32 %v9612_v27, %v9127_v34  ;;  %v3384_v33 = vmul.f32 %v9612_v27, %v9143_v39  ;;  %v3264_v63 = vsel %vm2805_vm6, %v3262_v13, %v3263_v36 }
  0x7b   : > { %v3341_v26 = vsel %vm3338_vm7, %v3339_v50, %v3340_v2  ;;  %14806 = vst [vmem:[#allocation59_spill] sm:$0xff] %v9623_v4  ;;  %v9627_v30 = vrot.slane %v14778_v24, %v9089_v19  ;;  %v2914_v56 = vadd.f32 %v2884_v52, %v2838_v12  ;;  %v9631_v42 = vrot.slane %v9062_v8, %v9091_v20  ;;  %v9644_v52 = vld [vmem:[%s14271_s1 + $0x30] ss:$0 sm:$0xff] }
  0x7c   : > { %v3415_v43 = vrot.slane %v3383_v28, 6  ;;  %v3416_v51 = vrot.slane %v3384_v33, 6  ;;  %v3459_v41 = vmul.f32 %v9623_v4, %v9145_v40  ;;  %v3460_v3 = vmul.f32 %v9623_v4, %v9289_v6 }
  0x7d   : > { %14807 = vst [vmem:[#allocation60_spill] sm:$0xff] %v9627_v30  ;;  %14808 = vst [vmem:[#allocation61_spill] sm:$0xff] %v9631_v42  ;;  %v3535_v5 = vmul.f32 %v9627_v30, %v9186_v58  ;;  %v3536_v24 = vmul.f32 %v9627_v30, %v9297_v7  ;;  %v2990_v17 = vadd.f32 %v2960_v57, %v2914_v56 }
  0x7e   : > { %v3417_v8 = vsel %vm3338_vm7, %v3415_v43, %v3416_v51  ;;  %v3611_v35 = vmul.f32 %v9631_v42, %v9188_v59  ;;  %v3612_v37 = vmul.f32 %v9631_v42, %v9299_v22  ;;  %v3491_v13 = vrot.slane %v3459_v41, 6 }
  0x7f   : > { %v3492_v36 = vrot.slane %v3460_v3, 6  ;;  %v3567_v50 = vrot.slane %v3535_v5, 6  ;;  %v3568_v2 = vrot.slane %v3536_v24, 6  ;;  %v3066_v12 = vadd.f32 %v3036_v48, %v2990_v17  ;;  %v14810_v17 = vld [vmem:[#allocation20_spill] sm:$0xff] }
  0x80   : > { %v3643_v28 = vrot.slane %v3611_v35, 6  ;;  %v3644_v33 = vrot.slane %v3612_v37, 6  ;;  %v9653_v20 = vrot.slane %v9067_v9, %v9121_v32  ;;  %v3763_v43 = vmul.f32 %v9644_v52, %v9209_v16 }
  0x81   : > { %v3493_v57 = vsel %vm3338_vm7, %v3491_v13, %v3492_v36  ;;  %v3569_v56 = vsel %vm3338_vm7, %v3567_v50, %v3568_v2  ;;  %v3764_v51 = vmul.f32 %v9644_v52, %v9329_v46  ;;  %v3142_v41 = vadd.f32 %v3112_v29, %v3066_v12 }
  0x82   : > { %14809 = vst [vmem:[#allocation62_spill] sm:$0xff] %v9653_v20  ;;  %v3645_v3 = vsel %vm3338_vm7, %v3643_v28, %v3644_v33  ;;  %v3687_v48 = vmul.f32 %v9653_v20, %v9199_v1  ;;  %v3688_v9 = vmul.f32 %v9653_v20, %v9327_v44  ;;  %v3795_v5 = vrot.slane %v3763_v43, 6 }
  0x83   : > { %v3796_v24 = vrot.slane %v3764_v51, 6  ;;  %v644_v35 = vmul.f32 %v14810_v17, %v9127_v34  ;;  %v721_v37 = vmul.f32 %v9141_v38, %v9145_v40  ;;  %v3218_v13 = vadd.f32 %v3188_v23, %v3142_v41 }
  0x84   : > { %v3719_v36 = vrot.slane %v3687_v48, 6  ;;  %v3720_v50 = vrot.slane %v3688_v9, 6  ;;  %v722_v29 = vmul.f32 %v9141_v38, %v9289_v6  ;;  %v797_v33 = vmul.f32 %v9157_v45, %v9186_v58 }
  0x85   : > { %v3797_v2 = vsel %vm3338_vm7, %v3795_v5, %v3796_v24  ;;  %v678_v12 = vrot.slane %v644_v35, 1  ;;  %v754_v28 = vrot.slane %v721_v37, 1  ;;  %v3294_v43 = vadd.f32 %v3264_v63, %v3218_v13 }
  0x86   : > { %v3721_v51 = vsel %vm3338_vm7, %v3719_v36, %v3720_v50  ;;  %v755_v32 = vrot.slane %v722_v29, 1  ;;  %v798_v19 = vmul.f32 %v9157_v45, %v9297_v7  ;;  %v14811_v23 = vrot.slane %v9196_v62, 1  ;;  %v9691_v29 = vld [vmem:[#allocation2 + $0x78] sm:$0x3f] }
  0x87   : > { %v830_v48 = vrot.slane %v797_v33, 1  ;;  %v873_v9 = vmul.f32 %v9166_v49, %v9188_v59  ;;  %v874_v5 = vmul.f32 %v9166_v49, %v9299_v22  ;;  %v3371_v24 = vadd.f32 %v3341_v26, %v3294_v43 }
  0x88   : > { %v680_v41 = vsel %vm674_vm2, %v678_v12, %v14811_v23  ;;  %v756_v35 = vsel %vm674_vm2, %v754_v28, %v755_v32  ;;  %v831_v37 = vrot.slane %v798_v19, 1  ;;  %v949_v62 = vmul.f32 %v9177_v53, %v9199_v1 }
  0x89   : > { %v708_v63 = vadd.f32 %v680_v41, %v9301_v54  ;;  %v906_v13 = vrot.slane %v873_v9, 1  ;;  %v907_v36 = vrot.slane %v874_v5, 1  ;;  %v950_v50 = vmul.f32 %v9177_v53, %v9327_v44 }
  0x8a   : > { %v3447_v12 = vadd.f32 %v3417_v8, %v3371_v24  ;;  %v832_v23 = vsel %vm674_vm2, %v830_v48, %v831_v37  ;;  %v1025_v54 = vmul.f32 %v9333_v47, %v9209_v16  ;;  %v982_v19 = vrot.slane %v949_v62, 1 }
  0x8b   : > { %v784_v33 = vadd.f32 %v756_v35, %v708_v63  ;;  %v908_v32 = vsel %vm674_vm2, %v906_v13, %v907_v36  ;;  %v983_v26 = vrot.slane %v950_v50, 1  ;;  %v1026_v28 = vmul.f32 %v9333_v47, %v9329_v46 }
  0x8c   : > { %v3523_v43 = vadd.f32 %v3493_v57, %v3447_v12  ;;  %v1058_v9 = vrot.slane %v1025_v54, 1  ;;  %v1101_v5 = vmul.f32 %v9338_v60, %v9211_v21  ;;  %v1102_v48 = vmul.f32 %v9338_v60, %v9691_v29  ;;  %v14812_v12 = vld [vmem:[#allocation31_spill] sm:$0xff] }
  0x8d   : > { %v860_v41 = vadd.f32 %v832_v23, %v784_v33  ;;  %v984_v8 = vsel %vm674_vm2, %v982_v19, %v983_v26  ;;  %v1059_v24 = vrot.slane %v1026_v28, 1  ;;  %v1177_v63 = vmul.f32 %v9342_v15, %v9127_v34  ;;  %v14813_v28 = vld [vmem:[#allocation32_spill] sm:$0xff] }
  0x8e   : > { %v3599_v35 = vadd.f32 %v3569_v56, %v3523_v43  ;;  %v1134_v13 = vrot.slane %v1101_v5, 1  ;;  %v1178_v57 = vmul.f32 %v9342_v15, %v9143_v39  ;;  %v1135_v62 = vrot.slane %v1102_v48, 1 }
  0x8f   : > { %v936_v37 = vadd.f32 %v908_v32, %v860_v41  ;;  %v1060_v36 = vsel %vm674_vm2, %v1058_v9, %v1059_v24  ;;  %v1211_v50 = vrot.slane %v1177_v63, 2  ;;  %v1254_v33 = vmul.f32 %v14812_v12, %v9145_v40  ;;  %v14814_v63 = vld [vmem:[#allocation33_spill] sm:$0xff] }
  0x90   : > { %v3675_v23 = vadd.f32 %v3645_v3, %v3599_v35  ;;  %v1212_v19 = vrot.slane %v1178_v57, 2  ;;  %v1255_v26 = vmul.f32 %v14812_v12, %v9289_v6  ;;  %v1136_v56 = vsel %vm674_vm2, %v1134_v13, %v1135_v62  ;;  %v14815_v13 = vld [vmem:[#allocation26_spill] sm:$0xff]  ;;  %v14816_v57 = vld [vmem:[#allocation27_spill] sm:$0xff] }
  0x91   : > { %v1012_v54 = vadd.f32 %v984_v8, %v936_v37  ;;  %v1287_v32 = vrot.slane %v1254_v33, 2  ;;  %v1330_v43 = vmul.f32 %v14813_v28, %v9186_v58  ;;  %v1331_v41 = vmul.f32 %v14813_v28, %v9297_v7 }
  0x92   : > { %v3751_v9 = vadd.f32 %v3721_v51, %v3675_v23  ;;  %v1213_v24 = vsel %vm1207_vm3, %v1211_v50, %v1212_v19  ;;  %v1288_v48 = vrot.slane %v1255_v26, 2  ;;  %v1406_v35 = vmul.f32 %v14814_v63, %v9188_v59  ;;  %v14819_v51 = vld [vmem:[#allocation3_spill] sm:$0xff] }
  0x93   : > { %v1088_v5 = vadd.f32 %v1060_v36, %v1012_v54  ;;  %v1363_v3 = vrot.slane %v1330_v43, 2  ;;  %v1364_v8 = vrot.slane %v1331_v41, 2  ;;  %v1407_v37 = vmul.f32 %v14814_v63, %v9299_v22  ;;  %v14820_v41 = vld [vmem:[#allocation34_spill] sm:$0xff]  ;;  %v14838_v63 = vld [vmem:[#allocation52_spill] sm:$0xff] }
  0x94   : > { %v9725_v62 = vadd.f32 %v14816_v57, %v14815_v13  ;;  %v9727_v33 = vadd.f32 %v3797_v2, %v3751_v9  ;;  %v1482_v36 = vmul.f32 %v14819_v51, %v9199_v1  ;;  %v1289_v50 = vsel %vm1207_vm3, %v1287_v32, %v1288_v48  ;;  %v14821_v32 = vld [vmem:[#allocation35_spill] sm:$0xff] }
  0x95   : > { %v1164_v18 = vadd.f32 %v1136_v56, %v1088_v5  ;;  %v1439_v23 = vrot.slane %v1406_v35, 2  ;;  %v1440_v54 = vrot.slane %v1407_v37, 2  ;;  %v1483_v19 = vmul.f32 %v14819_v51, %v9327_v44 }
  0x96   : > { %14817 = vst [vmem:[#allocation31_spill] sm:$0xff] %v9725_v62  ;;  %14818 = vst [vmem:[#allocation32_spill] sm:$0xff] %v9727_v33  ;;  %8621 = vmatprep.mubr.msk.f32.mxu0 %vm361_vm0, %v9727_v33  ;;  %v1515_v43 = vrot.slane %v1482_v36, 2  ;;  %v1558_v2 = vmul.f32 %v14820_v41, %v9209_v16  ;;  %v1559_v56 = vmul.f32 %v14820_v41, %v9329_v46  ;;  %v14823_v33 = vld [vmem:[#allocation37_spill] sm:$0xff] }
  0x97   : > { %v1241_v26 = vadd.f32 %v1213_v24, %v1164_v18  ;;  %v1365_v9 = vsel %vm1207_vm3, %v1363_v3, %v1364_v8  ;;  %v1516_v5 = vrot.slane %v1483_v19, 2  ;;  %v1634_v48 = vmul.f32 %v14821_v32, %v9211_v21  ;;  %v14822_v18 = vld [vmem:[#allocation36_spill] sm:$0xff] }
  0x98   : > { %v1635_v35 = vmul.f32 %v14821_v32, %v9691_v29  ;;  %v1591_v13 = vrot.slane %v1558_v2, 2  ;;  %v1592_v57 = vrot.slane %v1559_v56, 2  ;;  %v1710_v24 = vmul.f32 %v14822_v18, %v9127_v34 }
  0x99   : > { %v1317_v37 = vadd.f32 %v1289_v50, %v1241_v26  ;;  %v1441_v36 = vsel %vm1207_vm3, %v1439_v23, %v1440_v54  ;;  %v1667_v14 = vrot.slane %v1634_v48, 2  ;;  %v1711_v3 = vmul.f32 %v14822_v18, %v9143_v39  ;;  %v14824_v23 = vld [vmem:[#allocation38_spill] sm:$0xff] }
  0x9a   : > { %v1668_v55 = vrot.slane %v1635_v35, 2  ;;  %v1517_v19 = vsel %vm1207_vm3, %v1515_v43, %v1516_v5  ;;  %v1743_v10 = vrot.slane %v1710_v24, 3  ;;  %v1786_v62 = vmul.f32 %v14823_v33, %v9145_v40  ;;  %v14825_v43 = vld [vmem:[#allocation39_spill] sm:$0xff] }
  0x9b   : > { %v1393_v8 = vadd.f32 %v1365_v9, %v1317_v37  ;;  %v1593_v50 = vsel %vm1207_vm3, %v1591_v13, %v1592_v57  ;;  %v1744_v26 = vrot.slane %v1711_v3, 3  ;;  %v1787_v34 = vmul.f32 %v14823_v33, %v9289_v6 }
  0x9c   : > { %v1862_v54 = vmul.f32 %v14824_v23, %v9186_v58  ;;  %v1819_v56 = vrot.slane %v1786_v62, 3  ;;  %v1863_v39 = vmul.f32 %v14824_v23, %v9297_v7  ;;  %v1938_v9 = vmul.f32 %v14825_v43, %v9188_v59  ;;  %v14826_v58 = vld [vmem:[#allocation40_spill] sm:$0xff]  ;;  %v14827_v59 = vld [vmem:[#allocation41_spill] sm:$0xff] }
  0x9d   : > { %v1469_v2 = vadd.f32 %v1441_v36, %v1393_v8  ;;  %v1669_v5 = vsel %vm1207_vm3, %v1667_v14, %v1668_v55  ;;  %v1820_v40 = vrot.slane %v1787_v34, 3  ;;  %v1939_v35 = vmul.f32 %v14825_v43, %v9299_v22 }
  0x9e   : > { %v1895_v48 = vrot.slane %v1862_v54, 3  ;;  %v1745_v13 = vsel %vm452_vm4, %v1743_v10, %v1744_v26  ;;  %v1896_v57 = vrot.slane %v1863_v39, 3  ;;  %v2014_v62 = vmul.f32 %v14826_v58, %v9199_v1  ;;  %v14828_v1 = vld [vmem:[#allocation42_spill] sm:$0xff] }
  0x9f   : > { %v1545_v37 = vadd.f32 %v1517_v19, %v1469_v2  ;;  %v1971_v24 = vrot.slane %v1938_v9, 3  ;;  %v1972_v36 = vrot.slane %v1939_v35, 3  ;;  %v2015_v3 = vmul.f32 %v14826_v58, %v9327_v44 }
  0xa0   : > { %v2090_v14 = vmul.f32 %v14827_v59, %v9209_v16  ;;  %v1821_v8 = vsel %vm452_vm4, %v1819_v56, %v1820_v40  ;;  %v2047_v34 = vrot.slane %v2014_v62, 3  ;;  %v2091_v19 = vmul.f32 %v14827_v59, %v9329_v46  ;;  %v9780_v16 = vld [vmem:[#allocation2 + $0x10] sm:$0xff]  ;;  %v9785_v62 = vld [vmem:[#allocation2 + $0x18] sm:$0x3f] }
  0xa1   : > { %v1621_v55 = vadd.f32 %v1593_v50, %v1545_v37  ;;  %v1897_v10 = vsel %vm452_vm4, %v1895_v48, %v1896_v57  ;;  %v2048_v26 = vrot.slane %v2015_v3, 3  ;;  %v2166_v2 = vmul.f32 %v14828_v1, %v9211_v21  ;;  %v14829_v50 = vld [vmem:[#allocation43_spill] sm:$0xff]  ;;  %v14830_v21 = vld [vmem:[#allocation44_spill] sm:$0xff] }
  0xa2   : > { %v2123_v54 = vrot.slane %v2090_v14, 3  ;;  %v2124_v9 = vrot.slane %v2091_v19, 3  ;;  %v2167_v35 = vmul.f32 %v14828_v1, %v9691_v29  ;;  %v2242_v56 = vmul.f32 %v9780_v16, %v14829_v50  ;;  %v9789_v57 = vld [vmem:[#allocation2 + $0x20] sm:$0xff] }
  0xa3   : > { %v1697_v39 = vadd.f32 %v1669_v5, %v1621_v55  ;;  %v1973_v40 = vsel %vm452_vm4, %v1971_v24, %v1972_v36  ;;  %v2199_v37 = vrot.slane %v2166_v2, 3  ;;  %v2243_v48 = vmul.f32 %v9785_v62, %v14829_v50  ;;  %v9797_v36 = vld [vmem:[#allocation2 + $0x30] sm:$0xff] }
  0xa4   : > { %v2319_v5 = vmul.f32 %v9789_v57, %v14830_v21  ;;  %v2049_v14 = vsel %vm452_vm4, %v2047_v34, %v2048_v26  ;;  %v2200_v55 = vrot.slane %v2167_v35, 3  ;;  %v2276_v19 = vrot.slane %v2242_v56, 4  ;;  %v14831_v2 = vld [vmem:[#allocation45_spill] sm:$0xff]  ;;  %v14832_v34 = vld [vmem:[#allocation46_spill] sm:$0xff] }
  0xa5   : > { %v1773_v3 = vadd.f32 %v1745_v13, %v1697_v39  ;;  %v2125_v1 = vsel %vm452_vm4, %v2123_v54, %v2124_v9  ;;  %v2277_v59 = vrot.slane %v2243_v48, 4  ;;  %v2320_v24 = vmul.f32 %v14830_v21, %v9289_v6  ;;  %v9803_v39 = vld [vmem:[#allocation2 + $0x40] sm:$0xff] }
  0xa6   : > { %v2395_v50 = vmul.f32 %v9797_v36, %v14831_v2  ;;  %v2352_v43 = vrot.slane %v2319_v5, 4  ;;  %v2396_v13 = vmul.f32 %v14831_v2, %v9297_v7  ;;  %v2471_v26 = vmul.f32 %v9803_v39, %v14832_v34  ;;  %v9811_v5 = vld [vmem:[#allocation2 + $0x50] sm:$0xff] }
  0xa7   : > { %v1849_v58 = vadd.f32 %v1821_v8, %v1773_v3  ;;  %v2201_v54 = vsel %vm452_vm4, %v2199_v37, %v2200_v55  ;;  %v2353_v9 = vrot.slane %v2320_v24, 4  ;;  %v2472_v56 = vmul.f32 %v14832_v34, %v9299_v22  ;;  %v14833_v3 = vld [vmem:[#allocation47_spill] sm:$0xff]  ;;  %v14835_v34 = vld [vmem:[#allocation49_spill] sm:$0xff] }
  0xa8   : > { %v2428_v35 = vrot.slane %v2395_v50, 4  ;;  %v2278_v21 = vsel %vm2272_vm5, %v2276_v19, %v2277_v59  ;;  %v2429_v8 = vrot.slane %v2396_v13, 4  ;;  %v2547_v2 = vmul.f32 %v9811_v5, %v14833_v3  ;;  %v9817_v37 = vld [vmem:[#allocation2 + $0x60] sm:$0xff]  ;;  %v14834_v50 = vld [vmem:[#allocation48_spill] sm:$0xff] }
  0xa9   : > { %v1925_v48 = vadd.f32 %v1897_v10, %v1849_v58  ;;  %v2504_v23 = vrot.slane %v2471_v26, 4  ;;  %v2505_v33 = vrot.slane %v2472_v56, 4  ;;  %v2548_v18 = vmul.f32 %v14833_v3, %v9327_v44  ;;  %v9825_v56 = vld [vmem:[#allocation2 + $0x70] sm:$0xff] }
  0xaa   : > { %v2623_v55 = vmul.f32 %v9817_v37, %v14834_v50  ;;  %v2354_v58 = vsel %vm2272_vm5, %v2352_v43, %v2353_v9  ;;  %v2580_v59 = vrot.slane %v2547_v2, 4  ;;  %v2624_v10 = vmul.f32 %v14834_v50, %v9329_v46 }
  0xab   : > { %v2001_v24 = vadd.f32 %v1973_v40, %v1925_v48  ;;  %v2430_v19 = vsel %vm2272_vm5, %v2428_v35, %v2429_v8  ;;  %v2581_v13 = vrot.slane %v2548_v18, 4  ;;  %v2699_v3 = vmul.f32 %v9825_v56, %v14835_v34  ;;  %v14836_v48 = vld [vmem:[#allocation50_spill] sm:$0xff]  ;;  %v14837_v35 = vld [vmem:[#allocation51_spill] sm:$0xff] }
  0xac   : > { %v2656_v26 = vrot.slane %v2623_v55, 4  ;;  %v2657_v41 = vrot.slane %v2624_v10, 4  ;;  %v2700_v40 = vmul.f32 %v14835_v34, %v9691_v29  ;;  %v2775_v43 = vmul.f32 %v9780_v16, %v14836_v48 }
  0xad   : > { %v2077_v32 = vadd.f32 %v2049_v14, %v2001_v24  ;;  %v2506_v2 = vsel %vm2272_vm5, %v2504_v23, %v2505_v33  ;;  %v2732_v9 = vrot.slane %v2699_v3, 4  ;;  %v2776_v18 = vmul.f32 %v9785_v62, %v14836_v48 }
  0xae   : > { %v2852_v8 = vmul.f32 %v9789_v57, %v14837_v35  ;;  %v2582_v50 = vsel %vm2272_vm5, %v2580_v59, %v2581_v13  ;;  %v2733_v14 = vrot.slane %v2700_v40, 4  ;;  %v2809_v24 = vrot.slane %v2775_v43, 5 }
  0xaf   : > { %v2153_v55 = vadd.f32 %v2125_v1, %v2077_v32  ;;  %v2658_v10 = vsel %vm2272_vm5, %v2656_v26, %v2657_v41  ;;  %v2810_v34 = vrot.slane %v2776_v18, 5  ;;  %v2853_v51 = vmul.f32 %v14837_v35, %v9289_v6 }
  0xb0   : > { %v2928_v33 = vmul.f32 %v9797_v36, %v14838_v63  ;;  %v2885_v3 = vrot.slane %v2852_v8, 5  ;;  %v2929_v48 = vmul.f32 %v14838_v63, %v9297_v7  ;;  %v3004_v32 = vmul.f32 %v9803_v39, %v9564_v11 }
  0xb1   : > { %v2229_v23 = vadd.f32 %v2201_v54, %v2153_v55  ;;  %v2734_v1 = vsel %vm2272_vm5, %v2732_v9, %v2733_v14  ;;  %v2886_v59 = vrot.slane %v2853_v51, 5  ;;  %v3005_v41 = vmul.f32 %v9564_v11, %v9299_v22 }
  0xb2   : > { %v2961_v13 = vrot.slane %v2928_v33, 5  ;;  %v2811_v40 = vsel %vm2805_vm6, %v2809_v24, %v2810_v34  ;;  %v2962_v43 = vrot.slane %v2929_v48, 5  ;;  %v3080_v54 = vmul.f32 %v9811_v5, %v9568_v31 }
  0xb3   : > { %v2306_v26 = vadd.f32 %v2278_v21, %v2229_v23  ;;  %v3037_v18 = vrot.slane %v3004_v32, 5  ;;  %v3038_v8 = vrot.slane %v3005_v41, 5  ;;  %v3081_v55 = vmul.f32 %v9568_v31, %v9327_v44 }
  0xb4   : > { %v3156_v9 = vmul.f32 %v9817_v37, %v9585_v61  ;;  %v2887_v14 = vsel %vm2805_vm6, %v2885_v3, %v2886_v59  ;;  %v3113_v33 = vrot.slane %v3080_v54, 5  ;;  %v3157_v21 = vmul.f32 %v9585_v61, %v9329_v46 }
  0xb5   : > { %v2382_v51 = vadd.f32 %v2354_v58, %v2306_v26  ;;  %v2963_v34 = vsel %vm2805_vm6, %v2961_v13, %v2962_v43  ;;  %v3114_v48 = vrot.slane %v3081_v55, 5  ;;  %v3232_v23 = vmul.f32 %v9825_v56, %v9591_v25 }
  0xb6   : > { %v3189_v24 = vrot.slane %v3156_v9, 5  ;;  %v3190_v41 = vrot.slane %v3157_v21, 5  ;;  %v3233_v31 = vmul.f32 %v9591_v25, %v9691_v29  ;;  %v3308_v58 = vmul.f32 %v9780_v16, %v9595_v0 }
  0xb7   : > { %v2458_v32 = vadd.f32 %v2430_v19, %v2382_v51  ;;  %v9869_v3 = vsel %vm2805_vm6, %v3037_v18, %v3038_v8  ;;  %v3265_v59 = vrot.slane %v3232_v23, 5  ;;  %v3309_v13 = vmul.f32 %v9785_v62, %v9595_v0 }
  0xb8   : > { %v3385_v26 = vmul.f32 %v9789_v57, %v9612_v27  ;;  %v9876_v19 = vsel %vm2805_vm6, %v3113_v33, %v3114_v48  ;;  %v3266_v54 = vrot.slane %v3233_v31, 5  ;;  %v3342_v55 = vrot.slane %v3308_v58, 6 }
  0xb9   : > { %v2534_v43 = vadd.f32 %v2506_v2, %v2458_v32  ;;  %v9879_v9 = vsel %vm2805_vm6, %v3189_v24, %v3190_v41  ;;  %v3343_v16 = vrot.slane %v3309_v13, 6  ;;  %v3386_v18 = vmul.f32 %v9612_v27, %v9289_v6 }
  0xba   : > { %v3461_v8 = vmul.f32 %v9797_v36, %v9623_v4  ;;  %v3418_v51 = vrot.slane %v3385_v26, 6  ;;  %v3462_v2 = vmul.f32 %v9623_v4, %v9297_v7  ;;  %v3537_v33 = vmul.f32 %v9803_v39, %v9627_v30 }
  0xbb   : > { %v2610_v62 = vadd.f32 %v2582_v50, %v2534_v43  ;;  %v9890_v31 = vsel %vm2805_vm6, %v3265_v59, %v3266_v54  ;;  %v3419_v21 = vrot.slane %v3386_v18, 6  ;;  %v3538_v24 = vmul.f32 %v9627_v30, %v9299_v22 }
  0xbc   : > { %v3494_v48 = vrot.slane %v3461_v8, 6  ;;  %v9895_v23 = vsel %vm3338_vm7, %v3342_v55, %v3343_v16  ;;  %v3495_v50 = vrot.slane %v3462_v2, 6  ;;  %v3613_v32 = vmul.f32 %v9811_v5, %v9631_v42 }
  0xbd   : > { %v2686_v6 = vadd.f32 %v2658_v10, %v2610_v62  ;;  %v3570_v7 = vrot.slane %v3537_v33, 6  ;;  %v3571_v41 = vrot.slane %v3538_v24, 6  ;;  %v3614_v58 = vmul.f32 %v9631_v42, %v9327_v44 }
  0xbe   : > { %v3689_v59 = vmul.f32 %v9817_v37, %v9653_v20  ;;  %v9904_v26 = vsel %vm3338_vm7, %v3418_v51, %v3419_v21  ;;  %v3646_v22 = vrot.slane %v3613_v32, 6  ;;  %v3690_v10 = vmul.f32 %v9653_v20, %v9329_v46  ;;  %v9927_v51 = vld [vmem:[#allocation2 + $0x28] sm:$0x3f] }
  0xbf   : > { %v2762_v13 = vadd.f32 %v2734_v1, %v2686_v6  ;;  %v9909_v43 = vsel %vm3338_vm7, %v3494_v48, %v3495_v50  ;;  %v3647_v54 = vrot.slane %v3614_v58, 6  ;;  %v9913_v16 = vmul.f32 %v9825_v56, %v9644_v52  ;;  %v9937_v6 = vld [vmem:[#allocation2 + $0x38] sm:$0x3f] }
  0xc0   : > { %v3722_v55 = vrot.slane %v3689_v59, 6  ;;  %v3723_v18 = vrot.slane %v3690_v10, 6  ;;  %v9917_v1 = vmul.f32 %v9644_v52, %v9691_v29  ;;  %v646_v8 = vmul.f32 %v9789_v57, %v14810_v17 }
  0xc1   : > { %v2839_v44 = vadd.f32 %v2811_v40, %v2762_v13  ;;  %v9922_v46 = vsel %vm3338_vm7, %v3570_v7, %v3571_v41  ;;  %v9925_v62 = vsel %vm3338_vm7, %v3646_v22, %v3647_v54  ;;  %v647_v2 = vmul.f32 %v9927_v51, %v14810_v17 }
  0xc2   : > { %v723_v40 = vmul.f32 %v9797_v36, %v9141_v38  ;;  %v9934_v52 = vsel %vm3338_vm7, %v3722_v55, %v3723_v18  ;;  %v681_v48 = vrot.slane %v646_v8, 1  ;;  %v724_v50 = vmul.f32 %v9937_v6, %v9141_v38  ;;  %v9951_v55 = vld [vmem:[#allocation2 + $0x58] sm:$0x3f]  ;;  %v14839_v18 = vld [vmem:[#allocation28_spill] sm:$0xff] }
  0xc3   : > { %v2915_v33 = vadd.f32 %v2887_v14, %v2839_v44  ;;  %v682_v24 = vrot.slane %v647_v2, 1  ;;  %v799_v7 = vmul.f32 %v9803_v39, %v9157_v45  ;;  %v3799_v58 = vrot.slane %v9917_v1, 6  ;;  %v9944_v14 = vld [vmem:[#allocation2 + $0x48] sm:$0x3f] }
  0xc4   : > { %v757_v32 = vrot.slane %v723_v40, 1  ;;  %v800_v59 = vmul.f32 %v9944_v14, %v9157_v45  ;;  %v875_v13 = vmul.f32 %v9811_v5, %v9166_v49  ;;  %v758_v10 = vrot.slane %v724_v50, 1  ;;  %v9964_v50 = vld [vmem:[#allocation2 + $0x88] sm:$0x3f] }
  0xc5   : > { %v2991_v41 = vadd.f32 %v2963_v34, %v2915_v33  ;;  %v683_v22 = vsel %vm674_vm2, %v681_v48, %v682_v24  ;;  %v833_v54 = vrot.slane %v799_v7, 1  ;;  %v876_v44 = vmul.f32 %v9951_v55, %v9166_v49  ;;  %v9960_v48 = vld [vmem:[#allocation2 + $0x68] sm:$0x3f]  ;;  %v9974_v49 = vld [vmem:[#allocation2 + $0x80] sm:$0xff] }
  0xc6   : > { %v709_v1 = vadd.f32 %v683_v22, %v14839_v18  ;;  %v834_v8 = vrot.slane %v800_v59, 1  ;;  %v909_v2 = vrot.slane %v875_v13, 1  ;;  %v759_v40 = vsel %vm674_vm2, %v757_v32, %v758_v10 }
  0xc7   : > { %v3067_v34 = vadd.f32 %v9869_v3, %v2991_v41  ;;  %v910_v33 = vrot.slane %v876_v44, 1  ;;  %v951_v21 = vmul.f32 %v9817_v37, %v9177_v53  ;;  %v952_v24 = vmul.f32 %v9960_v48, %v9177_v53 }
  0xc8   : > { %v785_v3 = vadd.f32 %v759_v40, %v709_v1  ;;  %v835_v41 = vsel %vm674_vm2, %v833_v54, %v834_v8  ;;  %v1027_v59 = vmul.f32 %v9825_v56, %v9333_v47  ;;  %v1028_v10 = vmul.f32 %v9333_v47, %v9691_v29 }
  0xc9   : > { %v3143_v7 = vadd.f32 %v9876_v19, %v3067_v34  ;;  %v911_v32 = vsel %vm674_vm2, %v909_v2, %v910_v33  ;;  %v985_v13 = vrot.slane %v951_v21, 1  ;;  %v986_v22 = vrot.slane %v952_v24, 1 }
  0xca   : > { %v861_v18 = vadd.f32 %v835_v41, %v785_v3  ;;  %v1061_v53 = vrot.slane %v1027_v59, 1  ;;  %v1103_v19 = vmul.f32 %v9974_v49, %v9338_v60  ;;  %v1062_v34 = vrot.slane %v1028_v10, 1 }
  0xcb   : > { %v3219_v44 = vadd.f32 %v9879_v9, %v3143_v7  ;;  %v987_v54 = vsel %vm674_vm2, %v985_v13, %v986_v22  ;;  %v1104_v1 = vmul.f32 %v9338_v60, %v9964_v50  ;;  %v1179_v21 = vmul.f32 %v9789_v57, %v9342_v15 }
  0xcc   : > { %v937_v2 = vadd.f32 %v911_v32, %v861_v18  ;;  %v1137_v9 = vrot.slane %v1103_v19, 1  ;;  %v1180_v40 = vmul.f32 %v9927_v51, %v9342_v15  ;;  %v1063_v33 = vsel %vm674_vm2, %v1061_v53, %v1062_v34 }
  0xcd   : > { %v3295_v8 = vadd.f32 %v9890_v31, %v3219_v44  ;;  %v1138_v24 = vrot.slane %v1104_v1, 1  ;;  %v1214_v7 = vrot.slane %v1179_v21, 2  ;;  %v1256_v3 = vmul.f32 %v9797_v36, %v14812_v12  ;;  %v14840_v1 = vld [vmem:[#allocation33_spill] sm:$0xff] }
  0xce   : > { %v1013_v59 = vadd.f32 %v987_v54, %v937_v2  ;;  %v1215_v13 = vrot.slane %v1180_v40, 2  ;;  %v1257_v22 = vmul.f32 %v9937_v6, %v14812_v12  ;;  %v1332_v10 = vmul.f32 %v9803_v39, %v14813_v28 }
  0xcf   : > { %v3372_v41 = vadd.f32 %v9895_v23, %v3295_v8  ;;  %v1139_v31 = vsel %vm674_vm2, %v1137_v9, %v1138_v24  ;;  %v1290_v32 = vrot.slane %v1256_v3, 2  ;;  %v1333_v53 = vmul.f32 %v9944_v14, %v14813_v28 }
  0xd0   : > { %v1089_v18 = vadd.f32 %v1063_v33, %v1013_v59  ;;  %v1216_v19 = vsel %vm1207_vm3, %v1214_v7, %v1215_v13  ;;  %v1291_v23 = vrot.slane %v1257_v22, 2  ;;  %v1366_v54 = vrot.slane %v1332_v10, 2  ;;  %v14843_v10 = vld [vmem:[#allocation34_spill] sm:$0xff] }
  0xd1   : > { %v3448_v44 = vadd.f32 %v9904_v26, %v3372_v41  ;;  %v1367_v34 = vrot.slane %v1333_v53, 2  ;;  %v1408_v21 = vmul.f32 %v9811_v5, %v14840_v1  ;;  %v1409_v8 = vmul.f32 %v9951_v55, %v14840_v1  ;;  %v14842_v26 = vld [vmem:[#allocation3_spill] sm:$0xff] }
  0xd2   : > { %v14841_v9 = vrot.slane %v9913_v16, 6  ;;  %v1165_v24 = vadd.f32 %v1139_v31, %v1089_v18  ;;  %v1484_v33 = vmul.f32 %v9817_v37, %v14842_v26  ;;  %v1292_v7 = vsel %vm1207_vm3, %v1290_v32, %v1291_v23 }
  0xd3   : > { %v3524_v2 = vadd.f32 %v9909_v43, %v3448_v44  ;;  %v1442_v3 = vrot.slane %v1408_v21, 2  ;;  %v1443_v41 = vrot.slane %v1409_v8, 2  ;;  %v1485_v59 = vmul.f32 %v9960_v48, %v14842_v26  ;;  %v14844_v44 = vld [vmem:[#allocation35_spill] sm:$0xff]  ;;  %v14845_v8 = vld [vmem:[#allocation36_spill] sm:$0xff] }
  0xd4   : > { %v3800_v40 = vsel %vm3338_vm7, %v14841_v9, %v3799_v58  ;;  %v1242_v22 = vadd.f32 %v1216_v19, %v1165_v24  ;;  %v1368_v43 = vsel %vm1207_vm3, %v1366_v54, %v1367_v34  ;;  %v1560_v16 = vmul.f32 %v9825_v56, %v14843_v10 }
  0xd5   : > { %v3600_v13 = vadd.f32 %v9922_v46, %v3524_v2  ;;  %v1518_v58 = vrot.slane %v1484_v33, 2  ;;  %v1519_v31 = vrot.slane %v1485_v59, 2  ;;  %v1561_v53 = vmul.f32 %v14843_v10, %v9691_v29 }
  0xd6   : > { %v1636_v32 = vmul.f32 %v9974_v49, %v14844_v44  ;;  %v1318_v23 = vadd.f32 %v1292_v7, %v1242_v22  ;;  %v1594_v21 = vrot.slane %v1560_v16, 2  ;;  %v1637_v46 = vmul.f32 %v14844_v44, %v9964_v50  ;;  %v14858_v44 = vld [vmem:[#allocation48_spill] sm:$0xff] }
  0xd7   : > { %v3676_v18 = vadd.f32 %v9925_v62, %v3600_v13  ;;  %v1444_v19 = vsel %vm1207_vm3, %v1442_v3, %v1443_v41  ;;  %v1595_v54 = vrot.slane %v1561_v53, 2  ;;  %v1712_v2 = vmul.f32 %v9789_v57, %v14845_v8  ;;  %v14846_v13 = vld [vmem:[#allocation37_spill] sm:$0xff] }
  0xd8   : > { %v1670_v34 = vrot.slane %v1636_v32, 2  ;;  %v1394_v24 = vadd.f32 %v1368_v43, %v1318_v23  ;;  %v1671_v33 = vrot.slane %v1637_v46, 2  ;;  %v1713_v59 = vmul.f32 %v9927_v51, %v14845_v8  ;;  %v14855_v8 = vld [vmem:[#allocation45_spill] sm:$0xff] }
  0xd9   : > { %v3752_v9 = vadd.f32 %v9934_v52, %v3676_v18  ;;  %v1520_v62 = vsel %vm1207_vm3, %v1518_v58, %v1519_v31  ;;  %v1746_v7 = vrot.slane %v1712_v2, 3  ;;  %v1788_v22 = vmul.f32 %v9797_v36, %v14846_v13  ;;  %v14848_v18 = vld [vmem:[#allocation38_spill] sm:$0xff] }
  0xda   : > { %v1789_v3 = vmul.f32 %v9937_v6, %v14846_v13  ;;  %v1470_v16 = vadd.f32 %v1444_v19, %v1394_v24  ;;  %v1596_v53 = vsel %vm1207_vm3, %v1594_v21, %v1595_v54  ;;  %v1747_v52 = vrot.slane %v1713_v59, 3  ;;  %v14850_v24 = vld [vmem:[#allocation40_spill] sm:$0xff] }
  0xdb   : > { %v10034_v41 = vadd.f32 %v3800_v40, %v3752_v9  ;;  %v1822_v43 = vrot.slane %v1788_v22, 3  ;;  %v1864_v23 = vmul.f32 %v9803_v39, %v14848_v18  ;;  %v1865_v58 = vmul.f32 %v9944_v14, %v14848_v18  ;;  %v14849_v40 = vld [vmem:[#allocation39_spill] sm:$0xff] }
  0xdc   : > { %v1823_v32 = vrot.slane %v1789_v3, 3  ;;  %v1546_v31 = vadd.f32 %v1520_v62, %v1470_v16  ;;  %v1672_v46 = vsel %vm1207_vm3, %v1670_v34, %v1671_v33  ;;  %v1940_v19 = vmul.f32 %v9811_v5, %v14849_v40  ;;  %v14851_v16 = vld [vmem:[#allocation41_spill] sm:$0xff] }
  0xdd   : > { %14847 = vst [vmem:[#allocation26_spill] sm:$0xff] %v10034_v41  ;;  %8622 = vmatmul.mubr.msk.f32.vlgmr.msra.gmra.mrb[0].mxu0 %vm361_vm0, %v10034_v41  ;;  %v1941_v21 = vmul.f32 %v9951_v55, %v14849_v40  ;;  %v1748_v54 = vsel %vm452_vm4, %v1746_v7, %v1747_v52  ;;  %v1898_v2 = vrot.slane %v1864_v23, 3  ;;  %v1899_v9 = vrot.slane %v1865_v58, 3  ;;  %v14852_v40 = vld [vmem:[#allocation42_spill] sm:$0xff] }
  0xde   : > { %v2016_v59 = vmul.f32 %v9817_v37, %v14850_v24  ;;  %v1622_v22 = vadd.f32 %v1596_v53, %v1546_v31  ;;  %v1974_v3 = vrot.slane %v1940_v19, 3  ;;  %v2017_v62 = vmul.f32 %v9960_v48, %v14850_v24 }
  0xdf   : > { %v1975_v18 = vrot.slane %v1941_v21, 3  ;;  %v1824_v34 = vsel %vm452_vm4, %v1822_v43, %v1823_v32  ;;  %v2092_v41 = vmul.f32 %v9825_v56, %v14851_v16  ;;  %v2093_v7 = vmul.f32 %v14851_v16, %v9691_v29  ;;  %v14853_v43 = vld [vmem:[#allocation43_spill] sm:$0xff] }
  0xe0   : > { %v2050_v33 = vrot.slane %v2016_v59, 3  ;;  %v1698_v52 = vadd.f32 %v1672_v46, %v1622_v22  ;;  %v1900_v23 = vsel %vm452_vm4, %v1898_v2, %v1899_v9  ;;  %v2051_v58 = vrot.slane %v2017_v62, 3  ;;  %v14854_v62 = vld [vmem:[#allocation44_spill] sm:$0xff] }
  0xe1   : > { %v2168_v53 = vmul.f32 %v9974_v49, %v14852_v40  ;;  %v2126_v31 = vrot.slane %v2092_v41, 3  ;;  %v2127_v19 = vrot.slane %v2093_v7, 3  ;;  %v2169_v21 = vmul.f32 %v14852_v40, %v9964_v50 }
  0xe2   : > { %v2244_v32 = vmul.f32 %v9789_v57, %v14853_v43  ;;  %v1774_v59 = vadd.f32 %v1748_v54, %v1698_v52  ;;  %v1976_v24 = vsel %vm452_vm4, %v1974_v3, %v1975_v18  ;;  %v2245_v46 = vmul.f32 %v9927_v51, %v14853_v43  ;;  %v14857_v43 = vld [vmem:[#allocation47_spill] sm:$0xff] }
  0xe3   : > { %v2202_v13 = vrot.slane %v2168_v53, 3  ;;  %v2052_v2 = vsel %vm452_vm4, %v2050_v33, %v2051_v58  ;;  %v2203_v9 = vrot.slane %v2169_v21, 3  ;;  %v2321_v41 = vmul.f32 %v9797_v36, %v14854_v62  ;;  %v14856_v33 = vld [vmem:[#allocation46_spill] sm:$0xff] }
  0xe4   : > { %v2279_v22 = vrot.slane %v2244_v32, 4  ;;  %v1850_v7 = vadd.f32 %v1824_v34, %v1774_v59  ;;  %v2280_v16 = vrot.slane %v2245_v46, 4  ;;  %v2322_v40 = vmul.f32 %v9937_v6, %v14854_v62 }
  0xe5   : > { %v2397_v54 = vmul.f32 %v9803_v39, %v14855_v8  ;;  %v2128_v18 = vsel %vm452_vm4, %v2126_v31, %v2127_v19  ;;  %v2355_v3 = vrot.slane %v2321_v41, 4  ;;  %v2398_v52 = vmul.f32 %v9944_v14, %v14855_v8 }
  0xe6   : > { %v2473_v58 = vmul.f32 %v9811_v5, %v14856_v33  ;;  %v1926_v53 = vadd.f32 %v1900_v23, %v1850_v7  ;;  %v2204_v21 = vsel %vm452_vm4, %v2202_v13, %v2203_v9  ;;  %v2356_v34 = vrot.slane %v2322_v40, 4 }
  0xe7   : > { %v2431_v32 = vrot.slane %v2397_v54, 4  ;;  %v2281_v59 = vsel %vm2272_vm5, %v2279_v22, %v2280_v16  ;;  %v2432_v46 = vrot.slane %v2398_v52, 4  ;;  %v2474_v62 = vmul.f32 %v9951_v55, %v14856_v33  ;;  %v14859_v52 = vld [vmem:[#allocation49_spill] sm:$0xff]  ;;  %v14860_v33 = vld [vmem:[#allocation50_spill] sm:$0xff] }
  0xe8   : > { %v2549_v31 = vmul.f32 %v9817_v37, %v14857_v43  ;;  %v2002_v19 = vadd.f32 %v1976_v24, %v1926_v53  ;;  %v2507_v41 = vrot.slane %v2473_v58, 4  ;;  %v2550_v8 = vmul.f32 %v9960_v48, %v14857_v43 }
  0xe9   : > { %v2625_v23 = vmul.f32 %v9825_v56, %v14858_v44  ;;  %v2357_v13 = vsel %vm2272_vm5, %v2355_v3, %v2356_v34  ;;  %v2508_v40 = vrot.slane %v2474_v62, 4  ;;  %v2626_v16 = vmul.f32 %v14858_v44, %v9691_v29 }
  0xea   : > { %v2583_v9 = vrot.slane %v2549_v31, 4  ;;  %v2078_v22 = vadd.f32 %v2052_v2, %v2002_v19  ;;  %v2433_v7 = vsel %vm2272_vm5, %v2431_v32, %v2432_v46  ;;  %v2584_v54 = vrot.slane %v2550_v8, 4 }
  0xeb   : > { %v2701_v24 = vmul.f32 %v9974_v49, %v14859_v52  ;;  %v2659_v58 = vrot.slane %v2625_v23, 4  ;;  %v2660_v53 = vrot.slane %v2626_v16, 4  ;;  %v2702_v43 = vmul.f32 %v14859_v52, %v9964_v50 }
  0xec   : > { %v2777_v3 = vmul.f32 %v9789_v57, %v14860_v33  ;;  %v2154_v62 = vadd.f32 %v2128_v18, %v2078_v22  ;;  %v2509_v34 = vsel %vm2272_vm5, %v2507_v41, %v2508_v40  ;;  %v2778_v2 = vmul.f32 %v9927_v51, %v14860_v33 }
  0xed   : > { %v2735_v31 = vrot.slane %v2701_v24, 4  ;;  %v2585_v8 = vsel %vm2272_vm5, %v2583_v9, %v2584_v54  ;;  %v2736_v32 = vrot.slane %v2702_v43, 4  ;;  %v2854_v19 = vmul.f32 %v9797_v36, %v14837_v35 }
  0xee   : > { %v2812_v46 = vrot.slane %v2777_v3, 5  ;;  %v2230_v23 = vadd.f32 %v2204_v21, %v2154_v62  ;;  %v2813_v16 = vrot.slane %v2778_v2, 5  ;;  %v2855_v52 = vmul.f32 %v9937_v6, %v14837_v35  ;;  %v14861_v35 = vld [vmem:[#allocation54_spill] sm:$0xff] }
  0xef   : > { %v2930_v18 = vmul.f32 %v9803_v39, %v14838_v63  ;;  %v2661_v41 = vsel %vm2272_vm5, %v2659_v58, %v2660_v53  ;;  %v2888_v40 = vrot.slane %v2854_v19, 5  ;;  %v2931_v22 = vmul.f32 %v9944_v14, %v14838_v63 }
  0xf0   : > { %v3006_v43 = vmul.f32 %v9811_v5, %v9564_v11  ;;  %v2307_v9 = vadd.f32 %v2281_v59, %v2230_v23  ;;  %v2737_v54 = vsel %vm2272_vm5, %v2735_v31, %v2736_v32  ;;  %v2889_v21 = vrot.slane %v2855_v52, 5 }
  0xf1   : > { %v2964_v24 = vrot.slane %v2930_v18, 5  ;;  %v2814_v3 = vsel %vm2805_vm6, %v2812_v46, %v2813_v16  ;;  %v2965_v62 = vrot.slane %v2931_v22, 5  ;;  %v3007_v2 = vmul.f32 %v9951_v55, %v9564_v11 }
  0xf2   : > { %v3082_v58 = vmul.f32 %v9817_v37, %v14861_v35  ;;  %v2383_v53 = vadd.f32 %v2357_v13, %v2307_v9  ;;  %v3040_v19 = vrot.slane %v3006_v43, 5  ;;  %v3083_v63 = vmul.f32 %v9960_v48, %v14861_v35 }
  0xf3   : > { %v3158_v59 = vmul.f32 %v9825_v56, %v9585_v61  ;;  %v2890_v52 = vsel %vm2805_vm6, %v2888_v40, %v2889_v21  ;;  %v3041_v31 = vrot.slane %v3007_v2, 5  ;;  %v3159_v46 = vmul.f32 %v9585_v61, %v9691_v29 }
  0xf4   : > { %v3116_v32 = vrot.slane %v3082_v58, 5  ;;  %v2459_v23 = vadd.f32 %v2433_v7, %v2383_v53  ;;  %v2966_v16 = vsel %vm2805_vm6, %v2964_v24, %v2965_v62  ;;  %v3117_v18 = vrot.slane %v3083_v63, 5 }
  0xf5   : > { %v3234_v13 = vmul.f32 %v9974_v49, %v9591_v25  ;;  %v3192_v22 = vrot.slane %v3158_v59, 5  ;;  %v3193_v43 = vrot.slane %v3159_v46, 5  ;;  %v3235_v9 = vmul.f32 %v9591_v25, %v9964_v50 }
  0xf6   : > { %v3310_v40 = vmul.f32 %v9789_v57, %v9595_v0  ;;  %v2535_v21 = vadd.f32 %v2509_v34, %v2459_v23  ;;  %v3042_v2 = vsel %vm2805_vm6, %v3040_v19, %v3041_v31  ;;  %v3311_v7 = vmul.f32 %v9927_v51, %v9595_v0 }
  0xf7   : > { %v3268_v58 = vrot.slane %v3234_v13, 5  ;;  %v3118_v63 = vsel %vm2805_vm6, %v3116_v32, %v3117_v18  ;;  %v3269_v24 = vrot.slane %v3235_v9, 5  ;;  %v3387_v53 = vmul.f32 %v9797_v36, %v9612_v27 }
  0xf8   : > { %v3345_v62 = vrot.slane %v3310_v40, 6  ;;  %v2611_v59 = vadd.f32 %v2585_v8, %v2535_v21  ;;  %v3346_v46 = vrot.slane %v3311_v7, 6  ;;  %v3388_v25 = vmul.f32 %v9937_v6, %v9612_v27 }
  0xf9   : > { %v3463_v57 = vmul.f32 %v9803_v39, %v9623_v4  ;;  %v3194_v34 = vsel %vm2805_vm6, %v3192_v22, %v3193_v43  ;;  %v3421_v19 = vrot.slane %v3387_v53, 6  ;;  %v3464_v51 = vmul.f32 %v9944_v14, %v9623_v4 }
  0xfa   : > { %v3539_v31 = vmul.f32 %v9811_v5, %v9627_v30  ;;  %v2687_v32 = vadd.f32 %v2661_v41, %v2611_v59  ;;  %v10151_v23 = vsel %vm2805_vm6, %v3268_v58, %v3269_v24  ;;  %v10154_v8 = vsel %vm3338_vm7, %v3345_v62, %v3346_v46 }
  0xfb   : > { %v3422_v18 = vrot.slane %v3388_v25, 6  ;;  %v3497_v13 = vrot.slane %v3463_v57, 6  ;;  %v3498_v9 = vrot.slane %v3464_v51, 6  ;;  %v3540_v22 = vmul.f32 %v9951_v55, %v9627_v30 }
  0xfc   : > { %v3615_v43 = vmul.f32 %v9817_v37, %v9631_v42  ;;  %v2763_v40 = vadd.f32 %v2737_v54, %v2687_v32  ;;  %v3573_v21 = vrot.slane %v3539_v31, 6  ;;  %v3616_v41 = vmul.f32 %v9960_v48, %v9631_v42  ;;  %v10172_v54 = vld [vmem:[%s14271_s1 + $0x30] ss:$0 sm:$0xff] }
  0xfd   : > { %v3691_v58 = vmul.f32 %v9825_v56, %v9653_v20  ;;  %v10165_v7 = vsel %vm3338_vm7, %v3421_v19, %v3422_v18  ;;  %v3574_v25 = vrot.slane %v3540_v22, 6  ;;  %v3692_v62 = vmul.f32 %v9653_v20, %v9691_v29  ;;  %14862 = vst [vmem:[#allocation27_spill] sm:$0xff] %v10172_v54  ;;  %v14865_v20 = vld [vmem:[#allocation23_spill] sm:$0xff] }
  0xfe   : > { %v3649_v24 = vrot.slane %v3615_v43, 6  ;;  %v2840_v53 = vadd.f32 %v2814_v3, %v2763_v40  ;;  %v3650_v59 = vrot.slane %v3616_v41, 6  ;;  %v10176_v57 = vmul.f32 %v10172_v54, %v9974_v49 }
  0xff   : > { %v3725_v46 = vrot.slane %v3691_v58, 6  ;;  %v10179_v19 = vsel %vm3338_vm7, %v3497_v13, %v3498_v9  ;;  %v3726_v51 = vrot.slane %v3692_v62, 6  ;;  %v10183_v31 = vmul.f32 %v10172_v54, %v9964_v50 }
 0x100   : > { %v648_v3 = vmul.f32 %v9797_v36, %v14810_v17  ;;  %v2916_v32 = vadd.f32 %v2890_v52, %v2840_v53  ;;  %v10188_v18 = vsel %vm3338_vm7, %v3573_v21, %v3574_v25  ;;  %v10191_v22 = vsel %vm3338_vm7, %v3649_v24, %v3650_v59  ;;  %v14863_v59 = vld [vmem:[#allocation22_spill] sm:$0xff] }
 0x101   : > { %v649_v43 = vmul.f32 %v9937_v6, %v14810_v17  ;;  %v10196_v13 = vsel %vm3338_vm7, %v3725_v46, %v3726_v51  ;;  %v725_v41 = vmul.f32 %v9803_v39, %v9141_v38  ;;  %v726_v21 = vmul.f32 %v9944_v14, %v9141_v38 }
 0x102   : > { %v684_v40 = vrot.slane %v648_v3, 1  ;;  %v2992_v58 = vadd.f32 %v2966_v16, %v2916_v32  ;;  %v801_v25 = vmul.f32 %v9811_v5, %v9157_v45  ;;  %v802_v53 = vmul.f32 %v9951_v55, %v9157_v45 }
 0x103   : > { %v685_v52 = vrot.slane %v649_v43, 1  ;;  %v760_v62 = vrot.slane %v725_v41, 1  ;;  %v877_v46 = vmul.f32 %v9817_v37, %v14863_v59  ;;  %v761_v16 = vrot.slane %v726_v21, 1  ;;  %v14864_v43 = vld [vmem:[#allocation29_spill] sm:$0xff] }
 0x104   : > { %v3068_v51 = vadd.f32 %v3042_v2, %v2992_v58  ;;  %v836_v32 = vrot.slane %v801_v25, 1  ;;  %v837_v38 = vrot.slane %v802_v53, 1  ;;  %v878_v17 = vmul.f32 %v9960_v48, %v14863_v59  ;;  %v10219_v58 = vld [vmem:[#allocation2 + $0x98] sm:$0x3f] }
 0x105   : > { %v686_v3 = vsel %vm674_vm2, %v684_v40, %v685_v52  ;;  %v912_v54 = vrot.slane %v877_v46, 1  ;;  %v762_v41 = vsel %vm674_vm2, %v760_v62, %v761_v16  ;;  %v953_v45 = vmul.f32 %v9825_v56, %v14865_v20 }
 0x106   : > { %v710_v9 = vadd.f32 %v686_v3, %v14864_v43  ;;  %v3144_v24 = vadd.f32 %v3118_v63, %v3068_v51  ;;  %v954_v2 = vmul.f32 %v14865_v20, %v9691_v29  ;;  %v838_v52 = vsel %vm674_vm2, %v836_v32, %v837_v38  ;;  %v10227_v29 = vld [vmem:[#allocation2 + $0x90] sm:$0xff] }
 0x107   : > { %v913_v21 = vrot.slane %v878_v17, 1  ;;  %v1029_v25 = vmul.f32 %v9974_v49, %v9333_v47  ;;  %v988_v46 = vrot.slane %v953_v45, 1  ;;  %v1030_v62 = vmul.f32 %v9333_v47, %v9964_v50 }
 0x108   : > { %v786_v40 = vadd.f32 %v762_v41, %v710_v9  ;;  %v3220_v53 = vadd.f32 %v3194_v34, %v3144_v24  ;;  %v989_v63 = vrot.slane %v954_v2, 1  ;;  %v1105_v9 = vmul.f32 %v10227_v29, %v9338_v60 }
 0x109   : > { %v914_v3 = vsel %vm674_vm2, %v912_v54, %v913_v21  ;;  %v1064_v16 = vrot.slane %v1029_v25, 1  ;;  %v1065_v32 = vrot.slane %v1030_v62, 1  ;;  %v1106_v45 = vmul.f32 %v9338_v60, %v10219_v58 }
 0x10a   : > { %v862_v51 = vadd.f32 %v838_v52, %v786_v40  ;;  %v3296_v38 = vadd.f32 %v10151_v23, %v3220_v53  ;;  %v990_v17 = vsel %vm674_vm2, %v988_v46, %v989_v63  ;;  %v1140_v24 = vrot.slane %v1105_v9, 1 }
 0x10b   : > { %v1181_v43 = vmul.f32 %v9797_v36, %v9342_v15  ;;  %v1182_v54 = vmul.f32 %v9937_v6, %v9342_v15  ;;  %v1066_v2 = vsel %vm674_vm2, %v1064_v16, %v1065_v32  ;;  %v1141_v40 = vrot.slane %v1106_v45, 1 }
 0x10c   : > { %v938_v34 = vadd.f32 %v914_v3, %v862_v51  ;;  %v3373_v41 = vadd.f32 %v10154_v8, %v3296_v38  ;;  %v1258_v23 = vmul.f32 %v9803_v39, %v14812_v12  ;;  %v1259_v53 = vmul.f32 %v9944_v14, %v14812_v12 }
 0x10d   : > { %v1217_v21 = vrot.slane %v1181_v43, 2  ;;  %v1218_v25 = vrot.slane %v1182_v54, 2  ;;  %v1142_v63 = vsel %vm674_vm2, %v1140_v24, %v1141_v40  ;;  %v1334_v8 = vmul.f32 %v9811_v5, %v14813_v28  ;;  %v10261_v40 = vld [vmem:[#allocation2 + $0x78] sm:$0x3f] }
 0x10e   : > { %v1014_v52 = vadd.f32 %v990_v17, %v938_v34  ;;  %v3449_v46 = vadd.f32 %v10165_v7, %v3373_v41  ;;  %v1293_v62 = vrot.slane %v1258_v23, 2  ;;  %v1294_v16 = vrot.slane %v1259_v53, 2 }
 0x10f   : > { %v1219_v3 = vsel %vm1207_vm3, %v1217_v21, %v1218_v25  ;;  %v1335_v9 = vmul.f32 %v9951_v55, %v14813_v28  ;;  %v1369_v17 = vrot.slane %v1334_v8, 2  ;;  %v1410_v32 = vmul.f32 %v9817_v37, %v14840_v1 }
 0x110   : > { %v1090_v51 = vadd.f32 %v1066_v2, %v1014_v52  ;;  %v3525_v38 = vadd.f32 %v10179_v19, %v3449_v46  ;;  %v1411_v7 = vmul.f32 %v9960_v48, %v14840_v1  ;;  %v1295_v34 = vsel %vm1207_vm3, %v1293_v62, %v1294_v16 }
 0x111   : > { %v1370_v24 = vrot.slane %v1335_v9, 2  ;;  %v1486_v43 = vmul.f32 %v9825_v56, %v14842_v26  ;;  %v1445_v41 = vrot.slane %v1410_v32, 2  ;;  %v1487_v19 = vmul.f32 %v10261_v40, %v14842_v26  ;;  %v14869_v32 = vld [vmem:[#allocation36_spill] sm:$0xff] }
 0x112   : > { %v1166_v45 = vadd.f32 %v1142_v63, %v1090_v51  ;;  %v3601_v54 = vadd.f32 %v10188_v18, %v3525_v38  ;;  %v1446_v2 = vrot.slane %v1411_v7, 2  ;;  %v14866_v23 = vrot.slane %v10183_v31, 6  ;;  %v14868_v31 = vld [vmem:[#allocation35_spill] sm:$0xff] }
 0x113   : > { %v14867_v52 = vrot.slane %v10176_v57, 6  ;;  %v1371_v53 = vsel %vm1207_vm3, %v1369_v17, %v1370_v24  ;;  %v1562_v46 = vmul.f32 %v9974_v49, %v14843_v10  ;;  %v1521_v63 = vrot.slane %v1486_v43, 2 }
 0x114   : > { %v1243_v25 = vadd.f32 %v1219_v3, %v1166_v45  ;;  %v3677_v18 = vadd.f32 %v10191_v22, %v3601_v54  ;;  %v1522_v62 = vrot.slane %v1487_v19, 2  ;;  %v1563_v8 = vmul.f32 %v14843_v10, %v9964_v50 }
 0x115   : > { %v3803_v21 = vsel %vm3338_vm7, %v14867_v52, %v14866_v23  ;;  %v1597_v16 = vrot.slane %v1562_v46, 2  ;;  %v1638_v57 = vmul.f32 %v10227_v29, %v14868_v31  ;;  %v1639_v3 = vmul.f32 %v14868_v31, %v10219_v58  ;;  %v14871_v23 = vld [vmem:[#allocation37_spill] sm:$0xff]  ;;  %v14872_v46 = vld [vmem:[#allocation38_spill] sm:$0xff] }
 0x116   : > { %v1319_v51 = vadd.f32 %v1295_v34, %v1243_v25  ;;  %v3753_v9 = vadd.f32 %v10196_v13, %v3677_v18  ;;  %v1447_v38 = vsel %vm1207_vm3, %v1445_v41, %v1446_v2  ;;  %v1598_v17 = vrot.slane %v1563_v8, 2 }
 0x117   : > { %v1714_v22 = vmul.f32 %v9797_v36, %v14869_v32  ;;  %v1673_v45 = vrot.slane %v1638_v57, 2  ;;  %v1674_v24 = vrot.slane %v1639_v3, 2  ;;  %v1715_v34 = vmul.f32 %v9937_v6, %v14869_v32 }
 0x118   : > { %v1395_v7 = vadd.f32 %v1371_v53, %v1319_v51  ;;  %v10286_v43 = vadd.f32 %v3803_v21, %v3753_v9  ;;  %v1523_v54 = vsel %vm1207_vm3, %v1521_v63, %v1522_v62  ;;  %v1790_v13 = vmul.f32 %v9803_v39, %v14871_v23  ;;  %v14873_v63 = vld [vmem:[#allocation39_spill] sm:$0xff] }
 0x119   : > { %v1749_v19 = vrot.slane %v1714_v22, 3  ;;  %v1599_v41 = vsel %vm1207_vm3, %v1597_v16, %v1598_v17  ;;  %v1750_v2 = vrot.slane %v1715_v34, 3  ;;  %v1791_v25 = vmul.f32 %v9944_v14, %v14871_v23  ;;  %v14874_v17 = vld [vmem:[#allocation40_spill] sm:$0xff] }
 0x11a   : > { %14870 = vst [vmem:[#allocation28_spill] sm:$0xff] %v10286_v43  ;;  %v1471_v52 = vadd.f32 %v1447_v38, %v1395_v7  ;;  %8624 = vmatprep.mubr.msk.f32.mxu0 %vm361_vm0, %v10286_v43  ;;  %v1825_v53 = vrot.slane %v1790_v13, 3  ;;  %v1866_v21 = vmul.f32 %v9811_v5, %v14872_v46  ;;  %v1867_v18 = vmul.f32 %v9951_v55, %v14872_v46 }
 0x11b   : > { %v1942_v62 = vmul.f32 %v9817_v37, %v14873_v63  ;;  %v1675_v51 = vsel %vm1207_vm3, %v1673_v45, %v1674_v24  ;;  %v1826_v16 = vrot.slane %v1791_v25, 3  ;;  %v1943_v57 = vmul.f32 %v9960_v48, %v14873_v63  ;;  %v14875_v24 = vld [vmem:[#allocation41_spill] sm:$0xff] }
 0x11c   : > { %v1547_v8 = vadd.f32 %v1523_v54, %v1471_v52  ;;  %v1751_v3 = vsel %vm452_vm4, %v1749_v19, %v1750_v2  ;;  %v1901_v9 = vrot.slane %v1866_v21, 3  ;;  %v1902_v38 = vrot.slane %v1867_v18, 3  ;;  %v14876_v18 = vld [vmem:[#allocation42_spill] sm:$0xff] }
 0x11d   : > { %v2018_v22 = vmul.f32 %v9825_v56, %v14874_v17  ;;  %v1977_v34 = vrot.slane %v1942_v62, 3  ;;  %v1978_v13 = vrot.slane %v1943_v57, 3  ;;  %v2019_v43 = vmul.f32 %v10261_v40, %v14874_v17 }
 0x11e   : > { %v1623_v7 = vadd.f32 %v1599_v41, %v1547_v8  ;;  %v1827_v54 = vsel %vm452_vm4, %v1825_v53, %v1826_v16  ;;  %v2094_v52 = vmul.f32 %v9974_v49, %v14875_v24  ;;  %v2095_v19 = vmul.f32 %v14875_v24, %v9964_v50  ;;  %v14877_v53 = vld [vmem:[#allocation43_spill] sm:$0xff] }
 0x11f   : > { %v2053_v45 = vrot.slane %v2018_v22, 3  ;;  %v1903_v25 = vsel %vm452_vm4, %v1901_v9, %v1902_v38  ;;  %v2054_v21 = vrot.slane %v2019_v43, 3  ;;  %v2170_v41 = vmul.f32 %v10227_v29, %v14876_v18 }
 0x120   : > { %v1699_v2 = vadd.f32 %v1675_v51, %v1623_v7  ;;  %v2129_v62 = vrot.slane %v2094_v52, 3  ;;  %v2130_v8 = vrot.slane %v2095_v19, 3  ;;  %v2171_v57 = vmul.f32 %v14876_v18, %v10219_v58  ;;  %v14878_v7 = vld [vmem:[#allocation44_spill] sm:$0xff] }
 0x121   : > { %v2246_v16 = vmul.f32 %v9797_v36, %v14877_v53  ;;  %v1979_v17 = vsel %vm452_vm4, %v1977_v34, %v1978_v13  ;;  %v2205_v63 = vrot.slane %v2170_v41, 3  ;;  %v2247_v51 = vmul.f32 %v9937_v6, %v14877_v53  ;;  %v14879_v36 = vld [vmem:[#allocation45_spill] sm:$0xff] }
 0x122   : > { %v1775_v22 = vadd.f32 %v1751_v3, %v1699_v2  ;;  %v2055_v43 = vsel %vm452_vm4, %v2053_v45, %v2054_v21  ;;  %v2206_v9 = vrot.slane %v2171_v57, 3  ;;  %v2323_v52 = vmul.f32 %v9803_v39, %v14878_v7  ;;  %v14880_v45 = vld [vmem:[#allocation46_spill] sm:$0xff] }
 0x123   : > { %v2282_v38 = vrot.slane %v2246_v16, 4  ;;  %v2283_v24 = vrot.slane %v2247_v51, 4  ;;  %v2324_v18 = vmul.f32 %v9944_v14, %v14878_v7  ;;  %v2399_v3 = vmul.f32 %v9811_v5, %v14879_v36  ;;  %v14881_v51 = vld [vmem:[#allocation47_spill] sm:$0xff] }
 0x124   : > { %v1851_v19 = vadd.f32 %v1827_v54, %v1775_v22  ;;  %v2131_v34 = vsel %vm452_vm4, %v2129_v62, %v2130_v8  ;;  %v2358_v13 = vrot.slane %v2323_v52, 4  ;;  %v2400_v2 = vmul.f32 %v9951_v55, %v14879_v36 }
 0x125   : > { %v2475_v21 = vmul.f32 %v9817_v37, %v14880_v45  ;;  %v2207_v39 = vsel %vm452_vm4, %v2205_v63, %v2206_v9  ;;  %v2359_v54 = vrot.slane %v2324_v18, 4  ;;  %v2434_v57 = vrot.slane %v2399_v3, 4 }
 0x126   : > { %v1927_v41 = vadd.f32 %v1903_v25, %v1851_v19  ;;  %v2284_v16 = vsel %vm2272_vm5, %v2282_v38, %v2283_v24  ;;  %v2435_v22 = vrot.slane %v2400_v2, 4  ;;  %v2476_v5 = vmul.f32 %v9960_v48, %v14880_v45 }
 0x127   : > { %v2551_v62 = vmul.f32 %v9825_v56, %v14881_v51  ;;  %v2510_v52 = vrot.slane %v2475_v21, 4  ;;  %v2552_v36 = vmul.f32 %v10261_v40, %v14881_v51  ;;  %v2627_v37 = vmul.f32 %v9974_v49, %v14858_v44  ;;  %v14882_v56 = vld [vmem:[#allocation49_spill] sm:$0xff] }
 0x128   : > { %v2003_v8 = vadd.f32 %v1979_v17, %v1927_v41  ;;  %v2360_v63 = vsel %vm2272_vm5, %v2358_v13, %v2359_v54  ;;  %v2511_v25 = vrot.slane %v2476_v5, 4  ;;  %v2628_v24 = vmul.f32 %v14858_v44, %v9964_v50  ;;  %v8816_v41 = vld [vmem:[#allocation2 + $0x30] sm:$0xff] }
 0x129   : > { %v2586_v18 = vrot.slane %v2551_v62, 4  ;;  %v2436_v38 = vsel %vm2272_vm5, %v2434_v57, %v2435_v22  ;;  %v2587_v19 = vrot.slane %v2552_v36, 4  ;;  %v2703_v17 = vmul.f32 %v10227_v29, %v14882_v56 }
 0x12a   : > { %v2079_v9 = vadd.f32 %v2055_v43, %v2003_v8  ;;  %v2662_v3 = vrot.slane %v2627_v37, 4  ;;  %v2663_v2 = vrot.slane %v2628_v24, 4  ;;  %v2704_v21 = vmul.f32 %v14882_v56, %v10219_v58  ;;  %v10360_v8 = vld [vmem:[#allocation2 + $0x40] sm:$0xff] }
 0x12b   : > { %v2779_v13 = vmul.f32 %v8816_v41, %v14860_v33  ;;  %v2512_v5 = vsel %vm2272_vm5, %v2510_v52, %v2511_v25  ;;  %v2738_v62 = vrot.slane %v2703_v17, 4  ;;  %v2780_v43 = vmul.f32 %v9937_v6, %v14860_v33  ;;  %v14883_v37 = vld [vmem:[#allocation51_spill] sm:$0xff]  ;;  %v14884_v52 = vld [vmem:[#allocation52_spill] sm:$0xff] }
 0x12c   : > { %v2155_v54 = vadd.f32 %v2131_v34, %v2079_v9  ;;  %v2588_v36 = vsel %vm2272_vm5, %v2586_v18, %v2587_v19  ;;  %v2739_v57 = vrot.slane %v2704_v21, 4  ;;  %v2856_v24 = vmul.f32 %v10360_v8, %v14883_v37  ;;  %v10366_v9 = vld [vmem:[#allocation2 + $0x50] sm:$0xff]  ;;  %v10373_v21 = vld [vmem:[#allocation2 + $0x60] sm:$0xff] }
 0x12d   : > { %v2815_v22 = vrot.slane %v2779_v13, 5  ;;  %v2816_v44 = vrot.slane %v2780_v43, 5  ;;  %v2857_v34 = vmul.f32 %v9944_v14, %v14883_v37  ;;  %v2932_v25 = vmul.f32 %v10366_v9, %v14884_v52 }
 0x12e   : > { %v2231_v56 = vadd.f32 %v2207_v39, %v2155_v54  ;;  %v2664_v17 = vsel %vm2272_vm5, %v2662_v3, %v2663_v2  ;;  %v2891_v18 = vrot.slane %v2856_v24, 5  ;;  %v2933_v19 = vmul.f32 %v9951_v55, %v14884_v52  ;;  %v10381_v2 = vld [vmem:[#allocation2 + $0x70] sm:$0xff] }
 0x12f   : > { %v3008_v39 = vmul.f32 %v10373_v21, %v9564_v11  ;;  %v2740_v54 = vsel %vm2272_vm5, %v2738_v62, %v2739_v57  ;;  %v2892_v43 = vrot.slane %v2857_v34, 5  ;;  %v2967_v37 = vrot.slane %v2932_v25, 5 }
 0x130   : > { %v2308_v13 = vadd.f32 %v2284_v16, %v2231_v56  ;;  %v2817_v33 = vsel %vm2805_vm6, %v2815_v22, %v2816_v44  ;;  %v2968_v51 = vrot.slane %v2933_v19, 5  ;;  %v3009_v3 = vmul.f32 %v9960_v48, %v9564_v11  ;;  %v14885_v11 = vld [vmem:[#allocation56_spill] sm:$0xff] }
 0x131   : > { %v3084_v24 = vmul.f32 %v10381_v2, %v14861_v35  ;;  %v3043_v45 = vrot.slane %v3008_v39, 5  ;;  %v3085_v16 = vmul.f32 %v10261_v40, %v14861_v35  ;;  %v3160_v56 = vmul.f32 %v9974_v49, %v9585_v61 }
 0x132   : > { %v2384_v52 = vadd.f32 %v2360_v63, %v2308_v13  ;;  %v2893_v62 = vsel %vm2805_vm6, %v2891_v18, %v2892_v43  ;;  %v3044_v44 = vrot.slane %v3009_v3, 5  ;;  %v3161_v22 = vmul.f32 %v9585_v61, %v9964_v50 }
 0x133   : > { %v3119_v57 = vrot.slane %v3084_v24, 5  ;;  %v2969_v25 = vsel %vm2805_vm6, %v2967_v37, %v2968_v51  ;;  %v3120_v19 = vrot.slane %v3085_v16, 5  ;;  %v3236_v63 = vmul.f32 %v10227_v29, %v14885_v11 }
 0x134   : > { %v2460_v34 = vadd.f32 %v2436_v38, %v2384_v52  ;;  %v3195_v39 = vrot.slane %v3160_v56, 5  ;;  %v3196_v13 = vrot.slane %v3161_v22, 5  ;;  %v3237_v35 = vmul.f32 %v14885_v11, %v10219_v58 }
 0x135   : > { %v3312_v7 = vmul.f32 %v8816_v41, %v9595_v0  ;;  %v3045_v43 = vsel %vm2805_vm6, %v3043_v45, %v3044_v44  ;;  %v3271_v3 = vrot.slane %v3236_v63, 5  ;;  %v3313_v38 = vmul.f32 %v9937_v6, %v9595_v0 }
 0x136   : > { %v2536_v18 = vadd.f32 %v2512_v5, %v2460_v34  ;;  %v3121_v51 = vsel %vm2805_vm6, %v3119_v57, %v3120_v19  ;;  %v3272_v37 = vrot.slane %v3237_v35, 5  ;;  %v3389_v24 = vmul.f32 %v10360_v8, %v9612_v27 }
 0x137   : > { %v3348_v52 = vrot.slane %v3312_v7, 6  ;;  %v3349_v56 = vrot.slane %v3313_v38, 6  ;;  %v3390_v22 = vmul.f32 %v9944_v14, %v9612_v27  ;;  %v3465_v41 = vmul.f32 %v10366_v9, %v9623_v4  ;;  %v14886_v38 = vld [vmem:[#allocation62_spill] sm:$0xff] }
 0x138   : > { %v2612_v16 = vadd.f32 %v2588_v36, %v2536_v18  ;;  %v3197_v45 = vsel %vm2805_vm6, %v3195_v39, %v3196_v13  ;;  %v3424_v5 = vrot.slane %v3389_v24, 6  ;;  %v3466_v6 = vmul.f32 %v9951_v55, %v9623_v4 }
 0x139   : > { %v3541_v35 = vmul.f32 %v10373_v21, %v9627_v30  ;;  %v10414_v44 = vsel %vm2805_vm6, %v3271_v3, %v3272_v37  ;;  %v10417_v36 = vsel %vm3338_vm7, %v3348_v52, %v3349_v56  ;;  %v3425_v57 = vrot.slane %v3390_v22, 6 }
 0x13a   : > { %v2688_v7 = vadd.f32 %v2664_v17, %v2612_v16  ;;  %v3500_v34 = vrot.slane %v3465_v41, 6  ;;  %v3501_v19 = vrot.slane %v3466_v6, 6  ;;  %v3542_v63 = vmul.f32 %v9960_v48, %v9627_v30  ;;  %v14887_v6 = vld [vmem:[#allocation27_spill] sm:$0xff] }
 0x13b   : > { %v3617_v39 = vmul.f32 %v10381_v2, %v9631_v42  ;;  %v3576_v18 = vrot.slane %v3541_v35, 6  ;;  %v3618_v17 = vmul.f32 %v10261_v40, %v9631_v42  ;;  %v3693_v3 = vmul.f32 %v9974_v49, %v14886_v38 }
 0x13c   : > { %v2764_v13 = vadd.f32 %v2740_v54, %v2688_v7  ;;  %v10428_v37 = vsel %vm3338_vm7, %v3424_v5, %v3425_v57  ;;  %v3577_v52 = vrot.slane %v3542_v63, 6  ;;  %v3694_v16 = vmul.f32 %v14886_v38, %v9964_v50  ;;  %v14888_v57 = vld [vmem:[#allocation20_spill] sm:$0xff] }
 0x13d   : > { %v3652_v24 = vrot.slane %v3617_v39, 6  ;;  %v3653_v22 = vrot.slane %v3618_v17, 6  ;;  %v3728_v41 = vrot.slane %v3693_v3, 6  ;;  %v10434_v54 = vmul.f32 %v10227_v29, %v14887_v6 }
 0x13e   : > { %v2841_v56 = vadd.f32 %v2817_v33, %v2764_v13  ;;  %v10437_v35 = vsel %vm3338_vm7, %v3500_v34, %v3501_v19  ;;  %v3729_v7 = vrot.slane %v3694_v16, 6  ;;  %v10441_v5 = vmul.f32 %v14887_v6, %v10219_v58  ;;  %v14889_v16 = vld [vmem:[#allocation19_spill] sm:$0xff] }
 0x13f   : > { %v650_v63 = vmul.f32 %v10360_v8, %v14888_v57  ;;  %v10446_v33 = vsel %vm3338_vm7, %v3576_v18, %v3577_v52  ;;  %v10449_v13 = vsel %vm3338_vm7, %v3652_v24, %v3653_v22  ;;  %v651_v17 = vmul.f32 %v9944_v14, %v14888_v57  ;;  %v14890_v52 = vld [vmem:[#allocation21_spill] sm:$0xff] }
 0x140   : > { %v2917_v39 = vadd.f32 %v2893_v62, %v2841_v56  ;;  %v10454_v34 = vsel %vm3338_vm7, %v3728_v41, %v3729_v7  ;;  %v727_v6 = vmul.f32 %v10366_v9, %v14889_v16  ;;  %v728_v18 = vmul.f32 %v9951_v55, %v14889_v16 }
 0x141   : > { %v687_v3 = vrot.slane %v650_v63, 1  ;;  %v688_v62 = vrot.slane %v651_v17, 1  ;;  %v803_v24 = vmul.f32 %v10373_v21, %v14890_v52  ;;  %v804_v22 = vmul.f32 %v9960_v48, %v14890_v52  ;;  %v14891_v17 = vld [vmem:[#allocation31_spill] sm:$0xff] }
 0x142   : > { %v2993_v38 = vadd.f32 %v2969_v25, %v2917_v39  ;;  %v763_v14 = vrot.slane %v727_v6, 1  ;;  %v879_v41 = vmul.f32 %v10381_v2, %v14863_v59  ;;  %v764_v25 = vrot.slane %v728_v18, 1 }
 0x143   : > { %v689_v63 = vsel %vm674_vm2, %v687_v3, %v688_v62  ;;  %v839_v39 = vrot.slane %v803_v24, 1  ;;  %v840_v55 = vrot.slane %v804_v22, 1  ;;  %v880_v16 = vmul.f32 %v10261_v40, %v14863_v59 }
 0x144   : > { %v3069_v7 = vadd.f32 %v3045_v43, %v2993_v38  ;;  %v711_v19 = vadd.f32 %v689_v63, %v14891_v17  ;;  %v915_v57 = vrot.slane %v879_v41, 1  ;;  %v765_v6 = vsel %vm674_vm2, %v763_v14, %v764_v25  ;;  %v10477_v38 = vld [vmem:[#allocation2 + $0xa8] sm:$0x3f] }
 0x145   : > { %v955_v48 = vmul.f32 %v9974_v49, %v14865_v20  ;;  %v956_v43 = vmul.f32 %v14865_v20, %v9964_v50  ;;  %v841_v62 = vsel %vm674_vm2, %v839_v39, %v840_v55  ;;  %v916_v18 = vrot.slane %v880_v16, 1  ;;  %v10485_v50 = vld [vmem:[#allocation2 + $0xa0] sm:$0xff] }
 0x146   : > { %v3145_v56 = vadd.f32 %v3121_v51, %v3069_v7  ;;  %v787_v3 = vadd.f32 %v765_v6, %v711_v19  ;;  %v1031_v24 = vmul.f32 %v10227_v29, %v9333_v47  ;;  %v1032_v14 = vmul.f32 %v9333_v47, %v10219_v58 }
 0x147   : > { %v991_v41 = vrot.slane %v955_v48, 1  ;;  %v992_v51 = vrot.slane %v956_v43, 1  ;;  %v917_v49 = vsel %vm674_vm2, %v915_v57, %v916_v18  ;;  %v1107_v19 = vmul.f32 %v10485_v50, %v9338_v60  ;;  %v10495_v57 = vld [vmem:[#allocation2 + $0x48] sm:$0x3f] }
 0x148   : > { %v3221_v22 = vadd.f32 %v3197_v45, %v3145_v56  ;;  %v863_v7 = vadd.f32 %v841_v62, %v787_v3  ;;  %v1067_v63 = vrot.slane %v1031_v24, 1  ;;  %v1068_v39 = vrot.slane %v1032_v14, 1 }
 0x149   : > { %v993_v25 = vsel %vm674_vm2, %v991_v41, %v992_v51  ;;  %v1108_v45 = vmul.f32 %v9338_v60, %v10477_v38  ;;  %v1143_v17 = vrot.slane %v1107_v19, 1  ;;  %v1183_v55 = vmul.f32 %v10360_v8, %v9342_v15 }
 0x14a   : > { %v3297_v16 = vadd.f32 %v10414_v44, %v3221_v22  ;;  %v939_v56 = vadd.f32 %v917_v49, %v863_v7  ;;  %v1184_v6 = vmul.f32 %v10495_v57, %v9342_v15  ;;  %v1069_v44 = vsel %vm674_vm2, %v1067_v63, %v1068_v39  ;;  %v10503_v22 = vld [vmem:[#allocation2 + $0x58] sm:$0x3f] }
 0x14b   : > { %v1144_v43 = vrot.slane %v1108_v45, 1  ;;  %v1260_v3 = vmul.f32 %v10366_v9, %v14812_v12  ;;  %v1220_v18 = vrot.slane %v1183_v55, 2  ;;  %v1261_v41 = vmul.f32 %v10503_v22, %v14812_v12 }
 0x14c   : > { %v3374_v48 = vadd.f32 %v10417_v36, %v3297_v16  ;;  %v1015_v62 = vadd.f32 %v993_v25, %v939_v56  ;;  %v1221_v24 = vrot.slane %v1184_v6, 2  ;;  %v1336_v36 = vmul.f32 %v10373_v21, %v14813_v28  ;;  %v10512_v16 = vld [vmem:[#allocation2 + $0x68] sm:$0x3f] }
 0x14d   : > { %v1145_v14 = vsel %vm674_vm2, %v1143_v17, %v1144_v43  ;;  %v1296_v7 = vrot.slane %v1260_v3, 2  ;;  %v1297_v19 = vrot.slane %v1261_v41, 2  ;;  %v1337_v25 = vmul.f32 %v10512_v16, %v14813_v28 }
 0x14e   : > { %v3450_v51 = vadd.f32 %v10428_v37, %v3374_v48  ;;  %v1091_v49 = vadd.f32 %v1069_v44, %v1015_v62  ;;  %v1222_v63 = vsel %vm1207_vm3, %v1220_v18, %v1221_v24  ;;  %v1372_v45 = vrot.slane %v1336_v36, 2  ;;  %v10522_v48 = vld [vmem:[#allocation2 + $0x80] sm:$0xff]  ;;  %v10527_v62 = vld [vmem:[#allocation2 + $0x88] sm:$0x3f] }
 0x14f   : > { %v1412_v37 = vmul.f32 %v10381_v2, %v14840_v1  ;;  %v1413_v56 = vmul.f32 %v10261_v40, %v14840_v1  ;;  %v1298_v55 = vsel %vm1207_vm3, %v1296_v7, %v1297_v19  ;;  %v1373_v6 = vrot.slane %v1337_v25, 2 }
 0x150   : > { %v3526_v39 = vadd.f32 %v10437_v35, %v3450_v51  ;;  %v1167_v17 = vadd.f32 %v1145_v14, %v1091_v49  ;;  %v1488_v44 = vmul.f32 %v10522_v48, %v14842_v26  ;;  %v1489_v18 = vmul.f32 %v10527_v62, %v14842_v26 }
 0x151   : > { %v1448_v3 = vrot.slane %v1412_v37, 2  ;;  %v1449_v35 = vrot.slane %v1413_v56, 2  ;;  %v14892_v24 = vrot.slane %v10441_v5, 6  ;;  %v14893_v41 = vrot.slane %v10434_v54, 6 }
 0x152   : > { %v3602_v43 = vadd.f32 %v10446_v33, %v3526_v39  ;;  %v1244_v14 = vadd.f32 %v1222_v63, %v1167_v17  ;;  %v1374_v7 = vsel %vm1207_vm3, %v1372_v45, %v1373_v6  ;;  %v1564_v36 = vmul.f32 %v10227_v29, %v14843_v10 }
 0x153   : > { %v3806_v51 = vsel %vm3338_vm7, %v14893_v41, %v14892_v24  ;;  %v1524_v49 = vrot.slane %v1488_v44, 2  ;;  %v1525_v19 = vrot.slane %v1489_v18, 2  ;;  %v1565_v25 = vmul.f32 %v14843_v10, %v10219_v58 }
 0x154   : > { %v3678_v33 = vadd.f32 %v10449_v13, %v3602_v43  ;;  %v1320_v39 = vadd.f32 %v1298_v55, %v1244_v14  ;;  %v1600_v37 = vrot.slane %v1564_v36, 2  ;;  %v1640_v54 = vmul.f32 %v10485_v50, %v14868_v31 }
 0x155   : > { %v1641_v5 = vmul.f32 %v14868_v31, %v10477_v38  ;;  %v1450_v45 = vsel %vm1207_vm3, %v1448_v3, %v1449_v35  ;;  %v1601_v56 = vrot.slane %v1565_v25, 2  ;;  %v1716_v13 = vmul.f32 %v10360_v8, %v14869_v32 }
 0x156   : > { %v3754_v63 = vadd.f32 %v10454_v34, %v3678_v33  ;;  %v1396_v17 = vadd.f32 %v1374_v7, %v1320_v39  ;;  %v1676_v6 = vrot.slane %v1640_v54, 2  ;;  %v1717_v55 = vmul.f32 %v10495_v57, %v14869_v32  ;;  %v14895_v33 = vld [vmem:[#allocation39_spill] sm:$0xff] }
 0x157   : > { %v1677_v44 = vrot.slane %v1641_v5, 2  ;;  %v1526_v18 = vsel %vm1207_vm3, %v1524_v49, %v1525_v19  ;;  %v1752_v24 = vrot.slane %v1716_v13, 3  ;;  %v1792_v34 = vmul.f32 %v10366_v9, %v14871_v23 }
 0x158   : > { %v10552_v43 = vadd.f32 %v3806_v51, %v3754_v63  ;;  %v1472_v41 = vadd.f32 %v1450_v45, %v1396_v17  ;;  %v1602_v3 = vsel %vm1207_vm3, %v1600_v37, %v1601_v56  ;;  %v1753_v35 = vrot.slane %v1717_v55, 3  ;;  %v14896_v45 = vld [vmem:[#allocation40_spill] sm:$0xff] }
 0x159   : > { %v1793_v14 = vmul.f32 %v10503_v22, %v14871_v23  ;;  %v1828_v7 = vrot.slane %v1792_v34, 3  ;;  %v1868_v51 = vmul.f32 %v10373_v21, %v14872_v46  ;;  %v1869_v36 = vmul.f32 %v10512_v16, %v14872_v46  ;;  %v14907_v46 = vld [vmem:[#allocation52_spill] sm:$0xff] }
 0x15a   : > { %14894 = vst [vmem:[#allocation33_spill] sm:$0xff] %v10552_v43  ;;  %8625 = vmatmul.mubr.msk.f32.gmra.mrb[2].mxu0 %vm361_vm0, %v10552_v43  ;;  %v1944_v49 = vmul.f32 %v10381_v2, %v14895_v33  ;;  %v1548_v19 = vadd.f32 %v1526_v18, %v1472_v41  ;;  %v1678_v25 = vsel %vm1207_vm3, %v1676_v6, %v1677_v44  ;;  %v14897_v44 = vld [vmem:[#allocation41_spill] sm:$0xff] }
 0x15b   : > { %v1829_v39 = vrot.slane %v1793_v14, 3  ;;  %v1945_v37 = vmul.f32 %v10261_v40, %v14895_v33  ;;  %v1754_v54 = vsel %vm452_vm4, %v1752_v24, %v1753_v35  ;;  %v1904_v5 = vrot.slane %v1868_v51, 3  ;;  %v14903_v33 = vld [vmem:[#allocation48_spill] sm:$0xff] }
 0x15c   : > { %v1905_v63 = vrot.slane %v1869_v36, 3  ;;  %v2020_v56 = vmul.f32 %v10522_v48, %v14896_v45  ;;  %v1624_v13 = vadd.f32 %v1602_v3, %v1548_v19  ;;  %v1980_v17 = vrot.slane %v1944_v49, 3  ;;  %v14898_v36 = vld [vmem:[#allocation42_spill] sm:$0xff] }
 0x15d   : > { %v1981_v55 = vrot.slane %v1945_v37, 3  ;;  %v2021_v34 = vmul.f32 %v10527_v62, %v14896_v45  ;;  %v1830_v18 = vsel %vm452_vm4, %v1828_v7, %v1829_v39  ;;  %v2096_v41 = vmul.f32 %v10227_v29, %v14897_v44  ;;  %v14900_v45 = vld [vmem:[#allocation45_spill] sm:$0xff] }
 0x15e   : > { %v2056_v6 = vrot.slane %v2020_v56, 3  ;;  %v2097_v24 = vmul.f32 %v14897_v44, %v10219_v58  ;;  %v1700_v35 = vadd.f32 %v1678_v25, %v1624_v13  ;;  %v1906_v14 = vsel %vm452_vm4, %v1904_v5, %v1905_v63 }
 0x15f   : > { %v2057_v51 = vrot.slane %v2021_v34, 3  ;;  %v2172_v3 = vmul.f32 %v10485_v50, %v14898_v36  ;;  %v2132_v49 = vrot.slane %v2096_v41, 3  ;;  %v2173_v37 = vmul.f32 %v14898_v36, %v10477_v38  ;;  %v14899_v34 = vld [vmem:[#allocation44_spill] sm:$0xff] }
 0x160   : > { %v2133_v19 = vrot.slane %v2097_v24, 3  ;;  %v2248_v7 = vmul.f32 %v10360_v8, %v14877_v53  ;;  %v1776_v39 = vadd.f32 %v1754_v54, %v1700_v35  ;;  %v1982_v56 = vsel %vm452_vm4, %v1980_v17, %v1981_v55 }
 0x161   : > { %v2208_v43 = vrot.slane %v2172_v3, 3  ;;  %v2249_v25 = vmul.f32 %v10495_v57, %v14877_v53  ;;  %v2058_v5 = vsel %vm452_vm4, %v2056_v6, %v2057_v51  ;;  %v2209_v63 = vrot.slane %v2173_v37, 3  ;;  %v14901_v6 = vld [vmem:[#allocation46_spill] sm:$0xff]  ;;  %v14902_v53 = vld [vmem:[#allocation47_spill] sm:$0xff] }
 0x162   : > { %v2285_v13 = vrot.slane %v2248_v7, 4  ;;  %v2325_v41 = vmul.f32 %v10366_v9, %v14899_v34  ;;  %v1852_v24 = vadd.f32 %v1830_v18, %v1776_v39  ;;  %v2326_v36 = vmul.f32 %v10503_v22, %v14899_v34 }
 0x163   : > { %v2286_v44 = vrot.slane %v2249_v25, 4  ;;  %v2401_v54 = vmul.f32 %v10373_v21, %v14900_v45  ;;  %v2134_v17 = vsel %vm452_vm4, %v2132_v49, %v2133_v19  ;;  %v2402_v35 = vmul.f32 %v10512_v16, %v14900_v45 }
 0x164   : > { %v2361_v55 = vrot.slane %v2325_v41, 4  ;;  %v2477_v51 = vmul.f32 %v10381_v2, %v14901_v6  ;;  %v1928_v3 = vadd.f32 %v1906_v14, %v1852_v24  ;;  %v2210_v37 = vsel %vm452_vm4, %v2208_v43, %v2209_v63 }
 0x165   : > { %v2362_v18 = vrot.slane %v2326_v36, 4  ;;  %v2437_v7 = vrot.slane %v2401_v54, 4  ;;  %v2287_v39 = vsel %vm2272_vm5, %v2285_v13, %v2286_v44  ;;  %v2438_v25 = vrot.slane %v2402_v35, 4  ;;  %v14904_v35 = vld [vmem:[#allocation49_spill] sm:$0xff] }
 0x166   : > { %v2478_v34 = vmul.f32 %v10261_v40, %v14901_v6  ;;  %v2553_v49 = vmul.f32 %v10522_v48, %v14902_v53  ;;  %v2004_v19 = vadd.f32 %v1982_v56, %v1928_v3  ;;  %v2513_v41 = vrot.slane %v2477_v51, 4  ;;  %v14905_v6 = vld [vmem:[#allocation50_spill] sm:$0xff] }
 0x167   : > { %v2554_v45 = vmul.f32 %v10527_v62, %v14902_v53  ;;  %v2629_v14 = vmul.f32 %v10227_v29, %v14903_v33  ;;  %v2363_v43 = vsel %vm2272_vm5, %v2361_v55, %v2362_v18  ;;  %v2630_v44 = vmul.f32 %v14903_v33, %v10219_v58 }
 0x168   : > { %v2514_v36 = vrot.slane %v2478_v34, 4  ;;  %v2589_v63 = vrot.slane %v2553_v49, 4  ;;  %v2080_v13 = vadd.f32 %v2058_v5, %v2004_v19  ;;  %v2439_v24 = vsel %vm2272_vm5, %v2437_v7, %v2438_v25  ;;  %v14906_v19 = vld [vmem:[#allocation51_spill] sm:$0xff] }
 0x169   : > { %v2590_v54 = vrot.slane %v2554_v45, 4  ;;  %v2705_v56 = vmul.f32 %v10485_v50, %v14904_v35  ;;  %v2665_v51 = vrot.slane %v2629_v14, 4  ;;  %v2666_v3 = vrot.slane %v2630_v44, 4 }
 0x16a   : > { %v2706_v53 = vmul.f32 %v14904_v35, %v10477_v38  ;;  %v2781_v55 = vmul.f32 %v10360_v8, %v14905_v6  ;;  %v2156_v34 = vadd.f32 %v2134_v17, %v2080_v13  ;;  %v2515_v18 = vsel %vm2272_vm5, %v2513_v41, %v2514_v36 }
 0x16b   : > { %v2741_v49 = vrot.slane %v2705_v56, 4  ;;  %v2782_v5 = vmul.f32 %v10495_v57, %v14905_v6  ;;  %v2591_v45 = vsel %vm2272_vm5, %v2589_v63, %v2590_v54  ;;  %v2858_v14 = vmul.f32 %v10366_v9, %v14906_v19  ;;  %v14908_v63 = vld [vmem:[#allocation53_spill] sm:$0xff]  ;;  %v14909_v6 = vld [vmem:[#allocation54_spill] sm:$0xff] }
 0x16c   : > { %v2742_v7 = vrot.slane %v2706_v53, 4  ;;  %v2818_v25 = vrot.slane %v2781_v55, 5  ;;  %v2232_v44 = vadd.f32 %v2210_v37, %v2156_v34  ;;  %v2859_v35 = vmul.f32 %v10503_v22, %v14906_v19 }
 0x16d   : > { %v2819_v33 = vrot.slane %v2782_v5, 5  ;;  %v2934_v17 = vmul.f32 %v10373_v21, %v14907_v46  ;;  %v2667_v41 = vsel %vm2272_vm5, %v2665_v51, %v2666_v3  ;;  %v2894_v36 = vrot.slane %v2858_v14, 5 }
 0x16e   : > { %v2935_v13 = vmul.f32 %v10512_v16, %v14907_v46  ;;  %v3010_v53 = vmul.f32 %v10381_v2, %v14908_v63  ;;  %v2309_v54 = vadd.f32 %v2287_v39, %v2232_v44  ;;  %v2743_v56 = vsel %vm2272_vm5, %v2741_v49, %v2742_v7 }
 0x16f   : > { %v2895_v37 = vrot.slane %v2859_v35, 5  ;;  %v2970_v55 = vrot.slane %v2934_v17, 5  ;;  %v2820_v34 = vsel %vm2805_vm6, %v2818_v25, %v2819_v33  ;;  %v3011_v19 = vmul.f32 %v10261_v40, %v14908_v63 }
 0x170   : > { %v2971_v5 = vrot.slane %v2935_v13, 5  ;;  %v3086_v51 = vmul.f32 %v10522_v48, %v14909_v6  ;;  %v2385_v3 = vadd.f32 %v2363_v43, %v2309_v54  ;;  %v3046_v14 = vrot.slane %v3010_v53, 5 }
 0x171   : > { %v3087_v46 = vmul.f32 %v10527_v62, %v14909_v6  ;;  %v3162_v39 = vmul.f32 %v10227_v29, %v9585_v61  ;;  %v2896_v35 = vsel %vm2805_vm6, %v2894_v36, %v2895_v37  ;;  %v3047_v49 = vrot.slane %v3011_v19, 5 }
 0x172   : > { %v3122_v7 = vrot.slane %v3086_v51, 5  ;;  %v3163_v33 = vmul.f32 %v9585_v61, %v10219_v58  ;;  %v2461_v25 = vadd.f32 %v2439_v24, %v2385_v3  ;;  %v2972_v44 = vsel %vm2805_vm6, %v2970_v55, %v2971_v5 }
 0x173   : > { %v3123_v17 = vrot.slane %v3087_v46, 5  ;;  %v3238_v43 = vmul.f32 %v10485_v50, %v14885_v11  ;;  %v3198_v13 = vrot.slane %v3162_v39, 5  ;;  %v3239_v54 = vmul.f32 %v14885_v11, %v10477_v38 }
 0x174   : > { %v3199_v53 = vrot.slane %v3163_v33, 5  ;;  %v3314_v36 = vmul.f32 %v10360_v8, %v9595_v0  ;;  %v2537_v19 = vadd.f32 %v2515_v18, %v2461_v25  ;;  %v3048_v37 = vsel %vm2805_vm6, %v3046_v14, %v3047_v49 }
 0x175   : > { %v3274_v51 = vrot.slane %v3238_v43, 5  ;;  %v3315_v24 = vmul.f32 %v10495_v57, %v9595_v0  ;;  %v3124_v46 = vsel %vm2805_vm6, %v3122_v7, %v3123_v17  ;;  %v3275_v55 = vrot.slane %v3239_v54, 5 }
 0x176   : > { %v3351_v5 = vrot.slane %v3314_v36, 6  ;;  %v3391_v3 = vmul.f32 %v10366_v9, %v9612_v27  ;;  %v2613_v39 = vadd.f32 %v2591_v45, %v2537_v19  ;;  %v3392_v11 = vmul.f32 %v10503_v22, %v9612_v27 }
 0x177   : > { %v3352_v33 = vrot.slane %v3315_v24, 6  ;;  %v3467_v8 = vmul.f32 %v10373_v21, %v9623_v4  ;;  %v3200_v18 = vsel %vm2805_vm6, %v3198_v13, %v3199_v53  ;;  %v3468_v57 = vmul.f32 %v10512_v16, %v9623_v4  ;;  %v14910_v24 = vld [vmem:[#allocation62_spill] sm:$0xff] }
 0x178   : > { %v3427_v14 = vrot.slane %v3391_v3, 6  ;;  %v3543_v49 = vmul.f32 %v10381_v2, %v9627_v30  ;;  %v2689_v7 = vadd.f32 %v2667_v41, %v2613_v39  ;;  %v10674_v25 = vsel %vm2805_vm6, %v3274_v51, %v3275_v55 }
 0x179   : > { %v10677_v45 = vsel %vm3338_vm7, %v3351_v5, %v3352_v33  ;;  %v3428_v17 = vrot.slane %v3392_v11, 6  ;;  %v3503_v43 = vrot.slane %v3467_v8, 6  ;;  %v3504_v54 = vrot.slane %v3468_v57, 6  ;;  %v14911_v57 = vld [vmem:[#allocation27_spill] sm:$0xff] }
 0x17a   : > { %v3544_v13 = vmul.f32 %v10261_v40, %v9627_v30  ;;  %v3619_v53 = vmul.f32 %v10522_v48, %v9631_v42  ;;  %v2765_v36 = vadd.f32 %v2743_v56, %v2689_v7  ;;  %v3579_v19 = vrot.slane %v3543_v49, 6 }
 0x17b   : > { %v3620_v41 = vmul.f32 %v10527_v62, %v9631_v42  ;;  %v3695_v51 = vmul.f32 %v10227_v29, %v14910_v24  ;;  %v10688_v55 = vsel %vm3338_vm7, %v3427_v14, %v3428_v17  ;;  %v3696_v3 = vmul.f32 %v14910_v24, %v10219_v58  ;;  %v14912_v17 = vld [vmem:[#allocation20_spill] sm:$0xff] }
 0x17c   : > { %v3580_v11 = vrot.slane %v3544_v13, 6  ;;  %v3655_v5 = vrot.slane %v3619_v53, 6  ;;  %v2842_v39 = vadd.f32 %v2820_v34, %v2765_v36  ;;  %v10694_v56 = vmul.f32 %v10485_v50, %v14911_v57 }
 0x17d   : > { %v3656_v33 = vrot.slane %v3620_v41, 6  ;;  %v3731_v8 = vrot.slane %v3695_v51, 6  ;;  %v10697_v49 = vsel %vm3338_vm7, %v3503_v43, %v3504_v54  ;;  %v3732_v7 = vrot.slane %v3696_v3, 6  ;;  %v14913_v3 = vld [vmem:[#allocation19_spill] sm:$0xff] }
 0x17e   : > { %v10701_v14 = vmul.f32 %v14911_v57, %v10477_v38  ;;  %v652_v13 = vmul.f32 %v10366_v9, %v14912_v17  ;;  %v2918_v53 = vadd.f32 %v2896_v35, %v2842_v39  ;;  %v10706_v34 = vsel %vm3338_vm7, %v3579_v19, %v3580_v11 }
 0x17f   : > { %v10709_v36 = vsel %vm3338_vm7, %v3655_v5, %v3656_v33  ;;  %v653_v41 = vmul.f32 %v10503_v22, %v14912_v17  ;;  %v10714_v43 = vsel %vm3338_vm7, %v3731_v8, %v3732_v7  ;;  %v729_v57 = vmul.f32 %v10373_v21, %v14913_v3 }
 0x180   : > { %v690_v51 = vrot.slane %v652_v13, 1  ;;  %v2994_v24 = vadd.f32 %v2972_v44, %v2918_v53  ;;  %v730_v19 = vmul.f32 %v10512_v16, %v14913_v3  ;;  %v805_v11 = vmul.f32 %v10381_v2, %v14890_v52 }
 0x181   : > { %v691_v35 = vrot.slane %v653_v41, 1  ;;  %v766_v39 = vrot.slane %v729_v57, 1  ;;  %v806_v33 = vmul.f32 %v10261_v40, %v14890_v52  ;;  %v881_v8 = vmul.f32 %v10522_v48, %v14863_v59  ;;  %v14914_v41 = vld [vmem:[#allocation30_spill] sm:$0xff] }
 0x182   : > { %v3070_v7 = vadd.f32 %v3048_v37, %v2994_v24  ;;  %v767_v44 = vrot.slane %v730_v19, 1  ;;  %v842_v53 = vrot.slane %v805_v11, 1  ;;  %v882_v17 = vmul.f32 %v10527_v62, %v14863_v59  ;;  %v10737_v24 = vld [vmem:[#allocation2 + $0xb8] sm:$0x3f] }
 0x183   : > { %v692_v13 = vsel %vm674_vm2, %v690_v51, %v691_v35  ;;  %v843_v3 = vrot.slane %v806_v33, 1  ;;  %v918_v42 = vrot.slane %v881_v8, 1  ;;  %v957_v52 = vmul.f32 %v10227_v29, %v14865_v20 }
 0x184   : > { %v712_v54 = vadd.f32 %v692_v13, %v14914_v41  ;;  %v3146_v5 = vadd.f32 %v3124_v46, %v3070_v7  ;;  %v768_v57 = vsel %vm674_vm2, %v766_v39, %v767_v44  ;;  %v958_v37 = vmul.f32 %v14865_v20, %v10219_v58  ;;  %v10745_v58 = vld [vmem:[#allocation2 + $0xb0] sm:$0xff] }
 0x185   : > { %v844_v35 = vsel %vm674_vm2, %v842_v53, %v843_v3  ;;  %v919_v19 = vrot.slane %v882_v17, 1  ;;  %v1033_v11 = vmul.f32 %v10485_v50, %v9333_v47  ;;  %v994_v8 = vrot.slane %v957_v52, 1 }
 0x186   : > { %v788_v51 = vadd.f32 %v768_v57, %v712_v54  ;;  %v3222_v33 = vadd.f32 %v3200_v18, %v3146_v5  ;;  %v995_v46 = vrot.slane %v958_v37, 1  ;;  %v1034_v39 = vmul.f32 %v9333_v47, %v10477_v38 }
 0x187   : > { %v920_v29 = vsel %vm674_vm2, %v918_v42, %v919_v19  ;;  %v1070_v13 = vrot.slane %v1033_v11, 1  ;;  %v1109_v54 = vmul.f32 %v10745_v58, %v9338_v60  ;;  %v1110_v52 = vmul.f32 %v9338_v60, %v10737_v24 }
 0x188   : > { %v864_v7 = vadd.f32 %v844_v35, %v788_v51  ;;  %v3298_v17 = vadd.f32 %v10674_v25, %v3222_v33  ;;  %v996_v3 = vsel %vm674_vm2, %v994_v8, %v995_v46  ;;  %v1071_v44 = vrot.slane %v1034_v39, 1 }
 0x189   : > { %v1146_v5 = vrot.slane %v1109_v54, 1  ;;  %v1185_v53 = vmul.f32 %v10366_v9, %v9342_v15  ;;  %v1186_v42 = vmul.f32 %v10503_v22, %v9342_v15  ;;  %v1147_v37 = vrot.slane %v1110_v52, 1 }
 0x18a   : > { %v940_v18 = vadd.f32 %v920_v29, %v864_v7  ;;  %v3375_v41 = vadd.f32 %v10677_v45, %v3298_v17  ;;  %v1072_v57 = vsel %vm674_vm2, %v1070_v13, %v1071_v44  ;;  %v1262_v25 = vmul.f32 %v10373_v21, %v14812_v12 }
 0x18b   : > { %v1223_v35 = vrot.slane %v1185_v53, 2  ;;  %v1224_v19 = vrot.slane %v1186_v42, 2  ;;  %v1263_v11 = vmul.f32 %v10512_v16, %v14812_v12  ;;  %v1148_v8 = vsel %vm674_vm2, %v1146_v5, %v1147_v37  ;;  %v10776_v5 = vld [vmem:[#allocation2 + $0x90] sm:$0xff] }
 0x18c   : > { %v1016_v51 = vadd.f32 %v996_v3, %v940_v18  ;;  %v3451_v33 = vadd.f32 %v10688_v55, %v3375_v41  ;;  %v1299_v46 = vrot.slane %v1262_v25, 2  ;;  %v1338_v45 = vmul.f32 %v10381_v2, %v14813_v28  ;;  %v10781_v41 = vld [vmem:[#allocation2 + $0x98] sm:$0x3f] }
 0x18d   : > { %v1225_v7 = vsel %vm1207_vm3, %v1223_v35, %v1224_v19  ;;  %v1300_v29 = vrot.slane %v1263_v11, 2  ;;  %v1339_v13 = vmul.f32 %v10261_v40, %v14813_v28  ;;  %v1414_v3 = vmul.f32 %v10522_v48, %v14840_v1 }
 0x18e   : > { %v1092_v39 = vadd.f32 %v1072_v57, %v1016_v51  ;;  %v3527_v54 = vadd.f32 %v10697_v49, %v3451_v33  ;;  %v1375_v17 = vrot.slane %v1338_v45, 2  ;;  %v1415_v55 = vmul.f32 %v10527_v62, %v14840_v1 }
 0x18f   : > { %v1301_v52 = vsel %vm1207_vm3, %v1299_v46, %v1300_v29  ;;  %v1376_v18 = vrot.slane %v1339_v13, 2  ;;  %v1490_v53 = vmul.f32 %v10776_v5, %v14842_v26  ;;  %v1451_v42 = vrot.slane %v1414_v3, 2 }
 0x190   : > { %v1168_v44 = vadd.f32 %v1148_v8, %v1092_v39  ;;  %v3603_v40 = vadd.f32 %v10706_v34, %v3527_v54  ;;  %v1452_v49 = vrot.slane %v1415_v55, 2  ;;  %v1491_v57 = vmul.f32 %v10781_v41, %v14842_v26 }
 0x191   : > { %v14915_v37 = vrot.slane %v10701_v14, 6  ;;  %v14916_v25 = vrot.slane %v10694_v56, 6  ;;  %v1527_v19 = vrot.slane %v1490_v53, 2  ;;  %v1566_v11 = vmul.f32 %v10485_v50, %v14843_v10 }
 0x192   : > { %v1245_v35 = vadd.f32 %v1225_v7, %v1168_v44  ;;  %v3679_v34 = vadd.f32 %v10709_v36, %v3603_v40  ;;  %v1377_v33 = vsel %vm1207_vm3, %v1375_v17, %v1376_v18  ;;  %v1528_v8 = vrot.slane %v1491_v57, 2 }
 0x193   : > { %v3809_v51 = vsel %vm3338_vm7, %v14916_v25, %v14915_v37  ;;  %v1567_v46 = vmul.f32 %v14843_v10, %v10477_v38  ;;  %v1603_v39 = vrot.slane %v1566_v11, 2  ;;  %v1642_v56 = vmul.f32 %v10745_v58, %v14868_v31  ;;  %v14918_v37 = vld [vmem:[#allocation38_spill] sm:$0xff] }
 0x194   : > { %v1321_v45 = vadd.f32 %v1301_v52, %v1245_v35  ;;  %v1643_v14 = vmul.f32 %v14868_v31, %v10737_v24  ;;  %v3755_v7 = vadd.f32 %v10714_v43, %v3679_v34  ;;  %v1453_v29 = vsel %vm1207_vm3, %v1451_v42, %v1452_v49  ;;  %v14920_v34 = vld [vmem:[#allocation25_spill] sm:$0xff] }
 0x195   : > { %v1604_v13 = vrot.slane %v1567_v46, 2  ;;  %v1718_v36 = vmul.f32 %v10366_v9, %v14869_v32  ;;  %v1529_v17 = vsel %vm1207_vm3, %v1527_v19, %v1528_v8  ;;  %v1679_v3 = vrot.slane %v1642_v56, 2  ;;  %v14919_v19 = vld [vmem:[#allocation39_spill] sm:$0xff] }
 0x196   : > { %v1397_v54 = vadd.f32 %v1377_v33, %v1321_v45  ;;  %v1719_v55 = vmul.f32 %v10503_v22, %v14869_v32  ;;  %v10807_v44 = vadd.f32 %v3809_v51, %v3755_v7  ;;  %v1680_v18 = vrot.slane %v1643_v14, 2  ;;  %v10818_v51 = vld [vmem:[#allocation2 + $0x78] sm:$0x3f]  ;;  %v14921_v33 = vld [vmem:[#allocation24_spill] sm:$0xff] }
 0x197   : > { %v1605_v52 = vsel %vm1207_vm3, %v1603_v39, %v1604_v13  ;;  %v1794_v43 = vmul.f32 %v10373_v21, %v14871_v23  ;;  %v1755_v40 = vrot.slane %v1718_v36, 3  ;;  %v1795_v49 = vmul.f32 %v10512_v16, %v14871_v23 }
 0x198   : > { %14917 = vst [vmem:[#allocation3_spill] sm:$0xff] %v10807_v44  ;;  %v1473_v53 = vadd.f32 %v1453_v29, %v1397_v54  ;;  %v1756_v42 = vrot.slane %v1719_v55, 3  ;;  %8627 = vmatprep.mubr.msk.f32.mxu0 %vm361_vm0, %v10807_v44  ;;  %v1870_v25 = vmul.f32 %v10381_v2, %v14918_v37  ;;  %v1871_v35 = vmul.f32 %v10818_v51, %v14918_v37  ;;  %v14922_v29 = vld [vmem:[#allocation40_spill] sm:$0xff] }
 0x199   : > { %v1831_v57 = vrot.slane %v1794_v43, 3  ;;  %v1946_v11 = vmul.f32 %v10522_v48, %v14919_v19  ;;  %v10826_v8 = vadd.f32 %v14921_v33, %v14920_v34  ;;  %v1832_v45 = vrot.slane %v1795_v49, 3  ;;  %v14923_v49 = vld [vmem:[#allocation41_spill] sm:$0xff] }
 0x19a   : > { %v1549_v46 = vadd.f32 %v1529_v17, %v1473_v53  ;;  %v1947_v39 = vmul.f32 %v10527_v62, %v14919_v19  ;;  %v1681_v56 = vsel %vm1207_vm3, %v1679_v3, %v1680_v18  ;;  %v1907_v14 = vrot.slane %v1870_v25, 3 }
 0x19b   : > { %v1908_v7 = vrot.slane %v1871_v35, 3  ;;  %v2022_v13 = vmul.f32 %v10776_v5, %v14922_v29  ;;  %v1757_v54 = vsel %vm452_vm4, %v1755_v40, %v1756_v42  ;;  %v1983_v55 = vrot.slane %v1946_v11, 3 }
 0x19c   : > { %v1625_v36 = vadd.f32 %v1605_v52, %v1549_v46  ;;  %v2023_v43 = vmul.f32 %v10781_v41, %v14922_v29  ;;  %v1833_v17 = vsel %vm452_vm4, %v1831_v57, %v1832_v45  ;;  %v1984_v53 = vrot.slane %v1947_v39, 3  ;;  %v14924_v52 = vld [vmem:[#allocation42_spill] sm:$0xff]  ;;  %v14925_v57 = vld [vmem:[#allocation43_spill] sm:$0xff]  ;;  %v14927_v29 = vld [vmem:[#allocation45_spill] sm:$0xff] }
 0x19d   : > { %v2098_v34 = vmul.f32 %v10485_v50, %v14923_v49  ;;  %v2099_v3 = vmul.f32 %v14923_v49, %v10477_v38  ;;  %v1909_v25 = vsel %vm452_vm4, %v1907_v14, %v1908_v7  ;;  %v2059_v35 = vrot.slane %v2022_v13, 3 }
 0x19e   : > { %v1701_v18 = vadd.f32 %v1681_v56, %v1625_v36  ;;  %v2174_v40 = vmul.f32 %v10745_v58, %v14924_v52  ;;  %v2060_v42 = vrot.slane %v2023_v43, 3  ;;  %v2175_v33 = vmul.f32 %v14924_v52, %v10737_v24  ;;  %v14926_v36 = vld [vmem:[#allocation44_spill] sm:$0xff] }
 0x19f   : > { %v2135_v11 = vrot.slane %v2098_v34, 3  ;;  %v2250_v46 = vmul.f32 %v10366_v9, %v14925_v57  ;;  %v2136_v39 = vrot.slane %v2099_v3, 3  ;;  %v2251_v56 = vmul.f32 %v10503_v22, %v14925_v57 }
 0x1a0   : > { %v1777_v45 = vadd.f32 %v1757_v54, %v1701_v18  ;;  %v2211_v44 = vrot.slane %v2174_v40, 3  ;;  %v1985_v14 = vsel %vm452_vm4, %v1983_v55, %v1984_v53  ;;  %v2212_v7 = vrot.slane %v2175_v33, 3  ;;  %v14928_v55 = vld [vmem:[#allocation46_spill] sm:$0xff] }
 0x1a1   : > { %v2288_v13 = vrot.slane %v2250_v46, 4  ;;  %v2327_v43 = vmul.f32 %v10373_v21, %v14926_v36  ;;  %v2289_v49 = vrot.slane %v2251_v56, 4  ;;  %v2328_v52 = vmul.f32 %v10512_v16, %v14926_v36 }
 0x1a2   : > { %v1853_v34 = vadd.f32 %v1833_v17, %v1777_v45  ;;  %v2403_v54 = vmul.f32 %v10381_v2, %v14927_v29  ;;  %v2061_v3 = vsel %vm452_vm4, %v2059_v35, %v2060_v42  ;;  %v2404_v40 = vmul.f32 %v10818_v51, %v14927_v29  ;;  %v14929_v35 = vld [vmem:[#allocation47_spill] sm:$0xff] }
 0x1a3   : > { %v2364_v18 = vrot.slane %v2327_v43, 4  ;;  %v2479_v53 = vmul.f32 %v10522_v48, %v14928_v55  ;;  %v2137_v46 = vsel %vm452_vm4, %v2135_v11, %v2136_v39  ;;  %v2213_v17 = vsel %vm452_vm4, %v2211_v44, %v2212_v7 }
 0x1a4   : > { %v1929_v33 = vadd.f32 %v1909_v25, %v1853_v34  ;;  %v2365_v45 = vrot.slane %v2328_v52, 4  ;;  %v2290_v56 = vsel %vm2272_vm5, %v2288_v13, %v2289_v49  ;;  %v2440_v36 = vrot.slane %v2403_v54, 4  ;;  %v14930_v25 = vld [vmem:[#allocation48_spill] sm:$0xff]  ;;  %v14931_v54 = vld [vmem:[#allocation49_spill] sm:$0xff] }
 0x1a5   : > { %v2480_v57 = vmul.f32 %v10527_v62, %v14928_v55  ;;  %v2555_v42 = vmul.f32 %v10776_v5, %v14929_v35  ;;  %v2441_v29 = vrot.slane %v2404_v40, 4  ;;  %v2556_v19 = vmul.f32 %v10781_v41, %v14929_v35  ;;  %v14932_v55 = vld [vmem:[#allocation50_spill] sm:$0xff] }
 0x1a6   : > { %v2005_v43 = vadd.f32 %v1985_v14, %v1929_v33  ;;  %v2631_v11 = vmul.f32 %v10485_v50, %v14930_v25  ;;  %v2366_v44 = vsel %vm2272_vm5, %v2364_v18, %v2365_v45  ;;  %v2516_v52 = vrot.slane %v2479_v53, 4 }
 0x1a7   : > { %v2517_v39 = vrot.slane %v2480_v57, 4  ;;  %v2632_v49 = vmul.f32 %v14930_v25, %v10477_v38  ;;  %v2592_v13 = vrot.slane %v2555_v42, 4  ;;  %v2593_v34 = vrot.slane %v2556_v19, 4 }
 0x1a8   : > { %v2081_v7 = vadd.f32 %v2061_v3, %v2005_v43  ;;  %v2707_v14 = vmul.f32 %v10745_v58, %v14931_v54  ;;  %v2668_v40 = vrot.slane %v2631_v11, 4  ;;  %v2708_v35 = vmul.f32 %v14931_v54, %v10737_v24  ;;  %v14933_v43 = vld [vmem:[#allocation51_spill] sm:$0xff] }
 0x1a9   : > { %v2669_v33 = vrot.slane %v2632_v49, 4  ;;  %v2783_v37 = vmul.f32 %v10366_v9, %v14932_v55  ;;  %v2442_v57 = vsel %vm2272_vm5, %v2440_v36, %v2441_v29  ;;  %v2784_v3 = vmul.f32 %v10503_v22, %v14932_v55  ;;  %v14934_v9 = vld [vmem:[#allocation52_spill] sm:$0xff] }
 0x1aa   : > { %v2157_v18 = vadd.f32 %v2137_v46, %v2081_v7  ;;  %v2744_v53 = vrot.slane %v2707_v14, 4  ;;  %v2518_v19 = vsel %vm2272_vm5, %v2516_v52, %v2517_v39  ;;  %v2745_v45 = vrot.slane %v2708_v35, 4 }
 0x1ab   : > { %v2821_v42 = vrot.slane %v2783_v37, 5  ;;  %v2860_v11 = vmul.f32 %v10373_v21, %v14933_v43  ;;  %v2822_v25 = vrot.slane %v2784_v3, 5  ;;  %v2861_v54 = vmul.f32 %v10512_v16, %v14933_v43 }
 0x1ac   : > { %v2233_v49 = vadd.f32 %v2213_v17, %v2157_v18  ;;  %v2936_v46 = vmul.f32 %v10381_v2, %v14934_v9  ;;  %v2594_v29 = vsel %vm2272_vm5, %v2592_v13, %v2593_v34  ;;  %v2670_v36 = vsel %vm2272_vm5, %v2668_v40, %v2669_v33 }
 0x1ad   : > { %v2937_v52 = vmul.f32 %v10818_v51, %v14934_v9  ;;  %v3012_v37 = vmul.f32 %v10522_v48, %v14908_v63  ;;  %v2746_v21 = vsel %vm2272_vm5, %v2744_v53, %v2745_v45  ;;  %v2823_v17 = vsel %vm2805_vm6, %v2821_v42, %v2822_v25 }
 0x1ae   : > { %v2310_v35 = vadd.f32 %v2290_v56, %v2233_v49  ;;  %v2897_v39 = vrot.slane %v2860_v11, 5  ;;  %v2898_v7 = vrot.slane %v2861_v54, 5  ;;  %v2973_v14 = vrot.slane %v2936_v46, 5  ;;  %v14935_v11 = vld [vmem:[#allocation56_spill] sm:$0xff] }
 0x1af   : > { %v3013_v2 = vmul.f32 %v10527_v62, %v14908_v63  ;;  %v3088_v13 = vmul.f32 %v10776_v5, %v14909_v6  ;;  %v2974_v40 = vrot.slane %v2937_v52, 5  ;;  %v3089_v33 = vmul.f32 %v10781_v41, %v14909_v6 }
 0x1b0   : > { %v2386_v34 = vadd.f32 %v2366_v44, %v2310_v35  ;;  %v3164_v56 = vmul.f32 %v10485_v50, %v9585_v61  ;;  %v3049_v18 = vrot.slane %v3012_v37, 5  ;;  %v3165_v54 = vmul.f32 %v9585_v61, %v10477_v38  ;;  %v8831_v35 = vld [vmem:[#allocation2 + $0x50] sm:$0xff] }
 0x1b1   : > { %v3050_v53 = vrot.slane %v3013_v2, 5  ;;  %v3125_v25 = vrot.slane %v3088_v13, 5  ;;  %v3126_v45 = vrot.slane %v3089_v33, 5  ;;  %v3240_v49 = vmul.f32 %v10745_v58, %v14935_v11 }
 0x1b2   : > { %v2462_v3 = vadd.f32 %v2442_v57, %v2386_v34  ;;  %v3201_v42 = vrot.slane %v3164_v56, 5  ;;  %v2899_v44 = vsel %vm2805_vm6, %v2897_v39, %v2898_v7  ;;  %v3202_v46 = vrot.slane %v3165_v54, 5  ;;  %v10923_v7 = vld [vmem:[#allocation2 + $0x60] sm:$0xff] }
 0x1b3   : > { %v3241_v52 = vmul.f32 %v14935_v11, %v10737_v24  ;;  %v3316_v37 = vmul.f32 %v8831_v35, %v9595_v0  ;;  %v2975_v13 = vsel %vm2805_vm6, %v2973_v14, %v2974_v40  ;;  %v3277_v6 = vrot.slane %v3240_v49, 5  ;;  %v10932_v40 = vld [vmem:[#allocation2 + $0x70] sm:$0xff] }
 0x1b4   : > { %v2538_v2 = vadd.f32 %v2518_v19, %v2462_v3  ;;  %v3317_v57 = vmul.f32 %v10503_v22, %v9595_v0  ;;  %v3051_v34 = vsel %vm2805_vm6, %v3049_v18, %v3050_v53  ;;  %v10921_v33 = vsel %vm2805_vm6, %v3125_v25, %v3126_v45  ;;  %v14937_v0 = vld [vmem:[#allocation62_spill] sm:$0xff] }
 0x1b5   : > { %v3278_v39 = vrot.slane %v3241_v52, 5  ;;  %v3393_v56 = vmul.f32 %v10923_v7, %v9612_v27  ;;  %v10928_v19 = vsel %vm2805_vm6, %v3201_v42, %v3202_v46  ;;  %v3394_v14 = vmul.f32 %v10512_v16, %v9612_v27 }
 0x1b6   : > { %v2614_v54 = vadd.f32 %v2594_v29, %v2538_v2  ;;  %v3469_v22 = vmul.f32 %v10932_v40, %v9623_v4  ;;  %v3354_v18 = vrot.slane %v3316_v37, 6  ;;  %v3355_v53 = vrot.slane %v3317_v57, 6  ;;  %v14936_v2 = vld [vmem:[#allocation61_spill] sm:$0xff] }
 0x1b7   : > { %v3470_v25 = vmul.f32 %v10818_v51, %v9623_v4  ;;  %v3545_v3 = vmul.f32 %v10522_v48, %v9627_v30  ;;  %v10941_v45 = vsel %vm2805_vm6, %v3277_v6, %v3278_v39  ;;  %v3430_v42 = vrot.slane %v3393_v56, 6  ;;  %v10951_v6 = vld [vmem:[#allocation2 + $0xc0] sm:$0xff] }
 0x1b8   : > { %v2690_v29 = vadd.f32 %v2670_v36, %v2614_v54  ;;  %v3431_v49 = vrot.slane %v3394_v14, 6  ;;  %v3506_v46 = vrot.slane %v3469_v22, 6  ;;  %v3546_v35 = vmul.f32 %v10527_v62, %v9627_v30 }
 0x1b9   : > { %v3507_v52 = vrot.slane %v3470_v25, 6  ;;  %v3621_v37 = vmul.f32 %v10776_v5, %v14936_v2  ;;  %v3582_v27 = vrot.slane %v3545_v3, 6  ;;  %v3622_v4 = vmul.f32 %v10781_v41, %v14936_v2  ;;  %v10964_v3 = vld [vmem:[%s14271_s1 + $0x30] ss:$0 sm:$0xff] }
 0x1ba   : > { %v2766_v57 = vadd.f32 %v2746_v21, %v2690_v29  ;;  %v3697_v36 = vmul.f32 %v10485_v50, %v14937_v0  ;;  %v10954_v39 = vsel %vm3338_vm7, %v3354_v18, %v3355_v53  ;;  %v3583_v56 = vrot.slane %v3546_v35, 6  ;;  %14938 = vst [vmem:[#allocation34_spill] sm:$0xff] %v10964_v3 }
 0x1bb   : > { %v3658_v54 = vrot.slane %v3621_v37, 6  ;;  %v3698_v14 = vmul.f32 %v14937_v0, %v10477_v38  ;;  %v10959_v21 = vsel %vm3338_vm7, %v3430_v42, %v3431_v49  ;;  %v3659_v25 = vrot.slane %v3622_v4, 6  ;;  %v14939_v38 = vld [vmem:[#allocation18_spill] sm:$0xff]  ;;  %v14940_v37 = vld [vmem:[#allocation20_spill] sm:$0xff] }
 0x1bc   : > { %v2843_v22 = vadd.f32 %v2823_v17, %v2766_v57  ;;  %v10968_v29 = vmul.f32 %v10964_v3, %v10745_v58  ;;  %v10971_v18 = vsel %vm3338_vm7, %v3506_v46, %v3507_v52  ;;  %v3734_v53 = vrot.slane %v3697_v36, 6 }
 0x1bd   : > { %v3735_v35 = vrot.slane %v3698_v14, 6  ;;  %v628_v17 = vmul.f32 %v14939_v38, %v10951_v6  ;;  %v10976_v4 = vsel %vm3338_vm7, %v3582_v27, %v3583_v56  ;;  %v10980_v49 = vmul.f32 %v10964_v3, %v10737_v24  ;;  %v14941_v56 = vld [vmem:[#allocation19_spill] sm:$0xff] }
 0x1be   : > { %v2919_v42 = vadd.f32 %v2899_v44, %v2843_v22  ;;  %v654_v57 = vmul.f32 %v10923_v7, %v14940_v37  ;;  %v10985_v0 = vsel %vm3338_vm7, %v3658_v54, %v3659_v25  ;;  %v655_v44 = vmul.f32 %v10512_v16, %v14940_v37  ;;  %v14942_v25 = vld [vmem:[#allocation21_spill] sm:$0xff] }
 0x1bf   : > { %v636_v52 = vadd.f32 %v628_v17, %v10826_v8  ;;  %v731_v14 = vmul.f32 %v10932_v40, %v14941_v56  ;;  %v732_v22 = vmul.f32 %v10818_v51, %v14941_v56  ;;  %v10996_v38 = vsel %vm3338_vm7, %v3734_v53, %v3735_v35 }
 0x1c0   : > { %v2995_v36 = vadd.f32 %v2975_v13, %v2919_v42  ;;  %v693_v27 = vrot.slane %v654_v57, 1  ;;  %v694_v54 = vrot.slane %v655_v44, 1  ;;  %v807_v46 = vmul.f32 %v10522_v48, %v14942_v25 }
 0x1c1   : > { %v808_v8 = vmul.f32 %v10527_v62, %v14942_v25  ;;  %v769_v3 = vrot.slane %v731_v14, 1  ;;  %v770_v13 = vrot.slane %v732_v22, 1  ;;  %v883_v42 = vmul.f32 %v10776_v5, %v14863_v59  ;;  %v11012_v22 = vld [vmem:[#allocation2 + $0xa8] sm:$0x3f] }
 0x1c2   : > { %v3071_v17 = vadd.f32 %v3051_v34, %v2995_v36  ;;  %v695_v57 = vsel %vm674_vm2, %v693_v27, %v694_v54  ;;  %v845_v37 = vrot.slane %v807_v46, 1  ;;  %v884_v53 = vmul.f32 %v10781_v41, %v14863_v59  ;;  %v11017_v54 = vld [vmem:[#allocation2 + $0xc8] sm:$0x3f] }
 0x1c3   : > { %v846_v56 = vrot.slane %v808_v8, 1  ;;  %v713_v44 = vadd.f32 %v695_v57, %v636_v52  ;;  %v771_v2 = vsel %vm674_vm2, %v769_v3, %v770_v13  ;;  %v921_v30 = vrot.slane %v883_v42, 1 }
 0x1c4   : > { %v3147_v35 = vadd.f32 %v10921_v33, %v3071_v17  ;;  %v922_v36 = vrot.slane %v884_v53, 1  ;;  %v959_v14 = vmul.f32 %v10485_v50, %v14865_v20  ;;  %v960_v46 = vmul.f32 %v11012_v22, %v14865_v20 }
 0x1c5   : > { %v847_v34 = vsel %vm674_vm2, %v845_v37, %v846_v56  ;;  %v789_v33 = vadd.f32 %v771_v2, %v713_v44  ;;  %v1035_v3 = vmul.f32 %v10745_v58, %v9333_v47  ;;  %v1036_v37 = vmul.f32 %v9333_v47, %v10737_v24 }
 0x1c6   : > { %v3223_v27 = vadd.f32 %v10928_v19, %v3147_v35  ;;  %v923_v52 = vsel %vm674_vm2, %v921_v30, %v922_v36  ;;  %v997_v56 = vrot.slane %v959_v14, 1  ;;  %v998_v50 = vrot.slane %v960_v46, 1 }
 0x1c7   : > { %v1111_v8 = vmul.f32 %v9338_v60, %v10951_v6  ;;  %v865_v13 = vadd.f32 %v847_v34, %v789_v33  ;;  %v1073_v19 = vrot.slane %v1035_v3, 1  ;;  %v1074_v42 = vrot.slane %v1036_v37, 1 }
 0x1c8   : > { %v3299_v17 = vadd.f32 %v10941_v45, %v3223_v27  ;;  %v999_v2 = vsel %vm674_vm2, %v997_v56, %v998_v50  ;;  %v1112_v57 = vmul.f32 %v9338_v60, %v11017_v54  ;;  %v1187_v35 = vmul.f32 %v10923_v7, %v9342_v15 }
 0x1c9   : > { %v1149_v53 = vrot.slane %v1111_v8, 1  ;;  %v941_v44 = vadd.f32 %v923_v52, %v865_v13  ;;  %v1075_v36 = vsel %vm674_vm2, %v1073_v19, %v1074_v42  ;;  %v1188_v45 = vmul.f32 %v10512_v16, %v9342_v15 }
 0x1ca   : > { %v3376_v30 = vadd.f32 %v10954_v39, %v3299_v17  ;;  %v1150_v34 = vrot.slane %v1112_v57, 1  ;;  %v1226_v14 = vrot.slane %v1187_v35, 2  ;;  %v1264_v46 = vmul.f32 %v10932_v40, %v14812_v12  ;;  %v11054_v35 = vld [vmem:[#allocation2 + $0xa0] sm:$0xff] }
 0x1cb   : > { %v1265_v27 = vmul.f32 %v10818_v51, %v14812_v12  ;;  %v1017_v3 = vadd.f32 %v999_v2, %v941_v44  ;;  %v1227_v37 = vrot.slane %v1188_v45, 2  ;;  %v1340_v39 = vmul.f32 %v10522_v48, %v14813_v28 }
 0x1cc   : > { %v3452_v33 = vadd.f32 %v10959_v21, %v3376_v30  ;;  %v1151_v52 = vsel %vm674_vm2, %v1149_v53, %v1150_v34  ;;  %v1302_v56 = vrot.slane %v1264_v46, 2  ;;  %v1341_v16 = vmul.f32 %v10527_v62, %v14813_v28 }
 0x1cd   : > { %v1303_v50 = vrot.slane %v1265_v27, 2  ;;  %v3811_v17 = vrot.slane %v10980_v49, 6  ;;  %v1093_v13 = vadd.f32 %v1075_v36, %v1017_v3  ;;  %v1378_v19 = vrot.slane %v1340_v39, 2 }
 0x1ce   : > { %v3528_v8 = vadd.f32 %v10971_v18, %v3452_v33  ;;  %v1228_v21 = vsel %vm1207_vm3, %v1226_v14, %v1227_v37  ;;  %v1379_v42 = vrot.slane %v1341_v16, 2  ;;  %v1416_v2 = vmul.f32 %v10776_v5, %v14840_v1 }
 0x1cf   : > { %v1417_v48 = vmul.f32 %v10781_v41, %v14840_v1  ;;  %v1169_v53 = vadd.f32 %v1151_v52, %v1093_v13  ;;  %v1492_v62 = vmul.f32 %v11054_v35, %v14842_v26  ;;  %v1493_v18 = vmul.f32 %v11012_v22, %v14842_v26 }
 0x1d0   : > { %v3604_v57 = vadd.f32 %v10976_v4, %v3528_v8  ;;  %v1304_v49 = vsel %vm1207_vm3, %v1302_v56, %v1303_v50  ;;  %v1454_v30 = vrot.slane %v1416_v2, 2  ;;  %v1568_v36 = vmul.f32 %v10745_v58, %v14843_v10  ;;  %v11078_v8 = vld [vmem:[#allocation2 + $0x68] sm:$0x3f] }
 0x1d1   : > { %v1455_v44 = vrot.slane %v1417_v48, 2  ;;  %v14943_v4 = vrot.slane %v10968_v29, 6  ;;  %v1246_v14 = vadd.f32 %v1228_v21, %v1169_v53  ;;  %v1380_v46 = vsel %vm1207_vm3, %v1378_v19, %v1379_v42 }
 0x1d2   : > { %v3680_v45 = vadd.f32 %v10985_v0, %v3604_v57  ;;  %v1530_v27 = vrot.slane %v1492_v62, 2  ;;  %v1531_v33 = vrot.slane %v1493_v18, 2  ;;  %v1569_v3 = vmul.f32 %v14843_v10, %v10737_v24 }
 0x1d3   : > { %v3812_v34 = vsel %vm3338_vm7, %v14943_v4, %v3811_v17  ;;  %v1644_v37 = vmul.f32 %v14868_v31, %v10951_v6  ;;  %v1322_v52 = vadd.f32 %v1304_v49, %v1246_v14  ;;  %v1606_v56 = vrot.slane %v1568_v36, 2  ;;  %v11092_v49 = vld [vmem:[#allocation2 + $0x80] sm:$0xff]  ;;  %v11096_v36 = vld [vmem:[#allocation2 + $0x88] sm:$0x3f] }
 0x1d4   : > { %v3756_v39 = vadd.f32 %v10996_v38, %v3680_v45  ;;  %v1645_v0 = vmul.f32 %v14868_v31, %v11017_v54  ;;  %v1456_v29 = vsel %vm1207_vm3, %v1454_v30, %v1455_v44  ;;  %v1607_v50 = vrot.slane %v1569_v3, 2  ;;  %v14945_v30 = vld [vmem:[#allocation38_spill] sm:$0xff] }
 0x1d5   : > { %v1720_v16 = vmul.f32 %v10923_v7, %v14869_v32  ;;  %v1721_v17 = vmul.f32 %v11078_v8, %v14869_v32  ;;  %v1398_v19 = vadd.f32 %v1380_v46, %v1322_v52  ;;  %v1796_v38 = vmul.f32 %v10932_v40, %v14871_v23 }
 0x1d6   : > { %v11082_v13 = vadd.f32 %v3812_v34, %v3756_v39  ;;  %v1532_v21 = vsel %vm1207_vm3, %v1530_v27, %v1531_v33  ;;  %v1682_v42 = vrot.slane %v1644_v37, 2  ;;  %v1683_v2 = vrot.slane %v1645_v0, 2  ;;  %v14946_v27 = vld [vmem:[#allocation39_spill] sm:$0xff]  ;;  %v14947_v39 = vld [vmem:[#allocation40_spill] sm:$0xff] }
 0x1d7   : > { %v1797_v48 = vmul.f32 %v10818_v51, %v14871_v23  ;;  %v1474_v57 = vadd.f32 %v1456_v29, %v1398_v19  ;;  %v1608_v53 = vsel %vm1207_vm3, %v1606_v56, %v1607_v50  ;;  %v1758_v62 = vrot.slane %v1720_v16, 3  ;;  %v14948_v19 = vld [vmem:[#allocation41_spill] sm:$0xff] }
 0x1d8   : > { %14944 = vst [vmem:[#allocation22_spill] sm:$0xff] %v11082_v13  ;;  %8628 = vmatmul.mubr.msk.f32.gmra.mrb[4].mxu0 %vm361_vm0, %v11082_v13  ;;  %v1759_v18 = vrot.slane %v1721_v17, 3  ;;  %v1872_v44 = vmul.f32 %v11092_v49, %v14945_v30  ;;  %v1873_v45 = vmul.f32 %v11096_v36, %v14945_v30  ;;  %v1834_v34 = vrot.slane %v1796_v38, 3 }
 0x1d9   : > { %v1550_v4 = vadd.f32 %v1532_v21, %v1474_v57  ;;  %v1835_v14 = vrot.slane %v1797_v48, 3  ;;  %v1684_v46 = vsel %vm1207_vm3, %v1682_v42, %v1683_v2  ;;  %v1948_v33 = vmul.f32 %v10776_v5, %v14946_v27  ;;  %v14949_v48 = vld [vmem:[#allocation42_spill] sm:$0xff] }
 0x1da   : > { %v1949_v3 = vmul.f32 %v10781_v41, %v14946_v27  ;;  %v2024_v52 = vmul.f32 %v11054_v35, %v14947_v39  ;;  %v1760_v56 = vsel %vm452_vm4, %v1758_v62, %v1759_v18  ;;  %v1910_v0 = vrot.slane %v1872_v44, 3 }
 0x1db   : > { %v1626_v37 = vadd.f32 %v1608_v53, %v1550_v4  ;;  %v1911_v29 = vrot.slane %v1873_v45, 3  ;;  %v2025_v50 = vmul.f32 %v11012_v22, %v14947_v39  ;;  %v1836_v17 = vsel %vm452_vm4, %v1834_v34, %v1835_v14  ;;  %v14950_v4 = vld [vmem:[#allocation43_spill] sm:$0xff] }
 0x1dc   : > { %v2100_v38 = vmul.f32 %v10745_v58, %v14948_v19  ;;  %v2101_v21 = vmul.f32 %v14948_v19, %v10737_v24  ;;  %v1986_v42 = vrot.slane %v1948_v33, 3  ;;  %v1987_v2 = vrot.slane %v1949_v3, 3 }
 0x1dd   : > { %v1702_v16 = vadd.f32 %v1684_v46, %v1626_v37  ;;  %v2176_v57 = vmul.f32 %v14949_v48, %v10951_v6  ;;  %v2177_v53 = vmul.f32 %v14949_v48, %v11017_v54  ;;  %v2062_v18 = vrot.slane %v2024_v52, 3  ;;  %v11124_v46 = vpop.f32.mrb[0].mxu0 }
 0x1de   : > { %v1912_v44 = vsel %vm452_vm4, %v1910_v0, %v1911_v29  ;;  %v2063_v45 = vrot.slane %v2025_v50, 3  ;;  %v2252_v34 = vmul.f32 %v10923_v7, %v14950_v4  ;;  %v2253_v14 = vmul.f32 %v11078_v8, %v14950_v4  ;;  %14951 = vst [vmem:[#allocation29_spill] sm:$0xff] %v11124_v46  ;;  %v11126_v13 = vpop.f32.mrb[1].mxu0  ;;  %v14953_v0 = vld [vmem:[#allocation44_spill] sm:$0xff] }
 0x1df   : > { %v1778_v62 = vadd.f32 %v1760_v56, %v1702_v16  ;;  %v2138_v3 = vrot.slane %v2100_v38, 3  ;;  %v2139_v37 = vrot.slane %v2101_v21, 3  ;;  %14952 = vst [vmem:[#allocation23_spill] sm:$0xff] %v11126_v13  ;;  %v1988_v48 = vsel %vm452_vm4, %v1986_v42, %v1987_v2 }
 0x1e0   : > { %v2214_v56 = vrot.slane %v2176_v57, 3  ;;  %v2215_v52 = vrot.slane %v2177_v53, 3  ;;  %v2329_v29 = vmul.f32 %v10932_v40, %v14953_v0  ;;  %v2330_v50 = vmul.f32 %v10818_v51, %v14953_v0  ;;  %v14955_v57 = vld [vmem:[#allocation46_spill] sm:$0xff] }
 0x1e1   : > { %v1854_v33 = vadd.f32 %v1836_v17, %v1778_v62  ;;  %v2064_v4 = vsel %vm452_vm4, %v2062_v18, %v2063_v45  ;;  %v2291_v19 = vrot.slane %v2252_v34, 4  ;;  %v2292_v46 = vrot.slane %v2253_v14, 4  ;;  %v14954_v17 = vld [vmem:[#allocation45_spill] sm:$0xff]  ;;  %v14956_v14 = vld [vmem:[#allocation47_spill] sm:$0xff] }
 0x1e2   : > { %v2405_v38 = vmul.f32 %v11092_v49, %v14954_v17  ;;  %v2140_v62 = vsel %vm452_vm4, %v2138_v3, %v2139_v37  ;;  %v2216_v42 = vsel %vm452_vm4, %v2214_v56, %v2215_v52  ;;  %v2406_v2 = vmul.f32 %v11096_v36, %v14954_v17  ;;  %v14957_v56 = vld [vmem:[#allocation48_spill] sm:$0xff] }
 0x1e3   : > { %v1930_v16 = vadd.f32 %v1912_v44, %v1854_v33  ;;  %v2481_v53 = vmul.f32 %v10776_v5, %v14955_v57  ;;  %v2482_v44 = vmul.f32 %v10781_v41, %v14955_v57  ;;  %v2367_v45 = vrot.slane %v2329_v29, 4 }
 0x1e4   : > { %v2368_v34 = vrot.slane %v2330_v50, 4  ;;  %v2557_v33 = vmul.f32 %v11054_v35, %v14956_v14  ;;  %v2443_v3 = vrot.slane %v2405_v38, 4  ;;  %v2558_v37 = vmul.f32 %v11012_v22, %v14956_v14 }
 0x1e5   : > { %v2006_v21 = vadd.f32 %v1988_v48, %v1930_v16  ;;  %v2293_v48 = vsel %vm2272_vm5, %v2291_v19, %v2292_v46  ;;  %v2633_v52 = vmul.f32 %v10745_v58, %v14957_v56  ;;  %v2634_v13 = vmul.f32 %v14957_v56, %v10737_v24 }
 0x1e6   : > { %v2519_v57 = vrot.slane %v2481_v53, 4  ;;  %v2520_v19 = vrot.slane %v2482_v44, 4  ;;  %v2785_v46 = vmul.f32 %v10923_v7, %v14932_v55  ;;  %v2369_v14 = vsel %vm2272_vm5, %v2367_v45, %v2368_v34 }
 0x1e7   : > { %v2082_v18 = vadd.f32 %v2064_v4, %v2006_v21  ;;  %v14958_v4 = vld [vmem:[#allocation49_spill] sm:$0xff]  ;;  %v2444_v21 = vrot.slane %v2406_v2, 4  ;;  %v2595_v17 = vrot.slane %v2557_v33, 4  ;;  %v2671_v56 = vrot.slane %v2633_v52, 4 }
 0x1e8   : > { %v2709_v29 = vmul.f32 %v14958_v4, %v10951_v6  ;;  %v2710_v50 = vmul.f32 %v14958_v4, %v11017_v54  ;;  %v2862_v0 = vmul.f32 %v10932_v40, %v14933_v43  ;;  %v2863_v2 = vmul.f32 %v10818_v51, %v14933_v43 }
 0x1e9   : > { %v2158_v16 = vadd.f32 %v2140_v62, %v2082_v18  ;;  %v2786_v62 = vmul.f32 %v11078_v8, %v14932_v55  ;;  %v2596_v18 = vrot.slane %v2558_v37, 4  ;;  %v2672_v44 = vrot.slane %v2634_v13, 4 }
 0x1ea   : > { %v2747_v4 = vrot.slane %v2709_v29, 4  ;;  %v2748_v39 = vrot.slane %v2710_v50, 4  ;;  %v2521_v45 = vsel %vm2272_vm5, %v2519_v57, %v2520_v19  ;;  %v2824_v34 = vrot.slane %v2785_v46, 5  ;;  %v14959_v50 = vld [vmem:[#allocation54_spill] sm:$0xff] }
 0x1eb   : > { %v2234_v38 = vadd.f32 %v2216_v42, %v2158_v16  ;;  %v2445_v42 = vsel %vm2272_vm5, %v2443_v3, %v2444_v21  ;;  %v2825_v16 = vrot.slane %v2786_v62, 5  ;;  %v2938_v37 = vmul.f32 %v11092_v49, %v14934_v9 }
 0x1ec   : > { %v2939_v52 = vmul.f32 %v11096_v36, %v14934_v9  ;;  %v2900_v55 = vrot.slane %v2862_v0, 5  ;;  %v2901_v27 = vrot.slane %v2863_v2, 5  ;;  %v3014_v13 = vmul.f32 %v10776_v5, %v14908_v63 }
 0x1ed   : > { %v2311_v53 = vadd.f32 %v2293_v48, %v2234_v38  ;;  %v3015_v48 = vmul.f32 %v10781_v41, %v14908_v63  ;;  %v2597_v57 = vsel %vm2272_vm5, %v2595_v17, %v2596_v18  ;;  %v2749_v29 = vsel %vm2272_vm5, %v2747_v4, %v2748_v39 }
 0x1ee   : > { %v3090_v21 = vmul.f32 %v11054_v35, %v14959_v50  ;;  %v3091_v0 = vmul.f32 %v11012_v22, %v14959_v50  ;;  %v3166_v19 = vmul.f32 %v10745_v58, %v9585_v61  ;;  %v3167_v46 = vmul.f32 %v9585_v61, %v10737_v24 }
 0x1ef   : > { %v2387_v33 = vadd.f32 %v2369_v14, %v2311_v53  ;;  %v2673_v14 = vsel %vm2272_vm5, %v2671_v56, %v2672_v44  ;;  %v2826_v62 = vsel %vm2805_vm6, %v2824_v34, %v2825_v16  ;;  %v2976_v17 = vrot.slane %v2938_v37, 5 }
 0x1f0   : > { %v2977_v18 = vrot.slane %v2939_v52, 5  ;;  %v2902_v56 = vsel %vm2805_vm6, %v2900_v55, %v2901_v27  ;;  %v3052_v39 = vrot.slane %v3014_v13, 5  ;;  %v3053_v4 = vrot.slane %v3015_v48, 5  ;;  %v14961_v13 = vld [vmem:[#allocation58_spill] sm:$0xff] }
 0x1f1   : > { %v2463_v3 = vadd.f32 %v2445_v42, %v2387_v33  ;;  %v3242_v2 = vmul.f32 %v14935_v11, %v10951_v6  ;;  %v3243_v44 = vmul.f32 %v14935_v11, %v11017_v54  ;;  %v14960_v42 = vld [vmem:[#allocation57_spill] sm:$0xff]  ;;  %v3128_v34 = vrot.slane %v3090_v21, 5 }
 0x1f2   : > { %v3318_v33 = vmul.f32 %v10923_v7, %v14960_v42  ;;  %v3129_v16 = vrot.slane %v3091_v0, 5  ;;  %v3204_v37 = vrot.slane %v3166_v19, 5  ;;  %v3205_v52 = vrot.slane %v3167_v46, 5  ;;  %v14962_v7 = vld [vmem:[#allocation59_spill] sm:$0xff] }
 0x1f3   : > { %v2539_v38 = vadd.f32 %v2521_v45, %v2463_v3  ;;  %v3319_v45 = vmul.f32 %v11078_v8, %v14960_v42  ;;  %v2978_v27 = vsel %vm2805_vm6, %v2976_v17, %v2977_v18  ;;  %v3395_v48 = vmul.f32 %v10932_v40, %v14961_v13  ;;  %v14963_v18 = vld [vmem:[#allocation60_spill] sm:$0xff]  ;;  %v14964_v42 = vld [vmem:[#allocation61_spill] sm:$0xff] }
 0x1f4   : > { %v3396_v3 = vmul.f32 %v10818_v51, %v14961_v13  ;;  %v3471_v11 = vmul.f32 %v11092_v49, %v14962_v7  ;;  %v3472_v8 = vmul.f32 %v11096_v36, %v14962_v7  ;;  %v3281_v0 = vrot.slane %v3243_v44, 5 }
 0x1f5   : > { %v2615_v53 = vadd.f32 %v2597_v57, %v2539_v38  ;;  %v3054_v57 = vsel %vm2805_vm6, %v3052_v39, %v3053_v4  ;;  %v3280_v38 = vrot.slane %v3242_v2, 5  ;;  %v3358_v19 = vrot.slane %v3319_v45, 6  ;;  %v14965_v45 = vld [vmem:[#allocation11_spill] sm:$0xff] }
 0x1f6   : > { %v3130_v46 = vsel %vm2805_vm6, %v3128_v34, %v3129_v16  ;;  %v3206_v17 = vsel %vm2805_vm6, %v3204_v37, %v3205_v52  ;;  %v3548_v39 = vmul.f32 %v10781_v41, %v14963_v18  ;;  %v3433_v2 = vrot.slane %v3395_v48, 6 }
 0x1f7   : > { %v2691_v55 = vadd.f32 %v2673_v14, %v2615_v53  ;;  %v3357_v14 = vrot.slane %v3318_v33, 6  ;;  %v3547_v53 = vmul.f32 %v10776_v5, %v14963_v18  ;;  %v3434_v13 = vrot.slane %v3396_v3, 6 }
 0x1f8   : > { %v3623_v7 = vmul.f32 %v11054_v35, %v14964_v42  ;;  %v3510_v44 = vrot.slane %v3472_v8, 6  ;;  %v3624_v33 = vmul.f32 %v11012_v22, %v14964_v42  ;;  %v509_v34 = vmul.f32 %v10932_v40, %v14965_v45 }
 0x1f9   : > { %v2767_v21 = vadd.f32 %v2749_v29, %v2691_v55  ;;  %v3509_v29 = vrot.slane %v3471_v11, 6  ;;  %v3282_v37 = vsel %vm2805_vm6, %v3280_v38, %v3281_v0  ;;  %v3359_v52 = vsel %vm3338_vm7, %v3357_v14, %v3358_v19  ;;  %v14966_v55 = vld [vmem:[#allocation12_spill] sm:$0xff]  ;;  %v8840_v11 = vld [vmem:[%s14272_s2] ss:$0 sm:$0xff]  ;;  %v14968_v38 = vld [vmem:[#allocation62_spill] sm:$0xff] }
 0x1fa   : > { %v3585_v48 = vrot.slane %v3547_v53, 6  ;;  %v3586_v3 = vrot.slane %v3548_v39, 6  ;;  %v517_v8 = vadd.f32 %v8840_v11, %v509_v34  ;;  %v11231_v0 = vmul.f32 %v10745_v58, %v14968_v38  ;;  %v14969_v39 = vld [vmem:[#allocation14_spill] sm:$0xff]  ;;  %v14970_v11 = vld [vmem:[#allocation20_spill] sm:$0xff] }
 0x1fb   : > { %v2844_v4 = vadd.f32 %v2826_v62, %v2767_v21  ;;  %v529_v62 = vmul.f32 %v11092_v49, %v14966_v55  ;;  %v14967_v21 = vld [vmem:[#allocation13_spill] sm:$0xff]  ;;  %v3511_v14 = vsel %vm3338_vm7, %v3509_v29, %v3510_v44  ;;  %v3662_v19 = vrot.slane %v3624_v33, 6  ;;  %v14972_v33 = vld [vmem:[#allocation15_spill] sm:$0xff] }
 0x1fc   : > { %v549_v42 = vmul.f32 %v10776_v5, %v14967_v21  ;;  %v569_v45 = vmul.f32 %v11054_v35, %v14969_v39  ;;  %v3700_v34 = vmul.f32 %v14968_v38, %v10737_v24  ;;  %v11250_v24 = vld [vmem:[#allocation2 + $0xd0] sm:$0xff] }
 0x1fd   : > { %v2920_v16 = vadd.f32 %v2902_v56, %v2844_v4  ;;  %v3435_v56 = vsel %vm3338_vm7, %v3433_v2, %v3434_v13  ;;  %v3661_v4 = vrot.slane %v3623_v7, 6  ;;  %v537_v53 = vadd.f32 %v529_v62, %v517_v8  ;;  %v14971_v2 = vld [vmem:[#allocation34_spill] sm:$0xff]  ;;  %v14973_v62 = vld [vmem:[#allocation19_spill] sm:$0xff] }
 0x1fe   : > { %v657_v13 = vmul.f32 %v10818_v51, %v14970_v11  ;;  %v3587_v7 = vsel %vm3338_vm7, %v3585_v48, %v3586_v3  ;;  %v11245_v29 = vmul.f32 %v14971_v2, %v10951_v6  ;;  %v733_v8 = vmul.f32 %v11092_v49, %v14973_v62  ;;  %v14974_v3 = vld [vmem:[#allocation17_spill] sm:$0xff] }
 0x1ff   : > { %v2996_v18 = vadd.f32 %v2978_v27, %v2920_v16  ;;  %v656_v27 = vmul.f32 %v10932_v40, %v14970_v11  ;;  %v557_v44 = vadd.f32 %v549_v42, %v537_v53  ;;  %v589_v16 = vmul.f32 %v10745_v58, %v14972_v33  ;;  %v14975_v33 = vld [vmem:[#allocation18_spill] sm:$0xff] }
 0x200   : > { %v734_v21 = vmul.f32 %v11096_v36, %v14973_v62  ;;  %v609_v39 = vmul.f32 %v14974_v3, %v10951_v6  ;;  %v809_v42 = vmul.f32 %v10776_v5, %v14942_v25  ;;  %v810_v58 = vmul.f32 %v10781_v41, %v14942_v25 }
 0x201   : > { %v3072_v55 = vadd.f32 %v3054_v57, %v2996_v18  ;;  %v3737_v18 = vrot.slane %v11231_v0, 6  ;;  %v577_v48 = vadd.f32 %v569_v45, %v557_v44  ;;  %v3776_v0 = vmul.f32 %v14971_v2, %v11017_v54 }
 0x202   : > { %v696_v53 = vrot.slane %v656_v27, 1  ;;  %v629_v62 = vmul.f32 %v14975_v33, %v11250_v24  ;;  %v885_v45 = vmul.f32 %v11054_v35, %v14863_v59  ;;  %v886_v44 = vmul.f32 %v11012_v22, %v14863_v59  ;;  %v11274_v33 = vld [vmem:[#allocation2 + $0xb0] sm:$0xff]  ;;  %v11278_v59 = vld [vmem:[#allocation2 + $0xb8] sm:$0x3f] }
 0x203   : > { %v3148_v57 = vadd.f32 %v3130_v46, %v3072_v55  ;;  %v697_v55 = vrot.slane %v657_v13, 1  ;;  %v597_v11 = vadd.f32 %v589_v16, %v577_v48  ;;  %v3663_v3 = vsel %vm3338_vm7, %v3661_v4, %v3662_v19  ;;  %v11271_v16 = vld [vmem:[#allocation2 + $0xd8] sm:$0x3f] }
 0x204   : > { %v772_v41 = vrot.slane %v733_v8, 1  ;;  %v773_v25 = vrot.slane %v734_v21, 1  ;;  %v848_v38 = vrot.slane %v809_v42, 1  ;;  %v849_v27 = vrot.slane %v810_v58, 1 }
 0x205   : > { %v3224_v46 = vadd.f32 %v3206_v17, %v3148_v57  ;;  %v3738_v17 = vrot.slane %v3700_v34, 6  ;;  %v617_v57 = vadd.f32 %v609_v39, %v597_v11  ;;  %v698_v48 = vsel %vm674_vm2, %v696_v53, %v697_v55 }
 0x206   : > { %v961_v61 = vmul.f32 %v11274_v33, %v14865_v20  ;;  %v924_v19 = vrot.slane %v885_v45, 1  ;;  %v925_v34 = vrot.slane %v886_v44, 1  ;;  %v3813_v21 = vrot.slane %v11245_v29, 6 }
 0x207   : > { %v3300_v5 = vadd.f32 %v3282_v37, %v3224_v46  ;;  %v962_v37 = vmul.f32 %v11278_v59, %v14865_v20  ;;  %v637_v4 = vadd.f32 %v629_v62, %v617_v57  ;;  %v774_v39 = vsel %vm674_vm2, %v772_v41, %v773_v25 }
 0x208   : > { %v1038_v42 = vmul.f32 %v9333_v47, %v11017_v54  ;;  %v3814_v58 = vrot.slane %v3776_v0, 6  ;;  %v1113_v53 = vmul.f32 %v9338_v60, %v11250_v24  ;;  %v1114_v20 = vmul.f32 %v9338_v60, %v11271_v16 }
 0x209   : > { %v3377_v13 = vadd.f32 %v3359_v52, %v3300_v5  ;;  %v1037_v52 = vmul.f32 %v9333_v47, %v10951_v6  ;;  %v714_v46 = vadd.f32 %v698_v48, %v637_v4  ;;  %v850_v11 = vsel %vm674_vm2, %v848_v38, %v849_v27 }
 0x20a   : > { %v1000_v62 = vrot.slane %v961_v61, 1  ;;  %v3739_v29 = vsel %vm3338_vm7, %v3737_v18, %v3738_v17  ;;  %v926_v44 = vsel %vm674_vm2, %v924_v19, %v925_v34  ;;  %v1077_v0 = vrot.slane %v1038_v42, 1 }
 0x20b   : > { %v3453_v8 = vadd.f32 %v3435_v56, %v3377_v13  ;;  %v1001_v56 = vrot.slane %v962_v37, 1  ;;  %v790_v45 = vadd.f32 %v774_v39, %v714_v46  ;;  %v1076_v5 = vrot.slane %v1037_v52, 1  ;;  %v11305_v13 = vld [vmem:[#allocation2 + $0x90] sm:$0xff] }
 0x20c   : > { %v1189_v41 = vmul.f32 %v10932_v40, %v9342_v15  ;;  %v1190_v25 = vmul.f32 %v10818_v51, %v9342_v15  ;;  %v1153_v57 = vrot.slane %v1114_v20, 1  ;;  %v1266_v61 = vmul.f32 %v11092_v49, %v14812_v12  ;;  %v11309_v51 = vld [vmem:[#allocation2 + $0x98] sm:$0x3f] }
 0x20d   : > { %v3529_v55 = vadd.f32 %v3511_v14, %v3453_v8  ;;  %v866_v60 = vadd.f32 %v850_v11, %v790_v45  ;;  %v1152_v14 = vrot.slane %v1113_v53, 1  ;;  %v1002_v18 = vsel %vm674_vm2, %v1000_v62, %v1001_v56 }
 0x20e   : > { %v1267_v17 = vmul.f32 %v11096_v36, %v14812_v12  ;;  %v1342_v15 = vmul.f32 %v11305_v13, %v14813_v28  ;;  %v1343_v48 = vmul.f32 %v11309_v51, %v14813_v28  ;;  %v1229_v4 = vrot.slane %v1189_v41, 2 }
 0x20f   : > { %v3605_v47 = vadd.f32 %v3587_v7, %v3529_v55  ;;  %v3815_v7 = vsel %vm3338_vm7, %v3813_v21, %v3814_v58  ;;  %v942_v27 = vadd.f32 %v926_v44, %v866_v60  ;;  %v1230_v19 = vrot.slane %v1190_v25, 2 }
 0x210   : > { %v1154_v12 = vsel %vm674_vm2, %v1152_v14, %v1153_v57  ;;  %v1305_v52 = vrot.slane %v1266_v61, 2  ;;  %v1306_v21 = vrot.slane %v1267_v17, 2  ;;  %v1418_v39 = vmul.f32 %v11054_v35, %v14840_v1  ;;  %v11341_v61 = vld [vmem:[#allocation2 + $0x78] sm:$0x3f] }
 0x211   : > { %v3681_v38 = vadd.f32 %v3663_v3, %v3605_v47  ;;  %v1078_v3 = vsel %vm674_vm2, %v1076_v5, %v1077_v0  ;;  %v1018_v34 = vadd.f32 %v1002_v18, %v942_v27  ;;  %v1419_v42 = vmul.f32 %v11012_v22, %v14840_v1 }
 0x212   : > { %v1381_v28 = vrot.slane %v1342_v15, 2  ;;  %v1382_v46 = vrot.slane %v1343_v48, 2  ;;  %v1231_v53 = vsel %vm1207_vm3, %v1229_v4, %v1230_v19  ;;  %v1494_v20 = vmul.f32 %v11274_v33, %v14842_v26 }
 0x213   : > { %v3757_v37 = vadd.f32 %v3739_v29, %v3681_v38  ;;  %v1094_v58 = vadd.f32 %v1078_v3, %v1018_v34  ;;  %v1495_v55 = vmul.f32 %v11278_v59, %v14842_v26  ;;  %v1570_v62 = vmul.f32 %v14843_v10, %v10951_v6 }
 0x214   : > { %v1571_v1 = vmul.f32 %v14843_v10, %v11017_v54  ;;  %v1307_v56 = vsel %vm1207_vm3, %v1305_v52, %v1306_v21  ;;  %v1457_v29 = vrot.slane %v1418_v39, 2  ;;  %v1458_v45 = vrot.slane %v1419_v42, 2  ;;  %v14976_v21 = vld [vmem:[#allocation39_spill] sm:$0xff] }
 0x215   : > { %v11315_v8 = vadd.f32 %v3815_v7, %v3757_v37  ;;  %v1170_v11 = vadd.f32 %v1154_v12, %v1094_v58  ;;  %v1383_v5 = vsel %vm1207_vm3, %v1381_v28, %v1382_v46  ;;  %v1533_v47 = vrot.slane %v1494_v20, 2  ;;  %v14977_v58 = vld [vmem:[#allocation40_spill] sm:$0xff] }
 0x216   : > { %v1534_v0 = vrot.slane %v1495_v55, 2  ;;  %v1646_v41 = vmul.f32 %v14868_v31, %v11250_v24  ;;  %v1647_v26 = vmul.f32 %v14868_v31, %v11271_v16  ;;  %v1609_v60 = vrot.slane %v1570_v62, 2 }
 0x217   : > { %8630 = vmatprep.mubr.msk.f32.mxu0 %vm361_vm0, %v11315_v8  ;;  %v1247_v44 = vadd.f32 %v1231_v53, %v1170_v11  ;;  %v1610_v14 = vrot.slane %v1571_v1, 2  ;;  %v1459_v10 = vsel %vm1207_vm3, %v1457_v29, %v1458_v45  ;;  %v1722_v57 = vmul.f32 %v10932_v40, %v14869_v32 }
 0x218   : > { %v1723_v38 = vmul.f32 %v11341_v61, %v14869_v32  ;;  %v1798_v17 = vmul.f32 %v11092_v49, %v14871_v23  ;;  %v1799_v31 = vmul.f32 %v11096_v36, %v14871_v23  ;;  %v1535_v7 = vsel %vm1207_vm3, %v1533_v47, %v1534_v0 }
 0x219   : > { %v1323_v25 = vadd.f32 %v1307_v56, %v1247_v44  ;;  %v1685_v27 = vrot.slane %v1646_v41, 2  ;;  %v1686_v15 = vrot.slane %v1647_v26, 2  ;;  %v1611_v37 = vsel %vm1207_vm3, %v1609_v60, %v1610_v14  ;;  %v14978_v56 = vld [vmem:[#allocation41_spill] sm:$0xff]  ;;  %v14979_v41 = vld [vmem:[#allocation42_spill] sm:$0xff]  ;;  %v14980_v14 = vld [vmem:[#allocation43_spill] sm:$0xff] }
 0x21a   : > { %v1761_v3 = vrot.slane %v1722_v57, 3  ;;  %v1762_v4 = vrot.slane %v1723_v38, 3  ;;  %v1874_v19 = vmul.f32 %v11305_v13, %v14945_v30  ;;  %v1875_v32 = vmul.f32 %v11309_v51, %v14945_v30 }
 0x21b   : > { %v1399_v18 = vadd.f32 %v1383_v5, %v1323_v25  ;;  %v1837_v12 = vrot.slane %v1798_v17, 3  ;;  %v1838_v52 = vrot.slane %v1799_v31, 3  ;;  %v1950_v23 = vmul.f32 %v11054_v35, %v14976_v21 }
 0x21c   : > { %v1687_v39 = vsel %vm1207_vm3, %v1685_v27, %v1686_v15  ;;  %v1951_v42 = vmul.f32 %v11012_v22, %v14976_v21  ;;  %v2026_v28 = vmul.f32 %v11274_v33, %v14977_v58  ;;  %v2027_v46 = vmul.f32 %v11278_v59, %v14977_v58 }
 0x21d   : > { %v1475_v48 = vadd.f32 %v1459_v10, %v1399_v18  ;;  %v1763_v30 = vsel %vm452_vm4, %v1761_v3, %v1762_v4  ;;  %v1913_v20 = vrot.slane %v1874_v19, 3  ;;  %v1914_v55 = vrot.slane %v1875_v32, 3 }
 0x21e   : > { %v1839_v62 = vsel %vm452_vm4, %v1837_v12, %v1838_v52  ;;  %v1989_v1 = vrot.slane %v1950_v23, 3  ;;  %v2102_v29 = vmul.f32 %v14978_v56, %v10951_v6  ;;  %v1990_v45 = vrot.slane %v1951_v42, 3  ;;  %v14982_v12 = vld [vmem:[#allocation45_spill] sm:$0xff] }
 0x21f   : > { %v1551_v34 = vadd.f32 %v1535_v7, %v1475_v48  ;;  %v2065_v44 = vrot.slane %v2026_v28, 3  ;;  %v2066_v5 = vrot.slane %v2027_v46, 3  ;;  %v2103_v47 = vmul.f32 %v14978_v56, %v11017_v54 }
 0x220   : > { %v2178_v26 = vmul.f32 %v14979_v41, %v11250_v24  ;;  %v2179_v25 = vmul.f32 %v14979_v41, %v11271_v16  ;;  %v1915_v60 = vsel %vm452_vm4, %v1913_v20, %v1914_v55  ;;  %v2254_v10 = vmul.f32 %v10932_v40, %v14980_v14  ;;  %v14986_v41 = vld [vmem:[#allocation49_spill] sm:$0xff] }
 0x221   : > { %v1627_v53 = vadd.f32 %v1611_v37, %v1551_v34  ;;  %v2255_v57 = vmul.f32 %v11341_v61, %v14980_v14  ;;  %v1991_v18 = vsel %vm452_vm4, %v1989_v1, %v1990_v45  ;;  %v2067_v17 = vsel %vm452_vm4, %v2065_v44, %v2066_v5  ;;  %v14981_v37 = vld [vmem:[#allocation44_spill] sm:$0xff] }
 0x222   : > { %v2141_v31 = vrot.slane %v2102_v29, 3  ;;  %v2142_v7 = vrot.slane %v2103_v47, 3  ;;  %v2217_v15 = vrot.slane %v2178_v26, 3  ;;  %v2218_v48 = vrot.slane %v2179_v25, 3  ;;  %v14984_v29 = vld [vmem:[#allocation47_spill] sm:$0xff]  ;;  %v14985_v5 = vld [vmem:[#allocation48_spill] sm:$0xff] }
 0x223   : > { %v1703_v11 = vadd.f32 %v1687_v39, %v1627_v53  ;;  %v2331_v3 = vmul.f32 %v11092_v49, %v14981_v37  ;;  %v2294_v19 = vrot.slane %v2254_v10, 4  ;;  %v2295_v32 = vrot.slane %v2255_v57, 4  ;;  %v14983_v53 = vld [vmem:[#allocation46_spill] sm:$0xff] }
 0x224   : > { %v2332_v34 = vmul.f32 %v11096_v36, %v14981_v37  ;;  %v2407_v52 = vmul.f32 %v11305_v13, %v14982_v12  ;;  %v2408_v39 = vmul.f32 %v11309_v51, %v14982_v12  ;;  %v2143_v42 = vsel %vm452_vm4, %v2141_v31, %v2142_v7 }
 0x225   : > { %v1779_v0 = vadd.f32 %v1763_v30, %v1703_v11  ;;  %v2219_v28 = vsel %vm452_vm4, %v2217_v15, %v2218_v48  ;;  %v2370_v46 = vrot.slane %v2331_v3, 4  ;;  %v2483_v30 = vmul.f32 %v11054_v35, %v14983_v53 }
 0x226   : > { %v2296_v20 = vsel %vm2272_vm5, %v2294_v19, %v2295_v32  ;;  %v2371_v55 = vrot.slane %v2332_v34, 4  ;;  %v2446_v11 = vrot.slane %v2407_v52, 4  ;;  %v2447_v56 = vrot.slane %v2408_v39, 4 }
 0x227   : > { %v1855_v38 = vadd.f32 %v1839_v62, %v1779_v0  ;;  %v2484_v62 = vmul.f32 %v11012_v22, %v14983_v53  ;;  %v2559_v45 = vmul.f32 %v11274_v33, %v14984_v29  ;;  %v2560_v44 = vmul.f32 %v11278_v59, %v14984_v29 }
 0x228   : > { %v2635_v47 = vmul.f32 %v14985_v5, %v10951_v6  ;;  %v2636_v0 = vmul.f32 %v14985_v5, %v11017_v54  ;;  %v2711_v26 = vmul.f32 %v14986_v41, %v11250_v24  ;;  %v2712_v25 = vmul.f32 %v14986_v41, %v11271_v16 }
 0x229   : > { %v1931_v27 = vadd.f32 %v1915_v60, %v1855_v38  ;;  %v2522_v14 = vrot.slane %v2483_v30, 4  ;;  %v2372_v10 = vsel %vm2272_vm5, %v2370_v46, %v2371_v55  ;;  %v2523_v57 = vrot.slane %v2484_v62, 4  ;;  %v14987_v38 = vld [vmem:[#allocation50_spill] sm:$0xff] }
 0x22a   : > { %v2448_v7 = vsel %vm2272_vm5, %v2446_v11, %v2447_v56  ;;  %v2599_v15 = vrot.slane %v2560_v44, 4  ;;  %v2674_v48 = vrot.slane %v2635_v47, 4  ;;  %v2675_v37 = vrot.slane %v2636_v0, 4  ;;  %v14989_v56 = vld [vmem:[#allocation26_spill] sm:$0xff]  ;;  %v14990_v47 = vld [vmem:[#allocation23_spill] sm:$0xff] }
 0x22b   : > { %v2007_v23 = vadd.f32 %v1991_v18, %v1931_v27  ;;  %v2787_v18 = vmul.f32 %v10932_v40, %v14987_v38  ;;  %v2598_v27 = vrot.slane %v2559_v45, 4  ;;  %v2750_v3 = vrot.slane %v2711_v26, 4 }
 0x22c   : > { %v2751_v19 = vrot.slane %v2712_v25, 4  ;;  %v2864_v34 = vmul.f32 %v11092_v49, %v14933_v43  ;;  %v2524_v12 = vsel %vm2272_vm5, %v2522_v14, %v2523_v57  ;;  %v2865_v39 = vmul.f32 %v11096_v36, %v14933_v43 }
 0x22d   : > { %v11383_v4 = vpop.f32.mrb[2].mxu0  ;;  %v2083_v58 = vadd.f32 %v2067_v17, %v2007_v23  ;;  %v2788_v17 = vmul.f32 %v11341_v61, %v14987_v38  ;;  %v2827_v52 = vrot.slane %v2787_v18, 5  ;;  %v2940_v46 = vmul.f32 %v11305_v13, %v14934_v9 }
 0x22e   : > { %v11389_v21 = vpop.f32.mrb[3].mxu0  ;;  %v2903_v30 = vrot.slane %v2864_v34, 5  ;;  %v3777_v55 = vmul.f32 %v14971_v2, %v11250_v24  ;;  %v3016_v43 = vmul.f32 %v11054_v35, %v14908_v63  ;;  %v3778_v62 = vmul.f32 %v14971_v2, %v11271_v16 }
 0x22f   : > { %v2159_v1 = vadd.f32 %v2143_v42, %v2083_v58  ;;  %v2828_v40 = vrot.slane %v2788_v17, 5  ;;  %v2600_v42 = vsel %vm2272_vm5, %v2598_v27, %v2599_v15  ;;  %v2676_v58 = vsel %vm2272_vm5, %v2674_v48, %v2675_v37  ;;  %v14994_v37 = vld [vmem:[#allocation55_spill] sm:$0xff] }
 0x230   : > { %v2904_v44 = vrot.slane %v2865_v39, 5  ;;  %v3816_v5 = vrot.slane %v3777_v55, 6  ;;  %v2979_v41 = vrot.slane %v2940_v46, 5  ;;  %v3017_v26 = vmul.f32 %v11012_v22, %v14908_v63 }
 0x231   : > { %v2235_v60 = vadd.f32 %v2219_v28, %v2159_v1  ;;  %v2752_v28 = vsel %vm2272_vm5, %v2750_v3, %v2751_v19  ;;  %v2829_v11 = vsel %vm2805_vm6, %v2827_v52, %v2828_v40  ;;  %v14988_v1 = vld [vmem:[#allocation29_spill] sm:$0xff]  ;;  %v3092_v25 = vmul.f32 %v11274_v33, %v14959_v50  ;;  %v14995_v52 = vld [vmem:[#allocation56_spill] sm:$0xff] }
 0x232   : > { %v11439_v29 = vsub.f32 %v14989_v56, %v14988_v1  ;;  %v3093_v14 = vmul.f32 %v11278_v59, %v14959_v50  ;;  %v3055_v50 = vrot.slane %v3016_v43, 5  ;;  %v2905_v15 = vsel %vm2805_vm6, %v2903_v30, %v2904_v44  ;;  %v14997_v43 = vld [vmem:[#allocation58_spill] sm:$0xff] }
 0x233   : > { %v2312_v31 = vadd.f32 %v2296_v20, %v2235_v60  ;;  %v2941_v20 = vmul.f32 %v11309_v51, %v14934_v9  ;;  %v14991_v9 = vld [vmem:[#allocation32_spill] sm:$0xff]  ;;  %v3817_v60 = vrot.slane %v3778_v62, 6  ;;  %v3056_v48 = vrot.slane %v3017_v26, 5 }
 0x234   : > { %v11443_v0 = vsub.f32 %v14991_v9, %v14990_v47  ;;  %v3973_v63 = vmul.f32 %v11439_v29, %v11439_v29  ;;  %v3168_v3 = vmul.f32 %v14994_v37, %v10951_v6  ;;  %v3169_v19 = vmul.f32 %v14994_v37, %v11017_v54  ;;  %v14998_v47 = vld [vmem:[#allocation59_spill] sm:$0xff] }
 0x235   : > { %v2388_v32 = vadd.f32 %v2372_v10, %v2312_v31  ;;  %v14992_v10 = vld [vmem:[#allocation28_spill] sm:$0xff]  ;;  %v2980_v18 = vrot.slane %v2941_v20, 5  ;;  %v11458_v17 = vsel %vm3338_vm7, %v3816_v5, %v3817_v60  ;;  %v14993_v31 = vld [vmem:[#allocation33_spill] sm:$0xff]  ;;  %v3132_v34 = vrot.slane %v3093_v14, 5  ;;  %v8847_v37 = vld [vmem:[#allocation2 + $0xc0] sm:$0xff] }
 0x236   : > { %v11453_v57 = vsub.f32 %v14992_v10, %v11389_v21  ;;  %v3972_v38 = vmul.f32 %v11443_v0, %v11443_v0  ;;  %v3244_v40 = vmul.f32 %v14995_v52, %v11250_v24  ;;  %v3207_v30 = vrot.slane %v3168_v3, 5  ;;  %v15001_v3 = vld [vmem:[#allocation62_spill] sm:$0xff] }
 0x237   : > { %v2464_v23 = vadd.f32 %v2448_v7, %v2388_v32  ;;  %v11464_v7 = vsub.f32 %v14993_v31, %v11383_v4  ;;  %v3131_v32 = vrot.slane %v3092_v25, 5  ;;  %v3208_v20 = vrot.slane %v3169_v19, 5  ;;  %v14999_v25 = vld [vmem:[#allocation60_spill] sm:$0xff]  ;;  %v15000_v31 = vld [vmem:[#allocation61_spill] sm:$0xff] }
 0x238   : > { %v3974_v21 = vmul.f32 %v11453_v57, %v11453_v57  ;;  %8635 = vmatprep.mubr.msk.f32.mxu1 %vm361_vm0, %v3972_v38  ;;  %v3283_v55 = vrot.slane %v3244_v40, 5  ;;  %v3397_v62 = vmul.f32 %v11092_v49, %v14997_v43  ;;  %v3398_v1 = vmul.f32 %v11096_v36, %v14997_v43 }
 0x239   : > { %v2540_v53 = vadd.f32 %v2524_v12, %v2464_v23  ;;  %8636 = vmatmul.mubr.msk.f32.vlgmr.msra.gmra.mrb[0].mxu1 %vm361_vm0, %v3973_v63  ;;  %v2981_v12 = vsel %vm2805_vm6, %v2979_v41, %v2980_v18  ;;  %v3245_v23 = vmul.f32 %v14995_v52, %v11271_v16  ;;  %v3975_v6 = vmul.f32 %v11464_v7, %v11464_v7 }
 0x23a   : > { %8638 = vmatprep.mubr.msk.f32.mxu1 %vm361_vm0, %v3974_v21  ;;  %v3133_v16 = vsel %vm2805_vm6, %v3131_v32, %v3132_v34  ;;  %v3209_v5 = vsel %vm2805_vm6, %v3207_v30, %v3208_v20  ;;  %v3473_v9 = vmul.f32 %v11305_v13, %v14998_v47  ;;  %v3474_v41 = vmul.f32 %v11309_v51, %v14998_v47  ;;  %v15002_v30 = vld [vmem:[#allocation22_spill] sm:$0xff] }
 0x23b   : > { %v2616_v45 = vadd.f32 %v2600_v42, %v2540_v53  ;;  %v11483_v42 = vld [vmem:[#allocation2 + $0x70] sm:$0xff]  ;;  %v3057_v53 = vsel %vm2805_vm6, %v3055_v50, %v3056_v48  ;;  %v3549_v60 = vmul.f32 %v11054_v35, %v14999_v25  ;;  %v3437_v14 = vrot.slane %v3398_v1, 6 }
 0x23c   : > { %v3550_v36 = vmul.f32 %v11012_v22, %v14999_v25  ;;  %v3512_v18 = vrot.slane %v3473_v9, 6  ;;  %v3513_v63 = vrot.slane %v3474_v41, 6  ;;  %v3626_v50 = vmul.f32 %v11278_v59, %v15000_v31 }
 0x23d   : > { %v2692_v2 = vadd.f32 %v2676_v58, %v2616_v45  ;;  %v14996_v58 = vld [vmem:[#allocation57_spill] sm:$0xff]  ;;  %8639 = vmatmul.mubr.msk.f32.gmra.mrb[2].mxu1 %vm361_vm0, %v3975_v6  ;;  %v3588_v35 = vrot.slane %v3549_v60, 6  ;;  %v3701_v19 = vmul.f32 %v8847_v37, %v15001_v3  ;;  %v3702_v22 = vmul.f32 %v15001_v3, %v11017_v54  ;;  %v8498_v3 = vld [vmem:[%s14274_s4] ss:$0 sm:$0xff] }
 0x23e   : > { %v3321_v46 = vmul.f32 %v11341_v61, %v14996_v58  ;;  %v3589_v48 = vrot.slane %v3550_v36, 6  ;;  %v3514_v32 = vsel %vm3338_vm7, %v3512_v18, %v3513_v63 }
 0x23f   : > { %v2768_v27 = vadd.f32 %v2752_v28, %v2692_v2  ;;  %v3320_v28 = vmul.f32 %v11483_v42, %v14996_v58  ;;  %v3436_v2 = vrot.slane %v3397_v62, 6  ;;  %v3740_v59 = vrot.slane %v3701_v19, 6  ;;  %v4155_v62 = vld [vmem:[%s14275_s5] sm:$0xf] }
 0x240   : > { %v3361_v44 = vrot.slane %v3321_v46, 6  ;;  %v3590_v52 = vsel %vm3338_vm7, %v3588_v35, %v3589_v48  ;;  %v3741_v40 = vrot.slane %v3702_v22, 6  ;;  %8719 = vmatprep.subr.msk.bf16.mxu0 %vm2272_vm5, %v4155_v62  ;;  %v8497_v48 = vld [vmem:[%s14273_s3] ss:$0 sm:$0xff] }
 0x241   : > { %v2845_v4 = vadd.f32 %v2829_v11, %v2768_v27  ;;  %v3284_v11 = vrot.slane %v3245_v23, 5  ;;  %v3360_v45 = vrot.slane %v3320_v28, 6  ;;  %v3625_v27 = vmul.f32 %v11274_v33, %v15000_v31 }
 0x242   : > { %v3742_v58 = vsel %vm3338_vm7, %v3740_v59, %v3741_v40 }
 0x243   : > { %v2921_v39 = vadd.f32 %v2905_v15, %v2845_v4  ;;  %v3285_v49 = vsel %vm2805_vm6, %v3283_v55, %v3284_v11  ;;  %v3362_v38 = vsel %vm3338_vm7, %v3360_v45, %v3361_v44  ;;  %v3438_v15 = vsel %vm3338_vm7, %v3436_v2, %v3437_v14 }
 0x244   : > { %v3664_v34 = vrot.slane %v3625_v27, 6 }
 0x245   : > { %v2997_v24 = vadd.f32 %v2981_v12, %v2921_v39  ;;  %v3665_v12 = vrot.slane %v3626_v50, 6 }
 0x247   : > { %v3073_v56 = vadd.f32 %v3057_v53, %v2997_v24  ;;  %v3666_v6 = vsel %vm3338_vm7, %v3664_v34, %v3665_v12 }
 0x249   : > { %v3149_v26 = vadd.f32 %v3133_v16, %v3073_v56  ;;  %v15003_v16 = vld [vmem:[#allocation3_spill] sm:$0xff]  ;;  %v15004_v56 = vmov 0.125  }
 0x24b   : > { %v3225_v10 = vadd.f32 %v3209_v5, %v3149_v26 }
 0x24d   : > { %v3301_v21 = vadd.f32 %v3285_v49, %v3225_v10 }
 0x24f   : > { %v3378_v4 = vadd.f32 %v3362_v38, %v3301_v21 }
 0x251   : > { %v3454_v33 = vadd.f32 %v3438_v15, %v3378_v4 }
 0x253   : > { %v3530_v23 = vadd.f32 %v3514_v32, %v3454_v33 }
 0x255   : > { %v3606_v39 = vadd.f32 %v3590_v52, %v3530_v23 }
 0x257   : > { %v3682_v28 = vadd.f32 %v3666_v6, %v3606_v39 }
 0x259   : > { %v3758_v46 = vadd.f32 %v3742_v58, %v3682_v28 }
 0x25b   : > { %v3834_v54 = vadd.f32 %v11458_v17, %v3758_v46  ;;  %v4174_v17 = vsel %vm2272_vm5, %v4155_v62, 0 }
 0x25c   : > { %8648 = vmatpush3.bf16.msra.mxu0 %v4174_v17 }
 0x25d   : > { %8631 = vmatmul.mubr.msk.f32.gmra.mrb[6].mxu0 %vm361_vm0, %v3834_v54  ;;  %8669 = vmatprep.subr.mxu0 %v15004_v56 }
 0x2ab   : > { %v8629_v53 = vpop.f32.mrb[4].mxu0 }
 0x2ac   : > { %v3969_v20 = vsub.f32 %v15002_v30, %v8629_v53  ;;  %v3945_v24 = vpop.f32.mrb[5].mxu0 }
 0x2ad   : > { %v3968_v55 = vsub.f32 %v15003_v16, %v3945_v24 }
 0x2ae   : > { %v3977_v43 = vmul.f32 %v3969_v20, %v3969_v20 }
 0x2af   : > { %v3976_v11 = vmul.f32 %v3968_v55, %v3968_v55 }
 0x2b1   : > { %8641 = vmatprep.mubr.msk.f32.mxu1 %vm361_vm0, %v3976_v11 }
 0x2b2   : > { %8642 = vmatmul.mubr.msk.f32.gmra.mrb[4].mxu1 %vm361_vm0, %v3977_v43 }
 0x30c   : > { %v8637_v1 = vpop.f32.mrb[0].mxu1 }
 0x30d   : > { %v4070_v45 = vpop.f32.mrb[1].mxu1  ;;  %v4076_v49 = vadd.f32 1e-06, %v8637_v1 }
 0x30e   : > { %v4071_v2 = vadd.f32 1e-06, %v4070_v45  ;;  %v8499_v45 = vld [vmem:[%s14276_s6] ss:$0 sm:$0xff] }
 0x30f   : > { %8735 = vrsqrt.f32 %v4076_v49 }
 0x310   : > { %v8640_v44 = vpop.f32.mrb[2].mxu1  ;;  %8737 = vrsqrt.f32 %v4071_v2 }
 0x311   : > { %v4080_v5 = vpop.f32.mrb[3].mxu1  ;;  %v4086_v14 = vadd.f32 1e-06, %v8640_v44 }
 0x312   : > { %v4081_v36 = vadd.f32 1e-06, %v4080_v5 }
 0x313   : > { %8739 = vrsqrt.f32 %v4086_v14 }
 0x314   : > { %8741 = vrsqrt.f32 %v4081_v36 }
 0x319   : > { %v8736_v31 = vpop.eup %8735 }
 0x31a   : > { %v4118_v21 = vmul.f32 %v8736_v31, %v11439_v29 }
 0x31c   : > { %v4131_v19 = vmul.f32 %v8497_v48, %v4118_v21 }
 0x31e   : > { %v4144_v12 = vadd.f32 %v8498_v3, %v4131_v19 }
 0x330   : > { %v8632_v47 = vpop.f32.mrb[6].mxu0 }
 0x331   : > { %v3971_v9 = vsub.f32 %v3834_v54, %v8632_v47  ;;  %v3955_v41 = vpop.f32.mrb[7].mxu0 }
 0x332   : > { %v3970_v26 = vsub.f32 %v11315_v8, %v3955_v41  ;;  %v8738_v8 = vpop.eup %8737 }
 0x333   : > { %v3979_v60 = vmul.f32 %v3971_v9, %v3971_v9  ;;  %v8740_v27 = vpop.eup %8739  ;;  %v4117_v35 = vmul.f32 %v8738_v8, %v11443_v0 }
 0x334   : > { %v3978_v25 = vmul.f32 %v3970_v26, %v3970_v26  ;;  %v8742_v50 = vpop.eup %8741  ;;  %v4120_v15 = vmul.f32 %v8740_v27, %v11464_v7 }
 0x335   : > { %v4119_v37 = vmul.f32 %v8742_v50, %v11453_v57  ;;  %v4130_v34 = vmul.f32 %v8497_v48, %v4117_v35 }
 0x336   : > { %8644 = vmatprep.mubr.msk.f32.mxu1 %vm361_vm0, %v3978_v25  ;;  %v4133_v4 = vmul.f32 %v8497_v48, %v4120_v15 }
 0x337   : > { %8645 = vmatmul.mubr.msk.f32.gmra.mrb[6].mxu1 %vm361_vm0, %v3979_v60  ;;  %v4132_v32 = vmul.f32 %v8497_v48, %v4119_v37  ;;  %v4143_v0 = vadd.f32 %v8498_v3, %v4130_v34 }
 0x338   : > { %v4146_v7 = vadd.f32 %v8498_v3, %v4133_v4 }
 0x339   : > { %v4145_v52 = vadd.f32 %v8498_v3, %v4132_v32  ;;  %v4151_v40 = vpack.c.bf16 %v4144_v12, %v4143_v0 }
 0x33b   : > { %8649 = vmatprep.mubr.msk.bf16.mxu0 %vm361_vm0, %v4151_v40  ;;  %v4152_v23 = vpack.c.bf16 %v4146_v7, %v4145_v52 }
 0x33d   : > { %8650 = vmatmul.mubr.msk.bf16.vlgmr.msra.gmra.mrb[8].mxu0 %vm361_vm0, %v4152_v23 }
 0x33e   : > { %8670 = vmatpush3.msra.mxu0 %v15004_v56 }
 0x385   : > { %v8643_v10 = vpop.f32.mrb[4].mxu1 }
 0x386   : > { %v4096_v38 = vadd.f32 1e-06, %v8643_v10  ;;  %v4090_v18 = vpop.f32.mrb[5].mxu1 }
 0x387   : > { %v4091_v63 = vadd.f32 1e-06, %v4090_v18 }
 0x388   : > { %8743 = vrsqrt.f32 %v4096_v38 }
 0x389   : > { %8745 = vrsqrt.f32 %v4091_v63  ;;  %v8731_v63 = vld [vmem:[%s14277_s7] sm:$0xff]  }
 0x38a   : > { %8657 = vmatprep.subr.bf16.mxu1 %v8731_v63 }
 0x38b   : > { %8658 = vmatpush3.bf16.msra.mxu1 %v8731_v63  ;;  %v8853_v63 = vld [vmem:[#allocation2 + $0x68] sm:$0x3f] }
 0x392   : > { %v8744_v22 = vpop.eup %8743 }
 0x393   : > { %v8746_v29 = vpop.eup %8745  ;;  %v4122_v33 = vmul.f32 %v8744_v22, %v3969_v20  ;;  %v8732_v22 = vld [vmem:[%s14277_s7 + $0x8] sm:$0xff]  }
 0x394   : > { %v4121_v59 = vmul.f32 %v8746_v29, %v3968_v55  ;;  %8659 = vmatprep.subr.bf16.mxu1 %v8732_v22 }
 0x395   : > { %v4135_v57 = vmul.f32 %v8497_v48, %v4122_v33  ;;  %8660 = vmatpush3.bf16.msra.mxu1 %v8732_v22 }
 0x396   : > { %v4134_v6 = vmul.f32 %v8497_v48, %v4121_v59  ;;  %8683 = vmatprep.subr.mxu1 %v15004_v56 }
 0x397   : > { %v4148_v39 = vadd.f32 %v8498_v3, %v4135_v57 }
 0x398   : > { %v4147_v58 = vadd.f32 %v8498_v3, %v4134_v6 }
 0x39a   : > { %v4153_v28 = vpack.c.bf16 %v4148_v39, %v4147_v58 }
 0x39c   : > { %8653 = vmatprep.mubr.msk.bf16.mxu0 %vm361_vm0, %v4153_v28 }
 0x40a   : > { %v8646_v46 = vpop.f32.mrb[6].mxu1 }
 0x40b   : > { %v4106_v54 = vadd.f32 1e-06, %v8646_v46  ;;  %v4100_v53 = vpop.f32.mrb[7].mxu1 }
 0x40c   : > { %v4101_v30 = vadd.f32 1e-06, %v4100_v53 }
 0x40d   : > { %8747 = vrsqrt.f32 %v4106_v54 }
 0x40e   : > { %8749 = vrsqrt.f32 %v4101_v30 }
 0x410   : > { %v8651_v44 = vpop.f32.mrb[8].mxu0 }
 0x411   : > { %v4219_v5 = vadd.f32 %v8651_v44, %v8499_v45  ;;  %v4210_v47 = vpop.f32.mrb[9].mxu0 }
 0x412   : > { %v4211_v41 = vadd.f32 %v8499_v45, %v4210_v47  ;;  %v8652_v25 = vpop.f32.mrb[10].mxu0  ;;  %v8848_v47 = vld [vmem:[#allocation2 + $0x50] sm:$0xff] }
 0x413   : > { %v4252_v60 = vmul.f32 0.70710677, %v4219_v5  ;;  %v4222_v49 = vadd.f32 %v8652_v25, %v8499_v45  ;;  %v4243_v50 = vmul.f32 0.5, %v4219_v5  ;;  %v8849_v25 = vld [vmem:[#allocation2 + $0x58] sm:$0x3f] }
 0x414   : > { %v4241_v15 = vmul.f32 0.5, %v4211_v41 }
 0x415   : > { %8751 = verf.f32 %v4252_v60  ;;  %v4253_v14 = vmul.f32 0.70710677, %v4222_v49  ;;  %v4244_v21 = vmul.f32 0.5, %v4222_v49  ;;  %v460_v60 = vrot.slane %v8849_v25, 3  ;;  %v8504_v49 = vld [vmem:[%s14278_s8] ss:$0 sm:$0xff] }
 0x417   : > { %v8748_v20 = vpop.eup %8747 }
 0x418   : > { %v8750_v24 = vpop.eup %8749  ;;  %v4124_v16 = vmul.f32 %v8748_v20, %v3971_v9  ;;  %v4213_v9 = vpop.f32.mrb[11].mxu0 }
 0x419   : > { %v4123_v55 = vmul.f32 %v8750_v24, %v3970_v26  ;;  %v4250_v26 = vmul.f32 0.70710677, %v4211_v41  ;;  %v4214_v2 = vadd.f32 %v8499_v45, %v4213_v9  ;;  %v459_v41 = vrot.slane %v8848_v47, 3  ;;  %v8850_v9 = vld [vmem:[#allocation2 + $0x30] sm:$0xff] }
 0x41a   : > { %v4137_v11 = vmul.f32 %v8497_v48, %v4124_v16 }
 0x41b   : > { %v4136_v43 = vmul.f32 %v8497_v48, %v4123_v55  ;;  %8753 = verf.f32 %v4250_v26  ;;  %v4251_v36 = vmul.f32 0.70710677, %v4214_v2  ;;  %v4242_v48 = vmul.f32 0.5, %v4214_v2  ;;  %v8851_v2 = vld [vmem:[#allocation2 + $0x38] sm:$0x3f] }
 0x41c   : > { %v4150_v62 = vadd.f32 %v8498_v3, %v4137_v11  ;;  %8755 = verf.f32 %v4253_v14  ;;  %v453_v26 = vrot.slane %v8850_v9, 3  ;;  %v454_v14 = vrot.slane %v8851_v2, 3  ;;  %v8859_v2 = vld [vmem:[#allocation2 + $0x88] sm:$0x3f] }
 0x41d   : > { %v4149_v17 = vadd.f32 %v8498_v3, %v4136_v43  ;;  %8757 = verf.f32 %v4251_v36 }
 0x41e   : > { %v455_v22 = vsel %vm452_vm4, %v453_v26, %v454_v14  ;;  %v469_v14 = vrot.slane %v8859_v2, 3 }
 0x41f   : > { %v4154_v1 = vpack.c.bf16 %v4150_v62, %v4149_v17  ;;  %v8752_v10 = vpop.eup %8751 }
 0x420   : > { %v4268_v18 = vadd.f32 1.0, %v8752_v10  ;;  %v8511_v10 = vld [vmem:[%s14279_s9] ss:$0 sm:$0xff] }
 0x421   : > { %8654 = vmatmul.mubr.msk.bf16.gmra.mrb[12].mxu0 %vm361_vm0, %v4154_v1 }
 0x422   : > { %v4276_v3 = vmul.f32 %v4268_v18, %v4243_v50  ;;  %v8854_v50 = vld [vmem:[#allocation2 + $0x40] sm:$0xff] }
 0x425   : > { %v8754_v38 = vpop.eup %8753 }
 0x426   : > { %v8756_v31 = vpop.eup %8755  ;;  %v4266_v8 = vadd.f32 1.0, %v8754_v38  ;;  %v8852_v38 = vld [vmem:[#allocation2 + $0x60] sm:$0xff] }
 0x427   : > { %v8758_v27 = vpop.eup %8757  ;;  %v4269_v35 = vadd.f32 1.0, %v8756_v31  ;;  %v462_v18 = vrot.slane %v8852_v38, 3  ;;  %v463_v31 = vrot.slane %v8853_v63, 3 }
 0x428   : > { %v4267_v37 = vadd.f32 1.0, %v8758_v27  ;;  %v4274_v4 = vmul.f32 %v4266_v8, %v4241_v15 }
 0x429   : > { %v4277_v19 = vmul.f32 %v4269_v35, %v4244_v21  ;;  %v456_v21 = vrot.slane %v8854_v50, 3  ;;  %v8855_v35 = vld [vmem:[#allocation2 + $0x48] sm:$0x3f] }
 0x42a   : > { %v4275_v32 = vmul.f32 %v4267_v37, %v4242_v48  ;;  %v457_v15 = vrot.slane %v8855_v35, 3  ;;  %v461_v48 = vsel %vm452_vm4, %v459_v41, %v460_v60  ;;  %v8857_v41 = vld [vmem:[#allocation2 + $0xa8] sm:$0x3f]  ;;  %v8858_v60 = vld [vmem:[#allocation2 + $0x80] sm:$0xff] }
 0x42b   : > { %v4283_v34 = vpack.c.bf16 %v4277_v19, %v4276_v3  ;;  %v475_v25 = vrot.slane %v8857_v41, 3 }
 0x42c   : > { %v4282_v29 = vpack.c.bf16 %v4275_v32, %v4274_v4 }
 0x42e   : > { %8661 = vmatprep.mubr.msk.bf16.mxu1 %vm4307_vm8, %v4282_v29  ;;  %v464_v29 = vsel %vm452_vm4, %v462_v18, %v463_v31 }
 0x42f   : > { %8662 = vmatmul.mubr.msk.bf16.vlgmr.msra.gmra.mrb[8].mxu1 %vm4307_vm8, %v4283_v34 }
 0x430   : > { %8684 = vmatpush3.msra.mxu1 %v15004_v56 }
 0x4f4   : > { %v8655_v12 = vpop.f32.mrb[12].mxu0 }
 0x4f5   : > { %v4235_v0 = vadd.f32 %v8655_v12, %v8499_v45  ;;  %v4226_v33 = vpop.f32.mrb[13].mxu0 }
 0x4f6   : > { %v4227_v7 = vadd.f32 %v8499_v45, %v4226_v33  ;;  %v8656_v52 = vpop.f32.mrb[14].mxu0 }
 0x4f7   : > { %v4256_v59 = vmul.f32 0.70710677, %v4235_v0  ;;  %v4238_v40 = vadd.f32 %v8656_v52, %v8499_v45  ;;  %v4229_v57 = vpop.f32.mrb[15].mxu0  ;;  %v4247_v20 = vmul.f32 0.5, %v4235_v0 }
 0x4f8   : > { %v4254_v23 = vmul.f32 0.70710677, %v4227_v7  ;;  %v4230_v6 = vadd.f32 %v8499_v45, %v4229_v57  ;;  %v4245_v55 = vmul.f32 0.5, %v4227_v7  ;;  %v458_v7 = vsel %vm452_vm4, %v456_v21, %v457_v15  ;;  %v11578_v57 = vld [vmem:[%s14271_s1 + $0x38] sm:$0xff]  ;;  %v11648_v21 = vld [vmem:[%s14271_s1 + $0x48] sm:$0xff] }
 0x4f9   : > { %8759 = verf.f32 %v4256_v59  ;;  %v4257_v39 = vmul.f32 0.70710677, %v4238_v40  ;;  %v4248_v24 = vmul.f32 0.5, %v4238_v40 }
 0x4fa   : > { %8761 = verf.f32 %v4254_v23  ;;  %v4255_v58 = vmul.f32 0.70710677, %v4230_v6  ;;  %v4246_v11 = vmul.f32 0.5, %v4230_v6  ;;  %v15005_v6 = vld [vmem:[#allocation4_spill] sm:$0xff] }
 0x4fb   : > { %8763 = verf.f32 %v4257_v39  ;;  %v11583_v39 = vrot.slane %v11578_v57, %v15005_v6 }
 0x4fc   : > { %8765 = verf.f32 %v4255_v58  ;;  %v471_v58 = vrot.slane %v11305_v13, 3  ;;  %v8519_v13 = vld [vmem:[%s14272_s2 + $0x1] ss:$0 sm:$0xff] }
 0x4fd   : > { %15006 = vst [vmem:[#allocation35_spill] sm:$0xff] %v11583_v39 }
 0x502   : > { %v8663_v36 = vpop.f32.mrb[8].mxu1 }
 0x503   : > { %v8760_v28 = vpop.eup %8759  ;;  %v4363_v8 = vadd.f32 %v8663_v36, %v8504_v49  ;;  %v4354_v27 = vpop.f32.mrb[9].mxu1 }
 0x504   : > { %v8762_v46 = vpop.eup %8761  ;;  %v4272_v54 = vadd.f32 1.0, %v8760_v28  ;;  %v4355_v37 = vadd.f32 %v8504_v49, %v4354_v27  ;;  %v8664_v3 = vpop.f32.mrb[10].mxu1  ;;  %v472_v28 = vrot.slane %v11309_v51, 3  ;;  %v15011_v27 = vld [vmem:[#allocation6_spill] sm:$0xff] }
 0x505   : > { %v8764_v56 = vpop.eup %8763  ;;  %v4270_v53 = vadd.f32 1.0, %v8762_v46  ;;  %v4392_v19 = vmul.f32 %v8511_v10, %v4363_v8  ;;  %v4366_v4 = vadd.f32 %v8664_v3, %v8504_v49  ;;  %v4357_v32 = vpop.f32.mrb[11].mxu1  ;;  %v11588_v46 = vld [vmem:[#allocation2] sm:$0xff]  ;;  %v11659_v3 = vld [vmem:[%s14271_s1 + $0x50] sm:$0xff] }
 0x506   : > { %v8766_v30 = vpop.eup %8765  ;;  %v4273_v16 = vadd.f32 1.0, %v8764_v56  ;;  %v4280_v62 = vmul.f32 %v4272_v54, %v4247_v20  ;;  %v4390_v34 = vmul.f32 %v8511_v10, %v4355_v37  ;;  %v4358_v12 = vadd.f32 %v8504_v49, %v4357_v32  ;;  %v15007_v56 = vld [vmem:[#allocation5_spill] sm:$0xff] }
 0x507   : > { %v4271_v43 = vadd.f32 1.0, %v8766_v30  ;;  %v4278_v1 = vmul.f32 %v4270_v53, %v4245_v55  ;;  %v4400_v0 = vadd.f32 %v4392_v19, %v461_v48  ;;  %v4393_v33 = vmul.f32 %v8511_v10, %v4366_v4  ;;  %v11609_v55 = vld [vmem:[#allocation2 + $0x20] sm:$0xff] }
 0x508   : > { %v4281_v17 = vmul.f32 %v4273_v16, %v4248_v24  ;;  %v4398_v52 = vadd.f32 %v4390_v34, %v455_v22  ;;  %v4391_v59 = vmul.f32 %v8511_v10, %v4358_v12  ;;  %v4508_v54 = vmul.f32 %v11583_v39, %v11588_v46  ;;  %v11599_v24 = vld [vmem:[#allocation2 + $0x10] sm:$0xff] }
 0x509   : > { %v4279_v45 = vmul.f32 %v4271_v43, %v4246_v11  ;;  %4408 = vst.msk [vmem:[#allocation2 + $0x53] sm:$0xff] %vm361_vm0, %v4400_v0  ;;  %v4401_v40 = vadd.f32 %v4393_v33, %v464_v29  ;;  %v11595_v53 = vrot.slane %v11578_v57, %v15007_v56  ;;  %v465_v30 = vrot.slane %v11483_v42, 3 }
 0x50a   : > { %v4285_v44 = vpack.c.bf16 %v4281_v17, %v4280_v62  ;;  %4406 = vst.msk [vmem:[#allocation2 + $0x33] sm:$0xff] %vm361_vm0, %v4398_v52  ;;  %v4399_v23 = vadd.f32 %v4391_v59, %v458_v7  ;;  %v466_v20 = vrot.slane %v11341_v61, 3  ;;  %v4509_v51 = vmul.f32 %v11583_v39, %v11599_v24  ;;  %v8856_v61 = vld [vmem:[#allocation2 + $0xa0] sm:$0xff] }
 0x50b   : > { %v4284_v5 = vpack.c.bf16 %v4279_v45, %v4278_v1  ;;  %4409 = vst.msk [vmem:[#allocation2 + $0x63] sm:$0xff] %vm361_vm0, %v4401_v40  ;;  %15008 = vst [vmem:[#allocation36_spill] sm:$0xff] %v11595_v53  ;;  %v11607_v16 = vsel %vm452_vm4, %v471_v58, %v472_v28  ;;  %v4516_v11 = vadd.f32 %v8519_v13, %v4508_v54  ;;  %v474_v62 = vrot.slane %v8856_v61, 3  ;;  %v11618_v17 = vld [vmem:[%s14271_s1 + $0x40] sm:$0xff]  ;;  %v15017_v54 = vld [vmem:[#allocation8_spill] sm:$0xff] }
 0x50c   : > { %4407 = vst.msk [vmem:[#allocation2 + $0x43] sm:$0xff] %vm361_vm0, %v4399_v23  ;;  %15009 = vst [vmem:[#allocation37_spill] sm:$0xff] %v11607_v16  ;;  %v4528_v42 = vmul.f32 %v11595_v53, %v11599_v24  ;;  %v4510_v1 = vmul.f32 %v11583_v39, %v11609_v55  ;;  %v4517_v45 = vadd.f32 %v8519_v13, %v4509_v51  ;;  %v468_v49 = vrot.slane %v8858_v60, 3  ;;  %v15014_v59 = vld [vmem:[#allocation7_spill] sm:$0xff] }
 0x50d   : > { %8665 = vmatprep.mubr.msk.bf16.mxu1 %vm4307_vm8, %v4284_v5  ;;  %v11627_v47 = vsel %vm452_vm4, %v465_v30, %v466_v20  ;;  %v11643_v50 = vrot.slane %v11618_v17, %v15011_v27  ;;  %v11670_v33 = vsel %vm452_vm4, %v474_v62, %v475_v25  ;;  %v11674_v40 = vrot.slane %v11648_v21, %v15014_v59  ;;  %v11688_v20 = vld [vmem:[%s14271_s1 + $0x58] sm:$0xff] }
 0x50e   : > { %8666 = vmatmul.mubr.msk.bf16.gmra.mrb[12].mxu1 %vm4307_vm8, %v4285_v44  ;;  %v4529_v44 = vmul.f32 %v11595_v53, %v11609_v55  ;;  %15010 = vst [vmem:[#allocation31_spill] sm:$0xff] %v11627_v47  ;;  %v4518_v10 = vadd.f32 %v8519_v13, %v4510_v1  ;;  %v4536_v31 = vadd.f32 %v4528_v42, %v4516_v11  ;;  %15013 = vst [vmem:[#allocation27_spill] sm:$0xff] %v11670_v33 }
 0x50f   : > { %15012 = vst [vmem:[#allocation53_spill] sm:$0xff] %v11643_v50  ;;  %v4548_v4 = vmul.f32 %v11643_v50, %v11609_v55  ;;  %15015 = vst [vmem:[#allocation30_spill] sm:$0xff] %v11674_v40  ;;  %v11677_v23 = vsel %vm452_vm4, %v468_v49, %v469_v14  ;;  %v11683_v30 = vrot.slane %v11659_v3, %v15017_v54  ;;  %v15022_v14 = vld [vmem:[#allocation9_spill] sm:$0xff] }
 0x510   : > { %v11613_v43 = vld [vmem:[#allocation2 + $0x50] sm:$0xff]  ;;  %v4537_v8 = vadd.f32 %v4529_v44, %v4517_v45  ;;  %15016 = vst [vmem:[#allocation25_spill] sm:$0xff] %v11677_v23 }
 0x511   : > { %v11624_v5 = vld [vmem:[#allocation2 + $0x30] sm:$0xff]  ;;  %v4513_v9 = vmul.f32 %v11583_v39, %v11613_v43  ;;  %v4532_v63 = vmul.f32 %v11595_v53, %v11613_v43  ;;  %v4556_v7 = vadd.f32 %v4548_v4, %v4536_v31  ;;  %v4551_v28 = vmul.f32 %v11643_v50, %v11613_v43  ;;  %15018 = vst [vmem:[#allocation24_spill] sm:$0xff] %v11683_v30 }
 0x512   : > { %v11631_v26 = vld [vmem:[#allocation2 + $0x60] sm:$0xff]  ;;  %v4511_v36 = vmul.f32 %v11583_v39, %v11624_v5  ;;  %v4530_v38 = vmul.f32 %v11595_v53, %v11624_v5  ;;  %v4549_v32 = vmul.f32 %v11643_v50, %v11624_v5  ;;  %v4568_v42 = vmul.f32 %v11674_v40, %v11624_v5 }
 0x513   : > { %v11637_v18 = vld [vmem:[#allocation2 + $0x40] sm:$0xff]  ;;  %v4514_v15 = vmul.f32 %v11583_v39, %v11631_v26  ;;  %v4521_v19 = vadd.f32 %v8519_v13, %v4513_v9  ;;  %v4533_v29 = vmul.f32 %v11595_v53, %v11631_v26  ;;  %v4552_v1 = vmul.f32 %v11643_v50, %v11631_v26  ;;  %v11711_v9 = vld [vmem:[#allocation2 + $0x8] sm:$0x3f] }
 0x514   : > { %v4512_v35 = vmul.f32 %v11583_v39, %v11637_v18  ;;  %v4519_v48 = vadd.f32 %v8519_v13, %v4511_v36  ;;  %v4531_v37 = vmul.f32 %v11595_v53, %v11637_v18  ;;  %v4538_v22 = vadd.f32 %v4530_v38, %v4518_v10  ;;  %v15024_v10 = vld [vmem:[#allocation10_spill] sm:$0xff] }
 0x515   : > { %v4550_v0 = vmul.f32 %v11643_v50, %v11637_v18  ;;  %v4557_v52 = vadd.f32 %v4549_v32, %v4537_v8  ;;  %v11690_v51 = vadd.f32 %v8519_v13, %v4514_v15  ;;  %v4569_v61 = vmul.f32 %v11674_v40, %v11637_v18  ;;  %v11727_v8 = vld [vmem:[#allocation2 + $0x18] sm:$0x3f] }
 0x516   : > { %v4520_v34 = vadd.f32 %v8519_v13, %v4512_v35  ;;  %v4539_v12 = vadd.f32 %v4531_v37, %v4519_v48  ;;  %v11696_v62 = vadd.f32 %v4533_v29, %v4521_v19  ;;  %v4588_v44 = vmul.f32 %v11683_v30, %v11637_v18  ;;  %v11705_v13 = vld [vmem:[%s14271_s1 + $0x60] sm:$0xff] }
 0x517   : > { %15019 = vst [vmem:[#allocation51_spill] sm:$0xff] %v11690_v51  ;;  %v4558_v11 = vadd.f32 %v4550_v0, %v4538_v22  ;;  %v4570_v41 = vmul.f32 %v11674_v40, %v11613_v43  ;;  %v4571_v25 = vmul.f32 %v11674_v40, %v11631_v26  ;;  %v4576_v60 = vadd.f32 %v4568_v42, %v4556_v7 }
 0x518   : > { %v4540_v58 = vadd.f32 %v4532_v63, %v4520_v34  ;;  %15020 = vst [vmem:[#allocation52_spill] sm:$0xff] %v11696_v62  ;;  %v4559_v45 = vadd.f32 %v4551_v28, %v4539_v12  ;;  %v4577_v49 = vadd.f32 %v4569_v61, %v4557_v52  ;;  %v11717_v36 = vrot.slane %v11688_v20, %v15022_v14  ;;  %v15026_v63 = vld [vmem:[#allocation16_spill] sm:$0xff] }
 0x519   : > { %v11721_v38 = vrot.slane %v11705_v13, %v15024_v10  ;;  %v11725_v31 = vrot.slane %v11578_v57, %v15026_v63  ;;  %v4578_v35 = vadd.f32 %v4570_v41, %v4558_v11  ;;  %v4589_v15 = vmul.f32 %v11683_v30, %v11613_v43  ;;  %v11743_v34 = vld [vmem:[#allocation2 + $0x28] sm:$0x3f] }
 0x51a   : > { %v11713_v2 = vadd.f32 %v4552_v1, %v4540_v58  ;;  %15023 = vst [vmem:[#allocation38_spill] sm:$0xff] %v11717_v36  ;;  %v4596_v48 = vadd.f32 %v4588_v44, %v4576_v60  ;;  %v11733_v37 = vrot.slane %v11618_v17, %v15005_v6  ;;  %v11735_v19 = vadd.f32 %v4571_v25, %v4559_v45  ;;  %v11765_v44 = vld [vmem:[#allocation2 + $0x38] sm:$0x3f]  ;;  %v11767_v41 = vld [vmem:[#allocation2 + $0x48] sm:$0x3f] }
 0x51b   : > { %15025 = vst [vmem:[#allocation54_spill] sm:$0xff] %v11721_v38  ;;  %15027 = vst [vmem:[#allocation11_spill] sm:$0xff] %v11725_v31  ;;  %v4590_v22 = vmul.f32 %v11683_v30, %v11631_v26  ;;  %v4608_v4 = vmul.f32 %v11717_v36, %v11613_v43  ;;  %v4648_v32 = vmul.f32 %v11725_v31, %v11588_v46 }
 0x51c   : > { %15021 = vst [vmem:[#allocation21_spill] sm:$0xff] %v11713_v2  ;;  %15028 = vst [vmem:[#allocation12_spill] sm:$0xff] %v11733_v37  ;;  %v11745_v29 = vadd.f32 %v4589_v15, %v4577_v49  ;;  %v4649_v12 = vmul.f32 %v11725_v31, %v11711_v9  ;;  %v4724_v0 = vmul.f32 %v11733_v37, %v11599_v24 }
 0x51d   : > { %15029 = vst [vmem:[#allocation13_spill] sm:$0xff] %v11735_v19  ;;  %v11753_v7 = vrot.slane %v11618_v17, %v15007_v56  ;;  %v4616_v52 = vadd.f32 %v4608_v4, %v4596_v48  ;;  %v4628_v58 = vmul.f32 %v11721_v38, %v11631_v26  ;;  %v4680_v28 = vrot.slane %v4648_v32, 1 }
 0x51e   : > { %v4725_v11 = vmul.f32 %v11733_v37, %v11727_v8  ;;  %v11759_v42 = vadd.f32 %v4590_v22, %v4578_v35  ;;  %v11763_v61 = vmul.f32 %v11717_v36, %v11631_v26  ;;  %v4681_v1 = vrot.slane %v4649_v12, 1 }
 0x51f   : > { %15030 = vst [vmem:[#allocation14_spill] sm:$0xff] %v11753_v7  ;;  %v4756_v45 = vrot.slane %v4724_v0, 1  ;;  %v4636_v25 = vadd.f32 %v4628_v58, %v4616_v52  ;;  %v4800_v49 = vmul.f32 %v11753_v7, %v11609_v55  ;;  %v4801_v15 = vmul.f32 %v11753_v7, %v11743_v34  ;;  %v11787_v58 = vld [vmem:[#allocation2 + $0x58] sm:$0x3f] }
 0x520   : > { %15031 = vst [vmem:[#allocation20_spill] sm:$0xff] %v11759_v42  ;;  %v4757_v60 = vrot.slane %v4725_v11, 1  ;;  %v11775_v35 = vmul.f32 %v11725_v31, %v11599_v24  ;;  %v4682_v48 = vsel %vm674_vm2, %v4680_v28, %v4681_v1  ;;  %v11780_v22 = vrot.slane %v11648_v21, %v15011_v27  ;;  %v11797_v42 = vld [vmem:[#allocation2 + $0x68] sm:$0x3f] }
 0x521   : > { %v11784_v4 = vrot.slane %v11659_v3, %v15014_v59  ;;  %v4712_v32 = vadd.f32 %v4682_v48, %v4636_v25  ;;  %v4832_v0 = vrot.slane %v4800_v49, 1  ;;  %v4833_v52 = vrot.slane %v4801_v15, 1 }
 0x522   : > { %15032 = vst [vmem:[#allocation34_spill] sm:$0xff] %v11780_v22  ;;  %v4758_v12 = vsel %vm674_vm2, %v4756_v45, %v4757_v60  ;;  %v4876_v11 = vmul.f32 %v11780_v22, %v11624_v5  ;;  %v4877_v28 = vmul.f32 %v11780_v22, %v11765_v44  ;;  %v11802_v60 = vrot.slane %v11688_v20, %v15017_v54 }
 0x523   : > { %v4952_v1 = vmul.f32 %v11784_v4, %v11637_v18  ;;  %v4953_v39 = vmul.f32 %v11784_v4, %v11767_v41  ;;  %v4788_v25 = vadd.f32 %v4758_v12, %v4712_v32  ;;  %v4834_v45 = vsel %vm674_vm2, %v4832_v0, %v4833_v52 }
 0x524   : > { %v11806_v49 = vrot.slane %v11705_v13, %v15022_v14  ;;  %v4908_v15 = vrot.slane %v4876_v11, 1  ;;  %v4909_v48 = vrot.slane %v4877_v28, 1  ;;  %v5028_v62 = vmul.f32 %v11802_v60, %v11613_v43 }
 0x525   : > { %v4984_v36 = vrot.slane %v4952_v1, 1  ;;  %v4985_v19 = vrot.slane %v4953_v39, 1  ;;  %v4864_v2 = vadd.f32 %v4834_v45, %v4788_v25  ;;  %v5029_v32 = vmul.f32 %v11802_v60, %v11787_v58 }
 0x526   : > { %15033 = vst [vmem:[#allocation15_spill] sm:$0xff] %v11806_v49  ;;  %v5104_v12 = vmul.f32 %v11806_v49, %v11631_v26  ;;  %v4910_v0 = vsel %vm674_vm2, %v4908_v15, %v4909_v48  ;;  %v5105_v11 = vmul.f32 %v11806_v49, %v11797_v42  ;;  %v11820_v39 = vrot.slane %v11578_v57, %v15024_v10 }
 0x527   : > { %v4986_v52 = vsel %vm674_vm2, %v4984_v36, %v4985_v19  ;;  %v4940_v28 = vadd.f32 %v4910_v0, %v4864_v2  ;;  %v5060_v1 = vrot.slane %v5028_v62, 1  ;;  %v5061_v25 = vrot.slane %v5029_v32, 1 }
 0x528   : > { %15034 = vst [vmem:[#allocation19_spill] sm:$0xff] %v11820_v39  ;;  %v5136_v45 = vrot.slane %v5104_v12, 1  ;;  %v5137_v30 = vrot.slane %v5105_v11, 1  ;;  %v5180_v51 = vmul.f32 %v11820_v39, %v11588_v46  ;;  %v5181_v15 = vmul.f32 %v11820_v39, %v11711_v9 }
 0x529   : > { %v11828_v36 = vrot.slane %v11618_v17, %v15026_v63  ;;  %v5016_v19 = vadd.f32 %v4986_v52, %v4940_v28  ;;  %v5062_v48 = vsel %vm674_vm2, %v5060_v1, %v5061_v25  ;;  %v11833_v2 = vrot.slane %v11648_v21, %v15005_v6 }
 0x52a   : > { %v11837_v62 = vrot.slane %v11648_v21, %v15007_v56  ;;  %v5138_v32 = vsel %vm674_vm2, %v5136_v45, %v5137_v30  ;;  %v5212_v12 = vrot.slane %v5180_v51, 2  ;;  %v5213_v0 = vrot.slane %v5181_v15, 2 }
 0x52b   : > { %15035 = vst [vmem:[#allocation17_spill] sm:$0xff] %v11828_v36  ;;  %15036 = vst [vmem:[#allocation18_spill] sm:$0xff] %v11833_v2  ;;  %v5256_v11 = vmul.f32 %v11828_v36, %v11599_v24  ;;  %v5092_v49 = vadd.f32 %v5062_v48, %v5016_v19  ;;  %v5257_v52 = vmul.f32 %v11828_v36, %v11727_v8 }
 0x52c   : > { %15037 = vst [vmem:[#allocation39_spill] sm:$0xff] %v11837_v62  ;;  %v5332_v28 = vmul.f32 %v11833_v2, %v11609_v55  ;;  %v5333_v1 = vmul.f32 %v11833_v2, %v11743_v34  ;;  %v5214_v25 = vsel %vm1207_vm3, %v5212_v12, %v5213_v0  ;;  %v5408_v30 = vmul.f32 %v11837_v62, %v11624_v5 }
 0x52d   : > { %v5288_v38 = vrot.slane %v5256_v11, 2  ;;  %v5409_v51 = vmul.f32 %v11837_v62, %v11765_v44  ;;  %v5168_v45 = vadd.f32 %v5138_v32, %v5092_v49  ;;  %v5289_v15 = vrot.slane %v5257_v52, 2 }
 0x52e   : > { %v5364_v19 = vrot.slane %v5332_v28, 2  ;;  %v5365_v48 = vrot.slane %v5333_v1, 2  ;;  %v11855_v40 = vmul.f32 %v11725_v31, %v11727_v8  ;;  %v5440_v50 = vrot.slane %v5408_v30, 2 }
 0x52f   : > { %v11859_v53 = vrot.slane %v11659_v3, %v15011_v27  ;;  %v11863_v12 = vrot.slane %v11688_v20, %v15014_v59  ;;  %v5244_v0 = vadd.f32 %v5214_v25, %v5168_v45  ;;  %v5290_v11 = vsel %vm1207_vm3, %v5288_v38, %v5289_v15 }
 0x530   : > { %v5441_v49 = vrot.slane %v5409_v51, 2  ;;  %v11868_v32 = vrot.slane %v11705_v13, %v15017_v54  ;;  %v5366_v52 = vsel %vm1207_vm3, %v5364_v19, %v5365_v48  ;;  %v11885_v48 = vrot.slane %v11578_v57, %v15022_v14 }
 0x531   : > { %15038 = vst [vmem:[#allocation40_spill] sm:$0xff] %v11859_v53  ;;  %15039 = vst [vmem:[#allocation41_spill] sm:$0xff] %v11863_v12  ;;  %v5484_v28 = vmul.f32 %v11859_v53, %v11637_v18  ;;  %v5485_v1 = vmul.f32 %v11859_v53, %v11767_v41  ;;  %v5560_v30 = vmul.f32 %v11863_v12, %v11613_v43 }
 0x532   : > { %15040 = vst [vmem:[#allocation42_spill] sm:$0xff] %v11868_v32  ;;  %v5320_v31 = vadd.f32 %v5290_v11, %v5244_v0  ;;  %v5561_v38 = vmul.f32 %v11863_v12, %v11787_v58  ;;  %v5636_v25 = vmul.f32 %v11868_v32, %v11631_v26  ;;  %v5637_v51 = vmul.f32 %v11868_v32, %v11797_v42 }
 0x533   : > { %v5516_v45 = vrot.slane %v5484_v28, 2  ;;  %v5517_v15 = vrot.slane %v5485_v1, 2  ;;  %v5592_v19 = vrot.slane %v5560_v30, 2  ;;  %15041 = vst [vmem:[#allocation43_spill] sm:$0xff] %v11885_v48  ;;  %v5442_v33 = vsel %vm1207_vm3, %v5440_v50, %v5441_v49 }
 0x534   : > { %v5396_v23 = vadd.f32 %v5366_v52, %v5320_v31  ;;  %v5593_v0 = vrot.slane %v5561_v38, 2  ;;  %v5668_v11 = vrot.slane %v5636_v25, 2  ;;  %v5669_v47 = vrot.slane %v5637_v51, 2 }
 0x535   : > { %v5712_v16 = vmul.f32 %v11885_v48, %v11588_v46  ;;  %v5713_v12 = vmul.f32 %v11885_v48, %v11711_v9  ;;  %v11894_v28 = vrot.slane %v11618_v17, %v15024_v10  ;;  %v5518_v30 = vsel %vm1207_vm3, %v5516_v45, %v5517_v15 }
 0x536   : > { %v5472_v1 = vadd.f32 %v5442_v33, %v5396_v23  ;;  %v5594_v31 = vsel %vm1207_vm3, %v5592_v19, %v5593_v0  ;;  %v11900_v50 = vrot.slane %v11648_v21, %v15026_v63  ;;  %v11912_v45 = vrot.slane %v11659_v3, %v15005_v6 }
 0x537   : > { %15042 = vst [vmem:[#allocation44_spill] sm:$0xff] %v11894_v28  ;;  %v5744_v49 = vrot.slane %v5712_v16, 3  ;;  %v5745_v52 = vrot.slane %v5713_v12, 3  ;;  %v5788_v38 = vmul.f32 %v11894_v28, %v11599_v24  ;;  %v5789_v25 = vmul.f32 %v11894_v28, %v11727_v8 }
 0x538   : > { %15043 = vst [vmem:[#allocation45_spill] sm:$0xff] %v11900_v50  ;;  %v5548_v51 = vadd.f32 %v5518_v30, %v5472_v1  ;;  %v5864_v33 = vmul.f32 %v11900_v50, %v11609_v55  ;;  %v5865_v23 = vmul.f32 %v11900_v50, %v11743_v34  ;;  %15044 = vst [vmem:[#allocation46_spill] sm:$0xff] %v11912_v45 }
 0x539   : > { %v5670_v16 = vsel %vm1207_vm3, %v5668_v11, %v5669_v47  ;;  %v5820_v12 = vrot.slane %v5788_v38, 3  ;;  %v5821_v15 = vrot.slane %v5789_v25, 3  ;;  %v11917_v19 = vrot.slane %v11659_v3, %v15007_v56 }
 0x53a   : > { %v5624_v0 = vadd.f32 %v5594_v31, %v5548_v51  ;;  %v5746_v1 = vsel %vm452_vm4, %v5744_v49, %v5745_v52  ;;  %v5896_v30 = vrot.slane %v5864_v33, 3  ;;  %v5940_v32 = vmul.f32 %v11912_v45, %v11624_v5 }
 0x53b   : > { %15045 = vst [vmem:[#allocation47_spill] sm:$0xff] %v11917_v19  ;;  %v5897_v50 = vrot.slane %v5865_v23, 3  ;;  %v5941_v28 = vmul.f32 %v11912_v45, %v11765_v44  ;;  %v6016_v47 = vmul.f32 %v11917_v19, %v11637_v18  ;;  %v6017_v11 = vmul.f32 %v11917_v19, %v11767_v41 }
 0x53c   : > { %v11930_v38 = vadd.f32 %v11763_v61, %v11745_v29  ;;  %v5700_v31 = vadd.f32 %v5670_v16, %v5624_v0  ;;  %v5822_v49 = vsel %vm452_vm4, %v5820_v12, %v5821_v15  ;;  %v11935_v52 = vrot.slane %v11688_v20, %v15011_v27 }
 0x53d   : > { %v5972_v25 = vrot.slane %v5940_v32, 3  ;;  %v5973_v51 = vrot.slane %v5941_v28, 3  ;;  %v6048_v33 = vrot.slane %v6016_v47, 3  ;;  %v11939_v23 = vrot.slane %v11705_v13, %v15014_v59 }
 0x53e   : > { %15046 = vst [vmem:[#allocation48_spill] sm:$0xff] %v11930_v38  ;;  %15047 = vst [vmem:[#allocation49_spill] sm:$0xff] %v11935_v52  ;;  %v5776_v45 = vadd.f32 %v5746_v1, %v5700_v31  ;;  %v6049_v19 = vrot.slane %v6017_v11, 3  ;;  %v6092_v29 = vmul.f32 %v11935_v52, %v11613_v43  ;;  %v6093_v61 = vmul.f32 %v11935_v52, %v11787_v58 }
 0x53f   : > { %15048 = vst [vmem:[#allocation50_spill] sm:$0xff] %v11939_v23  ;;  %v5898_v16 = vsel %vm452_vm4, %v5896_v30, %v5897_v50  ;;  %v6168_v12 = vmul.f32 %v11939_v23, %v11631_v26  ;;  %v6169_v32 = vmul.f32 %v11939_v23, %v11797_v42  ;;  %v11952_v28 = vrot.slane %v11578_v57, %v15017_v54 }
 0x540   : > { %v4683_v15 = vrot.slane %v11775_v35, 1  ;;  %v4684_v0 = vrot.slane %v11855_v40, 1  ;;  %v5852_v1 = vadd.f32 %v5822_v49, %v5776_v45  ;;  %v6124_v47 = vrot.slane %v6092_v29, 3 }
 0x541   : > { %15049 = vst [vmem:[#allocation29_spill] sm:$0xff] %v11952_v28  ;;  %v6125_v11 = vrot.slane %v6093_v61, 3  ;;  %v6244_v50 = vmul.f32 %v11952_v28, %v11588_v46  ;;  %v6245_v30 = vmul.f32 %v11952_v28, %v11711_v9  ;;  %v11962_v31 = vrot.slane %v11618_v17, %v15022_v14 }
 0x542   : > { %v5928_v23 = vadd.f32 %v5898_v16, %v5852_v1  ;;  %v5974_v38 = vsel %vm452_vm4, %v5972_v25, %v5973_v51  ;;  %v6050_v35 = vsel %vm452_vm4, %v6048_v33, %v6049_v19  ;;  %v11968_v40 = vrot.slane %v11648_v21, %v15024_v10 }
 0x543   : > { %15050 = vst [vmem:[#allocation26_spill] sm:$0xff] %v11962_v31  ;;  %v6200_v45 = vrot.slane %v6168_v12, 3  ;;  %v6201_v49 = vrot.slane %v6169_v32, 3  ;;  %v6320_v29 = vmul.f32 %v11962_v31, %v11599_v24  ;;  %v6321_v61 = vmul.f32 %v11962_v31, %v11727_v8 }
 0x544   : > { %15051 = vst [vmem:[#allocation23_spill] sm:$0xff] %v11968_v40  ;;  %v6004_v28 = vadd.f32 %v5974_v38, %v5928_v23  ;;  %v6396_v16 = vmul.f32 %v11968_v40, %v11609_v55  ;;  %v6397_v25 = vmul.f32 %v11968_v40, %v11743_v34  ;;  %v11980_v19 = vrot.slane %v11659_v3, %v15026_v63 }
 0x545   : > { %v6126_v51 = vsel %vm452_vm4, %v6124_v47, %v6125_v11  ;;  %v6276_v33 = vrot.slane %v6244_v50, 4  ;;  %v6277_v12 = vrot.slane %v6245_v30, 4  ;;  %v11985_v32 = vrot.slane %v11688_v20, %v15005_v6 }
 0x546   : > { %15052 = vst [vmem:[#allocation32_spill] sm:$0xff] %v11980_v19  ;;  %v6080_v1 = vadd.f32 %v6050_v35, %v6004_v28  ;;  %v6352_v38 = vrot.slane %v6320_v29, 4  ;;  %v6353_v23 = vrot.slane %v6321_v61, 4  ;;  %v6472_v31 = vmul.f32 %v11980_v19, %v11624_v5 }
 0x547   : > { %15053 = vst [vmem:[#allocation28_spill] sm:$0xff] %v11985_v32  ;;  %v6428_v52 = vrot.slane %v6396_v16, 4  ;;  %v6473_v40 = vmul.f32 %v11980_v19, %v11765_v44  ;;  %v6548_v48 = vmul.f32 %v11985_v32, %v11637_v18  ;;  %v6549_v47 = vmul.f32 %v11985_v32, %v11767_v41 }
 0x548   : > { %v6156_v11 = vadd.f32 %v6126_v51, %v6080_v1  ;;  %v6429_v50 = vrot.slane %v6397_v25, 4  ;;  %v6504_v30 = vrot.slane %v6472_v31, 4  ;;  %v11997_v28 = vrot.slane %v11688_v20, %v15007_v56 }
 0x549   : > { %v6202_v35 = vsel %vm452_vm4, %v6200_v45, %v6201_v49  ;;  %v6278_v29 = vsel %vm2272_vm5, %v6276_v33, %v6277_v12  ;;  %v6505_v61 = vrot.slane %v6473_v40, 4  ;;  %v12003_v16 = vrot.slane %v11705_v13, %v15011_v27 }
 0x54a   : > { %15054 = vst [vmem:[#allocation33_spill] sm:$0xff] %v11997_v28  ;;  %v6232_v19 = vadd.f32 %v6202_v35, %v6156_v11  ;;  %v6580_v53 = vrot.slane %v6548_v48, 4  ;;  %v6581_v62 = vrot.slane %v6549_v47, 4  ;;  %v6624_v25 = vmul.f32 %v11997_v28, %v11613_v43 }
 0x54b   : > { %15055 = vst [vmem:[#allocation55_spill] sm:$0xff] %v12003_v16  ;;  %v6354_v31 = vsel %vm2272_vm5, %v6352_v38, %v6353_v23  ;;  %v6625_v51 = vmul.f32 %v11997_v28, %v11787_v58  ;;  %v6700_v45 = vmul.f32 %v12003_v16, %v11631_v26  ;;  %v12014_v40 = vrot.slane %v11578_v57, %v15014_v59 }
 0x54c   : > { %v12017_v49 = vsel %vm674_vm2, %v4683_v15, %v4684_v0  ;;  %v6308_v48 = vadd.f32 %v6278_v29, %v6232_v19  ;;  %v6430_v33 = vsel %vm2272_vm5, %v6428_v52, %v6429_v50  ;;  %v6506_v12 = vsel %vm2272_vm5, %v6504_v30, %v6505_v61 }
 0x54d   : > { %15056 = vst [vmem:[#allocation56_spill] sm:$0xff] %v12014_v40  ;;  %15057 = vst [vmem:[#allocation57_spill] sm:$0xff] %v12017_v49  ;;  %v6701_v1 = vmul.f32 %v12003_v16, %v11797_v42  ;;  %v6776_v38 = vmul.f32 %v12014_v40, %v11588_v46  ;;  %v6777_v23 = vmul.f32 %v12014_v40, %v11711_v9  ;;  %v6656_v19 = vrot.slane %v6624_v25, 4 }
 0x54e   : > { %v12029_v47 = vrot.slane %v11618_v17, %v15017_v54  ;;  %v6384_v15 = vadd.f32 %v6354_v31, %v6308_v48  ;;  %v6582_v0 = vsel %vm2272_vm5, %v6580_v53, %v6581_v62  ;;  %v12034_v52 = vrot.slane %v11648_v21, %v15022_v14 }
 0x54f   : > { %v6657_v11 = vrot.slane %v6625_v51, 4  ;;  %v6732_v50 = vrot.slane %v6700_v45, 4  ;;  %v12046_v62 = vrot.slane %v11659_v3, %v15024_v10  ;;  %v6733_v25 = vrot.slane %v6701_v1, 4 }
 0x550   : > { %15058 = vst [vmem:[#allocation58_spill] sm:$0xff] %v12029_v47  ;;  %15059 = vst [vmem:[#allocation59_spill] sm:$0xff] %v12034_v52  ;;  %v6852_v30 = vmul.f32 %v12029_v47, %v11599_v24  ;;  %v6853_v35 = vmul.f32 %v12029_v47, %v11727_v8  ;;  %v6460_v29 = vadd.f32 %v6430_v33, %v6384_v15  ;;  %v6808_v31 = vrot.slane %v6776_v38, 5 }
 0x551   : > { %v6928_v61 = vmul.f32 %v12034_v52, %v11609_v55  ;;  %v6929_v53 = vmul.f32 %v12034_v52, %v11743_v34  ;;  %15060 = vst [vmem:[#allocation60_spill] sm:$0xff] %v12046_v62  ;;  %v6809_v51 = vrot.slane %v6777_v23, 5  ;;  %v12050_v45 = vrot.slane %v11688_v20, %v15026_v63 }
 0x552   : > { %v6536_v48 = vadd.f32 %v6506_v12, %v6460_v29  ;;  %v6884_v16 = vrot.slane %v6852_v30, 5  ;;  %v6885_v33 = vrot.slane %v6853_v35, 5  ;;  %v7004_v15 = vmul.f32 %v12046_v62, %v11624_v5 }
 0x553   : > { %15061 = vst [vmem:[#allocation61_spill] sm:$0xff] %v12050_v45  ;;  %v6960_v49 = vrot.slane %v6928_v61, 5  ;;  %v7005_v52 = vmul.f32 %v12046_v62, %v11765_v44  ;;  %v7080_v47 = vmul.f32 %v12050_v45, %v11637_v18  ;;  %v7081_v1 = vmul.f32 %v12050_v45, %v11767_v41 }
 0x554   : > { %v6612_v38 = vadd.f32 %v6582_v0, %v6536_v48  ;;  %v6961_v23 = vrot.slane %v6929_v53, 5  ;;  %v7036_v40 = vrot.slane %v7004_v15, 5  ;;  %v12062_v12 = vrot.slane %v11705_v13, %v15005_v6 }
 0x555   : > { %v6658_v30 = vsel %vm2272_vm5, %v6656_v19, %v6657_v11  ;;  %v6734_v35 = vsel %vm2272_vm5, %v6732_v50, %v6733_v25  ;;  %v7037_v29 = vrot.slane %v7005_v52, 5  ;;  %v12068_v61 = vrot.slane %v11705_v13, %v15007_v56 }
 0x556   : > { %15062 = vst [vmem:[#allocation62_spill] sm:$0xff] %v12062_v12  ;;  %v6688_v62 = vadd.f32 %v6658_v30, %v6612_v38  ;;  %v7112_v28 = vrot.slane %v7080_v47, 5  ;;  %v7113_v32 = vrot.slane %v7081_v1, 5  ;;  %v7156_v0 = vmul.f32 %v12062_v12, %v11613_v43 }
 0x557   : > { %15063 = vst [vmem:[#allocation22_spill] sm:$0xff] %v12068_v61  ;;  %v6810_v53 = vsel %vm2805_vm6, %v6808_v31, %v6809_v51  ;;  %v7157_v6 = vmul.f32 %v12062_v12, %v11787_v58  ;;  %v7232_v19 = vmul.f32 %v12068_v61, %v11631_v26  ;;  %v12079_v52 = vrot.slane %v11578_v57, %v15011_v27 }
 0x558   : > { %v6764_v56 = vadd.f32 %v6734_v35, %v6688_v62  ;;  %v6886_v11 = vsel %vm2805_vm6, %v6884_v16, %v6885_v33  ;;  %v6962_v47 = vsel %vm2805_vm6, %v6960_v49, %v6961_v23  ;;  %v7038_v50 = vsel %vm2805_vm6, %v7036_v40, %v7037_v29  ;;  %v12120_v35 = vld [vmem:[%s14271_s1 + $0x68] ss:$0 sm:$0xff] }
 0x559   : > { %15064 = vst [vmem:[#allocation3_spill] sm:$0xff] %v12079_v52  ;;  %v7233_v25 = vmul.f32 %v12068_v61, %v11797_v42  ;;  %v7308_v31 = vmul.f32 %v12079_v52, %v11588_v46  ;;  %v7309_v51 = vmul.f32 %v12079_v52, %v11711_v9  ;;  %v12092_v57 = vrot.slane %v11618_v17, %v15014_v59 }
 0x55a   : > { %v6840_v27 = vadd.f32 %v6810_v53, %v6764_v56  ;;  %v7114_v16 = vsel %vm2805_vm6, %v7112_v28, %v7113_v32  ;;  %v7188_v62 = vrot.slane %v7156_v0, 5  ;;  %v12097_v40 = vrot.slane %v11648_v21, %v15017_v54 }
 0x55b   : > { %15065 = vst [vmem:[#allocation4_spill] sm:$0xff] %v12092_v57  ;;  %v7189_v49 = vrot.slane %v7157_v6, 5  ;;  %v7264_v48 = vrot.slane %v7232_v19, 5  ;;  %v7384_v46 = vmul.f32 %v12092_v57, %v11599_v24  ;;  %v7385_v9 = vmul.f32 %v12092_v57, %v11727_v8 }
 0x55c   : > { %15066 = vst [vmem:[#allocation5_spill] sm:$0xff] %v12097_v40  ;;  %v6916_v33 = vadd.f32 %v6886_v11, %v6840_v27  ;;  %v7460_v17 = vmul.f32 %v12097_v40, %v11609_v55  ;;  %v7461_v59 = vmul.f32 %v12097_v40, %v11743_v34  ;;  %v12109_v32 = vrot.slane %v11659_v3, %v15022_v14 }
 0x55d   : > { %v7265_v21 = vrot.slane %v7233_v25, 5  ;;  %v7340_v54 = vrot.slane %v7308_v31, 6  ;;  %v7341_v28 = vrot.slane %v7309_v51, 6  ;;  %v12113_v15 = vrot.slane %v11688_v20, %v15024_v10 }
 0x55e   : > { %15067 = vst [vmem:[#allocation6_spill] sm:$0xff] %v12109_v32  ;;  %v6992_v1 = vadd.f32 %v6962_v47, %v6916_v33  ;;  %v7416_v38 = vrot.slane %v7384_v46, 6  ;;  %v7417_v23 = vrot.slane %v7385_v9, 6  ;;  %v7536_v30 = vmul.f32 %v12109_v32, %v11624_v5 }
 0x55f   : > { %15068 = vst [vmem:[#allocation7_spill] sm:$0xff] %v12113_v15  ;;  %v7492_v3 = vrot.slane %v7460_v17, 6  ;;  %v7537_v14 = vmul.f32 %v12109_v32, %v11765_v44  ;;  %v7612_v29 = vmul.f32 %v12113_v15, %v11637_v18  ;;  %v7613_v20 = vmul.f32 %v12113_v15, %v11767_v41 }
 0x560   : > { %v7068_v10 = vadd.f32 %v7038_v50, %v6992_v1  ;;  %v7493_v0 = vrot.slane %v7461_v59, 6  ;;  %v7568_v53 = vrot.slane %v7536_v30, 6  ;;  %v12130_v6 = vrot.slane %v11705_v13, %v15026_v63 }
 0x561   : > { %v7190_v19 = vsel %vm2805_vm6, %v7188_v62, %v7189_v49  ;;  %v7569_v56 = vrot.slane %v7537_v14, 6  ;;  %v7644_v11 = vrot.slane %v7612_v29, 6  ;;  %v7645_v47 = vrot.slane %v7613_v20, 6 }
 0x562   : > { %15069 = vst [vmem:[#allocation8_spill] sm:$0xff] %v12130_v6  ;;  %v7144_v25 = vadd.f32 %v7114_v16, %v7068_v10  ;;  %v7266_v31 = vsel %vm2805_vm6, %v7264_v48, %v7265_v21  ;;  %v7688_v51 = vmul.f32 %v12130_v6, %v11613_v43  ;;  %v7764_v50 = vmul.f32 %v12120_v35, %v11631_v26 }
 0x563   : > { %v7342_v27 = vsel %vm3338_vm7, %v7340_v54, %v7341_v28  ;;  %v7689_v13 = vmul.f32 %v12130_v6, %v11787_v58  ;;  %v7765_v63 = vmul.f32 %v12120_v35, %v11797_v42  ;;  %v4726_v62 = vmul.f32 %v11733_v37, %v11609_v55 }
 0x564   : > { %v7220_v16 = vadd.f32 %v7190_v19, %v7144_v25  ;;  %v7418_v49 = vsel %vm3338_vm7, %v7416_v38, %v7417_v23  ;;  %v7494_v48 = vsel %vm3338_vm7, %v7492_v3, %v7493_v0  ;;  %v7570_v46 = vsel %vm3338_vm7, %v7568_v53, %v7569_v56 }
 0x565   : > { %v7646_v9 = vsel %vm3338_vm7, %v7644_v11, %v7645_v47  ;;  %v4727_v33 = vmul.f32 %v11733_v37, %v11743_v34  ;;  %v4802_v17 = vmul.f32 %v11753_v7, %v11624_v5  ;;  %v4803_v59 = vmul.f32 %v11753_v7, %v11765_v44 }
 0x566   : > { %v7296_v21 = vadd.f32 %v7266_v31, %v7220_v16  ;;  %v7720_v54 = vrot.slane %v7688_v51, 6  ;;  %v7796_v28 = vrot.slane %v7764_v50, 6  ;;  %v4878_v1 = vmul.f32 %v11780_v22, %v11637_v18 }
 0x567   : > { %v7721_v38 = vrot.slane %v7689_v13, 6  ;;  %v7797_v23 = vrot.slane %v7765_v63, 6  ;;  %v4759_v30 = vrot.slane %v4726_v62, 1  ;;  %v4879_v3 = vmul.f32 %v11780_v22, %v11767_v41 }
 0x568   : > { %v7372_v14 = vadd.f32 %v7342_v27, %v7296_v21  ;;  %v4760_v29 = vrot.slane %v4727_v33, 1  ;;  %v4954_v20 = vmul.f32 %v11784_v4, %v11613_v43  ;;  %v4955_v10 = vmul.f32 %v11784_v4, %v11787_v58 }
 0x569   : > { %v4835_v0 = vrot.slane %v4802_v17, 1  ;;  %v4836_v53 = vrot.slane %v4803_v59, 1  ;;  %v4911_v19 = vrot.slane %v4878_v1, 1  ;;  %v4912_v56 = vrot.slane %v4879_v3, 1  ;;  %v15070_v3 = vld [vmem:[#allocation39_spill] sm:$0xff] }
 0x56a   : > { %v7448_v11 = vadd.f32 %v7418_v49, %v7372_v14  ;;  %v4987_v47 = vrot.slane %v4954_v20, 1  ;;  %v4988_v25 = vrot.slane %v4955_v10, 1  ;;  %v5030_v31 = vmul.f32 %v11802_v60, %v11631_v26 }
 0x56b   : > { %v7722_v51 = vsel %vm3338_vm7, %v7720_v54, %v7721_v38  ;;  %v5031_v50 = vmul.f32 %v11802_v60, %v11797_v42  ;;  %v5182_v27 = vmul.f32 %v11820_v39, %v11599_v24  ;;  %v5183_v13 = vmul.f32 %v11820_v39, %v11727_v8 }
 0x56c   : > { %v7524_v63 = vadd.f32 %v7494_v48, %v7448_v11  ;;  %v7798_v62 = vsel %vm3338_vm7, %v7796_v28, %v7797_v23  ;;  %v12174_v16 = vsel %vm674_vm2, %v4759_v30, %v4760_v29  ;;  %v5258_v49 = vmul.f32 %v11828_v36, %v11609_v55 }
 0x56d   : > { %v12179_v33 = vsel %vm674_vm2, %v4835_v0, %v4836_v53  ;;  %v12182_v17 = vsel %vm674_vm2, %v4911_v19, %v4912_v56  ;;  %v5259_v59 = vmul.f32 %v11828_v36, %v11743_v34  ;;  %v5334_v48 = vmul.f32 %v11833_v2, %v11624_v5  ;;  %v15071_v19 = vld [vmem:[#allocation40_spill] sm:$0xff] }
 0x56e   : > { %v7600_v21 = vadd.f32 %v7570_v46, %v7524_v63  ;;  %v12189_v54 = vsel %vm674_vm2, %v4987_v47, %v4988_v25  ;;  %v5063_v28 = vrot.slane %v5030_v31, 1  ;;  %v5335_v1 = vmul.f32 %v11833_v2, %v11765_v44 }
 0x56f   : > { %v5064_v38 = vrot.slane %v5031_v50, 1  ;;  %v5215_v23 = vrot.slane %v5182_v27, 2  ;;  %v5216_v30 = vrot.slane %v5183_v13, 2  ;;  %v5410_v14 = vmul.f32 %v15070_v3, %v11637_v18  ;;  %v15072_v50 = vld [vmem:[#allocation41_spill] sm:$0xff] }
 0x570   : > { %v7676_v29 = vadd.f32 %v7646_v9, %v7600_v21  ;;  %v5291_v20 = vrot.slane %v5258_v49, 2  ;;  %v5292_v10 = vrot.slane %v5259_v59, 2  ;;  %v5411_v0 = vmul.f32 %v15070_v3, %v11767_v41  ;;  %v15073_v49 = vld [vmem:[#allocation43_spill] sm:$0xff]  ;;  %v15080_v3 = vld [vmem:[#allocation49_spill] sm:$0xff] }
 0x571   : > { %v5367_v46 = vrot.slane %v5334_v48, 2  ;;  %v5368_v53 = vrot.slane %v5335_v1, 2  ;;  %v5486_v56 = vmul.f32 %v15071_v19, %v11613_v43  ;;  %v5487_v11 = vmul.f32 %v15071_v19, %v11787_v58 }
 0x572   : > { %v7752_v47 = vadd.f32 %v7722_v51, %v7676_v29  ;;  %v5443_v25 = vrot.slane %v5410_v14, 2  ;;  %v5444_v31 = vrot.slane %v5411_v0, 2  ;;  %v5562_v27 = vmul.f32 %v15072_v50, %v11631_v26 }
 0x573   : > { %v12204_v9 = vsel %vm674_vm2, %v5063_v28, %v5064_v38  ;;  %v12207_v13 = vsel %vm1207_vm3, %v5215_v23, %v5216_v30  ;;  %v5563_v63 = vmul.f32 %v15072_v50, %v11797_v42  ;;  %v5714_v59 = vmul.f32 %v15073_v49, %v11599_v24  ;;  %v15075_v28 = vld [vmem:[#allocation44_spill] sm:$0xff] }
 0x574   : > { %v12213_v48 = vadd.f32 %v7798_v62, %v7752_v47  ;;  %v12216_v51 = vsel %vm1207_vm3, %v5291_v20, %v5292_v10  ;;  %v5715_v21 = vmul.f32 %v15073_v49, %v11727_v8  ;;  %v5790_v1 = vmul.f32 %v15075_v28, %v11609_v55  ;;  %v15077_v20 = vld [vmem:[#allocation45_spill] sm:$0xff] }
 0x575   : > { %v12223_v38 = vsel %vm1207_vm3, %v5367_v46, %v5368_v53  ;;  %v5519_v23 = vrot.slane %v5486_v56, 2  ;;  %v5520_v30 = vrot.slane %v5487_v11, 2  ;;  %v5791_v14 = vmul.f32 %v15075_v28, %v11743_v34  ;;  %v15078_v56 = vld [vmem:[#allocation46_spill] sm:$0xff] }
 0x576   : > { %15074 = vst [vmem:[#allocation9_spill] sm:$0xff] %v12213_v48  ;;  %8671 = vmatprep.mubr.msk.f32.mxu0 %vm361_vm0, %v12213_v48  ;;  %v12230_v62 = vsel %vm1207_vm3, %v5443_v25, %v5444_v31  ;;  %v5595_v29 = vrot.slane %v5562_v27, 2  ;;  %v5866_v10 = vmul.f32 %v15077_v20, %v11624_v5  ;;  %v5867_v0 = vmul.f32 %v15077_v20, %v11765_v44  ;;  %v15079_v25 = vld [vmem:[#allocation47_spill] sm:$0xff] }
 0x577   : > { %15076 = vst [vmem:[#allocation10_spill] sm:$0xff] %v12230_v62  ;;  %v5596_v46 = vrot.slane %v5563_v63, 2  ;;  %v5747_v53 = vrot.slane %v5714_v59, 3  ;;  %v5942_v11 = vmul.f32 %v15078_v56, %v11637_v18  ;;  %v5943_v47 = vmul.f32 %v15078_v56, %v11767_v41 }
 0x578   : > { %v5748_v28 = vrot.slane %v5715_v21, 3  ;;  %v5823_v48 = vrot.slane %v5790_v1, 3  ;;  %v5824_v49 = vrot.slane %v5791_v14, 3  ;;  %v6018_v31 = vmul.f32 %v15079_v25, %v11613_v43  ;;  %v15081_v14 = vld [vmem:[#allocation29_spill] sm:$0xff] }
 0x579   : > { %v5899_v27 = vrot.slane %v5866_v10, 3  ;;  %v5900_v50 = vrot.slane %v5867_v0, 3  ;;  %v5975_v19 = vrot.slane %v5942_v11, 3  ;;  %v6019_v20 = vmul.f32 %v15079_v25, %v11787_v58  ;;  %v15083_v25 = vld [vmem:[#allocation26_spill] sm:$0xff] }
 0x57a   : > { %v5976_v63 = vrot.slane %v5943_v47, 3  ;;  %v6051_v59 = vrot.slane %v6018_v31, 3  ;;  %v6094_v2 = vmul.f32 %v15080_v3, %v11631_v26  ;;  %v6095_v56 = vmul.f32 %v15080_v3, %v11797_v42 }
 0x57b   : > { %v12249_v21 = vsel %vm1207_vm3, %v5519_v23, %v5520_v30  ;;  %v6052_v1 = vrot.slane %v6019_v20, 3  ;;  %v6246_v10 = vmul.f32 %v15081_v14, %v11599_v24  ;;  %v6247_v0 = vmul.f32 %v15081_v14, %v11727_v8  ;;  %v15086_v20 = vld [vmem:[#allocation23_spill] sm:$0xff] }
 0x57c   : > { %v12256_v11 = vsel %vm1207_vm3, %v5595_v29, %v5596_v46  ;;  %v6127_v47 = vrot.slane %v6094_v2, 3  ;;  %v6128_v31 = vrot.slane %v6095_v56, 3  ;;  %v6322_v62 = vmul.f32 %v15083_v25, %v11609_v55 }
 0x57d   : > { %15082 = vst [vmem:[#allocation16_spill] sm:$0xff] %v12256_v11  ;;  %v12261_v3 = vsel %vm452_vm4, %v5747_v53, %v5748_v28  ;;  %v12264_v23 = vsel %vm452_vm4, %v5823_v48, %v5824_v49  ;;  %v6323_v30 = vmul.f32 %v15083_v25, %v11743_v34  ;;  %v6398_v14 = vmul.f32 %v15086_v20, %v11624_v5  ;;  %v15090_v53 = vld [vmem:[#allocation32_spill] sm:$0xff] }
 0x57e   : > { %15084 = vst [vmem:[#allocation63_spill] sm:$0xff] %v12261_v3  ;;  %15085 = vst [vmem:[#allocation64_spill] sm:$0xff] %v12264_v23  ;;  %v12271_v29 = vsel %vm452_vm4, %v5899_v27, %v5900_v50  ;;  %v12274_v2 = vsel %vm452_vm4, %v5975_v19, %v5976_v63  ;;  %v12277_v46 = vsel %vm452_vm4, %v6051_v59, %v6052_v1  ;;  %v6279_v49 = vrot.slane %v6246_v10, 4  ;;  %v15092_v19 = vld [vmem:[#allocation28_spill] sm:$0xff]  ;;  %v15093_v10 = vld [vmem:[#allocation33_spill] sm:$0xff] }
 0x57f   : > { %15087 = vst [vmem:[#allocation65_spill] sm:$0xff] %v12271_v29  ;;  %15088 = vst [vmem:[#allocation66_spill] sm:$0xff] %v12274_v2  ;;  %v6399_v28 = vmul.f32 %v15086_v20, %v11765_v44  ;;  %v6280_v48 = vrot.slane %v6247_v0, 4  ;;  %v6474_v56 = vmul.f32 %v15090_v53, %v11637_v18  ;;  %v6475_v25 = vmul.f32 %v15090_v53, %v11767_v41  ;;  %v15095_v3 = vld [vmem:[#allocation58_spill] sm:$0xff] }
 0x580   : > { %15089 = vst [vmem:[#allocation67_spill] sm:$0xff] %v12277_v46  ;;  %v12286_v50 = vsel %vm452_vm4, %v6127_v47, %v6128_v31  ;;  %v6355_v27 = vrot.slane %v6322_v62, 4  ;;  %v6550_v63 = vmul.f32 %v15092_v19, %v11613_v43  ;;  %v6551_v59 = vmul.f32 %v15092_v19, %v11787_v58  ;;  %v15094_v47 = vld [vmem:[#allocation56_spill] sm:$0xff] }
 0x581   : > { %15091 = vst [vmem:[#allocation68_spill] sm:$0xff] %v12286_v50  ;;  %v6356_v1 = vrot.slane %v6323_v30, 4  ;;  %v6431_v20 = vrot.slane %v6398_v14, 4  ;;  %v6626_v0 = vmul.f32 %v15093_v10, %v11631_v26  ;;  %v6627_v46 = vmul.f32 %v15093_v10, %v11797_v42 }
 0x582   : > { %v6432_v2 = vrot.slane %v6399_v28, 4  ;;  %v6507_v53 = vrot.slane %v6474_v56, 4  ;;  %v6508_v29 = vrot.slane %v6475_v25, 4  ;;  %v6778_v62 = vmul.f32 %v15094_v47, %v11599_v24  ;;  %v15096_v24 = vld [vmem:[#allocation59_spill] sm:$0xff] }
 0x583   : > { %v6583_v31 = vrot.slane %v6550_v63, 4  ;;  %v6584_v50 = vrot.slane %v6551_v59, 4  ;;  %v6659_v23 = vrot.slane %v6626_v0, 4  ;;  %v6779_v19 = vmul.f32 %v15094_v47, %v11727_v8  ;;  %v15097_v0 = vld [vmem:[#allocation60_spill] sm:$0xff] }
 0x584   : > { %v6660_v30 = vrot.slane %v6627_v46, 4  ;;  %v6811_v14 = vrot.slane %v6778_v62, 5  ;;  %v6854_v11 = vmul.f32 %v15095_v3, %v11609_v55  ;;  %v6855_v10 = vmul.f32 %v15095_v3, %v11743_v34 }
 0x585   : > { %v12305_v28 = vsel %vm2272_vm5, %v6279_v49, %v6280_v48  ;;  %v6812_v25 = vrot.slane %v6779_v19, 5  ;;  %v12309_v56 = vmul.f32 %v15096_v24, %v11624_v5  ;;  %v12313_v63 = vmul.f32 %v15096_v24, %v11765_v44 }
 0x586   : > { %v12316_v46 = vsel %vm2272_vm5, %v6355_v27, %v6356_v1  ;;  %v6887_v59 = vrot.slane %v6854_v11, 5  ;;  %v6888_v55 = vrot.slane %v6855_v10, 5  ;;  %v12320_v62 = vmul.f32 %v15097_v0, %v11637_v18 }
 0x587   : > { %v12323_v49 = vsel %vm2272_vm5, %v6431_v20, %v6432_v2  ;;  %v12326_v48 = vsel %vm2272_vm5, %v6507_v53, %v6508_v29  ;;  %v12329_v5 = vsel %vm2272_vm5, %v6583_v31, %v6584_v50  ;;  %v12333_v19 = vmul.f32 %v15097_v0, %v11767_v41  ;;  %v8860_v2 = vld [vmem:[%s14278_s8] ss:$0 sm:$0xff] }
 0x588   : > { %15098 = vst [vmem:[#allocation69_spill] sm:$0xff] %v12329_v5  ;;  %v12336_v11 = vsel %vm2272_vm5, %v6659_v23, %v6660_v30  ;;  %v12339_v18 = vsel %vm2805_vm6, %v6811_v14, %v6812_v25  ;;  %v12343_v20 = vmul.f32 %v12050_v45, %v11613_v43  ;;  %v12347_v29 = vmul.f32 %v12050_v45, %v11787_v58  ;;  %v12373_v5 = vld [vmem:[#allocation2 + $0x20] sm:$0xff] }
 0x589   : > { %15099 = vst [vmem:[#allocation70_spill] sm:$0xff] %v12336_v11  ;;  %15100 = vst [vmem:[#allocation71_spill] sm:$0xff] %v12339_v18  ;;  %v6963_v23 = vrot.slane %v12309_v56, 5  ;;  %v6964_v1 = vrot.slane %v12313_v63, 5  ;;  %v7158_v10 = vmul.f32 %v12062_v12, %v11631_v26  ;;  %v12357_v30 = vsel %vm2805_vm6, %v6887_v59, %v6888_v55  ;;  %v8862_v26 = vld [vmem:[#allocation2 + $0x10] sm:$0xff] }
 0x58a   : > { %15101 = vst [vmem:[#allocation72_spill] sm:$0xff] %v12357_v30  ;;  %v7039_v14 = vrot.slane %v12320_v62, 5  ;;  %v7159_v25 = vmul.f32 %v12062_v12, %v11797_v42  ;;  %v7040_v0 = vrot.slane %v12333_v19, 5  ;;  %v7115_v55 = vrot.slane %v12343_v20, 5  ;;  %v15102_v30 = vld [vmem:[#allocation37_spill] sm:$0xff]  ;;  %v15104_v20 = vld [vmem:[#allocation27_spill] sm:$0xff] }
 0x58b   : > { %v7116_v62 = vrot.slane %v12347_v29, 5  ;;  %v7191_v3 = vrot.slane %v7158_v10, 5  ;;  %v12381_v10 = vld [vmem:[#allocation2 + $0x30] sm:$0xff] }
 0x58c   : > { %v7192_v19 = vrot.slane %v7159_v25, 5 }
 0x5e1   : > { %v8667_v27 = vpop.f32.mrb[12].mxu1 }
 0x5e2   : > { %v4379_v53 = vadd.f32 %v8860_v2, %v8667_v27  ;;  %v4370_v50 = vpop.f32.mrb[13].mxu1  ;;  %v8861_v27 = vld [vmem:[%s14279_s9] ss:$0 sm:$0xff] }
 0x5e3   : > { %v4371_v31 = vadd.f32 %v8860_v2, %v4370_v50  ;;  %v8668_v43 = vpop.f32.mrb[14].mxu1  ;;  %v7310_v50 = vmul.f32 %v8862_v26, %v12079_v52 }
 0x5e4   : > { %v4396_v56 = vmul.f32 %v8861_v27, %v4379_v53  ;;  %v4382_v45 = vadd.f32 %v8860_v2, %v8668_v43  ;;  %v4373_v63 = vpop.f32.mrb[15].mxu1  ;;  %v7311_v53 = vmul.f32 %v12079_v52, %v11727_v8  ;;  %v15103_v43 = vld [vmem:[#allocation31_spill] sm:$0xff]  ;;  %v7462_v8 = vmul.f32 %v12381_v10, %v12097_v40 }
 0x5e5   : > { %v4394_v24 = vmul.f32 %v8861_v27, %v4371_v31  ;;  %v4374_v59 = vadd.f32 %v8860_v2, %v4373_v63  ;;  %v7386_v2 = vmul.f32 %v12373_v5, %v12092_v57  ;;  %v7343_v31 = vrot.slane %v7310_v50, 6 }
 0x5e6   : > { %v4404_v12 = vadd.f32 %v4396_v56, %v15102_v30  ;;  %v4397_v18 = vmul.f32 %v8861_v27, %v4382_v45  ;;  %v7387_v45 = vmul.f32 %v12092_v57, %v11743_v34  ;;  %v7344_v25 = vrot.slane %v7311_v53, 6  ;;  %v15126_v57 = vld [vmem:[#allocation21_spill] sm:$0xff] }
 0x5e7   : > { %v4402_v47 = vadd.f32 %v4394_v24, %v15103_v43  ;;  %v4395_v11 = vmul.f32 %v8861_v27, %v4374_v59  ;;  %v15105_v24 = vld [vmem:[#allocation25_spill] sm:$0xff]  ;;  %v7463_v27 = vmul.f32 %v12097_v40, %v11765_v44  ;;  %v7419_v56 = vrot.slane %v7386_v2, 6 }
 0x5e8   : > { %4412 = vst.msk [vmem:[#allocation2 + $0x93] sm:$0xff] %vm361_vm0, %v4404_v12  ;;  %v4405_v29 = vadd.f32 %v4397_v18, %v15104_v20  ;;  %v12389_v12 = vld [vmem:[#allocation2 + $0x40] sm:$0xff]  ;;  %v7420_v63 = vrot.slane %v7387_v45, 6  ;;  %v7495_v26 = vrot.slane %v7462_v8, 6  ;;  %v7539_v50 = vmul.f32 %v12109_v32, %v11767_v41  ;;  %v12397_v59 = vld [vmem:[#allocation2 + $0x50] sm:$0xff] }
 0x5e9   : > { %4410 = vst.msk [vmem:[#allocation2 + $0x73] sm:$0xff] %vm361_vm0, %v4402_v47  ;;  %v4403_v30 = vadd.f32 %v4395_v11, %v15105_v24  ;;  %v7538_v18 = vmul.f32 %v12389_v12, %v12109_v32  ;;  %v7496_v47 = vrot.slane %v7463_v27, 6  ;;  %v7614_v53 = vmul.f32 %v12397_v59, %v12113_v15  ;;  %v15106_v27 = vld [vmem:[#allocation11_spill] sm:$0xff] }
 0x5ea   : > { %4413 = vst.msk [vmem:[#allocation2 + $0xa3] sm:$0xff] %vm361_vm0, %v4405_v29  ;;  %v7615_v43 = vmul.f32 %v12113_v15, %v11787_v58  ;;  %v12404_v20 = vsel %vm2805_vm6, %v6963_v23, %v6964_v1  ;;  %v7572_v2 = vrot.slane %v7539_v50, 6  ;;  %v12406_v29 = vld [vmem:[#allocation2 + $0x60] sm:$0xff]  ;;  %v7691_v45 = vmul.f32 %v12130_v6, %v11797_v42  ;;  %v15124_v15 = vld [vmem:[#allocation48_spill] sm:$0xff] }
 0x5eb   : > { %4411 = vst.msk [vmem:[#allocation2 + $0x83] sm:$0xff] %vm361_vm0, %v4403_v30  ;;  %v7571_v11 = vrot.slane %v7538_v18, 6  ;;  %v7690_v41 = vmul.f32 %v12406_v29, %v12130_v6  ;;  %v12413_v8 = vsel %vm2805_vm6, %v7039_v14, %v7040_v0  ;;  %v7647_v24 = vrot.slane %v7614_v53, 6 }
 0x5ec   : > { %v7648_v30 = vrot.slane %v7615_v43, 6  ;;  %v12417_v58 = vmul.f32 %v12373_v5, %v15106_v27  ;;  %v12420_v23 = vsel %vm2805_vm6, %v7115_v55, %v7116_v62  ;;  %v12423_v1 = vsel %vm2805_vm6, %v7191_v3, %v7192_v19 }
 0x5ed   : > { %15107 = vst [vmem:[#allocation37_spill] sm:$0xff] %v12423_v1  ;;  %v12426_v18 = vsel %vm3338_vm7, %v7343_v31, %v7344_v25  ;;  %v12429_v42 = vsel %vm3338_vm7, %v7419_v56, %v7420_v63  ;;  %v12434_v14 = vsel %vm3338_vm7, %v7495_v26, %v7496_v47  ;;  %v12437_v50 = vsel %vm3338_vm7, %v7571_v11, %v7572_v2  ;;  %v15114_v26 = vld [vmem:[#allocation36_spill] sm:$0xff]  ;;  %v15115_v11 = vld [vmem:[#allocation53_spill] sm:$0xff]  ;;  %v15116_v2 = vld [vmem:[#allocation30_spill] sm:$0xff] }
 0x5ee   : > { %15108 = vst [vmem:[#allocation31_spill] sm:$0xff] %v12426_v18  ;;  %15109 = vst [vmem:[#allocation27_spill] sm:$0xff] %v12429_v42  ;;  %v7723_v53 = vrot.slane %v7690_v41, 6  ;;  %v7724_v55 = vrot.slane %v7691_v45, 6  ;;  %v12444_v19 = vsel %vm3338_vm7, %v7647_v24, %v7648_v30  ;;  %v12448_v31 = vmul.f32 %v15106_v27, %v11743_v34  ;;  %v15118_v30 = vld [vmem:[#allocation54_spill] sm:$0xff] }
 0x5ef   : > { %v12431_v0 = vld [vmem:[#allocation2 + $0x90] sm:$0xff]  ;;  %15111 = vst [vmem:[#allocation73_spill] sm:$0xff] %v12434_v14  ;;  %15112 = vst [vmem:[#allocation74_spill] sm:$0xff] %v12437_v50  ;;  %v12453_v56 = vmul.f32 %v12381_v10, %v11733_v37  ;;  %v12463_v34 = vmul.f32 %v11733_v37, %v11765_v44  ;;  %v15120_v50 = vld [vmem:[#allocation51_spill] sm:$0xff] }
 0x5f0   : > { %15110 = vst [vmem:[#allocation25_spill] sm:$0xff] %v12431_v0  ;;  %v12439_v62 = vld [vmem:[#allocation2 + $0x70] sm:$0xff]  ;;  %v12441_v3 = vld [vmem:[#allocation2 + $0x78] sm:$0x3f]  ;;  %15113 = vst [vmem:[#allocation75_spill] sm:$0xff] %v12444_v19  ;;  %v12469_v24 = vmul.f32 %v15116_v2, %v12431_v0  ;;  %v12491_v32 = vsel %vm3338_vm7, %v7723_v53, %v7724_v55 }
 0x5f1   : > { %v4434_v63 = vld [vmem:[#allocation2 + $0xa0] sm:$0xff]  ;;  %v4534_v47 = vmul.f32 %v15114_v26, %v12439_v62  ;;  %v4553_v43 = vmul.f32 %v15115_v11, %v12439_v62  ;;  %v4572_v41 = vmul.f32 %v15116_v2, %v12439_v62  ;;  %v4629_v25 = vmul.f32 %v15118_v30, %v12439_v62  ;;  %v15121_v37 = vld [vmem:[#allocation24_spill] sm:$0xff] }
 0x5f2   : > { %v12465_v45 = vld [vmem:[#allocation2 + $0x80] sm:$0xff]  ;;  %15117 = vst [vmem:[#allocation76_spill] sm:$0xff] %v12469_v24  ;;  %v4591_v6 = vmul.f32 %v15121_v37, %v12439_v62  ;;  %v12484_v24 = vmul.f32 %v15121_v37, %v12431_v0  ;;  %v12487_v42 = vmul.f32 %v15121_v37, %v4434_v63 }
 0x5f3   : > { %v15119_v26 = vld [vmem:[#allocation15_spill] sm:$0xff]  ;;  %v4542_v14 = vadd.f32 %v4534_v47, %v15120_v50  ;;  %v4554_v44 = vmul.f32 %v15115_v11, %v12465_v45  ;;  %v4637_v18 = vadd.f32 %v4629_v25, %v15124_v15  ;;  %v4687_v50 = vrot.slane %v12448_v31, 1  ;;  %v15125_v47 = vld [vmem:[#allocation52_spill] sm:$0xff]  ;;  %v15132_v25 = vld [vmem:[#allocation13_spill] sm:$0xff] }
 0x5f4   : > { %v5106_v19 = vmul.f32 %v15119_v26, %v12439_v62  ;;  %v5107_v27 = vmul.f32 %v15119_v26, %v12441_v3  ;;  %15122 = vst [vmem:[#allocation51_spill] sm:$0xff] %v12484_v24  ;;  %15123 = vst [vmem:[#allocation77_spill] sm:$0xff] %v12487_v42  ;;  %v4561_v40 = vadd.f32 %v4553_v43, %v15125_v47  ;;  %v15128_v24 = vld [vmem:[#allocation57_spill] sm:$0xff]  ;;  %v15129_v42 = vld [vmem:[#allocation42_spill] sm:$0xff] }
 0x5f5   : > { %v4573_v11 = vmul.f32 %v15116_v2, %v12465_v45  ;;  %v12498_v1 = vadd.f32 %v4572_v41, %v15126_v57  ;;  %v4713_v52 = vadd.f32 %v15128_v24, %v4637_v18  ;;  %v5638_v15 = vmul.f32 %v15129_v42, %v12439_v62  ;;  %v15133_v57 = vld [vmem:[#allocation50_spill] sm:$0xff] }
 0x5f6   : > { %v5139_v0 = vrot.slane %v5106_v19, 1  ;;  %v5140_v63 = vrot.slane %v5107_v27, 1  ;;  %v5639_v53 = vmul.f32 %v15129_v42, %v12441_v3  ;;  %v12505_v55 = vadd.f32 %v4554_v44, %v4542_v14  ;;  %v15135_v44 = vld [vmem:[#allocation55_spill] sm:$0xff] }
 0x5f7   : > { %15127 = vst [vmem:[#allocation48_spill] sm:$0xff] %v12498_v1  ;;  %v12509_v31 = vmul.f32 %v15121_v37, %v12465_v45  ;;  %v12512_v43 = vadd.f32 %v4591_v6, %v15132_v25  ;;  %v6170_v19 = vmul.f32 %v15133_v57, %v12439_v62  ;;  %v4789_v27 = vadd.f32 %v12174_v16, %v4713_v52 }
 0x5f8   : > { %15130 = vst [vmem:[#allocation52_spill] sm:$0xff] %v12505_v55  ;;  %v5671_v18 = vrot.slane %v5638_v15, 2  ;;  %v5672_v41 = vrot.slane %v5639_v53, 2  ;;  %v6171_v24 = vmul.f32 %v15133_v57, %v12441_v3  ;;  %v12519_v47 = vadd.f32 %v4573_v11, %v4561_v40 }
 0x5f9   : > { %15131 = vst [vmem:[#allocation21_spill] sm:$0xff] %v12509_v31  ;;  %v6203_v14 = vrot.slane %v6170_v19, 3  ;;  %v6702_v37 = vmul.f32 %v15135_v44, %v12439_v62  ;;  %v6703_v6 = vmul.f32 %v15135_v44, %v12441_v3  ;;  %v4865_v25 = vadd.f32 %v12179_v33, %v4789_v27 }
 0x5fa   : > { %15134 = vst [vmem:[#allocation57_spill] sm:$0xff] %v12519_v47  ;;  %v5141_v2 = vsel %vm674_vm2, %v5139_v0, %v5140_v63  ;;  %v6204_v55 = vrot.slane %v6171_v24, 3  ;;  %v7234_v52 = vmul.f32 %v12068_v61, %v12439_v62  ;;  %v7235_v40 = vmul.f32 %v12068_v61, %v12441_v3  ;;  %v15136_v24 = vld [vmem:[#allocation38_spill] sm:$0xff] }
 0x5fb   : > { %v6735_v16 = vrot.slane %v6702_v37, 4  ;;  %v6736_v15 = vrot.slane %v6703_v6, 4  ;;  %v7766_v11 = vmul.f32 %v12120_v35, %v12439_v62  ;;  %v4941_v53 = vadd.f32 %v12182_v17, %v4865_v25 }
 0x5fc   : > { %v12535_v19 = vsel %vm1207_vm3, %v5671_v18, %v5672_v41  ;;  %v7267_v33 = vrot.slane %v7234_v52, 5  ;;  %v7767_v0 = vmul.f32 %v12120_v35, %v12441_v3  ;;  %v12540_v63 = vsel %vm452_vm4, %v6203_v14, %v6204_v55  ;;  %v15137_v35 = vld [vmem:[#allocation20_spill] sm:$0xff] }
 0x5fd   : > { %v7268_v37 = vrot.slane %v7235_v40, 5  ;;  %v7799_v27 = vrot.slane %v7766_v11, 6  ;;  %v4610_v6 = vmul.f32 %v15136_v24, %v12439_v62  ;;  %v5017_v47 = vadd.f32 %v12189_v54, %v4941_v53  ;;  %v12562_v40 = vld [vmem:[#allocation2 + $0x48] sm:$0x3f] }
 0x5fe   : > { %v12546_v31 = vsel %vm2272_vm5, %v6735_v16, %v6736_v15  ;;  %v7800_v17 = vrot.slane %v7767_v0, 6  ;;  %v4630_v18 = vmul.f32 %v15118_v30, %v12465_v45  ;;  %v15138_v14 = vrot.slane %v12417_v58, 1 }
 0x5ff   : > { %v12551_v41 = vsel %vm2805_vm6, %v7267_v33, %v7268_v37  ;;  %v4618_v55 = vadd.f32 %v4610_v6, %v15137_v35  ;;  %v4762_v52 = vrot.slane %v12453_v56, 1  ;;  %v5093_v54 = vadd.f32 %v12204_v9, %v5017_v47  ;;  %v12571_v56 = vld [vmem:[#allocation2 + $0x58] sm:$0x3f]  ;;  %v12577_v37 = vld [vmem:[#allocation2 + $0x88] sm:$0x3f] }
 0x600   : > { %v4688_v25 = vsel %vm674_vm2, %v15138_v14, %v4687_v50  ;;  %v4763_v16 = vrot.slane %v12463_v34, 1  ;;  %v4804_v15 = vmul.f32 %v12389_v12, %v11753_v7  ;;  %v4805_v11 = vmul.f32 %v12562_v40, %v11753_v7 }
 0x601   : > { %v12567_v53 = vsel %vm3338_vm7, %v7799_v27, %v7800_v17  ;;  %v4638_v58 = vadd.f32 %v4630_v18, %v4618_v55  ;;  %v4880_v50 = vmul.f32 %v12397_v59, %v11780_v22  ;;  %v4881_v9 = vmul.f32 %v12571_v56, %v11780_v22  ;;  %v12579_v18 = vld [vmem:[#allocation2 + $0x68] sm:$0x3f] }
 0x602   : > { %v5169_v34 = vadd.f32 %v5141_v2, %v5093_v54  ;;  %v4838_v47 = vrot.slane %v4804_v15, 1  ;;  %v4839_v33 = vrot.slane %v4805_v11, 1  ;;  %v4956_v0 = vmul.f32 %v12406_v29, %v11784_v4 }
 0x603   : > { %v4714_v6 = vadd.f32 %v4688_v25, %v4638_v58  ;;  %v4914_v27 = vrot.slane %v4880_v50, 1  ;;  %v4915_v17 = vrot.slane %v4881_v9, 1  ;;  %v4957_v35 = vmul.f32 %v12579_v18, %v11784_v4 }
 0x604   : > { %v5245_v55 = vadd.f32 %v12207_v13, %v5169_v34  ;;  %v4764_v14 = vsel %vm674_vm2, %v4762_v52, %v4763_v16  ;;  %v4840_v2 = vsel %vm674_vm2, %v4838_v47, %v4839_v33  ;;  %v5032_v54 = vmul.f32 %v11802_v60, %v12439_v62 }
 0x605   : > { %v4790_v15 = vadd.f32 %v4764_v14, %v4714_v6  ;;  %v4990_v11 = vrot.slane %v4956_v0, 1  ;;  %v4991_v1 = vrot.slane %v4957_v35, 1  ;;  %v5033_v25 = vmul.f32 %v11802_v60, %v12441_v3  ;;  %v12599_v35 = vld [vmem:[#allocation2 + $0x28] sm:$0x3f] }
 0x606   : > { %v5321_v58 = vadd.f32 %v12216_v51, %v5245_v55  ;;  %v5066_v50 = vrot.slane %v5032_v54, 1  ;;  %v5108_v9 = vmul.f32 %v15119_v26, %v12465_v45  ;;  %v5109_v13 = vmul.f32 %v15119_v26, %v12577_v37  ;;  %v15143_v26 = vld [vmem:[#allocation40_spill] sm:$0xff] }
 0x607   : > { %v4866_v52 = vadd.f32 %v4840_v2, %v4790_v15  ;;  %v4916_v16 = vsel %vm674_vm2, %v4914_v27, %v4915_v17  ;;  %v5067_v34 = vrot.slane %v5033_v25, 1  ;;  %v5184_v47 = vmul.f32 %v12373_v5, %v11820_v39  ;;  %v15139_v17 = vld [vmem:[#allocation10_spill] sm:$0xff] }
 0x608   : > { %v5397_v33 = vadd.f32 %v12223_v38, %v5321_v58  ;;  %v5142_v0 = vrot.slane %v5108_v9, 1  ;;  %v5143_v6 = vrot.slane %v5109_v13, 1  ;;  %v5185_v51 = vmul.f32 %v12599_v35, %v11820_v39  ;;  %v12608_v38 = vld [vmem:[#allocation2 + $0x38] sm:$0x3f] }
 0x609   : > { %v4942_v55 = vadd.f32 %v4916_v16, %v4866_v52  ;;  %v4992_v14 = vsel %vm674_vm2, %v4990_v11, %v4991_v1  ;;  %v5068_v2 = vsel %vm674_vm2, %v5066_v50, %v5067_v34  ;;  %v5260_v27 = vmul.f32 %v12381_v10, %v11828_v36  ;;  %v15140_v39 = vld [vmem:[#allocation18_spill] sm:$0xff]  ;;  %v15141_v34 = vld [vmem:[#allocation39_spill] sm:$0xff] }
 0x60a   : > { %v5473_v54 = vadd.f32 %v15139_v17, %v5397_v33  ;;  %v5218_v15 = vrot.slane %v5184_v47, 2  ;;  %v5219_v25 = vrot.slane %v5185_v51, 2  ;;  %v5261_v58 = vmul.f32 %v12608_v38, %v11828_v36 }
 0x60b   : > { %v5018_v9 = vadd.f32 %v4992_v14, %v4942_v55  ;;  %v5294_v13 = vrot.slane %v5260_v27, 2  ;;  %v5336_v52 = vmul.f32 %v12389_v12, %v15140_v39  ;;  %v5337_v1 = vmul.f32 %v12562_v40, %v15140_v39  ;;  %v15142_v14 = vld [vmem:[#allocation16_spill] sm:$0xff] }
 0x60c   : > { %v5549_v11 = vadd.f32 %v12249_v21, %v5473_v54  ;;  %v5144_v50 = vsel %vm674_vm2, %v5142_v0, %v5143_v6  ;;  %v5295_v16 = vrot.slane %v5261_v58, 2  ;;  %v5412_v47 = vmul.f32 %v12397_v59, %v15141_v34 }
 0x60d   : > { %v5094_v33 = vadd.f32 %v5068_v2, %v5018_v9  ;;  %v5370_v51 = vrot.slane %v5336_v52, 2  ;;  %v5371_v17 = vrot.slane %v5337_v1, 2  ;;  %v5413_v55 = vmul.f32 %v12571_v56, %v15141_v34  ;;  %v15144_v52 = vld [vmem:[#allocation41_spill] sm:$0xff] }
 0x60e   : > { %v5625_v27 = vadd.f32 %v15142_v14, %v5549_v11  ;;  %v5220_v36 = vsel %vm1207_vm3, %v5218_v15, %v5219_v25  ;;  %v5296_v39 = vsel %vm1207_vm3, %v5294_v13, %v5295_v16  ;;  %v5488_v21 = vmul.f32 %v12406_v29, %v15143_v26  ;;  %v15145_v16 = vld [vmem:[#allocation63_spill] sm:$0xff] }
 0x60f   : > { %v5170_v0 = vadd.f32 %v5144_v50, %v5094_v33  ;;  %v5446_v6 = vrot.slane %v5412_v47, 2  ;;  %v5447_v54 = vrot.slane %v5413_v55, 2  ;;  %v5489_v2 = vmul.f32 %v12579_v18, %v15143_v26  ;;  %v15152_v26 = vld [vmem:[#allocation46_spill] sm:$0xff] }
 0x610   : > { %v5701_v58 = vadd.f32 %v12535_v19, %v5625_v27  ;;  %v5522_v9 = vrot.slane %v5488_v21, 2  ;;  %v5564_v1 = vmul.f32 %v15144_v52, %v12439_v62  ;;  %v5565_v15 = vmul.f32 %v15144_v52, %v12441_v3  ;;  %v15146_v52 = vld [vmem:[#allocation43_spill] sm:$0xff] }
 0x611   : > { %v5246_v25 = vadd.f32 %v5220_v36, %v5170_v0  ;;  %v5372_v13 = vsel %vm1207_vm3, %v5370_v51, %v5371_v17  ;;  %v5523_v11 = vrot.slane %v5489_v2, 2  ;;  %v5640_v50 = vmul.f32 %v15129_v42, %v12465_v45  ;;  %v15147_v51 = vld [vmem:[#allocation64_spill] sm:$0xff] }
 0x612   : > { %v5777_v47 = vadd.f32 %v15145_v16, %v5701_v58  ;;  %v5598_v33 = vrot.slane %v5564_v1, 2  ;;  %v5599_v55 = vrot.slane %v5565_v15, 2  ;;  %v5641_v19 = vmul.f32 %v15129_v42, %v12577_v37  ;;  %v15148_v16 = vld [vmem:[#allocation44_spill] sm:$0xff] }
 0x613   : > { %v5322_v14 = vadd.f32 %v5296_v39, %v5246_v25  ;;  %v5448_v27 = vsel %vm1207_vm3, %v5446_v6, %v5447_v54  ;;  %v5524_v21 = vsel %vm1207_vm3, %v5522_v9, %v5523_v11  ;;  %v5716_v36 = vmul.f32 %v12373_v5, %v15146_v52  ;;  %v15149_v6 = vld [vmem:[#allocation65_spill] sm:$0xff] }
 0x614   : > { %v5853_v17 = vadd.f32 %v15147_v51, %v5777_v47  ;;  %v5674_v0 = vrot.slane %v5640_v50, 2  ;;  %v5675_v2 = vrot.slane %v5641_v19, 2  ;;  %v5717_v58 = vmul.f32 %v12599_v35, %v15146_v52  ;;  %v15150_v11 = vld [vmem:[#allocation45_spill] sm:$0xff] }
 0x615   : > { %v5398_v1 = vadd.f32 %v5372_v13, %v5322_v14  ;;  %v5750_v15 = vrot.slane %v5716_v36, 3  ;;  %v5792_v42 = vmul.f32 %v12381_v10, %v15148_v16  ;;  %v5793_v39 = vmul.f32 %v12608_v38, %v15148_v16  ;;  %v15151_v14 = vld [vmem:[#allocation66_spill] sm:$0xff] }
 0x616   : > { %v5929_v54 = vadd.f32 %v15149_v6, %v5853_v17  ;;  %v5600_v9 = vsel %vm1207_vm3, %v5598_v33, %v5599_v55  ;;  %v5751_v25 = vrot.slane %v5717_v58, 3  ;;  %v5868_v50 = vmul.f32 %v12389_v12, %v15150_v11  ;;  %v15154_v6 = vld [vmem:[#allocation47_spill] sm:$0xff] }
 0x617   : > { %v5474_v47 = vadd.f32 %v5448_v27, %v5398_v1  ;;  %v5826_v19 = vrot.slane %v5792_v42, 3  ;;  %v5827_v51 = vrot.slane %v5793_v39, 3  ;;  %v5869_v13 = vmul.f32 %v12562_v40, %v15150_v11  ;;  %v15153_v42 = vld [vmem:[#allocation67_spill] sm:$0xff] }
 0x618   : > { %v6005_v36 = vadd.f32 %v15151_v14, %v5929_v54  ;;  %v5676_v52 = vsel %vm1207_vm3, %v5674_v0, %v5675_v2  ;;  %v5752_v16 = vsel %vm452_vm4, %v5750_v15, %v5751_v25  ;;  %v5944_v17 = vmul.f32 %v12397_v59, %v15152_v26 }
 0x619   : > { %v5550_v33 = vadd.f32 %v5524_v21, %v5474_v47  ;;  %v5902_v55 = vrot.slane %v5868_v50, 3  ;;  %v5903_v58 = vrot.slane %v5869_v13, 3  ;;  %v5945_v27 = vmul.f32 %v12571_v56, %v15152_v26  ;;  %v15155_v21 = vld [vmem:[#allocation49_spill] sm:$0xff]  ;;  %v15156_v50 = vld [vmem:[#allocation68_spill] sm:$0xff] }
 0x61a   : > { %v6081_v1 = vadd.f32 %v15153_v42, %v6005_v36  ;;  %v5978_v39 = vrot.slane %v5944_v17, 3  ;;  %v6020_v11 = vmul.f32 %v12406_v29, %v15154_v6  ;;  %v6021_v0 = vmul.f32 %v12579_v18, %v15154_v6 }
 0x61b   : > { %v5626_v2 = vadd.f32 %v5600_v9, %v5550_v33  ;;  %v5828_v15 = vsel %vm452_vm4, %v5826_v19, %v5827_v51  ;;  %v5979_v54 = vrot.slane %v5945_v27, 3  ;;  %v6096_v25 = vmul.f32 %v15155_v21, %v12439_v62 }
 0x61c   : > { %v6157_v47 = vadd.f32 %v15156_v50, %v6081_v1  ;;  %v6054_v13 = vrot.slane %v6020_v11, 3  ;;  %v6055_v14 = vrot.slane %v6021_v0, 3  ;;  %v6097_v36 = vmul.f32 %v15155_v21, %v12441_v3  ;;  %v15157_v0 = vld [vmem:[#allocation29_spill] sm:$0xff] }
 0x61d   : > { %v5702_v17 = vadd.f32 %v5676_v52, %v5626_v2  ;;  %v5904_v42 = vsel %vm452_vm4, %v5902_v55, %v5903_v58  ;;  %v5980_v26 = vsel %vm452_vm4, %v5978_v39, %v5979_v54  ;;  %v6172_v9 = vmul.f32 %v15133_v57, %v12465_v45  ;;  %v15158_v2 = vld [vmem:[#allocation26_spill] sm:$0xff] }
 0x61e   : > { %v6233_v19 = vadd.f32 %v12540_v63, %v6157_v47  ;;  %v6130_v51 = vrot.slane %v6096_v25, 3  ;;  %v6131_v33 = vrot.slane %v6097_v36, 3  ;;  %v6173_v27 = vmul.f32 %v15133_v57, %v12577_v37 }
 0x61f   : > { %v5778_v11 = vadd.f32 %v5752_v16, %v5702_v17  ;;  %v6206_v1 = vrot.slane %v6172_v9, 3  ;;  %v6248_v50 = vmul.f32 %v12373_v5, %v15157_v0  ;;  %v6249_v52 = vmul.f32 %v12599_v35, %v15157_v0  ;;  %v15159_v0 = vld [vmem:[#allocation23_spill] sm:$0xff] }
 0x620   : > { %v6309_v55 = vadd.f32 %v12305_v28, %v6233_v19  ;;  %v6056_v58 = vsel %vm452_vm4, %v6054_v13, %v6055_v14  ;;  %v6207_v39 = vrot.slane %v6173_v27, 3  ;;  %v6324_v63 = vmul.f32 %v12381_v10, %v15158_v2 }
 0x621   : > { %v5854_v54 = vadd.f32 %v5828_v15, %v5778_v11  ;;  %v6282_v25 = vrot.slane %v6248_v50, 4  ;;  %v6283_v47 = vrot.slane %v6249_v52, 4  ;;  %v6325_v16 = vmul.f32 %v12608_v38, %v15158_v2  ;;  %v15160_v50 = vld [vmem:[#allocation32_spill] sm:$0xff] }
 0x622   : > { %v6385_v36 = vadd.f32 %v12316_v46, %v6309_v55  ;;  %v6132_v17 = vsel %vm452_vm4, %v6130_v51, %v6131_v33  ;;  %v6208_v9 = vsel %vm452_vm4, %v6206_v1, %v6207_v39  ;;  %v6400_v28 = vmul.f32 %v12389_v12, %v15159_v0  ;;  %v15161_v55 = vld [vmem:[#allocation28_spill] sm:$0xff] }
 0x623   : > { %v5930_v13 = vadd.f32 %v5904_v42, %v5854_v54  ;;  %v6358_v14 = vrot.slane %v6324_v63, 4  ;;  %v6359_v19 = vrot.slane %v6325_v16, 4  ;;  %v6401_v15 = vmul.f32 %v12562_v40, %v15159_v0 }
 0x624   : > { %v6461_v27 = vadd.f32 %v12323_v49, %v6385_v36  ;;  %v6434_v11 = vrot.slane %v6400_v28, 4  ;;  %v6476_v52 = vmul.f32 %v12397_v59, %v15160_v50  ;;  %v6477_v46 = vmul.f32 %v12571_v56, %v15160_v50 }
 0x625   : > { %v6006_v51 = vadd.f32 %v5980_v26, %v5930_v13  ;;  %v6284_v33 = vsel %vm2272_vm5, %v6282_v25, %v6283_v47  ;;  %v6435_v1 = vrot.slane %v6401_v15, 4  ;;  %v6552_v42 = vmul.f32 %v12406_v29, %v15161_v55  ;;  %v15162_v26 = vld [vmem:[#allocation33_spill] sm:$0xff] }
 0x626   : > { %v6537_v39 = vadd.f32 %v12326_v48, %v6461_v27  ;;  %v6510_v63 = vrot.slane %v6476_v52, 4  ;;  %v6511_v54 = vrot.slane %v6477_v46, 4  ;;  %v6553_v49 = vmul.f32 %v12579_v18, %v15161_v55  ;;  %v15163_v25 = vld [vmem:[#allocation69_spill] sm:$0xff] }
 0x627   : > { %v6082_v16 = vadd.f32 %v6056_v58, %v6006_v51  ;;  %v6360_v36 = vsel %vm2272_vm5, %v6358_v14, %v6359_v19  ;;  %v6436_v28 = vsel %vm2272_vm5, %v6434_v11, %v6435_v1  ;;  %v6628_v13 = vmul.f32 %v15162_v26, %v12439_v62  ;;  %v15164_v14 = vld [vmem:[#allocation70_spill] sm:$0xff]  ;;  %v15165_v1 = vld [vmem:[#allocation56_spill] sm:$0xff] }
 0x628   : > { %v6613_v47 = vadd.f32 %v15163_v25, %v6537_v39  ;;  %v6586_v15 = vrot.slane %v6552_v42, 4  ;;  %v6587_v50 = vrot.slane %v6553_v49, 4  ;;  %v6629_v48 = vmul.f32 %v15162_v26, %v12441_v3  ;;  %v15166_v26 = vld [vmem:[#allocation58_spill] sm:$0xff] }
 0x629   : > { %v6158_v27 = vadd.f32 %v6132_v17, %v6082_v16  ;;  %v6662_v52 = vrot.slane %v6628_v13, 4  ;;  %v6704_v46 = vmul.f32 %v15135_v44, %v12465_v45  ;;  %v6705_v58 = vmul.f32 %v15135_v44, %v12577_v37 }
 0x62a   : > { %v6689_v19 = vadd.f32 %v15164_v14, %v6613_v47  ;;  %v6512_v11 = vsel %vm2272_vm5, %v6510_v63, %v6511_v54  ;;  %v6663_v51 = vrot.slane %v6629_v48, 4  ;;  %v6780_v42 = vmul.f32 %v12373_v5, %v15165_v1  ;;  %v15168_v14 = vld [vmem:[#allocation59_spill] sm:$0xff] }
 0x62b   : > { %v6234_v39 = vadd.f32 %v6208_v9, %v6158_v27  ;;  %v6738_v49 = vrot.slane %v6704_v46, 4  ;;  %v6739_v25 = vrot.slane %v6705_v58, 4  ;;  %v6781_v17 = vmul.f32 %v12599_v35, %v15165_v1  ;;  %v15167_v27 = vld [vmem:[#allocation71_spill] sm:$0xff] }
 0x62c   : > { %v6765_v16 = vadd.f32 %v12546_v31, %v6689_v19  ;;  %v6588_v13 = vsel %vm2272_vm5, %v6586_v15, %v6587_v50  ;;  %v6664_v44 = vsel %vm2272_vm5, %v6662_v52, %v6663_v51  ;;  %v6856_v47 = vmul.f32 %v12381_v10, %v15166_v26  ;;  %v15169_v19 = vld [vmem:[#allocation60_spill] sm:$0xff] }
 0x62d   : > { %v6310_v63 = vadd.f32 %v6284_v33, %v6234_v39  ;;  %v6814_v54 = vrot.slane %v6780_v42, 5  ;;  %v6815_v48 = vrot.slane %v6781_v17, 5  ;;  %v6857_v9 = vmul.f32 %v12608_v38, %v15166_v26  ;;  %v15170_v51 = vld [vmem:[#allocation72_spill] sm:$0xff] }
 0x62e   : > { %v6841_v46 = vadd.f32 %v15167_v27, %v6765_v16  ;;  %v6890_v58 = vrot.slane %v6856_v47, 5  ;;  %v6932_v1 = vmul.f32 %v12389_v12, %v15168_v14  ;;  %v6933_v31 = vmul.f32 %v12562_v40, %v15168_v14  ;;  %v15171_v14 = vld [vmem:[#allocation61_spill] sm:$0xff] }
 0x62f   : > { %v6386_v50 = vadd.f32 %v6360_v36, %v6310_v63  ;;  %v6740_v15 = vsel %vm2272_vm5, %v6738_v49, %v6739_v25  ;;  %v6891_v52 = vrot.slane %v6857_v9, 5  ;;  %v7008_v33 = vmul.f32 %v12397_v59, %v15169_v19 }
 0x630   : > { %v6917_v42 = vadd.f32 %v15170_v51, %v6841_v46  ;;  %v6966_v39 = vrot.slane %v6932_v1, 5  ;;  %v6967_v17 = vrot.slane %v6933_v31, 5  ;;  %v7009_v16 = vmul.f32 %v12571_v56, %v15169_v19  ;;  %v15172_v31 = vld [vmem:[#allocation62_spill] sm:$0xff] }
 0x631   : > { %v6462_v47 = vadd.f32 %v6436_v28, %v6386_v50  ;;  %v6816_v27 = vsel %vm2805_vm6, %v6814_v54, %v6815_v48  ;;  %v6892_v26 = vsel %vm2805_vm6, %v6890_v58, %v6891_v52  ;;  %v7084_v36 = vmul.f32 %v12406_v29, %v15171_v14 }
 0x632   : > { %v6993_v49 = vadd.f32 %v12404_v20, %v6917_v42  ;;  %v7042_v25 = vrot.slane %v7008_v33, 5  ;;  %v7043_v63 = vrot.slane %v7009_v16, 5  ;;  %v7085_v9 = vmul.f32 %v12579_v18, %v15171_v14 }
 0x633   : > { %v6538_v1 = vadd.f32 %v6512_v11, %v6462_v47  ;;  %v7118_v46 = vrot.slane %v7084_v36, 5  ;;  %v7160_v51 = vmul.f32 %v15172_v31, %v12439_v62  ;;  %v7161_v28 = vmul.f32 %v15172_v31, %v12441_v3  ;;  %v15173_v36 = vld [vmem:[#allocation3_spill] sm:$0xff] }
 0x634   : > { %v7069_v54 = vadd.f32 %v12413_v8, %v6993_v49  ;;  %v6968_v48 = vsel %vm2805_vm6, %v6966_v39, %v6967_v17  ;;  %v7119_v58 = vrot.slane %v7085_v9, 5  ;;  %v7236_v20 = vmul.f32 %v12068_v61, %v12465_v45  ;;  %v15174_v9 = vld [vmem:[#allocation37_spill] sm:$0xff] }
 0x635   : > { %v6614_v50 = vadd.f32 %v6588_v13, %v6538_v1  ;;  %v7194_v52 = vrot.slane %v7160_v51, 5  ;;  %v7195_v33 = vrot.slane %v7161_v28, 5  ;;  %v7237_v11 = vmul.f32 %v12068_v61, %v12577_v37  ;;  %v15175_v28 = vld [vmem:[#allocation4_spill] sm:$0xff] }
 0x636   : > { %v7145_v42 = vadd.f32 %v12420_v23, %v7069_v54  ;;  %v7044_v16 = vsel %vm2805_vm6, %v7042_v25, %v7043_v63  ;;  %v7120_v47 = vsel %vm2805_vm6, %v7118_v46, %v7119_v58  ;;  %v7312_v8 = vmul.f32 %v12373_v5, %v15173_v36  ;;  %v15176_v5 = vld [vmem:[#allocation5_spill] sm:$0xff] }
 0x637   : > { %v6690_v39 = vadd.f32 %v6664_v44, %v6614_v50  ;;  %v7270_v17 = vrot.slane %v7236_v20, 5  ;;  %v7271_v49 = vrot.slane %v7237_v11, 5  ;;  %v7313_v13 = vmul.f32 %v12599_v35, %v15173_v36 }
 0x638   : > { %v7221_v1 = vadd.f32 %v15174_v9, %v7145_v42  ;;  %v7346_v51 = vrot.slane %v7312_v8, 6  ;;  %v7388_v61 = vmul.f32 %v12381_v10, %v15175_v28  ;;  %v7389_v23 = vmul.f32 %v12608_v38, %v15175_v28  ;;  %v15177_v8 = vld [vmem:[#allocation6_spill] sm:$0xff] }
 0x639   : > { %v6766_v25 = vadd.f32 %v6740_v15, %v6690_v39  ;;  %v7196_v63 = vsel %vm2805_vm6, %v7194_v52, %v7195_v33  ;;  %v7347_v46 = vrot.slane %v7313_v13, 6  ;;  %v7464_v44 = vmul.f32 %v12389_v12, %v15176_v5  ;;  %v15178_v52 = vld [vmem:[#allocation31_spill] sm:$0xff] }
 0x63a   : > { %v7297_v54 = vadd.f32 %v12551_v41, %v7221_v1  ;;  %v7422_v58 = vrot.slane %v7388_v61, 6  ;;  %v7423_v35 = vrot.slane %v7389_v23, 6  ;;  %v7465_v20 = vmul.f32 %v12562_v40, %v15176_v5  ;;  %v15179_v1 = vld [vmem:[#allocation7_spill] sm:$0xff] }
 0x63b   : > { %v6842_v50 = vadd.f32 %v6816_v27, %v6766_v25  ;;  %v7272_v11 = vsel %vm2805_vm6, %v7270_v17, %v7271_v49  ;;  %v7348_v42 = vsel %vm3338_vm7, %v7346_v51, %v7347_v46  ;;  %v7540_v15 = vmul.f32 %v12397_v59, %v15177_v8  ;;  %v15180_v17 = vld [vmem:[#allocation27_spill] sm:$0xff]  ;;  %v15181_v46 = vld [vmem:[#allocation8_spill] sm:$0xff] }
 0x63c   : > { %v7373_v33 = vadd.f32 %v15178_v52, %v7297_v54  ;;  %v7498_v39 = vrot.slane %v7464_v44, 6  ;;  %v7499_v13 = vrot.slane %v7465_v20, 6  ;;  %v7541_v41 = vmul.f32 %v12571_v56, %v15177_v8 }
 0x63d   : > { %v6918_v61 = vadd.f32 %v6892_v26, %v6842_v50  ;;  %v7574_v9 = vrot.slane %v7540_v15, 6  ;;  %v7616_v23 = vmul.f32 %v12406_v29, %v15179_v1  ;;  %v7617_v27 = vmul.f32 %v12579_v18, %v15179_v1  ;;  %v15182_v50 = vld [vmem:[#allocation73_spill] sm:$0xff] }
 0x63e   : > { %v7449_v49 = vadd.f32 %v15180_v17, %v7373_v33  ;;  %v7424_v51 = vsel %vm3338_vm7, %v7422_v58, %v7423_v35  ;;  %v7575_v25 = vrot.slane %v7541_v41, 6  ;;  %v7692_v44 = vmul.f32 %v15181_v46, %v12439_v62  ;;  %v12802_v33 = vld [vmem:[%s14271_s1 + $0x68] ss:$0 sm:$0xff] }
 0x63f   : > { %v6994_v54 = vadd.f32 %v6968_v48, %v6918_v61  ;;  %v7650_v20 = vrot.slane %v7616_v23, 6  ;;  %v7651_v52 = vrot.slane %v7617_v27, 6  ;;  %v7693_v26 = vmul.f32 %v15181_v46, %v12441_v3  ;;  %15183 = vst [vmem:[#allocation13_spill] sm:$0xff] %v12802_v33  ;;  %v15184_v23 = vld [vmem:[#allocation74_spill] sm:$0xff] }
 0x640   : > { %v7525_v15 = vadd.f32 %v15182_v50, %v7449_v49  ;;  %v7500_v8 = vsel %vm3338_vm7, %v7498_v39, %v7499_v13  ;;  %v7726_v5 = vrot.slane %v7692_v44, 6  ;;  %v7768_v58 = vmul.f32 %v12802_v33, %v12465_v45  ;;  %v15185_v50 = vld [vmem:[#allocation25_spill] sm:$0xff] }
 0x641   : > { %v7070_v35 = vadd.f32 %v7044_v16, %v6994_v54  ;;  %v7576_v48 = vsel %vm3338_vm7, %v7574_v9, %v7575_v25  ;;  %v7727_v41 = vrot.slane %v7693_v26, 6  ;;  %v7769_v61 = vmul.f32 %v12802_v33, %v12577_v37  ;;  %v15186_v9 = vld [vmem:[#allocation11_spill] sm:$0xff] }
 0x642   : > { %v7601_v27 = vadd.f32 %v15184_v23, %v7525_v15  ;;  %v7652_v39 = vsel %vm3338_vm7, %v7650_v20, %v7651_v52  ;;  %v7802_v13 = vrot.slane %v7768_v58, 6  ;;  %v4611_v17 = vmul.f32 %v15136_v24, %v12465_v45  ;;  %v15187_v54 = vld [vmem:[#allocation75_spill] sm:$0xff]  ;;  %v15188_v52 = vld [vmem:[#allocation12_spill] sm:$0xff] }
 0x643   : > { %v7146_v49 = vadd.f32 %v7120_v47, %v7070_v35  ;;  %v12814_v44 = vsel %vm3338_vm7, %v7726_v5, %v7727_v41  ;;  %v4631_v16 = vmul.f32 %v15118_v30, %v15185_v50  ;;  %v4654_v25 = vmul.f32 %v12381_v10, %v15186_v9 }
 0x644   : > { %v7677_v26 = vadd.f32 %v15187_v54, %v7601_v27  ;;  %v4619_v15 = vadd.f32 %v4611_v17, %v12512_v43  ;;  %v4655_v20 = vmul.f32 %v12608_v38, %v15186_v9  ;;  %v4730_v58 = vmul.f32 %v12389_v12, %v15188_v52 }
 0x645   : > { %v7222_v47 = vadd.f32 %v7196_v63, %v7146_v49  ;;  %v7803_v35 = vrot.slane %v7769_v61, 6  ;;  %v4689_v5 = vrot.slane %v4654_v25, 1  ;;  %v4731_v41 = vmul.f32 %v12562_v40, %v15188_v52 }
 0x646   : > { %v7753_v23 = vadd.f32 %v12491_v32, %v7677_v26  ;;  %v4639_v30 = vadd.f32 %v4631_v16, %v4619_v15  ;;  %v4690_v24 = vrot.slane %v4655_v20, 1  ;;  %v4765_v33 = vrot.slane %v4730_v58, 1  ;;  %v12846_v58 = vld [vmem:[#allocation2 + $0x98] sm:$0x3f] }
 0x647   : > { %v7298_v27 = vadd.f32 %v7272_v11, %v7222_v47  ;;  %v4766_v54 = vrot.slane %v4731_v41, 1  ;;  %v4806_v43 = vmul.f32 %v12397_v59, %v11753_v7  ;;  %v4807_v17 = vmul.f32 %v12571_v56, %v11753_v7 }
 0x648   : > { %v12834_v63 = vadd.f32 %v12567_v53, %v7753_v23  ;;  %v4691_v61 = vsel %vm674_vm2, %v4689_v5, %v4690_v24  ;;  %v4882_v49 = vmul.f32 %v12406_v29, %v11780_v22  ;;  %v4883_v32 = vmul.f32 %v12579_v18, %v11780_v22 }
 0x649   : > { %v7374_v16 = vadd.f32 %v7348_v42, %v7298_v27  ;;  %v4715_v11 = vadd.f32 %v4691_v61, %v4639_v30  ;;  %v4767_v25 = vsel %vm674_vm2, %v4765_v33, %v4766_v54  ;;  %v4841_v26 = vrot.slane %v4806_v43, 1 }
 0x64a   : > { %15189 = vst [vmem:[#allocation20_spill] sm:$0xff] %v12834_v63  ;;  %8672 = vmatmul.mubr.msk.f32.vlgmr.msra.gmra.mrb[16].mxu0 %vm361_vm0, %v12834_v63  ;;  %v4842_v15 = vrot.slane %v4807_v17, 1  ;;  %v4917_v20 = vrot.slane %v4882_v49, 1  ;;  %v4918_v53 = vrot.slane %v4883_v32, 1  ;;  %v4958_v24 = vmul.f32 %v11784_v4, %v12439_v62  ;;  %v15190_v49 = vld [vmem:[#allocation15_spill] sm:$0xff] }
 0x64b   : > { %v7450_v47 = vadd.f32 %v7424_v51, %v7374_v16  ;;  %v4791_v5 = vadd.f32 %v4767_v25, %v4715_v11  ;;  %v4959_v42 = vmul.f32 %v11784_v4, %v12441_v3  ;;  %v5034_v30 = vmul.f32 %v11802_v60, %v12465_v45  ;;  %v15191_v11 = vld [vmem:[#allocation19_spill] sm:$0xff] }
 0x64c   : > { %v4843_v33 = vsel %vm674_vm2, %v4841_v26, %v4842_v15  ;;  %v4919_v41 = vsel %vm674_vm2, %v4917_v20, %v4918_v53  ;;  %v4993_v23 = vrot.slane %v4958_v24, 1  ;;  %v5035_v27 = vmul.f32 %v11802_v60, %v12577_v37 }
 0x64d   : > { %v7526_v54 = vadd.f32 %v7500_v8, %v7450_v47  ;;  %v4867_v43 = vadd.f32 %v4843_v33, %v4791_v5  ;;  %v4994_v17 = vrot.slane %v4959_v42, 1  ;;  %v5069_v61 = vrot.slane %v5034_v30, 1 }
 0x64e   : > { %v5070_v51 = vrot.slane %v5035_v27, 1  ;;  %v5110_v32 = vmul.f32 %v15190_v49, %v15185_v50  ;;  %v5111_v16 = vmul.f32 %v15190_v49, %v12846_v58  ;;  %v5186_v25 = vmul.f32 %v12381_v10, %v15191_v11  ;;  %v15192_v27 = vld [vmem:[#allocation17_spill] sm:$0xff] }
 0x64f   : > { %v7602_v26 = vadd.f32 %v7576_v48, %v7526_v54  ;;  %v7804_v15 = vsel %vm3338_vm7, %v7802_v13, %v7803_v35  ;;  %v4943_v20 = vadd.f32 %v4919_v41, %v4867_v43  ;;  %v5187_v8 = vmul.f32 %v12608_v38, %v15191_v11  ;;  %v15193_v13 = vld [vmem:[#allocation18_spill] sm:$0xff] }
 0x650   : > { %v4995_v53 = vsel %vm674_vm2, %v4993_v23, %v4994_v17  ;;  %v5071_v24 = vsel %vm674_vm2, %v5069_v61, %v5070_v51  ;;  %v5145_v47 = vrot.slane %v5110_v32, 1  ;;  %v5146_v5 = vrot.slane %v5111_v16, 1 }
 0x651   : > { %v7678_v42 = vadd.f32 %v7652_v39, %v7602_v26  ;;  %v5019_v30 = vadd.f32 %v4995_v53, %v4943_v20  ;;  %v5221_v33 = vrot.slane %v5186_v25, 2  ;;  %v5262_v63 = vmul.f32 %v12389_v12, %v15192_v27  ;;  %v15195_v20 = vld [vmem:[#allocation40_spill] sm:$0xff] }
 0x652   : > { %v5222_v49 = vrot.slane %v5187_v8, 2  ;;  %v5263_v48 = vmul.f32 %v12562_v40, %v15192_v27  ;;  %v5338_v35 = vmul.f32 %v12397_v59, %v15193_v13  ;;  %v5339_v41 = vmul.f32 %v12571_v56, %v15193_v13 }
 0x653   : > { %v7754_v23 = vadd.f32 %v12814_v44, %v7678_v42  ;;  %v5095_v54 = vadd.f32 %v5071_v24, %v5019_v30  ;;  %v5147_v39 = vsel %vm674_vm2, %v5145_v47, %v5146_v5  ;;  %v5297_v43 = vrot.slane %v5262_v63, 2  ;;  %v15196_v42 = vld [vmem:[#allocation41_spill] sm:$0xff] }
 0x654   : > { %v5298_v17 = vrot.slane %v5263_v48, 2  ;;  %v5373_v61 = vrot.slane %v5338_v35, 2  ;;  %v5374_v51 = vrot.slane %v5339_v41, 2  ;;  %v5414_v32 = vmul.f32 %v12406_v29, %v15141_v34 }
 0x655   : > { %v12879_v16 = vadd.f32 %v7804_v15, %v7754_v23  ;;  %v5171_v25 = vadd.f32 %v5147_v39, %v5095_v54  ;;  %v5415_v26 = vmul.f32 %v12579_v18, %v15141_v34  ;;  %v5490_v8 = vmul.f32 %v15195_v20, %v12439_v62  ;;  %v15198_v23 = vld [vmem:[#allocation48_spill] sm:$0xff]  ;;  %v15199_v54 = vld [vmem:[#allocation21_spill] sm:$0xff] }
 0x656   : > { %v5223_v44 = vsel %vm1207_vm3, %v5221_v33, %v5222_v49  ;;  %v5299_v53 = vsel %vm1207_vm3, %v5297_v43, %v5298_v17  ;;  %v5449_v63 = vrot.slane %v5414_v32, 2  ;;  %v5491_v24 = vmul.f32 %v15195_v20, %v12441_v3  ;;  %v15197_v49 = vld [vmem:[#allocation42_spill] sm:$0xff]  ;;  %v15200_v32 = vld [vmem:[#allocation43_spill] sm:$0xff]  ;;  %v15201_v20 = vld [vmem:[#allocation44_spill] sm:$0xff] }
 0x657   : > { %15194 = vst [vmem:[#allocation10_spill] sm:$0xff] %v12879_v16  ;;  %8674 = vmatprep.mubr.msk.f32.mxu0 %vm361_vm0, %v12879_v16  ;;  %v5247_v15 = vadd.f32 %v5223_v44, %v5171_v25  ;;  %v5450_v47 = vrot.slane %v5415_v26, 2  ;;  %v5525_v5 = vrot.slane %v5490_v8, 2  ;;  %v5566_v30 = vmul.f32 %v15196_v42, %v12465_v45 }
 0x658   : > { %v5526_v48 = vrot.slane %v5491_v24, 2  ;;  %v5567_v35 = vmul.f32 %v15196_v42, %v12577_v37  ;;  %v5642_v33 = vmul.f32 %v15197_v49, %v15185_v50  ;;  %v5643_v41 = vmul.f32 %v15197_v49, %v12846_v58 }
 0x659   : > { %v12901_v39 = vadd.f32 %v15199_v54, %v15198_v23  ;;  %v5323_v43 = vadd.f32 %v5299_v53, %v5247_v15  ;;  %v5375_v17 = vsel %vm1207_vm3, %v5373_v61, %v5374_v51  ;;  %v5718_v25 = vmul.f32 %v12381_v10, %v15200_v32  ;;  %v15202_v51 = vld [vmem:[#allocation45_spill] sm:$0xff]  ;;  %v15203_v54 = vld [vmem:[#allocation46_spill] sm:$0xff] }
 0x65a   : > { %v5451_v26 = vsel %vm1207_vm3, %v5449_v63, %v5450_v47  ;;  %v5527_v8 = vsel %vm1207_vm3, %v5525_v5, %v5526_v48  ;;  %v5601_v44 = vrot.slane %v5566_v30, 2  ;;  %v5602_v24 = vrot.slane %v5567_v35, 2 }
 0x65b   : > { %v5399_v16 = vadd.f32 %v5375_v17, %v5323_v43  ;;  %v5677_v42 = vrot.slane %v5642_v33, 2  ;;  %v5719_v49 = vmul.f32 %v12608_v38, %v15200_v32  ;;  %v5794_v23 = vmul.f32 %v12389_v12, %v15201_v20 }
 0x65c   : > { %v5678_v53 = vrot.slane %v5643_v41, 2  ;;  %v5753_v15 = vrot.slane %v5718_v25, 3  ;;  %v5795_v61 = vmul.f32 %v12562_v40, %v15201_v20  ;;  %v5870_v63 = vmul.f32 %v12397_v59, %v15202_v51 }
 0x65d   : > { %v5475_v47 = vadd.f32 %v5451_v26, %v5399_v16  ;;  %v5754_v5 = vrot.slane %v5719_v49, 3  ;;  %v5829_v30 = vrot.slane %v5794_v23, 3  ;;  %v5871_v48 = vmul.f32 %v12571_v56, %v15202_v51 }
 0x65e   : > { %v5830_v35 = vrot.slane %v5795_v61, 3  ;;  %v5905_v33 = vrot.slane %v5870_v63, 3  ;;  %v5946_v43 = vmul.f32 %v12406_v29, %v15203_v54  ;;  %v5947_v41 = vmul.f32 %v12579_v18, %v15203_v54 }
 0x65f   : > { %v5551_v17 = vadd.f32 %v5527_v8, %v5475_v47  ;;  %v5603_v25 = vsel %vm1207_vm3, %v5601_v44, %v5602_v24  ;;  %v5906_v20 = vrot.slane %v5871_v48, 3  ;;  %v6022_v16 = vmul.f32 %v15154_v6, %v12439_v62 }
 0x660   : > { %v5679_v49 = vsel %vm1207_vm3, %v5677_v42, %v5678_v53  ;;  %v5755_v26 = vsel %vm452_vm4, %v5753_v15, %v5754_v5  ;;  %v5831_v23 = vsel %vm452_vm4, %v5829_v30, %v5830_v35  ;;  %v6023_v61 = vmul.f32 %v15154_v6, %v12441_v3  ;;  %v15204_v30 = vld [vmem:[#allocation29_spill] sm:$0xff] }
 0x661   : > { %v5627_v63 = vadd.f32 %v5603_v25, %v5551_v17  ;;  %v5981_v51 = vrot.slane %v5946_v43, 3  ;;  %v5982_v32 = vrot.slane %v5947_v41, 3  ;;  %v6098_v8 = vmul.f32 %v15155_v21, %v12465_v45 }
 0x662   : > { %v5907_v44 = vsel %vm452_vm4, %v5905_v33, %v5906_v20  ;;  %v6057_v24 = vrot.slane %v6022_v16, 3  ;;  %v6099_v47 = vmul.f32 %v15155_v21, %v12577_v37  ;;  %v6174_v42 = vmul.f32 %v15133_v57, %v15185_v50 }
 0x663   : > { %v5703_v53 = vadd.f32 %v5679_v49, %v5627_v63  ;;  %v6058_v15 = vrot.slane %v6023_v61, 3  ;;  %v6175_v5 = vmul.f32 %v15133_v57, %v12846_v58  ;;  %v6250_v48 = vmul.f32 %v12381_v10, %v15204_v30 }
 0x664   : > { %v6133_v35 = vrot.slane %v6098_v8, 3  ;;  %v6134_v43 = vrot.slane %v6099_v47, 3  ;;  %v6209_v41 = vrot.slane %v6174_v42, 3  ;;  %v6251_v20 = vmul.f32 %v12608_v38, %v15204_v30 }
 0x665   : > { %v5779_v33 = vadd.f32 %v5755_v26, %v5703_v53  ;;  %v6210_v17 = vrot.slane %v6175_v5, 3  ;;  %v6285_v25 = vrot.slane %v6250_v48, 4  ;;  %v6326_v50 = vmul.f32 %v12389_v12, %v15158_v2 }
 0x666   : > { %v5983_v16 = vsel %vm452_vm4, %v5981_v51, %v5982_v32  ;;  %v6286_v49 = vrot.slane %v6251_v20, 4  ;;  %v6327_v61 = vmul.f32 %v12562_v40, %v15158_v2  ;;  %v6402_v10 = vmul.f32 %v12397_v59, %v15159_v0  ;;  %v15205_v32 = vld [vmem:[#allocation32_spill] sm:$0xff] }
 0x667   : > { %v5855_v63 = vadd.f32 %v5831_v23, %v5779_v33  ;;  %v6059_v8 = vsel %vm452_vm4, %v6057_v24, %v6058_v15  ;;  %v6361_v47 = vrot.slane %v6326_v50, 4  ;;  %v6403_v26 = vmul.f32 %v12571_v56, %v15159_v0 }
 0x668   : > { %v6135_v42 = vsel %vm452_vm4, %v6133_v35, %v6134_v43  ;;  %v6211_v12 = vsel %vm452_vm4, %v6209_v41, %v6210_v17  ;;  %v6362_v53 = vrot.slane %v6327_v61, 4  ;;  %v6478_v51 = vmul.f32 %v12406_v29, %v15205_v32  ;;  %v15206_v43 = vld [vmem:[#allocation33_spill] sm:$0xff] }
 0x669   : > { %v5931_v5 = vadd.f32 %v5907_v44, %v5855_v63  ;;  %v6287_v48 = vsel %vm2272_vm5, %v6285_v25, %v6286_v49  ;;  %v6479_v59 = vmul.f32 %v12579_v18, %v15205_v32  ;;  %v6554_v23 = vmul.f32 %v15161_v55, %v12439_v62  ;;  %v12969_v49 = vld [vmem:[#allocation2 + $0x90] sm:$0xff]  ;;  %v15207_v62 = vld [vmem:[#allocation55_spill] sm:$0xff]  ;;  %v15208_v63 = vld [vmem:[#allocation56_spill] sm:$0xff] }
 0x66a   : > { %v6437_v24 = vrot.slane %v6402_v10, 4  ;;  %v6438_v15 = vrot.slane %v6403_v26, 4  ;;  %v6555_v35 = vmul.f32 %v15161_v55, %v12441_v3  ;;  %v6630_v41 = vmul.f32 %v15206_v43, %v12465_v45 }
 0x66b   : > { %v6007_v20 = vadd.f32 %v5983_v16, %v5931_v5  ;;  %v6363_v29 = vsel %vm2272_vm5, %v6361_v47, %v6362_v53  ;;  %v6513_v44 = vrot.slane %v6478_v51, 4  ;;  %v6514_v33 = vrot.slane %v6479_v59, 4  ;;  %v8875_v16 = vld [vmem:[#allocation2 + $0x30] sm:$0xff] }
 0x66c   : > { %v6589_v17 = vrot.slane %v6554_v23, 4  ;;  %v6590_v25 = vrot.slane %v6555_v35, 4  ;;  %v6631_v50 = vmul.f32 %v15206_v43, %v12577_v37  ;;  %v6706_v61 = vmul.f32 %v12969_v49, %v15207_v62  ;;  %v12980_v43 = vld [vmem:[#allocation2 + $0x40] sm:$0xff] }
 0x66d   : > { %v6083_v10 = vadd.f32 %v6059_v8, %v6007_v20  ;;  %v6665_v3 = vrot.slane %v6630_v41, 4  ;;  %v6707_v45 = vmul.f32 %v15207_v62, %v12846_v58  ;;  %v6782_v47 = vmul.f32 %v8875_v16, %v15208_v63  ;;  %v15209_v8 = vld [vmem:[#allocation58_spill] sm:$0xff] }
 0x66e   : > { %v6439_v26 = vsel %vm2272_vm5, %v6437_v24, %v6438_v15  ;;  %v6666_v53 = vrot.slane %v6631_v50, 4  ;;  %v6741_v51 = vrot.slane %v6706_v61, 4  ;;  %v6783_v5 = vmul.f32 %v12608_v38, %v15208_v63  ;;  %v12987_v15 = vld [vmem:[#allocation2 + $0x50] sm:$0xff]  ;;  %v15210_v50 = vld [vmem:[#allocation59_spill] sm:$0xff] }
 0x66f   : > { %v6159_v59 = vadd.f32 %v6135_v42, %v6083_v10  ;;  %v6515_v23 = vsel %vm2272_vm5, %v6513_v44, %v6514_v33  ;;  %v6742_v35 = vrot.slane %v6707_v45, 4  ;;  %v6858_v41 = vmul.f32 %v12980_v43, %v15209_v8 }
 0x670   : > { %v6591_v20 = vsel %vm2272_vm5, %v6589_v17, %v6590_v25  ;;  %v6817_v62 = vrot.slane %v6782_v47, 5  ;;  %v6859_v24 = vmul.f32 %v12562_v40, %v15209_v8  ;;  %v6934_v61 = vmul.f32 %v12987_v15, %v15210_v50  ;;  %v12995_v25 = vld [vmem:[#allocation2 + $0x60] sm:$0xff] }
 0x671   : > { %v6235_v42 = vadd.f32 %v6211_v12, %v6159_v59  ;;  %v6667_v44 = vsel %vm2272_vm5, %v6665_v3, %v6666_v53  ;;  %v6818_v33 = vrot.slane %v6783_v5, 5  ;;  %v6935_v10 = vmul.f32 %v12571_v56, %v15210_v50  ;;  %v13001_v59 = vld [vmem:[#allocation2 + $0x70] sm:$0xff] }
 0x672   : > { %v6743_v45 = vsel %vm2272_vm5, %v6741_v51, %v6742_v35  ;;  %v6893_v63 = vrot.slane %v6858_v41, 5  ;;  %v6894_v17 = vrot.slane %v6859_v24, 5  ;;  %v7010_v47 = vmul.f32 %v12995_v25, %v15169_v19  ;;  %v13005_v51 = vld [vmem:[#allocation2 + $0x78] sm:$0x3f]  ;;  %v13009_v41 = vld [vmem:[#allocation2 + $0x80] sm:$0xff] }
 0x673   : > { %v6311_v8 = vadd.f32 %v6287_v48, %v6235_v42  ;;  %v6969_v55 = vrot.slane %v6934_v61, 5  ;;  %v7011_v12 = vmul.f32 %v12579_v18, %v15169_v19  ;;  %v7086_v3 = vmul.f32 %v13001_v59, %v15171_v14 }
 0x674   : > { %v6970_v53 = vrot.slane %v6935_v10, 5  ;;  %v7045_v5 = vrot.slane %v7010_v47, 5  ;;  %v7087_v35 = vmul.f32 %v13005_v51, %v15171_v14  ;;  %v7162_v48 = vmul.f32 %v13009_v41, %v15172_v31  ;;  %v15211_v47 = vld [vmem:[#allocation22_spill] sm:$0xff] }
 0x675   : > { %v6387_v24 = vadd.f32 %v6363_v29, %v6311_v8  ;;  %v6819_v61 = vsel %vm2805_vm6, %v6817_v62, %v6818_v33  ;;  %v7046_v42 = vrot.slane %v7011_v12, 5  ;;  %v7121_v19 = vrot.slane %v7086_v3, 5 }
 0x676   : > { %v6895_v50 = vsel %vm2805_vm6, %v6893_v63, %v6894_v17  ;;  %v7122_v32 = vrot.slane %v7087_v35, 5  ;;  %v7163_v10 = vmul.f32 %v15172_v31, %v12577_v37  ;;  %v7238_v0 = vmul.f32 %v12969_v49, %v15211_v47 }
 0x677   : > { %v6463_v14 = vadd.f32 %v6439_v26, %v6387_v24  ;;  %v7197_v2 = vrot.slane %v7162_v48, 5  ;;  %v7239_v30 = vmul.f32 %v15211_v47, %v12846_v58  ;;  %v7314_v29 = vmul.f32 %v8875_v16, %v15173_v36 }
 0x678   : > { %v6971_v62 = vsel %vm2805_vm6, %v6969_v55, %v6970_v53  ;;  %v7047_v8 = vsel %vm2805_vm6, %v7045_v5, %v7046_v42  ;;  %v7198_v33 = vrot.slane %v7163_v10, 5  ;;  %v7315_v63 = vmul.f32 %v12608_v38, %v15173_v36  ;;  %v15212_v55 = vld [vmem:[#allocation5_spill] sm:$0xff] }
 0x679   : > { %v6539_v17 = vadd.f32 %v6515_v23, %v6463_v14  ;;  %v13027_v12 = vsel %vm2805_vm6, %v7121_v19, %v7122_v32  ;;  %v7273_v3 = vrot.slane %v7238_v0, 5  ;;  %v7390_v26 = vmul.f32 %v12980_v43, %v15175_v28  ;;  %v15213_v23 = vld [vmem:[#allocation6_spill] sm:$0xff] }
 0x67a   : > { %v7274_v35 = vrot.slane %v7239_v30, 5  ;;  %v7349_v48 = vrot.slane %v7314_v29, 6  ;;  %v7391_v16 = vmul.f32 %v12562_v40, %v15175_v28  ;;  %v7466_v53 = vmul.f32 %v12987_v15, %v15212_v55 }
 0x67b   : > { %v6615_v5 = vadd.f32 %v6591_v20, %v6539_v17  ;;  %v13036_v24 = vsel %vm2805_vm6, %v7197_v2, %v7198_v33  ;;  %v7350_v38 = vrot.slane %v7315_v63, 6  ;;  %v7467_v14 = vmul.f32 %v12571_v56, %v15212_v55 }
 0x67c   : > { %v7425_v0 = vrot.slane %v7390_v26, 6  ;;  %v7426_v19 = vrot.slane %v7391_v16, 6  ;;  %v7501_v32 = vrot.slane %v7466_v53, 6  ;;  %v7542_v30 = vmul.f32 %v12995_v25, %v15213_v23 }
 0x67d   : > { %v6691_v42 = vadd.f32 %v6667_v44, %v6615_v5  ;;  %v7502_v10 = vrot.slane %v7467_v14, 6  ;;  %v7543_v40 = vmul.f32 %v12579_v18, %v15213_v23  ;;  %v7618_v20 = vmul.f32 %v13001_v59, %v15179_v1 }
 0x67e   : > { %v13047_v2 = vsel %vm2805_vm6, %v7273_v3, %v7274_v35  ;;  %v7577_v29 = vrot.slane %v7542_v30, 6  ;;  %v7619_v56 = vmul.f32 %v13005_v51, %v15179_v1  ;;  %v7694_v33 = vmul.f32 %v13009_v41, %v15181_v46  ;;  %v15214_v35 = vld [vmem:[#allocation13_spill] sm:$0xff] }
 0x67f   : > { %v6767_v63 = vadd.f32 %v6743_v45, %v6691_v42  ;;  %v13054_v44 = vsel %vm3338_vm7, %v7349_v48, %v7350_v38  ;;  %v7578_v17 = vrot.slane %v7543_v40, 6  ;;  %v7653_v26 = vrot.slane %v7618_v20, 6  ;;  %v15215_v48 = vld [vmem:[#allocation38_spill] sm:$0xff]  ;;  %v13077_v40 = vld [vmem:[#allocation2 + $0xa0] sm:$0xff] }
 0x680   : > { %v13057_v18 = vsel %vm3338_vm7, %v7425_v0, %v7426_v19  ;;  %v7654_v16 = vrot.slane %v7619_v56, 6  ;;  %v7695_v3 = vmul.f32 %v15181_v46, %v12577_v37  ;;  %v7770_v53 = vmul.f32 %v12969_v49, %v15214_v35 }
 0x681   : > { %v6843_v5 = vadd.f32 %v6819_v61, %v6767_v63  ;;  %v13064_v14 = vsel %vm3338_vm7, %v7501_v32, %v7502_v10  ;;  %v7771_v45 = vmul.f32 %v15214_v35, %v12846_v58  ;;  %v4612_v38 = vmul.f32 %v12969_v49, %v15215_v48  ;;  %v15216_v32 = vld [vmem:[#allocation54_spill] sm:$0xff]  ;;  %v13083_v63 = vld [vmem:[#allocation2 + $0x48] sm:$0x3f] }
 0x682   : > { %v13071_v0 = vsel %vm3338_vm7, %v7577_v29, %v7578_v17  ;;  %v13074_v19 = vsel %vm3338_vm7, %v7653_v26, %v7654_v16  ;;  %v7729_v37 = vrot.slane %v7694_v33, 6  ;;  %v7730_v30 = vrot.slane %v7695_v3, 6 }
 0x683   : > { %v6919_v42 = vadd.f32 %v6895_v50, %v6843_v5  ;;  %v4620_v61 = vadd.f32 %v4612_v38, %v12901_v39  ;;  %v4632_v10 = vmul.f32 %v13077_v40, %v15216_v32  ;;  %v4656_v20 = vmul.f32 %v12980_v43, %v15186_v9  ;;  %v13089_v50 = vld [vmem:[#allocation2 + $0x58] sm:$0x3f] }
 0x684   : > { %v7805_v56 = vrot.slane %v7770_v53, 6  ;;  %v4657_v29 = vmul.f32 %v13083_v63, %v15186_v9  ;;  %v4732_v33 = vmul.f32 %v12987_v15, %v15188_v52  ;;  %v4733_v39 = vmul.f32 %v13089_v50, %v15188_v52  ;;  %v13095_v9 = vld [vmem:[#allocation2 + $0x68] sm:$0x3f] }
 0x685   : > { %v6995_v17 = vadd.f32 %v6971_v62, %v6919_v42  ;;  %v7806_v26 = vrot.slane %v7771_v45, 6  ;;  %v4640_v16 = vadd.f32 %v4632_v10, %v4620_v61  ;;  %v4692_v3 = vrot.slane %v4656_v20, 1 }
 0x686   : > { %v4693_v35 = vrot.slane %v4657_v29, 1  ;;  %v4768_v5 = vrot.slane %v4732_v33, 1  ;;  %v4769_v53 = vrot.slane %v4733_v39, 1  ;;  %v4808_v38 = vmul.f32 %v12995_v25, %v11753_v7  ;;  %v13110_v39 = vld [vmem:[#allocation2 + $0xa8] sm:$0x3f] }
 0x687   : > { %v7071_v32 = vadd.f32 %v7047_v8, %v6995_v17  ;;  %v4809_v48 = vmul.f32 %v13095_v9, %v11753_v7  ;;  %v4884_v46 = vmul.f32 %v13001_v59, %v11780_v22  ;;  %v4885_v62 = vmul.f32 %v13005_v51, %v11780_v22  ;;  %v13113_v22 = vld [vmem:[#allocation2 + $0x88] sm:$0x3f] }
 0x688   : > { %v13104_v45 = vsel %vm3338_vm7, %v7729_v37, %v7730_v30  ;;  %v4694_v42 = vsel %vm674_vm2, %v4692_v3, %v4693_v35  ;;  %v4844_v61 = vrot.slane %v4808_v38, 1  ;;  %v4960_v8 = vmul.f32 %v13009_v41, %v11784_v4 }
 0x689   : > { %v7147_v10 = vadd.f32 %v13027_v12, %v7071_v32  ;;  %v4716_v20 = vadd.f32 %v4694_v42, %v4640_v16  ;;  %v4845_v29 = vrot.slane %v4809_v48, 1  ;;  %v4920_v33 = vrot.slane %v4884_v46, 1 }
 0x68a   : > { %v4770_v17 = vsel %vm674_vm2, %v4768_v5, %v4769_v53  ;;  %v4921_v7 = vrot.slane %v4885_v62, 1  ;;  %v4961_v37 = vmul.f32 %v13113_v22, %v11784_v4  ;;  %v5036_v30 = vmul.f32 %v12969_v49, %v11802_v60  ;;  %v15217_v5 = vld [vmem:[#allocation15_spill] sm:$0xff] }
 0x68b   : > { %v7223_v3 = vadd.f32 %v13036_v24, %v7147_v10  ;;  %v4792_v35 = vadd.f32 %v4770_v17, %v4716_v20  ;;  %v4996_v12 = vrot.slane %v4960_v8, 1  ;;  %v5037_v46 = vmul.f32 %v11802_v60, %v12846_v58 }
 0x68c   : > { %v7807_v48 = vsel %vm3338_vm7, %v7805_v56, %v7806_v26  ;;  %v4846_v32 = vsel %vm674_vm2, %v4844_v61, %v4845_v29  ;;  %v4997_v16 = vrot.slane %v4961_v37, 1  ;;  %v5112_v53 = vmul.f32 %v13077_v40, %v15217_v5 }
 0x68d   : > { %v7299_v38 = vadd.f32 %v13047_v2, %v7223_v3  ;;  %v4868_v62 = vadd.f32 %v4846_v32, %v4792_v35  ;;  %v4922_v42 = vsel %vm674_vm2, %v4920_v33, %v4921_v7  ;;  %v5113_v24 = vmul.f32 %v15217_v5, %v13110_v39 }
 0x68e   : > { %v5072_v8 = vrot.slane %v5036_v30, 1  ;;  %v5073_v10 = vrot.slane %v5037_v46, 1  ;;  %v5188_v20 = vmul.f32 %v12980_v43, %v15191_v11  ;;  %v5189_v56 = vmul.f32 %v13083_v63, %v15191_v11 }
 0x68f   : > { %v7375_v26 = vadd.f32 %v13054_v44, %v7299_v38  ;;  %v4944_v61 = vadd.f32 %v4922_v42, %v4868_v62  ;;  %v4998_v29 = vsel %vm674_vm2, %v4996_v12, %v4997_v16  ;;  %v5148_v2 = vrot.slane %v5112_v53, 1 }
 0x690   : > { %v5149_v17 = vrot.slane %v5113_v24, 1  ;;  %v5224_v37 = vrot.slane %v5188_v20, 2  ;;  %v5264_v7 = vmul.f32 %v12987_v15, %v15192_v27  ;;  %v5265_v33 = vmul.f32 %v13089_v50, %v15192_v27 }
 0x691   : > { %v7451_v30 = vadd.f32 %v13057_v18, %v7375_v26  ;;  %v5020_v3 = vadd.f32 %v4998_v29, %v4944_v61  ;;  %v5225_v35 = vrot.slane %v5189_v56, 2  ;;  %v5340_v46 = vmul.f32 %v12995_v25, %v15193_v13  ;;  %v15218_v56 = vld [vmem:[#allocation40_spill] sm:$0xff] }
 0x692   : > { %v5074_v44 = vsel %vm674_vm2, %v5072_v8, %v5073_v10  ;;  %v5300_v32 = vrot.slane %v5264_v7, 2  ;;  %v5301_v12 = vrot.slane %v5265_v33, 2  ;;  %v5341_v16 = vmul.f32 %v13095_v9, %v15193_v13 }
 0x693   : > { %v7527_v53 = vadd.f32 %v13064_v14, %v7451_v30  ;;  %v5096_v38 = vadd.f32 %v5074_v44, %v5020_v3  ;;  %v5376_v62 = vrot.slane %v5340_v46, 2  ;;  %v5416_v42 = vmul.f32 %v13001_v59, %v15141_v34 }
 0x694   : > { %v5150_v18 = vsel %vm674_vm2, %v5148_v2, %v5149_v17  ;;  %v5377_v24 = vrot.slane %v5341_v16, 2  ;;  %v5417_v20 = vmul.f32 %v13005_v51, %v15141_v34  ;;  %v5492_v8 = vmul.f32 %v13009_v41, %v15218_v56  ;;  %v15219_v17 = vld [vmem:[#allocation41_spill] sm:$0xff] }
 0x695   : > { %v7603_v10 = vadd.f32 %v13071_v0, %v7527_v53  ;;  %v5172_v26 = vadd.f32 %v5150_v18, %v5096_v38  ;;  %v5226_v61 = vsel %vm1207_vm3, %v5224_v37, %v5225_v35  ;;  %v5493_v14 = vmul.f32 %v13113_v22, %v15218_v56  ;;  %v15220_v35 = vld [vmem:[#allocation42_spill] sm:$0xff]  ;;  %v15221_v18 = vld [vmem:[#allocation43_spill] sm:$0xff] }
 0x696   : > { %v5302_v29 = vsel %vm1207_vm3, %v5300_v32, %v5301_v12  ;;  %v5378_v7 = vsel %vm1207_vm3, %v5376_v62, %v5377_v24  ;;  %v5452_v2 = vrot.slane %v5416_v42, 2  ;;  %v5568_v33 = vmul.f32 %v12969_v49, %v15219_v17 }
 0x697   : > { %v7679_v30 = vadd.f32 %v13074_v19, %v7603_v10  ;;  %v5248_v3 = vadd.f32 %v5226_v61, %v5172_v26  ;;  %v5453_v46 = vrot.slane %v5417_v20, 2  ;;  %v5569_v0 = vmul.f32 %v15219_v17, %v12846_v58  ;;  %v15223_v10 = vld [vmem:[#allocation51_spill] sm:$0xff] }
 0x698   : > { %v5528_v44 = vrot.slane %v5492_v8, 2  ;;  %v5529_v37 = vrot.slane %v5493_v14, 2  ;;  %v5644_v16 = vmul.f32 %v13077_v40, %v15220_v35  ;;  %v5645_v32 = vmul.f32 %v15220_v35, %v13110_v39  ;;  %v15222_v8 = vld [vmem:[#allocation57_spill] sm:$0xff]  ;;  %v15225_v35 = vld [vmem:[#allocation44_spill] sm:$0xff] }
 0x699   : > { %v7755_v12 = vadd.f32 %v13104_v45, %v7679_v30  ;;  %v5324_v53 = vadd.f32 %v5302_v29, %v5248_v3  ;;  %v5604_v38 = vrot.slane %v5568_v33, 2  ;;  %v5605_v62 = vrot.slane %v5569_v0, 2 }
 0x69a   : > { %v5680_v42 = vrot.slane %v5644_v16, 2  ;;  %v5681_v19 = vrot.slane %v5645_v32, 2  ;;  %v5720_v24 = vmul.f32 %v12980_v43, %v15221_v18  ;;  %v5721_v20 = vmul.f32 %v13083_v63, %v15221_v18  ;;  %v15226_v32 = vld [vmem:[#allocation45_spill] sm:$0xff] }
 0x69b   : > { %v13176_v26 = vadd.f32 %v15223_v10, %v15222_v8  ;;  %v13178_v61 = vadd.f32 %v7807_v48, %v7755_v12  ;;  %v5400_v14 = vadd.f32 %v5378_v7, %v5324_v53  ;;  %v5796_v45 = vmul.f32 %v12987_v15, %v15225_v35 }
 0x69c   : > { %v5454_v29 = vsel %vm1207_vm3, %v5452_v2, %v5453_v46  ;;  %v5756_v33 = vrot.slane %v5720_v24, 3  ;;  %v5757_v30 = vrot.slane %v5721_v20, 3  ;;  %v5797_v3 = vmul.f32 %v13089_v50, %v15225_v35 }
 0x69d   : > { %15224 = vst [vmem:[#allocation39_spill] sm:$0xff] %v13178_v61  ;;  %8675 = vmatmul.mubr.msk.f32.gmra.mrb[18].mxu0 %vm361_vm0, %v13178_v61  ;;  %v5476_v0 = vadd.f32 %v5454_v29, %v5400_v14  ;;  %v5530_v16 = vsel %vm1207_vm3, %v5528_v44, %v5529_v37  ;;  %v5872_v48 = vmul.f32 %v12995_v25, %v15226_v32  ;;  %v5832_v44 = vrot.slane %v5796_v45, 3 }
 0x69e   : > { %v5873_v7 = vmul.f32 %v13095_v9, %v15226_v32  ;;  %v5606_v12 = vsel %vm1207_vm3, %v5604_v38, %v5605_v62  ;;  %v5682_v2 = vsel %vm1207_vm3, %v5680_v42, %v5681_v19  ;;  %v5948_v46 = vmul.f32 %v13001_v59, %v15203_v54  ;;  %v15234_v32 = vld [vmem:[#allocation56_spill] sm:$0xff] }
 0x69f   : > { %v5949_v53 = vmul.f32 %v13005_v51, %v15203_v54  ;;  %v5552_v24 = vadd.f32 %v5530_v16, %v5476_v0  ;;  %v5758_v20 = vsel %vm452_vm4, %v5756_v33, %v5757_v30  ;;  %v6024_v37 = vmul.f32 %v13009_v41, %v15154_v6 }
 0x6a0   : > { %v5833_v8 = vrot.slane %v5797_v3, 3  ;;  %v5908_v10 = vrot.slane %v5872_v48, 3  ;;  %v5909_v14 = vrot.slane %v5873_v7, 3  ;;  %v6025_v38 = vmul.f32 %v13113_v22, %v15154_v6  ;;  %v15227_v48 = vld [vmem:[#allocation29_spill] sm:$0xff]  ;;  %v15228_v6 = vld [vmem:[#allocation26_spill] sm:$0xff] }
 0x6a1   : > { %v5628_v62 = vadd.f32 %v5606_v12, %v5552_v24  ;;  %v5984_v42 = vrot.slane %v5948_v46, 3  ;;  %v5985_v19 = vrot.slane %v5949_v53, 3  ;;  %v6100_v29 = vmul.f32 %v12969_v49, %v15155_v21 }
 0x6a2   : > { %v6060_v61 = vrot.slane %v6024_v37, 3  ;;  %v6061_v0 = vrot.slane %v6025_v38, 3  ;;  %v6101_v45 = vmul.f32 %v15155_v21, %v12846_v58  ;;  %v6176_v33 = vmul.f32 %v13077_v40, %v15133_v57 }
 0x6a3   : > { %v5704_v30 = vadd.f32 %v5682_v2, %v5628_v62  ;;  %v6136_v3 = vrot.slane %v6100_v29, 3  ;;  %v6177_v16 = vmul.f32 %v15133_v57, %v13110_v39  ;;  %v6252_v7 = vmul.f32 %v12980_v43, %v15227_v48 }
 0x6a4   : > { %v5834_v12 = vsel %vm452_vm4, %v5832_v44, %v5833_v8  ;;  %v6137_v46 = vrot.slane %v6101_v45, 3  ;;  %v6212_v53 = vrot.slane %v6176_v33, 3  ;;  %v6253_v24 = vmul.f32 %v13083_v63, %v15227_v48  ;;  %v15229_v44 = vld [vmem:[#allocation23_spill] sm:$0xff]  ;;  %v15231_v48 = vld [vmem:[#allocation28_spill] sm:$0xff] }
 0x6a5   : > { %v5780_v37 = vadd.f32 %v5758_v20, %v5704_v30  ;;  %v5910_v38 = vsel %vm452_vm4, %v5908_v10, %v5909_v14  ;;  %v6213_v21 = vrot.slane %v6177_v16, 3  ;;  %v6328_v2 = vmul.f32 %v12987_v15, %v15228_v6 }
 0x6a6   : > { %v5986_v62 = vsel %vm452_vm4, %v5984_v42, %v5985_v19  ;;  %v6062_v29 = vsel %vm452_vm4, %v6060_v61, %v6061_v0  ;;  %v6329_v57 = vmul.f32 %v13089_v50, %v15228_v6  ;;  %v6404_v8 = vmul.f32 %v12995_v25, %v15229_v44  ;;  %v15230_v42 = vld [vmem:[#allocation32_spill] sm:$0xff] }
 0x6a7   : > { %v5856_v45 = vadd.f32 %v5834_v12, %v5780_v37  ;;  %v6138_v33 = vsel %vm452_vm4, %v6136_v3, %v6137_v46  ;;  %v6288_v20 = vrot.slane %v6252_v7, 4  ;;  %v6405_v10 = vmul.f32 %v13095_v9, %v15229_v44  ;;  %v15232_v37 = vld [vmem:[#allocation33_spill] sm:$0xff] }
 0x6a8   : > { %v6214_v14 = vsel %vm452_vm4, %v6212_v53, %v6213_v21  ;;  %v6289_v30 = vrot.slane %v6253_v24, 4  ;;  %v6364_v16 = vrot.slane %v6328_v2, 4  ;;  %v6480_v61 = vmul.f32 %v13001_v59, %v15230_v42 }
 0x6a9   : > { %v5932_v19 = vadd.f32 %v5910_v38, %v5856_v45  ;;  %v6365_v0 = vrot.slane %v6329_v57, 4  ;;  %v6481_v6 = vmul.f32 %v13005_v51, %v15230_v42  ;;  %v6556_v12 = vmul.f32 %v13009_v41, %v15231_v48  ;;  %v15233_v42 = vld [vmem:[#allocation55_spill] sm:$0xff] }
 0x6aa   : > { %v6440_v3 = vrot.slane %v6404_v8, 4  ;;  %v6441_v7 = vrot.slane %v6405_v10, 4  ;;  %v6557_v46 = vmul.f32 %v13113_v22, %v15231_v48  ;;  %v6632_v21 = vmul.f32 %v12969_v49, %v15232_v37 }
 0x6ab   : > { %v6008_v53 = vadd.f32 %v5986_v62, %v5932_v19  ;;  %v6516_v24 = vrot.slane %v6480_v61, 4  ;;  %v6517_v2 = vrot.slane %v6481_v6, 4  ;;  %v6592_v44 = vrot.slane %v6556_v12, 4 }
 0x6ac   : > { %v6290_v57 = vsel %vm2272_vm5, %v6288_v20, %v6289_v30  ;;  %v6593_v38 = vrot.slane %v6557_v46, 4  ;;  %v6633_v45 = vmul.f32 %v15232_v37, %v12846_v58  ;;  %v6708_v8 = vmul.f32 %v13077_v40, %v15233_v42  ;;  %v15235_v46 = vld [vmem:[#allocation58_spill] sm:$0xff] }
 0x6ad   : > { %v6084_v10 = vadd.f32 %v6062_v29, %v6008_v53  ;;  %v6668_v54 = vrot.slane %v6632_v21, 4  ;;  %v6709_v48 = vmul.f32 %v15233_v42, %v13110_v39  ;;  %v6784_v62 = vmul.f32 %v12980_v43, %v15234_v32 }
 0x6ae   : > { %v6366_v6 = vsel %vm2272_vm5, %v6364_v16, %v6365_v0  ;;  %v6442_v61 = vsel %vm2272_vm5, %v6440_v3, %v6441_v7  ;;  %v6669_v20 = vrot.slane %v6633_v45, 4  ;;  %v6785_v30 = vmul.f32 %v13083_v63, %v15234_v32  ;;  %v15236_v16 = vld [vmem:[#allocation59_spill] sm:$0xff]  ;;  %v15238_v32 = vld [vmem:[#allocation61_spill] sm:$0xff] }
 0x6af   : > { %v6160_v19 = vadd.f32 %v6138_v33, %v6084_v10  ;;  %v6518_v12 = vsel %vm2272_vm5, %v6516_v24, %v6517_v2  ;;  %v6594_v29 = vsel %vm2272_vm5, %v6592_v44, %v6593_v38  ;;  %v6860_v21 = vmul.f32 %v12987_v15, %v15235_v46  ;;  %v15237_v38 = vld [vmem:[#allocation60_spill] sm:$0xff] }
 0x6b0   : > { %v6744_v53 = vrot.slane %v6708_v8, 4  ;;  %v6745_v42 = vrot.slane %v6709_v48, 4  ;;  %v6861_v37 = vmul.f32 %v13089_v50, %v15235_v46  ;;  %v6936_v0 = vmul.f32 %v12995_v25, %v15236_v16 }
 0x6b1   : > { %v6236_v3 = vadd.f32 %v6214_v14, %v6160_v19  ;;  %v6670_v7 = vsel %vm2272_vm5, %v6668_v54, %v6669_v20  ;;  %v6820_v45 = vrot.slane %v6784_v62, 5  ;;  %v6937_v33 = vmul.f32 %v13095_v9, %v15236_v16 }
 0x6b2   : > { %v6821_v24 = vrot.slane %v6785_v30, 5  ;;  %v6896_v44 = vrot.slane %v6860_v21, 5  ;;  %v6897_v2 = vrot.slane %v6861_v37, 5  ;;  %v7012_v8 = vmul.f32 %v13001_v59, %v15237_v38 }
 0x6b3   : > { %v6312_v48 = vadd.f32 %v6290_v57, %v6236_v3  ;;  %v6972_v10 = vrot.slane %v6936_v0, 5  ;;  %v7013_v46 = vmul.f32 %v13005_v51, %v15237_v38  ;;  %v7088_v14 = vmul.f32 %v13009_v41, %v15238_v32 }
 0x6b4   : > { %v6973_v19 = vrot.slane %v6937_v33, 5  ;;  %v7048_v54 = vrot.slane %v7012_v8, 5  ;;  %v7089_v62 = vmul.f32 %v13113_v22, %v15238_v32  ;;  %v7164_v20 = vmul.f32 %v12969_v49, %v15172_v31 }
 0x6b5   : > { %v6388_v37 = vadd.f32 %v6366_v6, %v6312_v48  ;;  %v6746_v30 = vsel %vm2272_vm5, %v6744_v53, %v6745_v42  ;;  %v7049_v21 = vrot.slane %v7013_v46, 5  ;;  %v7124_v57 = vrot.slane %v7088_v14, 5 }
 0x6b6   : > { %v6822_v0 = vsel %vm2805_vm6, %v6820_v45, %v6821_v24  ;;  %v7125_v3 = vrot.slane %v7089_v62, 5  ;;  %v7165_v38 = vmul.f32 %v15172_v31, %v12846_v58  ;;  %v7240_v33 = vmul.f32 %v13077_v40, %v15211_v47 }
 0x6b7   : > { %v6464_v8 = vadd.f32 %v6442_v61, %v6388_v37  ;;  %v6898_v32 = vsel %vm2805_vm6, %v6896_v44, %v6897_v2  ;;  %v7241_v16 = vmul.f32 %v15211_v47, %v13110_v39  ;;  %v7316_v42 = vmul.f32 %v12980_v43, %v15173_v36 }
 0x6b8   : > { %v6974_v6 = vsel %vm2805_vm6, %v6972_v10, %v6973_v19  ;;  %v7050_v46 = vsel %vm2805_vm6, %v7048_v54, %v7049_v21  ;;  %v7200_v53 = vrot.slane %v7164_v20, 5  ;;  %v7317_v45 = vmul.f32 %v13083_v63, %v15173_v36 }
 0x6b9   : > { %v6540_v24 = vadd.f32 %v6518_v12, %v6464_v8  ;;  %v13289_v48 = vsel %vm2805_vm6, %v7124_v57, %v7125_v3  ;;  %v7201_v61 = vrot.slane %v7165_v38, 5  ;;  %v7392_v44 = vmul.f32 %v12987_v15, %v15175_v28 }
 0x6ba   : > { %v7276_v2 = vrot.slane %v7240_v33, 5  ;;  %v7277_v14 = vrot.slane %v7241_v16, 5  ;;  %v7393_v43 = vmul.f32 %v13089_v50, %v15175_v28  ;;  %v7468_v10 = vmul.f32 %v12995_v25, %v15212_v55 }
 0x6bb   : > { %v6616_v19 = vadd.f32 %v6594_v29, %v6540_v24  ;;  %v7352_v54 = vrot.slane %v7316_v42, 6  ;;  %v7353_v62 = vrot.slane %v7317_v45, 6  ;;  %v7469_v63 = vmul.f32 %v13095_v9, %v15212_v55  ;;  %v15239_v42 = vld [vmem:[#allocation8_spill] sm:$0xff] }
 0x6bc   : > { %v7428_v12 = vrot.slane %v7392_v44, 6  ;;  %v7429_v20 = vrot.slane %v7393_v43, 6  ;;  %v7504_v38 = vrot.slane %v7468_v10, 6  ;;  %v7544_v37 = vmul.f32 %v13001_v59, %v15213_v23  ;;  %v13313_v10 = vld [vmem:[#allocation2 + $0xb0] sm:$0xff] }
 0x6bd   : > { %v6692_v21 = vadd.f32 %v6670_v7, %v6616_v19  ;;  %v7505_v16 = vrot.slane %v7469_v63, 6  ;;  %v7545_v57 = vmul.f32 %v13005_v51, %v15213_v23  ;;  %v7620_v3 = vmul.f32 %v13009_v41, %v15179_v1 }
 0x6be   : > { %v7202_v29 = vsel %vm2805_vm6, %v7200_v53, %v7201_v61  ;;  %v7580_v33 = vrot.slane %v7544_v37, 6  ;;  %v7621_v8 = vmul.f32 %v13113_v22, %v15179_v1  ;;  %v13310_v45 = vmul.f32 %v12969_v49, %v15239_v42 }
 0x6bf   : > { %v6768_v24 = vadd.f32 %v6746_v30, %v6692_v21  ;;  %v7278_v7 = vsel %vm2805_vm6, %v7276_v2, %v7277_v14  ;;  %v7581_v44 = vrot.slane %v7545_v57, 6  ;;  %v7656_v43 = vrot.slane %v7620_v3, 6  ;;  %v13331_v2 = vld [vmem:[%s14271_s1 + $0x68] ss:$0 sm:$0xff]  ;;  %v15243_v3 = vld [vmem:[#allocation11_spill] sm:$0xff] }
 0x6c0   : > { %v13316_v19 = vsel %vm3338_vm7, %v7352_v54, %v7353_v62  ;;  %v13319_v53 = vsel %vm3338_vm7, %v7428_v12, %v7429_v20  ;;  %v7657_v61 = vrot.slane %v7621_v8, 6  ;;  %v13323_v63 = vmul.f32 %v15239_v42, %v12846_v58  ;;  %15240 = vst [vmem:[#allocation16_spill] sm:$0xff] %v13331_v2  ;;  %v15241_v54 = vld [vmem:[#allocation38_spill] sm:$0xff] }
 0x6c1   : > { %v6844_v37 = vadd.f32 %v6822_v0, %v6768_v24  ;;  %v13326_v30 = vsel %vm3338_vm7, %v7504_v38, %v7505_v16  ;;  %v13335_v14 = vmul.f32 %v13331_v2, %v13077_v40  ;;  %v4613_v62 = vmul.f32 %v13077_v40, %v15241_v54  ;;  %v15242_v20 = vld [vmem:[#allocation54_spill] sm:$0xff] }
 0x6c2   : > { %v13340_v12 = vsel %vm3338_vm7, %v7580_v33, %v7581_v44  ;;  %v13345_v0 = vmul.f32 %v13331_v2, %v13110_v39  ;;  %v4633_v38 = vmul.f32 %v15242_v20, %v13313_v10  ;;  %v13350_v16 = vsel %vm3338_vm7, %v7656_v43, %v7657_v61  ;;  %v15244_v2 = vld [vmem:[#allocation14_spill] sm:$0xff] }
 0x6c3   : > { %v6920_v21 = vadd.f32 %v6898_v32, %v6844_v37  ;;  %v4621_v57 = vadd.f32 %v4613_v62, %v13176_v26  ;;  %v4658_v8 = vmul.f32 %v12987_v15, %v15243_v3  ;;  %v4659_v24 = vmul.f32 %v13089_v50, %v15243_v3  ;;  %v15245_v42 = vld [vmem:[#allocation34_spill] sm:$0xff] }
 0x6c4   : > { %v4734_v44 = vmul.f32 %v12995_v25, %v15188_v52  ;;  %v4735_v58 = vmul.f32 %v13095_v9, %v15188_v52  ;;  %v4810_v33 = vmul.f32 %v13001_v59, %v15244_v2  ;;  %v4811_v3 = vmul.f32 %v13005_v51, %v15244_v2  ;;  %v13379_v52 = vld [vmem:[#allocation2 + $0x98] sm:$0x3f] }
 0x6c5   : > { %v6996_v32 = vadd.f32 %v6974_v6, %v6920_v21  ;;  %v4641_v61 = vadd.f32 %v4633_v38, %v4621_v57  ;;  %v4695_v37 = vrot.slane %v4658_v8, 1  ;;  %v4696_v26 = vrot.slane %v4659_v24, 1 }
 0x6c6   : > { %v4771_v62 = vrot.slane %v4734_v44, 1  ;;  %v4772_v20 = vrot.slane %v4735_v58, 1  ;;  %v4886_v1 = vmul.f32 %v13009_v41, %v15245_v42  ;;  %v4887_v6 = vmul.f32 %v13113_v22, %v15245_v42 }
 0x6c7   : > { %v7072_v54 = vadd.f32 %v7050_v46, %v6996_v32  ;;  %v7809_v21 = vrot.slane %v13345_v0, 6  ;;  %v4697_v38 = vsel %vm674_vm2, %v4695_v37, %v4696_v26  ;;  %v4847_v57 = vrot.slane %v4810_v33, 1  ;;  %v13377_v32 = vld [vmem:[#allocation2 + $0xb8] sm:$0x3f] }
 0x6c8   : > { %v4962_v58 = vmul.f32 %v12969_v49, %v11784_v4  ;;  %v4717_v46 = vadd.f32 %v4697_v38, %v4641_v61  ;;  %v4773_v24 = vsel %vm674_vm2, %v4771_v62, %v4772_v20  ;;  %v4848_v44 = vrot.slane %v4811_v3, 1 }
 0x6c9   : > { %v7148_v8 = vadd.f32 %v13289_v48, %v7072_v54  ;;  %v4923_v43 = vrot.slane %v4886_v1, 1  ;;  %v4924_v2 = vrot.slane %v4887_v6, 1  ;;  %v4963_v0 = vmul.f32 %v13379_v52, %v11784_v4 }
 0x6ca   : > { %v5038_v33 = vmul.f32 %v13077_v40, %v11802_v60  ;;  %v4793_v26 = vadd.f32 %v4773_v24, %v4717_v46  ;;  %v4999_v42 = vrot.slane %v4962_v58, 1  ;;  %v5039_v48 = vmul.f32 %v11802_v60, %v13110_v39 }
 0x6cb   : > { %v7224_v37 = vadd.f32 %v7202_v29, %v7148_v8  ;;  %v4849_v54 = vsel %vm674_vm2, %v4847_v57, %v4848_v44  ;;  %v5000_v20 = vrot.slane %v4963_v0, 1  ;;  %v5114_v1 = vmul.f32 %v15217_v5, %v13313_v10 }
 0x6cc   : > { %v5075_v3 = vrot.slane %v5038_v33, 1  ;;  %v4869_v62 = vadd.f32 %v4849_v54, %v4793_v26  ;;  %v5076_v6 = vrot.slane %v5039_v48, 1  ;;  %v5115_v38 = vmul.f32 %v15217_v5, %v13377_v32 }
 0x6cd   : > { %v7300_v61 = vadd.f32 %v7278_v7, %v7224_v37  ;;  %v4925_v29 = vsel %vm674_vm2, %v4923_v43, %v4924_v2  ;;  %v5151_v8 = vrot.slane %v5114_v1, 1  ;;  %v5190_v58 = vmul.f32 %v12987_v15, %v15191_v11 }
 0x6ce   : > { %v5191_v57 = vmul.f32 %v13089_v50, %v15191_v11  ;;  %v4945_v24 = vadd.f32 %v4925_v29, %v4869_v62  ;;  %v5001_v44 = vsel %vm674_vm2, %v4999_v42, %v5000_v20  ;;  %v5152_v7 = vrot.slane %v5115_v38, 1 }
 0x6cf   : > { %v7376_v46 = vadd.f32 %v13316_v19, %v7300_v61  ;;  %v5077_v0 = vsel %vm674_vm2, %v5075_v3, %v5076_v6  ;;  %v5227_v33 = vrot.slane %v5190_v58, 2  ;;  %v5266_v37 = vmul.f32 %v12995_v25, %v15192_v27 }
 0x6d0   : > { %v5267_v2 = vmul.f32 %v13095_v9, %v15192_v27  ;;  %v5021_v26 = vadd.f32 %v5001_v44, %v4945_v24  ;;  %v5228_v48 = vrot.slane %v5191_v57, 2  ;;  %v5342_v19 = vmul.f32 %v13001_v59, %v15193_v13 }
 0x6d1   : > { %v7452_v43 = vadd.f32 %v13319_v53, %v7376_v46  ;;  %v5153_v54 = vsel %vm674_vm2, %v5151_v8, %v5152_v7  ;;  %v5303_v42 = vrot.slane %v5266_v37, 2  ;;  %v5343_v3 = vmul.f32 %v13005_v51, %v15193_v13 }
 0x6d2   : > { %v5304_v20 = vrot.slane %v5267_v2, 2  ;;  %v5097_v61 = vadd.f32 %v5077_v0, %v5021_v26  ;;  %v5379_v62 = vrot.slane %v5342_v19, 2  ;;  %v5418_v6 = vmul.f32 %v13009_v41, %v15141_v34  ;;  %v15249_v19 = vld [vmem:[#allocation42_spill] sm:$0xff] }
 0x6d3   : > { %v7528_v1 = vadd.f32 %v13326_v30, %v7452_v43  ;;  %v15246_v53 = vrot.slane %v13323_v63, 6  ;;  %v15247_v38 = vrot.slane %v13310_v45, 6  ;;  %v5380_v58 = vrot.slane %v5343_v3, 2 }
 0x6d4   : > { %v5419_v8 = vmul.f32 %v13113_v22, %v15141_v34  ;;  %v5494_v57 = vmul.f32 %v12969_v49, %v15218_v56  ;;  %v15248_v46 = vrot.slane %v13335_v14, 6  ;;  %v5173_v44 = vadd.f32 %v5153_v54, %v5097_v61 }
 0x6d5   : > { %v7734_v29 = vsel %vm3338_vm7, %v15247_v38, %v15246_v53  ;;  %v7604_v30 = vadd.f32 %v13340_v12, %v7528_v1  ;;  %v5495_v63 = vmul.f32 %v13379_v52, %v15218_v56  ;;  %v5229_v45 = vsel %vm1207_vm3, %v5227_v33, %v5228_v48 }
 0x6d6   : > { %v7810_v24 = vsel %vm3338_vm7, %v15248_v46, %v7809_v21  ;;  %v5305_v7 = vsel %vm1207_vm3, %v5303_v42, %v5304_v20  ;;  %v5455_v0 = vrot.slane %v5418_v6, 2  ;;  %v5570_v37 = vmul.f32 %v13077_v40, %v15219_v17 }
 0x6d7   : > { %v7680_v2 = vadd.f32 %v13350_v16, %v7604_v30  ;;  %v5249_v43 = vadd.f32 %v5229_v45, %v5173_v44  ;;  %v5381_v12 = vsel %vm1207_vm3, %v5379_v62, %v5380_v58  ;;  %v5571_v14 = vmul.f32 %v15219_v17, %v13110_v39  ;;  %v15253_v45 = vld [vmem:[#allocation45_spill] sm:$0xff] }
 0x6d8   : > { %v5456_v21 = vrot.slane %v5419_v8, 2  ;;  %v5531_v26 = vrot.slane %v5494_v57, 2  ;;  %v5646_v54 = vmul.f32 %v15249_v19, %v13313_v10  ;;  %v5647_v33 = vmul.f32 %v15249_v19, %v13377_v32  ;;  %v15251_v8 = vld [vmem:[#allocation52_spill] sm:$0xff] }
 0x6d9   : > { %v7756_v48 = vadd.f32 %v7734_v29, %v7680_v2  ;;  %v5325_v42 = vadd.f32 %v5305_v7, %v5249_v43  ;;  %v5532_v20 = vrot.slane %v5495_v63, 2  ;;  %v5607_v3 = vrot.slane %v5570_v37, 2  ;;  %v15252_v29 = vld [vmem:[#allocation76_spill] sm:$0xff] }
 0x6da   : > { %v5608_v1 = vrot.slane %v5571_v14, 2  ;;  %v5683_v16 = vrot.slane %v5646_v54, 2  ;;  %v5722_v61 = vmul.f32 %v12987_v15, %v15221_v18  ;;  %v5723_v62 = vmul.f32 %v13089_v50, %v15221_v18 }
 0x6db   : > { %v13444_v6 = vadd.f32 %v7810_v24, %v7756_v48  ;;  %v5401_v53 = vadd.f32 %v5381_v12, %v5325_v42  ;;  %v5684_v38 = vrot.slane %v5647_v33, 2  ;;  %v5798_v58 = vmul.f32 %v12995_v25, %v15225_v35 }
 0x6dc   : > { %v4582_v57 = vadd.f32 %v15252_v29, %v15251_v8  ;;  %v5457_v30 = vsel %vm1207_vm3, %v5455_v0, %v5456_v21  ;;  %v5759_v46 = vrot.slane %v5722_v61, 3  ;;  %v5799_v44 = vmul.f32 %v13095_v9, %v15225_v35  ;;  %v15254_v0 = vld [vmem:[#allocation46_spill] sm:$0xff] }
 0x6dd   : > { %15250 = vst [vmem:[#allocation63_spill] sm:$0xff] %v13444_v6  ;;  %8677 = vmatprep.mubr.msk.f32.mxu0 %vm361_vm0, %v13444_v6  ;;  %v5477_v63 = vadd.f32 %v5457_v30, %v5401_v53  ;;  %v5760_v24 = vrot.slane %v5723_v62, 3  ;;  %v5874_v7 = vmul.f32 %v13001_v59, %v15253_v45  ;;  %v5875_v37 = vmul.f32 %v13005_v51, %v15253_v45  ;;  %v15255_v62 = vld [vmem:[#allocation47_spill] sm:$0xff]  ;;  %v15260_v6 = vld [vmem:[#allocation26_spill] sm:$0xff] }
 0x6de   : > { %v5533_v2 = vsel %vm1207_vm3, %v5531_v26, %v5532_v20  ;;  %v5835_v43 = vrot.slane %v5798_v58, 3  ;;  %v5836_v12 = vrot.slane %v5799_v44, 3  ;;  %v5950_v14 = vmul.f32 %v13009_v41, %v15254_v0  ;;  %v15256_v20 = vld [vmem:[#allocation77_spill] sm:$0xff]  ;;  %v15258_v44 = vld [vmem:[#allocation50_spill] sm:$0xff] }
 0x6df   : > { %v5553_v21 = vadd.f32 %v5533_v2, %v5477_v63  ;;  %v5609_v54 = vsel %vm1207_vm3, %v5607_v3, %v5608_v1  ;;  %v5685_v33 = vsel %vm1207_vm3, %v5683_v16, %v5684_v38  ;;  %v5951_v48 = vmul.f32 %v13113_v22, %v15254_v0  ;;  %v15257_v3 = vld [vmem:[#allocation49_spill] sm:$0xff] }
 0x6e0   : > { %v5911_v42 = vrot.slane %v5874_v7, 3  ;;  %v5912_v61 = vrot.slane %v5875_v37, 3  ;;  %v6026_v53 = vmul.f32 %v12969_v49, %v15255_v62  ;;  %v6027_v26 = vmul.f32 %v13379_v52, %v15255_v62  ;;  %v15259_v2 = vld [vmem:[#allocation29_spill] sm:$0xff] }
 0x6e1   : > { %v13471_v58 = vadd.f32 %v15256_v20, %v4582_v57  ;;  %v5629_v8 = vadd.f32 %v5609_v54, %v5553_v21  ;;  %v5761_v29 = vsel %vm452_vm4, %v5759_v46, %v5760_v24  ;;  %v6102_v1 = vmul.f32 %v13077_v40, %v15257_v3 }
 0x6e2   : > { %v5837_v16 = vsel %vm452_vm4, %v5835_v43, %v5836_v12  ;;  %v5987_v38 = vrot.slane %v5950_v14, 3  ;;  %v6103_v30 = vmul.f32 %v15257_v3, %v13110_v39  ;;  %v6178_v63 = vmul.f32 %v15258_v44, %v13313_v10  ;;  %v15261_v3 = vld [vmem:[#allocation23_spill] sm:$0xff] }
 0x6e3   : > { %v5705_v7 = vadd.f32 %v5685_v33, %v5629_v8  ;;  %v5988_v37 = vrot.slane %v5951_v48, 3  ;;  %v6179_v57 = vmul.f32 %v15258_v44, %v13377_v32  ;;  %v6254_v46 = vmul.f32 %v12987_v15, %v15259_v2 }
 0x6e4   : > { %v5913_v24 = vsel %vm452_vm4, %v5911_v42, %v5912_v61  ;;  %v6063_v21 = vrot.slane %v6026_v53, 3  ;;  %v6064_v54 = vrot.slane %v6027_v26, 3  ;;  %v6255_v43 = vmul.f32 %v13089_v50, %v15259_v2 }
 0x6e5   : > { %v5781_v12 = vadd.f32 %v5761_v29, %v5705_v7  ;;  %v6139_v14 = vrot.slane %v6102_v1, 3  ;;  %v6140_v20 = vrot.slane %v6103_v30, 3  ;;  %v6330_v33 = vmul.f32 %v12995_v25, %v15260_v6  ;;  %v15262_v7 = vld [vmem:[#allocation32_spill] sm:$0xff] }
 0x6e6   : > { %v6215_v48 = vrot.slane %v6178_v63, 3  ;;  %v6216_v8 = vrot.slane %v6179_v57, 3  ;;  %v6331_v44 = vmul.f32 %v13095_v9, %v15260_v6  ;;  %v6406_v62 = vmul.f32 %v13001_v59, %v15261_v3 }
 0x6e7   : > { %v5857_v42 = vadd.f32 %v5837_v16, %v5781_v12  ;;  %v6291_v61 = vrot.slane %v6254_v46, 4  ;;  %v6292_v53 = vrot.slane %v6255_v43, 4  ;;  %v6407_v26 = vmul.f32 %v13005_v51, %v15261_v3  ;;  %v15263_v46 = vld [vmem:[#allocation28_spill] sm:$0xff]  ;;  %v15264_v12 = vld [vmem:[#allocation33_spill] sm:$0xff] }
 0x6e8   : > { %v5989_v29 = vsel %vm452_vm4, %v5987_v38, %v5988_v37  ;;  %v6367_v1 = vrot.slane %v6330_v33, 4  ;;  %v6368_v30 = vrot.slane %v6331_v44, 4  ;;  %v6482_v63 = vmul.f32 %v13009_v41, %v15262_v7 }
 0x6e9   : > { %v5933_v57 = vadd.f32 %v5913_v24, %v5857_v42  ;;  %v6065_v2 = vsel %vm452_vm4, %v6063_v21, %v6064_v54  ;;  %v6443_v6 = vrot.slane %v6406_v62, 4  ;;  %v6444_v0 = vrot.slane %v6407_v26, 4 }
 0x6ea   : > { %v6141_v45 = vsel %vm452_vm4, %v6139_v14, %v6140_v20  ;;  %v6483_v16 = vmul.f32 %v13113_v22, %v15262_v7  ;;  %v6558_v43 = vmul.f32 %v12969_v49, %v15263_v46  ;;  %v6559_v38 = vmul.f32 %v13379_v52, %v15263_v46  ;;  %v15265_v20 = vld [vmem:[#allocation55_spill] sm:$0xff] }
 0x6eb   : > { %v6009_v44 = vadd.f32 %v5989_v29, %v5933_v57  ;;  %v6217_v37 = vsel %vm452_vm4, %v6215_v48, %v6216_v8  ;;  %v6293_v24 = vsel %vm2272_vm5, %v6291_v61, %v6292_v53  ;;  %v6634_v62 = vmul.f32 %v13077_v40, %v15264_v12  ;;  %v15266_v8 = vld [vmem:[#allocation56_spill] sm:$0xff] }
 0x6ec   : > { %v6369_v21 = vsel %vm2272_vm5, %v6367_v1, %v6368_v30  ;;  %v6519_v54 = vrot.slane %v6482_v63, 4  ;;  %v6635_v14 = vmul.f32 %v15264_v12, %v13110_v39  ;;  %v6710_v49 = vmul.f32 %v15265_v20, %v13313_v10  ;;  %v15267_v12 = vld [vmem:[#allocation58_spill] sm:$0xff] }
 0x6ed   : > { %v6085_v33 = vadd.f32 %v6065_v2, %v6009_v44  ;;  %v6445_v42 = vsel %vm2272_vm5, %v6443_v6, %v6444_v0  ;;  %v6711_v48 = vmul.f32 %v15265_v20, %v13377_v32  ;;  %v6786_v61 = vmul.f32 %v12987_v15, %v15266_v8  ;;  %v15268_v20 = vld [vmem:[#allocation59_spill] sm:$0xff] }
 0x6ee   : > { %v6520_v53 = vrot.slane %v6483_v16, 4  ;;  %v6595_v26 = vrot.slane %v6558_v43, 4  ;;  %v6596_v29 = vrot.slane %v6559_v38, 4  ;;  %v6787_v1 = vmul.f32 %v13089_v50, %v15266_v8 }
 0x6ef   : > { %v6161_v30 = vadd.f32 %v6141_v45, %v6085_v33  ;;  %v6671_v63 = vrot.slane %v6634_v62, 4  ;;  %v6672_v57 = vrot.slane %v6635_v14, 4  ;;  %v6862_v2 = vmul.f32 %v12995_v25, %v15267_v12  ;;  %v15269_v33 = vld [vmem:[#allocation60_spill] sm:$0xff] }
 0x6f0   : > { %v6747_v44 = vrot.slane %v6710_v49, 4  ;;  %v6748_v6 = vrot.slane %v6711_v48, 4  ;;  %v6863_v0 = vmul.f32 %v13095_v9, %v15267_v12  ;;  %v6938_v15 = vmul.f32 %v13001_v59, %v15268_v20 }
 0x6f1   : > { %v6237_v16 = vadd.f32 %v6217_v37, %v6161_v30  ;;  %v6823_v43 = vrot.slane %v6786_v61, 5  ;;  %v6824_v38 = vrot.slane %v6787_v1, 5  ;;  %v6939_v8 = vmul.f32 %v13005_v51, %v15268_v20  ;;  %v13538_v61 = vld [vmem:[#allocation2 + $0x90] sm:$0xff] }
 0x6f2   : > { %v6521_v45 = vsel %vm2272_vm5, %v6519_v54, %v6520_v53  ;;  %v6899_v62 = vrot.slane %v6862_v2, 5  ;;  %v6900_v14 = vrot.slane %v6863_v0, 5  ;;  %v7014_v25 = vmul.f32 %v13009_v41, %v15269_v33  ;;  %v15270_v51 = vld [vmem:[#allocation61_spill] sm:$0xff] }
 0x6f3   : > { %v6313_v49 = vadd.f32 %v6293_v24, %v6237_v16  ;;  %v6597_v48 = vsel %vm2272_vm5, %v6595_v26, %v6596_v29  ;;  %v6975_v12 = vrot.slane %v6938_v15, 5  ;;  %v6976_v46 = vrot.slane %v6939_v8, 5 }
 0x6f4   : > { %v6673_v59 = vsel %vm2272_vm5, %v6671_v63, %v6672_v57  ;;  %v7015_v37 = vmul.f32 %v13113_v22, %v15269_v33  ;;  %v7090_v54 = vmul.f32 %v13538_v61, %v15270_v51  ;;  %v7091_v53 = vmul.f32 %v13379_v52, %v15270_v51 }
 0x6f5   : > { %v6389_v1 = vadd.f32 %v6369_v21, %v6313_v49  ;;  %v6749_v41 = vsel %vm2272_vm5, %v6747_v44, %v6748_v6  ;;  %v6825_v24 = vsel %vm2805_vm6, %v6823_v43, %v6824_v38  ;;  %v7166_v8 = vmul.f32 %v13077_v40, %v15172_v31  ;;  %v8890_v44 = vld [vmem:[#allocation2 + $0x50] sm:$0xff] }
 0x6f6   : > { %v6901_v26 = vsel %vm2805_vm6, %v6899_v62, %v6900_v14  ;;  %v7051_v29 = vrot.slane %v7014_v25, 5  ;;  %v7167_v30 = vmul.f32 %v15172_v31, %v13110_v39  ;;  %v7242_v63 = vmul.f32 %v15211_v47, %v13313_v10  ;;  %v13559_v25 = vld [vmem:[#allocation2 + $0x60] sm:$0xff] }
 0x6f7   : > { %v6465_v57 = vadd.f32 %v6445_v42, %v6389_v1  ;;  %v6977_v2 = vsel %vm2805_vm6, %v6975_v12, %v6976_v46  ;;  %v7243_v21 = vmul.f32 %v15211_v47, %v13377_v32  ;;  %v7318_v6 = vmul.f32 %v8890_v44, %v15173_v36  ;;  %v13565_v1 = vld [vmem:[#allocation2 + $0x70] sm:$0xff] }
 0x6f8   : > { %v7052_v0 = vrot.slane %v7015_v37, 5  ;;  %v7127_v15 = vrot.slane %v7090_v54, 5  ;;  %v7128_v16 = vrot.slane %v7091_v53, 5  ;;  %v7319_v43 = vmul.f32 %v13089_v50, %v15173_v36  ;;  %v13569_v53 = vld [vmem:[#allocation2 + $0x78] sm:$0x3f] }
 0x6f9   : > { %v6541_v38 = vadd.f32 %v6521_v45, %v6465_v57  ;;  %v7203_v62 = vrot.slane %v7166_v8, 5  ;;  %v7204_v14 = vrot.slane %v7167_v30, 5  ;;  %v7394_v46 = vmul.f32 %v13559_v25, %v15175_v28 }
 0x6fa   : > { %v7279_v12 = vrot.slane %v7242_v63, 5  ;;  %v7280_v42 = vrot.slane %v7243_v21, 5  ;;  %v7395_v49 = vmul.f32 %v13095_v9, %v15175_v28  ;;  %v7470_v37 = vmul.f32 %v13565_v1, %v15212_v55  ;;  %v13573_v21 = vld [vmem:[#allocation2 + $0x80] sm:$0xff] }
 0x6fb   : > { %v6617_v54 = vadd.f32 %v6597_v48, %v6541_v38  ;;  %v7355_v50 = vrot.slane %v7318_v6, 6  ;;  %v7356_v45 = vrot.slane %v7319_v43, 6  ;;  %v7471_v8 = vmul.f32 %v13569_v53, %v15212_v55  ;;  %v15271_v6 = vld [vmem:[#allocation7_spill] sm:$0xff] }
 0x6fc   : > { %v7431_v30 = vrot.slane %v7394_v46, 6  ;;  %v7432_v57 = vrot.slane %v7395_v49, 6  ;;  %v7507_v63 = vrot.slane %v7470_v37, 6  ;;  %v7546_v44 = vmul.f32 %v13573_v21, %v15213_v23  ;;  %v15272_v49 = vld [vmem:[#allocation8_spill] sm:$0xff] }
 0x6fd   : > { %v6693_v28 = vadd.f32 %v6673_v59, %v6617_v54  ;;  %v7508_v36 = vrot.slane %v7471_v8, 6  ;;  %v7547_v48 = vmul.f32 %v13113_v22, %v15213_v23  ;;  %v7622_v43 = vmul.f32 %v13538_v61, %v15271_v6  ;;  %v13590_v23 = vld [vmem:[#allocation2 + $0xc0] sm:$0xff] }
 0x6fe   : > { %v7053_v38 = vsel %vm2805_vm6, %v7051_v29, %v7052_v0  ;;  %v7129_v55 = vsel %vm2805_vm6, %v7127_v15, %v7128_v16  ;;  %v7623_v46 = vmul.f32 %v13379_v52, %v15271_v6  ;;  %v13587_v37 = vmul.f32 %v13077_v40, %v15272_v49 }
 0x6ff   : > { %v6769_v47 = vadd.f32 %v6749_v41, %v6693_v28  ;;  %v7205_v59 = vsel %vm2805_vm6, %v7203_v62, %v7204_v14  ;;  %v7583_v54 = vrot.slane %v7546_v44, 6  ;;  %v7584_v8 = vrot.slane %v7547_v48, 6  ;;  %v15273_v41 = vld [vmem:[#allocation38_spill] sm:$0xff]  ;;  %v15277_v48 = vld [vmem:[#allocation12_spill] sm:$0xff] }
 0x700   : > { %v7281_v31 = vsel %vm2805_vm6, %v7279_v12, %v7280_v42  ;;  %v13594_v29 = vsel %vm3338_vm7, %v7355_v50, %v7356_v45  ;;  %v13597_v0 = vsel %vm3338_vm7, %v7431_v30, %v7432_v57  ;;  %v13600_v15 = vsel %vm3338_vm7, %v7507_v63, %v7508_v36  ;;  %v15274_v42 = vld [vmem:[#allocation16_spill] sm:$0xff]  ;;  %v15275_v45 = vld [vmem:[#allocation54_spill] sm:$0xff]  ;;  %v15276_v57 = vld [vmem:[#allocation11_spill] sm:$0xff] }
 0x701   : > { %v6845_v40 = vadd.f32 %v6825_v24, %v6769_v47  ;;  %v7659_v16 = vrot.slane %v7622_v43, 6  ;;  %v7660_v28 = vrot.slane %v7623_v46, 6  ;;  %v4614_v62 = vmul.f32 %v15273_v41, %v13313_v10 }
 0x702   : > { %v13606_v14 = vmul.f32 %v15272_v49, %v13110_v39  ;;  %v13611_v50 = vmul.f32 %v15274_v42, %v13313_v10  ;;  %v4634_v36 = vmul.f32 %v15275_v45, %v13590_v23  ;;  %v13616_v47 = vsel %vm3338_vm7, %v7583_v54, %v7584_v8 }
 0x703   : > { %v6921_v30 = vadd.f32 %v6901_v26, %v6845_v40  ;;  %v4622_v24 = vadd.f32 %v4614_v62, %v13471_v58  ;;  %v4660_v63 = vmul.f32 %v13559_v25, %v15276_v57  ;;  %v13623_v39 = vmul.f32 %v15274_v42, %v13377_v32  ;;  %v15278_v42 = vld [vmem:[#allocation14_spill] sm:$0xff] }
 0x704   : > { %v4661_v44 = vmul.f32 %v13095_v9, %v15276_v57  ;;  %v4736_v43 = vmul.f32 %v13565_v1, %v15277_v48  ;;  %v4737_v26 = vmul.f32 %v13569_v53, %v15277_v48  ;;  %v13632_v54 = vsel %vm3338_vm7, %v7659_v16, %v7660_v28  ;;  %v15279_v57 = vld [vmem:[#allocation34_spill] sm:$0xff] }
 0x705   : > { %v6997_v46 = vadd.f32 %v6977_v2, %v6921_v30  ;;  %v4642_v58 = vadd.f32 %v4634_v36, %v4622_v24  ;;  %v4698_v8 = vrot.slane %v4660_v63, 1  ;;  %v4812_v45 = vmul.f32 %v13573_v21, %v15278_v42  ;;  %v13644_v30 = vld [vmem:[#allocation2 + $0xa0] sm:$0xff] }
 0x706   : > { %v4699_v40 = vrot.slane %v4661_v44, 1  ;;  %v4774_v62 = vrot.slane %v4736_v43, 1  ;;  %v4775_v12 = vrot.slane %v4737_v26, 1  ;;  %v4813_v9 = vmul.f32 %v13113_v22, %v15278_v42  ;;  %v13649_v43 = vld [vmem:[#allocation2 + $0xc8] sm:$0x3f] }
 0x707   : > { %v7073_v41 = vadd.f32 %v7053_v38, %v6997_v46  ;;  %v4888_v49 = vmul.f32 %v13538_v61, %v15279_v57  ;;  %v4889_v2 = vmul.f32 %v13379_v52, %v15279_v57  ;;  %v7736_v16 = vrot.slane %v13606_v14, 6  ;;  %v13651_v57 = vld [vmem:[#allocation2 + $0xa8] sm:$0x3f] }
 0x708   : > { %v4700_v28 = vsel %vm674_vm2, %v4698_v8, %v4699_v40  ;;  %v4850_v36 = vrot.slane %v4812_v45, 1  ;;  %v4964_v24 = vmul.f32 %v13644_v30, %v11784_v4  ;;  %v4776_v22 = vsel %vm674_vm2, %v4774_v62, %v4775_v12 }
 0x709   : > { %v7149_v38 = vadd.f32 %v7129_v55, %v7073_v41  ;;  %v4718_v63 = vadd.f32 %v4700_v28, %v4642_v58  ;;  %v4851_v44 = vrot.slane %v4813_v9, 1  ;;  %v4926_v26 = vrot.slane %v4888_v49, 1 }
 0x70a   : > { %v4927_v46 = vrot.slane %v4889_v2, 1  ;;  %v4965_v14 = vmul.f32 %v13651_v57, %v11784_v4  ;;  %v5040_v45 = vmul.f32 %v11802_v60, %v13313_v10  ;;  %v5002_v42 = vrot.slane %v4964_v24, 1 }
 0x70b   : > { %v7225_v8 = vadd.f32 %v7205_v59, %v7149_v38  ;;  %v4794_v40 = vadd.f32 %v4776_v22, %v4718_v63  ;;  %v5041_v55 = vmul.f32 %v11802_v60, %v13377_v32  ;;  %v4852_v41 = vsel %vm674_vm2, %v4850_v36, %v4851_v44  ;;  %v13667_v63 = vld [vmem:[#allocation2 + $0x68] sm:$0x3f] }
 0x70c   : > { %v5003_v12 = vrot.slane %v4965_v14, 1  ;;  %v5078_v58 = vrot.slane %v5040_v45, 1  ;;  %v5116_v49 = vmul.f32 %v15217_v5, %v13590_v23  ;;  %v5117_v28 = vmul.f32 %v15217_v5, %v13649_v43 }
 0x70d   : > { %v7301_v62 = vadd.f32 %v7281_v31, %v7225_v8  ;;  %v4870_v9 = vadd.f32 %v4852_v41, %v4794_v40  ;;  %v5079_v2 = vrot.slane %v5041_v55, 1  ;;  %v4928_v59 = vsel %vm674_vm2, %v4926_v26, %v4927_v46 }
 0x70e   : > { %v5154_v38 = vrot.slane %v5116_v49, 1  ;;  %v5192_v24 = vmul.f32 %v13559_v25, %v15191_v11  ;;  %v5193_v36 = vmul.f32 %v13667_v63, %v15191_v11  ;;  %v7811_v31 = vrot.slane %v13611_v50, 6 }
 0x70f   : > { %v7377_v22 = vadd.f32 %v13594_v29, %v7301_v62  ;;  %v4946_v44 = vadd.f32 %v4928_v59, %v4870_v9  ;;  %v5155_v14 = vrot.slane %v5117_v28, 1  ;;  %v5004_v45 = vsel %vm674_vm2, %v5002_v42, %v5003_v12  ;;  %v13684_v12 = vld [vmem:[#allocation2 + $0x88] sm:$0x3f] }
 0x710   : > { %v5080_v8 = vsel %vm674_vm2, %v5078_v58, %v5079_v2  ;;  %v5268_v26 = vmul.f32 %v13565_v1, %v15192_v27  ;;  %v5269_v46 = vmul.f32 %v13569_v53, %v15192_v27  ;;  %v7812_v55 = vrot.slane %v13623_v39, 6 }
 0x711   : > { %v7453_v40 = vadd.f32 %v13597_v0, %v7377_v22  ;;  %v5022_v41 = vadd.f32 %v5004_v45, %v4946_v44  ;;  %v5344_v29 = vmul.f32 %v13573_v21, %v15193_v13  ;;  %v5156_v50 = vsel %vm674_vm2, %v5154_v38, %v5155_v14 }
 0x712   : > { %v5230_v49 = vrot.slane %v5192_v24, 2  ;;  %v5231_v42 = vrot.slane %v5193_v36, 2  ;;  %v5345_v58 = vmul.f32 %v13684_v12, %v15193_v13  ;;  %v5306_v2 = vrot.slane %v5268_v26, 2 }
 0x713   : > { %v7529_v62 = vadd.f32 %v13600_v15, %v7453_v40  ;;  %v5098_v9 = vadd.f32 %v5080_v8, %v5022_v41  ;;  %v5307_v0 = vrot.slane %v5269_v46, 2  ;;  %v15280_v39 = vrot.slane %v13587_v37, 6 }
 0x714   : > { %v5382_v59 = vrot.slane %v5344_v29, 2  ;;  %v5420_v38 = vmul.f32 %v13538_v61, %v15141_v34  ;;  %v5421_v24 = vmul.f32 %v13379_v52, %v15141_v34  ;;  %v5383_v44 = vrot.slane %v5345_v58, 2 }
 0x715   : > { %v7737_v28 = vsel %vm3338_vm7, %v15280_v39, %v7736_v16  ;;  %v7605_v36 = vadd.f32 %v13616_v47, %v7529_v62  ;;  %v5174_v22 = vadd.f32 %v5156_v50, %v5098_v9  ;;  %v5496_v15 = vmul.f32 %v13644_v30, %v15218_v56 }
 0x716   : > { %v7813_v14 = vsel %vm3338_vm7, %v7811_v31, %v7812_v55  ;;  %v5232_v37 = vsel %vm1207_vm3, %v5230_v49, %v5231_v42  ;;  %v5497_v16 = vmul.f32 %v13651_v57, %v15218_v56  ;;  %v5572_v45 = vmul.f32 %v15219_v17, %v13313_v10 }
 0x717   : > { %v7681_v8 = vadd.f32 %v13632_v54, %v7605_v36  ;;  %v5250_v26 = vadd.f32 %v5232_v37, %v5174_v22  ;;  %v5308_v47 = vsel %vm1207_vm3, %v5306_v2, %v5307_v0  ;;  %v5573_v46 = vmul.f32 %v15219_v17, %v13377_v32 }
 0x718   : > { %v5458_v40 = vrot.slane %v5420_v38, 2  ;;  %v5459_v41 = vrot.slane %v5421_v24, 2  ;;  %v5648_v31 = vmul.f32 %v15249_v19, %v13590_v23  ;;  %v5649_v55 = vmul.f32 %v15249_v19, %v13649_v43 }
 0x719   : > { %v7757_v29 = vadd.f32 %v7737_v28, %v7681_v8  ;;  %v5326_v50 = vadd.f32 %v5308_v47, %v5250_v26  ;;  %v5384_v49 = vsel %vm1207_vm3, %v5382_v59, %v5383_v44  ;;  %v5534_v42 = vrot.slane %v5496_v15, 2  ;;  %v15282_v44 = vld [vmem:[#allocation45_spill] sm:$0xff] }
 0x71a   : > { %v5535_v54 = vrot.slane %v5497_v16, 2  ;;  %v5610_v58 = vrot.slane %v5572_v45, 2  ;;  %v5611_v62 = vrot.slane %v5573_v46, 2  ;;  %v5686_v9 = vrot.slane %v5648_v31, 2 }
 0x71b   : > { %v13714_v2 = vadd.f32 %v7813_v14, %v7757_v29  ;;  %v5402_v0 = vadd.f32 %v5384_v49, %v5326_v50  ;;  %v5687_v39 = vrot.slane %v5649_v55, 2  ;;  %v5724_v38 = vmul.f32 %v13559_v25, %v15221_v18 }
 0x71c   : > { %v5460_v24 = vsel %vm1207_vm3, %v5458_v40, %v5459_v41  ;;  %v5725_v28 = vmul.f32 %v13667_v63, %v15221_v18  ;;  %v5800_v59 = vmul.f32 %v13565_v1, %v15225_v35  ;;  %v5801_v36 = vmul.f32 %v13569_v53, %v15225_v35  ;;  %v15283_v41 = vld [vmem:[#allocation46_spill] sm:$0xff] }
 0x71d   : > { %15281 = vst [vmem:[#allocation64_spill] sm:$0xff] %v13714_v2  ;;  %8678 = vmatmul.mubr.msk.f32.gmra.mrb[20].mxu0 %vm361_vm0, %v13714_v2  ;;  %v5478_v22 = vadd.f32 %v5460_v24, %v5402_v0  ;;  %v5876_v15 = vmul.f32 %v13573_v21, %v15282_v44  ;;  %v5877_v14 = vmul.f32 %v13684_v12, %v15282_v44  ;;  %v5762_v26 = vrot.slane %v5724_v38, 3  ;;  %v15284_v0 = vld [vmem:[#allocation47_spill] sm:$0xff]  ;;  %v15286_v38 = vld [vmem:[#allocation50_spill] sm:$0xff] }
 0x71e   : > { %v5536_v37 = vsel %vm1207_vm3, %v5534_v42, %v5535_v54  ;;  %v5612_v16 = vsel %vm1207_vm3, %v5610_v58, %v5611_v62  ;;  %v5688_v8 = vsel %vm1207_vm3, %v5686_v9, %v5687_v39  ;;  %v5763_v47 = vrot.slane %v5725_v28, 3  ;;  %v15285_v58 = vld [vmem:[#allocation49_spill] sm:$0xff] }
 0x71f   : > { %v5554_v45 = vadd.f32 %v5536_v37, %v5478_v22  ;;  %v5838_v46 = vrot.slane %v5800_v59, 3  ;;  %v5839_v40 = vrot.slane %v5801_v36, 3  ;;  %v5952_v31 = vmul.f32 %v13538_v61, %v15283_v41  ;;  %v15287_v22 = vld [vmem:[#allocation29_spill] sm:$0xff] }
 0x720   : > { %v5914_v29 = vrot.slane %v5876_v15, 3  ;;  %v5915_v50 = vrot.slane %v5877_v14, 3  ;;  %v5953_v49 = vmul.f32 %v13379_v52, %v15283_v41  ;;  %v6028_v42 = vmul.f32 %v13644_v30, %v15284_v0  ;;  %v15290_v41 = vld [vmem:[#allocation26_spill] sm:$0xff] }
 0x721   : > { %v5630_v55 = vadd.f32 %v5612_v16, %v5554_v45  ;;  %v6029_v54 = vmul.f32 %v13651_v57, %v15284_v0  ;;  %v6104_v62 = vmul.f32 %v15285_v58, %v13313_v10  ;;  %v6105_v9 = vmul.f32 %v15285_v58, %v13377_v32 }
 0x722   : > { %v6180_v24 = vmul.f32 %v15286_v38, %v13590_v23  ;;  %v6181_v28 = vmul.f32 %v15286_v38, %v13649_v43  ;;  %v5764_v59 = vsel %vm452_vm4, %v5762_v26, %v5763_v47  ;;  %v5840_v36 = vsel %vm452_vm4, %v5838_v46, %v5839_v40 }
 0x723   : > { %v5706_v39 = vadd.f32 %v5688_v8, %v5630_v55  ;;  %v6256_v15 = vmul.f32 %v13559_v25, %v15287_v22  ;;  %v6257_v14 = vmul.f32 %v13667_v63, %v15287_v22  ;;  %v5916_v16 = vsel %vm452_vm4, %v5914_v29, %v5915_v50  ;;  %v13757_v55 = vpop.f32.mrb[16].mxu0 }
 0x724   : > { %v5990_v45 = vrot.slane %v5952_v31, 3  ;;  %v5991_v8 = vrot.slane %v5953_v49, 3  ;;  %15288 = vst [vmem:[#allocation65_spill] sm:$0xff] %v13757_v55  ;;  %v6066_v2 = vrot.slane %v6028_v42, 3  ;;  %v6067_v58 = vrot.slane %v6029_v54, 3  ;;  %v13759_v26 = vpop.f32.mrb[17].mxu0 }
 0x725   : > { %v5782_v37 = vadd.f32 %v5764_v59, %v5706_v39  ;;  %v6142_v38 = vrot.slane %v6104_v62, 3  ;;  %v6143_v0 = vrot.slane %v6105_v9, 3  ;;  %15289 = vst [vmem:[#allocation66_spill] sm:$0xff] %v13759_v26  ;;  %v6218_v46 = vrot.slane %v6180_v24, 3 }
 0x726   : > { %v6219_v40 = vrot.slane %v6181_v28, 3  ;;  %v6332_v44 = vmul.f32 %v13565_v1, %v15290_v41  ;;  %v6294_v22 = vrot.slane %v6256_v15, 4  ;;  %v6295_v39 = vrot.slane %v6257_v14, 4 }
 0x727   : > { %v5858_v47 = vadd.f32 %v5840_v36, %v5782_v37  ;;  %v6333_v31 = vmul.f32 %v13569_v53, %v15290_v41  ;;  %v6408_v29 = vmul.f32 %v13573_v21, %v15261_v3  ;;  %v5992_v49 = vsel %vm452_vm4, %v5990_v45, %v5991_v8  ;;  %v15293_v45 = vld [vmem:[#allocation55_spill] sm:$0xff] }
 0x728   : > { %v6068_v42 = vsel %vm452_vm4, %v6066_v2, %v6067_v58  ;;  %v6144_v54 = vsel %vm452_vm4, %v6142_v38, %v6143_v0  ;;  %v6220_v9 = vsel %vm452_vm4, %v6218_v46, %v6219_v40  ;;  %v6370_v24 = vrot.slane %v6332_v44, 4  ;;  %v15291_v58 = vld [vmem:[#allocation28_spill] sm:$0xff]  ;;  %v15292_v38 = vld [vmem:[#allocation33_spill] sm:$0xff] }
 0x729   : > { %v5934_v50 = vadd.f32 %v5916_v16, %v5858_v47  ;;  %v6409_v28 = vmul.f32 %v13684_v12, %v15261_v3  ;;  %v6296_v59 = vsel %vm2272_vm5, %v6294_v22, %v6295_v39  ;;  %v6371_v36 = vrot.slane %v6333_v31, 4  ;;  %v15294_v39 = vld [vmem:[#allocation56_spill] sm:$0xff] }
 0x72a   : > { %v6446_v15 = vrot.slane %v6408_v29, 4  ;;  %v6484_v14 = vmul.f32 %v13538_v61, %v15262_v7  ;;  %v6485_v2 = vmul.f32 %v13379_v52, %v15262_v7  ;;  %v6560_v0 = vmul.f32 %v13644_v30, %v15291_v58 }
 0x72b   : > { %v6010_v62 = vadd.f32 %v5992_v49, %v5934_v50  ;;  %v6561_v44 = vmul.f32 %v13651_v57, %v15291_v58  ;;  %v6636_v16 = vmul.f32 %v15292_v38, %v13313_v10  ;;  %v6637_v22 = vmul.f32 %v15292_v38, %v13377_v32 }
 0x72c   : > { %v6712_v8 = vmul.f32 %v15293_v45, %v13590_v23  ;;  %v6713_v47 = vmul.f32 %v15293_v45, %v13649_v43  ;;  %v6447_v40 = vrot.slane %v6409_v28, 4  ;;  %v6788_v31 = vmul.f32 %v13559_v25, %v15294_v39 }
 0x72d   : > { %v6086_v37 = vadd.f32 %v6068_v42, %v6010_v62  ;;  %v6789_v29 = vmul.f32 %v13667_v63, %v15294_v39  ;;  %v6372_v50 = vsel %vm2272_vm5, %v6370_v24, %v6371_v36  ;;  %v6522_v49 = vrot.slane %v6484_v14, 4  ;;  %v15295_v42 = vld [vmem:[#allocation58_spill] sm:$0xff] }
 0x72e   : > { %v6864_v62 = vmul.f32 %v13565_v1, %v15295_v42  ;;  %v6865_v26 = vmul.f32 %v13569_v53, %v15295_v42  ;;  %v6523_v38 = vrot.slane %v6485_v2, 4  ;;  %v6598_v45 = vrot.slane %v6560_v0, 4 }
 0x72f   : > { %v6162_v46 = vadd.f32 %v6144_v54, %v6086_v37  ;;  %v6599_v54 = vrot.slane %v6561_v44, 4  ;;  %v6674_v28 = vrot.slane %v6636_v16, 4  ;;  %v6675_v37 = vrot.slane %v6637_v22, 4 }
 0x730   : > { %v6750_v58 = vrot.slane %v6712_v8, 4  ;;  %v6751_v7 = vrot.slane %v6713_v47, 4  ;;  %v6826_v41 = vrot.slane %v6788_v31, 5  ;;  %v6827_v39 = vrot.slane %v6789_v29, 5 }
 0x731   : > { %v6238_v55 = vadd.f32 %v6220_v9, %v6162_v46  ;;  %v6940_v24 = vmul.f32 %v13573_v21, %v15268_v20  ;;  %v6902_v36 = vrot.slane %v6864_v62, 5  ;;  %v6903_v14 = vrot.slane %v6865_v26, 5 }
 0x732   : > { %v6941_v35 = vmul.f32 %v13684_v12, %v15268_v20  ;;  %v7016_v9 = vmul.f32 %v13538_v61, %v15269_v33  ;;  %v7017_v0 = vmul.f32 %v13379_v52, %v15269_v33  ;;  %v6448_v44 = vsel %vm2272_vm5, %v6446_v15, %v6447_v40 }
 0x733   : > { %v6314_v3 = vadd.f32 %v6296_v59, %v6238_v55  ;;  %v6524_v55 = vsel %vm2272_vm5, %v6522_v49, %v6523_v38  ;;  %v6600_v59 = vsel %vm2272_vm5, %v6598_v45, %v6599_v54  ;;  %v6676_v16 = vsel %vm2272_vm5, %v6674_v28, %v6675_v37  ;;  %v15296_v45 = vld [vmem:[#allocation62_spill] sm:$0xff]  ;;  %v15299_v28 = vld [vmem:[#allocation4_spill] sm:$0xff] }
 0x734   : > { %v6752_v26 = vsel %vm2272_vm5, %v6750_v58, %v6751_v7  ;;  %v6828_v8 = vsel %vm2805_vm6, %v6826_v41, %v6827_v39  ;;  %v6978_v47 = vrot.slane %v6940_v24, 5  ;;  %v6904_v46 = vsel %vm2805_vm6, %v6902_v36, %v6903_v14  ;;  %v15297_v41 = vld [vmem:[#allocation22_spill] sm:$0xff]  ;;  %v15298_v39 = vld [vmem:[#allocation3_spill] sm:$0xff]  ;;  %v15300_v14 = vld [vmem:[#allocation5_spill] sm:$0xff] }
 0x735   : > { %v6390_v2 = vadd.f32 %v6372_v50, %v6314_v3  ;;  %v6979_v3 = vrot.slane %v6941_v35, 5  ;;  %v7054_v31 = vrot.slane %v7016_v9, 5  ;;  %v7092_v29 = vmul.f32 %v13644_v30, %v15270_v51 }
 0x736   : > { %v7055_v40 = vrot.slane %v7017_v0, 5  ;;  %v7093_v38 = vmul.f32 %v13651_v57, %v15270_v51  ;;  %v7168_v50 = vmul.f32 %v15296_v45, %v13313_v10  ;;  %v7169_v7 = vmul.f32 %v15296_v45, %v13377_v32  ;;  %v15301_v45 = vld [vmem:[#allocation6_spill] sm:$0xff] }
 0x737   : > { %v6466_v22 = vadd.f32 %v6448_v44, %v6390_v2  ;;  %v7244_v58 = vmul.f32 %v15297_v41, %v13590_v23  ;;  %v7245_v35 = vmul.f32 %v15297_v41, %v13649_v43  ;;  %v7320_v49 = vmul.f32 %v13559_v25, %v15298_v39 }
 0x738   : > { %v7321_v54 = vmul.f32 %v13667_v63, %v15298_v39  ;;  %v7396_v37 = vmul.f32 %v13565_v1, %v15299_v28  ;;  %v7397_v10 = vmul.f32 %v13569_v53, %v15299_v28  ;;  %v6980_v24 = vsel %vm2805_vm6, %v6978_v47, %v6979_v3 }
 0x739   : > { %v6542_v15 = vadd.f32 %v6524_v55, %v6466_v22  ;;  %v7130_v36 = vrot.slane %v7092_v29, 5  ;;  %v7472_v9 = vmul.f32 %v13573_v21, %v15300_v14  ;;  %v7473_v2 = vmul.f32 %v13684_v12, %v15300_v14 }
 0x73a   : > { %v7056_v0 = vsel %vm2805_vm6, %v7054_v31, %v7055_v40  ;;  %v7131_v44 = vrot.slane %v7093_v38, 5  ;;  %v7206_v63 = vrot.slane %v7168_v50, 5  ;;  %v7207_v55 = vrot.slane %v7169_v7, 5  ;;  %v15302_v38 = vld [vmem:[#allocation35_spill] sm:$0xff] }
 0x73b   : > { %v6618_v62 = vadd.f32 %v6600_v59, %v6542_v15  ;;  %v7282_v59 = vrot.slane %v7244_v58, 5  ;;  %v7283_v22 = vrot.slane %v7245_v35, 5  ;;  %v7358_v15 = vrot.slane %v7320_v49, 6  ;;  %v13852_v58 = vld [vmem:[#allocation2 + $0xb0] sm:$0xff]  ;;  %v15303_v35 = vld [vmem:[#allocation8_spill] sm:$0xff] }
 0x73c   : > { %v7359_v28 = vrot.slane %v7321_v54, 6  ;;  %v7434_v41 = vrot.slane %v7396_v37, 6  ;;  %v7435_v47 = vrot.slane %v7397_v10, 6  ;;  %v7510_v3 = vrot.slane %v7472_v9, 6  ;;  %v8900_v10 = vld [vmem:[%s14272_s2 + $0x1] ss:$0 sm:$0xff] }
 0x73d   : > { %v6694_v25 = vadd.f32 %v6676_v16, %v6618_v62  ;;  %v7511_v29 = vrot.slane %v7473_v2, 6  ;;  %v7548_v51 = vmul.f32 %v13538_v61, %v15301_v45  ;;  %v7549_v16 = vmul.f32 %v13379_v52, %v15301_v45  ;;  %v15304_v52 = vld [vmem:[#allocation36_spill] sm:$0xff] }
 0x73e   : > { %v7132_v31 = vsel %vm2805_vm6, %v7130_v36, %v7131_v44  ;;  %v7624_v40 = vmul.f32 %v13644_v30, %v15271_v6  ;;  %v7208_v50 = vsel %vm2805_vm6, %v7206_v63, %v7207_v55  ;;  %v7625_v7 = vmul.f32 %v13651_v57, %v15271_v6 }
 0x73f   : > { %v6770_v39 = vadd.f32 %v6752_v26, %v6694_v25  ;;  %v4515_v26 = vmul.f32 %v13565_v1, %v15302_v38  ;;  %v13856_v49 = vmul.f32 %v13852_v58, %v15303_v35  ;;  %v7284_v54 = vsel %vm2805_vm6, %v7282_v59, %v7283_v22 }
 0x740   : > { %v7360_v37 = vsel %vm3338_vm7, %v7358_v15, %v7359_v28  ;;  %v7436_v9 = vsel %vm3338_vm7, %v7434_v41, %v7435_v47  ;;  %v13867_v2 = vsel %vm3338_vm7, %v7510_v3, %v7511_v29  ;;  %v7586_v25 = vrot.slane %v7548_v51, 6  ;;  %v13877_v41 = vld [vmem:[%s14271_s1 + $0x68] ss:$0 sm:$0xff]  ;;  %v13883_v47 = vld [vmem:[#allocation2 + $0xd0] sm:$0xff]  ;;  %v15306_v29 = vld [vmem:[#allocation30_spill] sm:$0xff] }
 0x741   : > { %v6846_v62 = vadd.f32 %v6828_v8, %v6770_v39  ;;  %v4535_v8 = vmul.f32 %v13573_v21, %v15304_v52  ;;  %v4523_v36 = vadd.f32 %v8900_v10, %v4515_v26  ;;  %v7587_v44 = vrot.slane %v7549_v16, 6  ;;  %v15308_v26 = vld [vmem:[#allocation38_spill] sm:$0xff] }
 0x742   : > { %v7662_v55 = vrot.slane %v7624_v40, 6  ;;  %v7663_v22 = vrot.slane %v7625_v7, 6  ;;  %v7701_v28 = vmul.f32 %v15303_v35, %v13377_v32  ;;  %v7738_v15 = vrot.slane %v13856_v49, 6  ;;  %v15309_v49 = vld [vmem:[#allocation11_spill] sm:$0xff]  ;;  %v15311_v35 = vld [vmem:[#allocation14_spill] sm:$0xff] }
 0x743   : > { %v6922_v39 = vadd.f32 %v6904_v46, %v6846_v62  ;;  %v4543_v38 = vadd.f32 %v4535_v8, %v4523_v36  ;;  %v15305_v46 = vld [vmem:[#allocation53_spill] sm:$0xff]  ;;  %v13881_v51 = vmul.f32 %v13877_v41, %v13590_v23  ;;  %v4575_v16 = vmul.f32 %v13644_v30, %v15306_v29  ;;  %v15307_v62 = vld [vmem:[#allocation24_spill] sm:$0xff] }
 0x744   : > { %v4555_v59 = vmul.f32 %v13538_v61, %v15305_v46  ;;  %v4595_v32 = vmul.f32 %v13852_v58, %v15307_v62  ;;  %v13891_v40 = vmul.f32 %v13877_v41, %v13649_v43  ;;  %v4615_v7 = vmul.f32 %v15308_v26, %v13590_v23 }
 0x745   : > { %v6998_v63 = vadd.f32 %v6980_v24, %v6922_v39  ;;  %v4662_v52 = vmul.f32 %v13565_v1, %v15309_v49  ;;  %v4738_v10 = vmul.f32 %v13573_v21, %v15277_v48  ;;  %v4739_v36 = vmul.f32 %v13684_v12, %v15277_v48 }
 0x746   : > { %v4563_v3 = vadd.f32 %v4555_v59, %v4543_v38  ;;  %v7664_v38 = vsel %vm3338_vm7, %v7662_v55, %v7663_v22  ;;  %v7739_v46 = vrot.slane %v7701_v28, 6  ;;  %v15310_v59 = vld [vmem:[#allocation54_spill] sm:$0xff]  ;;  %v7814_v48 = vrot.slane %v13881_v51, 6 }
 0x747   : > { %v7074_v24 = vadd.f32 %v7056_v0, %v6998_v63  ;;  %v4663_v0 = vmul.f32 %v13569_v53, %v15309_v49  ;;  %v7588_v63 = vsel %vm3338_vm7, %v7586_v25, %v7587_v44  ;;  %v4635_v29 = vmul.f32 %v15310_v59, %v13883_v47  ;;  %v13923_v51 = vld [vmem:[#allocation2 + $0xb8] sm:$0x3f] }
 0x748   : > { %v4583_v39 = vadd.f32 %v4575_v16, %v4563_v3  ;;  %v7815_v25 = vrot.slane %v13891_v40, 6  ;;  %v4701_v44 = vrot.slane %v4662_v52, 1  ;;  %v4777_v16 = vrot.slane %v4738_v10, 1 }
 0x749   : > { %v7150_v8 = vadd.f32 %v7132_v31, %v7074_v24  ;;  %v4814_v31 = vmul.f32 %v13538_v61, %v15311_v35  ;;  %v13909_v24 = vld [vmem:[#allocation2 + $0x98] sm:$0x3f]  ;;  %v4702_v55 = vrot.slane %v4663_v0, 1  ;;  %v4778_v49 = vrot.slane %v4739_v36, 1 }
 0x74a   : > { %v4603_v26 = vadd.f32 %v4595_v32, %v4583_v39  ;;  %v4815_v3 = vmul.f32 %v13909_v24, %v15311_v35  ;;  %v15312_v32 = vld [vmem:[#allocation34_spill] sm:$0xff]  ;;  %v4966_v35 = vmul.f32 %v13852_v58, %v11784_v4  ;;  %v4967_v40 = vmul.f32 %v13923_v51, %v11784_v4 }
 0x74b   : > { %v7226_v62 = vadd.f32 %v7208_v50, %v7150_v8  ;;  %v13915_v50 = vld [vmem:[#allocation2 + $0xd8] sm:$0x3f]  ;;  %v4890_v8 = vmul.f32 %v13644_v30, %v15312_v32  ;;  %v4891_v39 = vmul.f32 %v13651_v57, %v15312_v32  ;;  %v4853_v52 = vrot.slane %v4814_v31, 1 }
 0x74c   : > { %v4623_v28 = vadd.f32 %v4615_v7, %v4603_v26  ;;  %v4854_v0 = vrot.slane %v4815_v3, 1  ;;  %v4703_v10 = vsel %vm674_vm2, %v4701_v44, %v4702_v55  ;;  %v5042_v36 = vmul.f32 %v11802_v60, %v13590_v23 }
 0x74d   : > { %v7302_v22 = vadd.f32 %v7284_v54, %v7226_v62  ;;  %v5043_v59 = vmul.f32 %v11802_v60, %v13649_v43  ;;  %v5118_v62 = vmul.f32 %v15217_v5, %v13883_v47  ;;  %v4779_v6 = vsel %vm674_vm2, %v4777_v16, %v4778_v49 }
 0x74e   : > { %v4643_v7 = vadd.f32 %v4635_v29, %v4623_v28  ;;  %v5119_v4 = vmul.f32 %v15217_v5, %v13915_v50  ;;  %v4930_v29 = vrot.slane %v4891_v39, 1  ;;  %v5005_v31 = vrot.slane %v4966_v35, 1 }
 0x74f   : > { %v7378_v54 = vadd.f32 %v7360_v37, %v7302_v22  ;;  %v4929_v37 = vrot.slane %v4890_v8, 1  ;;  %v5006_v3 = vrot.slane %v4967_v40, 1  ;;  %v7740_v55 = vsel %vm3338_vm7, %v7738_v15, %v7739_v46 }
 0x750   : > { %v4719_v32 = vadd.f32 %v4703_v10, %v4643_v7  ;;  %v4855_v60 = vsel %vm674_vm2, %v4853_v52, %v4854_v0  ;;  %v5081_v28 = vrot.slane %v5042_v36, 1  ;;  %v5082_v45 = vrot.slane %v5043_v59, 1 }
 0x751   : > { %v7454_v26 = vadd.f32 %v7436_v9, %v7378_v54  ;;  %v5157_v9 = vrot.slane %v5118_v62, 1  ;;  %v5194_v16 = vmul.f32 %v13565_v1, %v15191_v11  ;;  %v5158_v5 = vrot.slane %v5119_v4, 1 }
 0x752   : > { %v4795_v22 = vadd.f32 %v4779_v6, %v4719_v32  ;;  %v5195_v8 = vmul.f32 %v13569_v53, %v15191_v11  ;;  %v4931_v39 = vsel %vm674_vm2, %v4929_v37, %v4930_v29  ;;  %v5270_v6 = vmul.f32 %v13573_v21, %v15192_v27 }
 0x753   : > { %v7530_v44 = vadd.f32 %v13867_v2, %v7454_v26  ;;  %v5007_v2 = vsel %vm674_vm2, %v5005_v31, %v5006_v3  ;;  %v5271_v15 = vmul.f32 %v13684_v12, %v15192_v27  ;;  %v7816_v40 = vsel %vm3338_vm7, %v7814_v48, %v7815_v25 }
 0x754   : > { %v4871_v54 = vadd.f32 %v4855_v60, %v4795_v22  ;;  %v5233_v7 = vrot.slane %v5194_v16, 2  ;;  %v5159_v11 = vsel %vm674_vm2, %v5157_v9, %v5158_v5  ;;  %v5234_v10 = vrot.slane %v5195_v8, 2 }
 0x755   : > { %v7606_v49 = vadd.f32 %v7588_v63, %v7530_v44  ;;  %v5083_v63 = vsel %vm674_vm2, %v5081_v28, %v5082_v45  ;;  %v5309_v36 = vrot.slane %v5270_v6, 2  ;;  %v5310_v59 = vrot.slane %v5271_v15, 2 }
 0x756   : > { %v4947_v35 = vadd.f32 %v4931_v39, %v4871_v54  ;;  %v5346_v62 = vmul.f32 %v13538_v61, %v15193_v13  ;;  %v5347_v27 = vmul.f32 %v13909_v24, %v15193_v13  ;;  %v5422_v45 = vmul.f32 %v13644_v30, %v15141_v34 }
 0x757   : > { %v7682_v46 = vadd.f32 %v7664_v38, %v7606_v49  ;;  %v5423_v48 = vmul.f32 %v13651_v57, %v15141_v34  ;;  %v5498_v25 = vmul.f32 %v13852_v58, %v15218_v56  ;;  %v5499_v32 = vmul.f32 %v13923_v51, %v15218_v56 }
 0x758   : > { %v5023_v0 = vadd.f32 %v5007_v2, %v4947_v35  ;;  %v5235_v13 = vsel %vm1207_vm3, %v5233_v7, %v5234_v10  ;;  %v5385_v37 = vrot.slane %v5346_v62, 2  ;;  %v5386_v29 = vrot.slane %v5347_v27, 2  ;;  %v15313_v35 = vld [vmem:[#allocation44_spill] sm:$0xff] }
 0x759   : > { %v7758_v52 = vadd.f32 %v7740_v55, %v7682_v46  ;;  %v5574_v31 = vmul.f32 %v15219_v17, %v13590_v23  ;;  %v5575_v34 = vmul.f32 %v15219_v17, %v13649_v43  ;;  %v5311_v44 = vsel %vm1207_vm3, %v5309_v36, %v5310_v59 }
 0x75a   : > { %v5099_v26 = vadd.f32 %v5083_v63, %v5023_v0  ;;  %v5461_v55 = vrot.slane %v5422_v45, 2  ;;  %v5462_v22 = vrot.slane %v5423_v48, 2  ;;  %v5537_v56 = vrot.slane %v5498_v25, 2  ;;  %v15315_v45 = vld [vmem:[#allocation46_spill] sm:$0xff] }
 0x75b   : > { %v13957_v38 = vadd.f32 %v7816_v40, %v7758_v52  ;;  %v5538_v60 = vrot.slane %v5499_v32, 2  ;;  %v5650_v28 = vmul.f32 %v15249_v19, %v13883_v47  ;;  %v5651_v9 = vmul.f32 %v15249_v19, %v13915_v50  ;;  %v15316_v32 = vld [vmem:[#allocation47_spill] sm:$0xff] }
 0x75c   : > { %v5175_v4 = vadd.f32 %v5159_v11, %v5099_v26  ;;  %v5387_v49 = vsel %vm1207_vm3, %v5385_v37, %v5386_v29  ;;  %v5613_v54 = vrot.slane %v5574_v31, 2  ;;  %v5614_v5 = vrot.slane %v5575_v34, 2 }
 0x75d   : > { %8680 = vmatprep.mubr.msk.f32.mxu0 %vm361_vm0, %v13957_v38  ;;  %v5463_v17 = vsel %vm1207_vm3, %v5461_v55, %v5462_v22  ;;  %v5726_v39 = vmul.f32 %v13565_v1, %v15221_v18  ;;  %v5727_v2 = vmul.f32 %v13569_v53, %v15221_v18  ;;  %v5539_v6 = vsel %vm1207_vm3, %v5537_v56, %v5538_v60  ;;  %v15314_v18 = vld [vmem:[#allocation45_spill] sm:$0xff] }
 0x75e   : > { %v5251_v3 = vadd.f32 %v5235_v13, %v5175_v4  ;;  %v5689_v15 = vrot.slane %v5650_v28, 2  ;;  %v5690_v46 = vrot.slane %v5651_v9, 2  ;;  %v5802_v19 = vmul.f32 %v13573_v21, %v15313_v35 }
 0x75f   : > { %v5803_v63 = vmul.f32 %v13684_v12, %v15313_v35  ;;  %v5615_v7 = vsel %vm1207_vm3, %v5613_v54, %v5614_v5  ;;  %v5765_v0 = vrot.slane %v5726_v39, 3  ;;  %v5766_v11 = vrot.slane %v5727_v2, 3  ;;  %v15319_v35 = vld [vmem:[#allocation29_spill] sm:$0xff] }
 0x760   : > { %v5327_v16 = vadd.f32 %v5311_v44, %v5251_v3  ;;  %v5691_v10 = vsel %vm1207_vm3, %v5689_v15, %v5690_v46  ;;  %v5841_v36 = vrot.slane %v5802_v19, 3  ;;  %v5878_v59 = vmul.f32 %v13538_v61, %v15314_v18  ;;  %v15317_v3 = vld [vmem:[#allocation49_spill] sm:$0xff] }
 0x761   : > { %v5879_v62 = vmul.f32 %v13909_v24, %v15314_v18  ;;  %v5842_v26 = vrot.slane %v5803_v63, 3  ;;  %v5954_v48 = vmul.f32 %v13644_v30, %v15315_v45  ;;  %v5955_v25 = vmul.f32 %v13651_v57, %v15315_v45 }
 0x762   : > { %v5403_v8 = vadd.f32 %v5387_v49, %v5327_v16  ;;  %v6030_v4 = vmul.f32 %v13852_v58, %v15316_v32  ;;  %v6031_v13 = vmul.f32 %v13923_v51, %v15316_v32  ;;  %v5767_v29 = vsel %vm452_vm4, %v5765_v0, %v5766_v11  ;;  %v15318_v49 = vld [vmem:[#allocation50_spill] sm:$0xff] }
 0x763   : > { %v5917_v31 = vrot.slane %v5878_v59, 3  ;;  %v5918_v34 = vrot.slane %v5879_v62, 3  ;;  %v6106_v44 = vmul.f32 %v15317_v3, %v13590_v23  ;;  %v6107_v55 = vmul.f32 %v15317_v3, %v13649_v43  ;;  %v15320_v11 = vld [vmem:[#allocation26_spill] sm:$0xff]  ;;  %v15323_v3 = vld [vmem:[#allocation28_spill] sm:$0xff] }
 0x764   : > { %v5479_v40 = vadd.f32 %v5463_v17, %v5403_v8  ;;  %v5843_v56 = vsel %vm452_vm4, %v5841_v36, %v5842_v26  ;;  %v5993_v60 = vrot.slane %v5954_v48, 3  ;;  %v5994_v28 = vrot.slane %v5955_v25, 3  ;;  %v15321_v25 = vld [vmem:[#allocation23_spill] sm:$0xff] }
 0x765   : > { %v6069_v9 = vrot.slane %v6030_v4, 3  ;;  %v6070_v16 = vrot.slane %v6031_v13, 3  ;;  %v6182_v54 = vmul.f32 %v15318_v49, %v13883_v47  ;;  %v6183_v5 = vmul.f32 %v15318_v49, %v13915_v50  ;;  %v15325_v49 = vld [vmem:[#allocation55_spill] sm:$0xff] }
 0x766   : > { %v5555_v52 = vadd.f32 %v5539_v6, %v5479_v40  ;;  %v5919_v17 = vsel %vm452_vm4, %v5917_v31, %v5918_v34  ;;  %v6145_v39 = vrot.slane %v6106_v44, 3  ;;  %v6146_v2 = vrot.slane %v6107_v55, 3 }
 0x767   : > { %v5995_v46 = vsel %vm452_vm4, %v5993_v60, %v5994_v28  ;;  %v6258_v19 = vmul.f32 %v13565_v1, %v15319_v35  ;;  %v6259_v40 = vmul.f32 %v13569_v53, %v15319_v35  ;;  %v6222_v0 = vrot.slane %v6183_v5, 3  ;;  %v15326_v35 = vld [vmem:[#allocation56_spill] sm:$0xff] }
 0x768   : > { %v5631_v27 = vadd.f32 %v5615_v7, %v5555_v52  ;;  %v6071_v7 = vsel %vm452_vm4, %v6069_v9, %v6070_v16  ;;  %v6221_v52 = vrot.slane %v6182_v54, 3  ;;  %v6335_v18 = vmul.f32 %v13684_v12, %v15320_v11 }
 0x769   : > { %v6147_v59 = vsel %vm452_vm4, %v6145_v39, %v6146_v2  ;;  %v6298_v26 = vrot.slane %v6259_v40, 4  ;;  %v6410_v32 = vmul.f32 %v13538_v61, %v15321_v25  ;;  %v6411_v4 = vmul.f32 %v13909_v24, %v15321_v25  ;;  %v14065_v25 = vld [vmem:[#allocation2 + $0x90] sm:$0xff] }
 0x76a   : > { %v5707_v37 = vadd.f32 %v5691_v10, %v5631_v27  ;;  %v6334_v10 = vmul.f32 %v13573_v21, %v15320_v11  ;;  %v6297_v27 = vrot.slane %v6258_v19, 4  ;;  %v6223_v45 = vsel %vm452_vm4, %v6221_v52, %v6222_v0 }
 0x76b   : > { %v6562_v44 = vmul.f32 %v13852_v58, %v15323_v3  ;;  %v6563_v55 = vmul.f32 %v13923_v51, %v15323_v3  ;;  %v6449_v9 = vrot.slane %v6410_v32, 4  ;;  %v6450_v16 = vrot.slane %v6411_v4, 4  ;;  %v15328_v3 = vld [vmem:[#allocation20_spill] sm:$0xff] }
 0x76c   : > { %v5783_v22 = vadd.f32 %v5767_v29, %v5707_v37  ;;  %v6373_v48 = vrot.slane %v6334_v10, 4  ;;  %v6374_v37 = vrot.slane %v6335_v18, 4  ;;  %v15322_v29 = vld [vmem:[#allocation32_spill] sm:$0xff]  ;;  %v6299_v61 = vsel %vm2272_vm5, %v6297_v27, %v6298_v26 }
 0x76d   : > { %v6486_v31 = vmul.f32 %v13644_v30, %v15322_v29  ;;  %v6487_v34 = vmul.f32 %v13651_v57, %v15322_v29  ;;  %v6714_v54 = vmul.f32 %v15325_v49, %v13883_v47  ;;  %v6715_v5 = vmul.f32 %v15325_v49, %v13915_v50 }
 0x76e   : > { %v5859_v8 = vadd.f32 %v5843_v56, %v5783_v22  ;;  %v15324_v56 = vld [vmem:[#allocation33_spill] sm:$0xff]  ;;  %v6790_v19 = vmul.f32 %v13565_v1, %v15326_v35  ;;  %v6791_v40 = vmul.f32 %v13569_v53, %v15326_v35  ;;  %v6451_v11 = vsel %vm2272_vm5, %v6449_v9, %v6450_v16 }
 0x76f   : > { %v6638_v60 = vmul.f32 %v15324_v56, %v13590_v23  ;;  %v6639_v28 = vmul.f32 %v15324_v56, %v13649_v43  ;;  %v6525_v39 = vrot.slane %v6486_v31, 4  ;;  %v6526_v2 = vrot.slane %v6487_v34, 4  ;;  %v15327_v34 = vld [vmem:[#allocation65_spill] sm:$0xff]  ;;  %v15329_v56 = vld [vmem:[#allocation66_spill] sm:$0xff] }
 0x770   : > { %v14015_v6 = vpop.f32.mrb[18].mxu0  ;;  %v5935_v15 = vadd.f32 %v5919_v17, %v5859_v8  ;;  %v6375_v17 = vsel %vm2272_vm5, %v6373_v48, %v6374_v37  ;;  %v6753_v10 = vrot.slane %v6714_v54, 4  ;;  %v6866_v18 = vmul.f32 %v13573_v21, %v15295_v42  ;;  %v15331_v54 = vld [vmem:[#allocation61_spill] sm:$0xff] }
 0x771   : > { %v14022_v63 = vpop.f32.mrb[19].mxu0  ;;  %v6677_v52 = vrot.slane %v6638_v60, 4  ;;  %v6678_v0 = vrot.slane %v6639_v28, 4  ;;  %v6829_v26 = vrot.slane %v6790_v19, 5  ;;  %v6830_v1 = vrot.slane %v6791_v40, 5  ;;  %v15334_v40 = vld [vmem:[#allocation62_spill] sm:$0xff] }
 0x772   : > { %v6011_v36 = vadd.f32 %v5995_v46, %v5935_v15  ;;  %v6601_v15 = vrot.slane %v6562_v44, 4  ;;  %v6602_v46 = vrot.slane %v6563_v55, 4  ;;  %v6867_v53 = vmul.f32 %v13684_v12, %v15295_v42 }
 0x773   : > { %v6679_v48 = vsel %vm2272_vm5, %v6677_v52, %v6678_v0  ;;  %v6942_v32 = vmul.f32 %v14065_v25, %v15268_v20  ;;  %v6905_v4 = vrot.slane %v6866_v18, 5  ;;  %v7778_v37 = vmul.f32 %v13877_v41, %v13883_v47 }
 0x774   : > { %v6087_v62 = vadd.f32 %v6071_v7, %v6011_v36  ;;  %v6754_v36 = vrot.slane %v6715_v5, 4  ;;  %v6603_v27 = vsel %vm2272_vm5, %v6601_v15, %v6602_v46  ;;  %v7018_v42 = vmul.f32 %v13644_v30, %v15269_v33  ;;  %v15333_v46 = vld [vmem:[#allocation39_spill] sm:$0xff] }
 0x775   : > { %v7779_v31 = vmul.f32 %v13877_v41, %v13915_v50  ;;  %v14080_v44 = vsub.f32 %v15328_v3, %v15327_v34  ;;  %v6831_v55 = vsel %vm2805_vm6, %v6829_v26, %v6830_v1  ;;  %v6981_v9 = vrot.slane %v6942_v32, 5  ;;  %v15336_v32 = vld [vmem:[#allocation3_spill] sm:$0xff]  ;;  %v15337_v34 = vld [vmem:[#allocation4_spill] sm:$0xff] }
 0x776   : > { %v6163_v13 = vadd.f32 %v6147_v59, %v6087_v62  ;;  %v6527_v62 = vsel %vm2272_vm5, %v6525_v39, %v6526_v2  ;;  %v6755_v21 = vsel %vm2272_vm5, %v6753_v10, %v6754_v36  ;;  %v7019_v16 = vmul.f32 %v13651_v57, %v15269_v33 }
 0x777   : > { %v7818_v49 = vrot.slane %v7779_v31, 6  ;;  %v7094_v41 = vmul.f32 %v13852_v58, %v15331_v54  ;;  %v7095_v5 = vmul.f32 %v13923_v51, %v15331_v54  ;;  %v7974_v33 = vmul.f32 %v14080_v44, %v14080_v44  ;;  %v14136_v31 = vld [vmem:[#allocation2 + $0x80] sm:$0xff] }
 0x778   : > { %v6239_v22 = vadd.f32 %v6223_v45, %v6163_v13  ;;  %v6943_v13 = vmul.f32 %v13909_v24, %v15268_v20  ;;  %v15330_v20 = vld [vmem:[#allocation9_spill] sm:$0xff]  ;;  %v14106_v35 = vsub.f32 %v15333_v46, %v14015_v6  ;;  %v7171_v52 = vmul.f32 %v15334_v40, %v13649_v43 }
 0x779   : > { %v14085_v60 = vsub.f32 %v15330_v20, %v15329_v56  ;;  %v7057_v10 = vrot.slane %v7018_v42, 5  ;;  %v7058_v36 = vrot.slane %v7019_v16, 5  ;;  %v7133_v6 = vrot.slane %v7094_v41, 5  ;;  %v15338_v41 = vld [vmem:[#allocation6_spill] sm:$0xff] }
 0x77a   : > { %v6315_v8 = vadd.f32 %v6299_v61, %v6239_v22  ;;  %v6906_v22 = vrot.slane %v6867_v53, 5  ;;  %v7817_v61 = vrot.slane %v7778_v37, 6  ;;  %v6982_v19 = vrot.slane %v6943_v13, 5 }
 0x77b   : > { %v7134_v18 = vrot.slane %v7095_v5, 5  ;;  %v7210_v53 = vrot.slane %v7171_v52, 5  ;;  %v7398_v3 = vmul.f32 %v14136_v31, %v15337_v34  ;;  %v7475_v16 = vmul.f32 %v13909_v24, %v15300_v14  ;;  %v15340_v52 = vld [vmem:[#allocation8_spill] sm:$0xff] }
 0x77c   : > { %v6391_v7 = vadd.f32 %v6375_v17, %v6315_v8  ;;  %v7973_v8 = vmul.f32 %v14085_v60, %v14085_v60  ;;  %v15332_v17 = vld [vmem:[#allocation10_spill] sm:$0xff]  ;;  %v14100_v15 = vsel %vm3338_vm7, %v7817_v61, %v7818_v49  ;;  %v6983_v26 = vsel %vm2805_vm6, %v6981_v9, %v6982_v19 }
 0x77d   : > { %v14097_v39 = vsub.f32 %v15332_v17, %v14022_v63  ;;  %v7135_v13 = vsel %vm2805_vm6, %v7133_v6, %v7134_v18  ;;  %v7474_v9 = vmul.f32 %v14065_v25, %v15300_v14  ;;  %v7437_v54 = vrot.slane %v7398_v3, 6  ;;  %v15339_v17 = vld [vmem:[#allocation7_spill] sm:$0xff] }
 0x77e   : > { %v6467_v59 = vadd.f32 %v6451_v11, %v6391_v7  ;;  %v7170_v7 = vmul.f32 %v15334_v40, %v13590_v23  ;;  %8685 = vmatprep.mubr.msk.f32.mxu1 %vm361_vm0, %v7973_v8  ;;  %v6907_v11 = vsel %vm2805_vm6, %v6905_v4, %v6906_v22  ;;  %v7059_v4 = vsel %vm2805_vm6, %v7057_v10, %v7058_v36  ;;  %v8539_v3 = vld [vmem:[%s14275_s5 + $0x4] sm:$0xf] }
 0x77f   : > { %v7975_v63 = vmul.f32 %v14097_v39, %v14097_v39  ;;  %8686 = vmatmul.mubr.msk.f32.vlgmr.msra.gmra.mrb[16].mxu1 %vm361_vm0, %v7974_v33  ;;  %v7399_v22 = vmul.f32 %v13684_v12, %v15337_v34  ;;  %v7550_v5 = vmul.f32 %v13644_v30, %v15338_v41  ;;  %v7551_v12 = vmul.f32 %v13651_v57, %v15338_v41 }
 0x780   : > { %v6543_v45 = vadd.f32 %v6527_v62, %v6467_v59  ;;  %v15335_v59 = vld [vmem:[#allocation22_spill] sm:$0xff]  ;;  %v7209_v1 = vrot.slane %v7170_v7, 5  ;;  %v7627_v33 = vmul.f32 %v13923_v51, %v15339_v17  ;;  %v7513_v40 = vrot.slane %v7474_v9, 6  ;;  %v8908_v7 = vld [vmem:[#allocation2 + $0xc0] sm:$0xff]  ;;  %8720 = vmatprep.subr.msk.bf16.mxu0 %vm2272_vm5, %v8539_v3 }
 0x781   : > { %v7246_v23 = vmul.f32 %v15335_v59, %v13883_v47  ;;  %v7247_v43 = vmul.f32 %v15335_v59, %v13915_v50  ;;  %8688 = vmatprep.mubr.msk.f32.mxu1 %vm361_vm0, %v7975_v63  ;;  %v14129_v47 = vld [vmem:[#allocation2 + $0x78] sm:$0x3f]  ;;  %v7438_v8 = vrot.slane %v7399_v22, 6  ;;  %v7514_v14 = vrot.slane %v7475_v16, 6 }
 0x782   : > { %v6619_v29 = vadd.f32 %v6603_v27, %v6543_v45  ;;  %v7976_v27 = vmul.f32 %v14106_v35, %v14106_v35  ;;  %v7323_v50 = vmul.f32 %v14129_v47, %v15336_v32  ;;  %v7702_v63 = vmul.f32 %v8908_v7, %v15340_v52 }
 0x783   : > { %v7285_v37 = vrot.slane %v7246_v23, 5  ;;  %v7589_v10 = vrot.slane %v7550_v5, 6  ;;  %v7439_v57 = vsel %vm3338_vm7, %v7437_v54, %v7438_v8  ;;  %v7590_v36 = vrot.slane %v7551_v12, 6 }
 0x784   : > { %v6695_v28 = vadd.f32 %v6679_v48, %v6619_v29  ;;  %v14125_v48 = vld [vmem:[#allocation2 + $0x70] sm:$0xff]  ;;  %8689 = vmatmul.mubr.msk.f32.gmra.mrb[18].mxu1 %vm361_vm0, %v7976_v27  ;;  %v7286_v29 = vrot.slane %v7247_v43, 5  ;;  %v7362_v20 = vrot.slane %v7323_v50, 6  ;;  %v7666_v6 = vrot.slane %v7627_v33, 6  ;;  %v15341_v50 = vld [vmem:[#allocation64_spill] sm:$0xff] }
 0x785   : > { %v7515_v51 = vsel %vm3338_vm7, %v7513_v40, %v7514_v14  ;;  %v7741_v59 = vrot.slane %v7702_v63, 6 }
 0x786   : > { %v6771_v2 = vadd.f32 %v6755_v21, %v6695_v28  ;;  %v7322_v21 = vmul.f32 %v14125_v48, %v15336_v32  ;;  %v7287_v28 = vsel %vm2805_vm6, %v7285_v37, %v7286_v29  ;;  %v15342_v37 = vld [vmem:[#allocation63_spill] sm:$0xff] }
 0x788   : > { %v6847_v0 = vadd.f32 %v6831_v55, %v6771_v2  ;;  %v7211_v55 = vsel %vm2805_vm6, %v7209_v1, %v7210_v53  ;;  %v7361_v56 = vrot.slane %v7322_v21, 6  ;;  %v7626_v2 = vmul.f32 %v13852_v58, %v15339_v17 }
 0x78a   : > { %v6923_v62 = vadd.f32 %v6907_v11, %v6847_v0  ;;  %v7363_v19 = vsel %vm3338_vm7, %v7361_v56, %v7362_v20  ;;  %v8909_v0 = vld [vmem:[#allocation2 + $0xc8] sm:$0x3f]  ;;  %v7665_v58 = vrot.slane %v7626_v2, 6 }
 0x78b   : > { %v7703_v30 = vmul.f32 %v8909_v0, %v15340_v52  ;;  %v8537_v52 = vld [vmem:[%s14273_s3 + $0x1] ss:$0 sm:$0xff] }
 0x78c   : > { %v6999_v45 = vadd.f32 %v6983_v26, %v6923_v62  ;;  %v7591_v62 = vsel %vm3338_vm7, %v7589_v10, %v7590_v36  ;;  %v7667_v27 = vsel %vm3338_vm7, %v7665_v58, %v7666_v6  ;;  %v8538_v36 = vld [vmem:[%s14274_s4 + $0x1] ss:$0 sm:$0xff] }
 0x78d   : > { %v7742_v23 = vrot.slane %v7703_v30, 6 }
 0x78e   : > { %v7075_v42 = vadd.f32 %v7059_v4, %v6999_v45 }
 0x78f   : > { %v7743_v1 = vsel %vm3338_vm7, %v7741_v59, %v7742_v23 }
 0x790   : > { %v7151_v61 = vadd.f32 %v7135_v13, %v7075_v42 }
 0x792   : > { %v7227_v49 = vadd.f32 %v7211_v55, %v7151_v61 }
 0x794   : > { %v7303_v46 = vadd.f32 %v7287_v28, %v7227_v49 }
 0x796   : > { %v7379_v11 = vadd.f32 %v7363_v19, %v7303_v46 }
 0x798   : > { %v7455_v18 = vadd.f32 %v7439_v57, %v7379_v11 }
 0x79a   : > { %v7531_v43 = vadd.f32 %v7515_v51, %v7455_v18 }
 0x79c   : > { %v7607_v26 = vadd.f32 %v7591_v62, %v7531_v43 }
 0x79e   : > { %v7683_v53 = vadd.f32 %v7667_v27, %v7607_v26 }
 0x7a0   : > { %v7759_v45 = vadd.f32 %v7743_v1, %v7683_v53 }
 0x7a2   : > { %v7835_v32 = vadd.f32 %v14100_v15, %v7759_v45  ;;  %v8176_v15 = vsel %vm2272_vm5, %v8539_v3, 0 }
 0x7a3   : > { %8698 = vmatpush3.bf16.msra.mxu0 %v8176_v15 }
 0x7a4   : > { %8681 = vmatmul.mubr.msk.f32.gmra.mrb[22].mxu0 %vm361_vm0, %v7835_v32 }
 0x7f0   : > { %v8679_v21 = vpop.f32.mrb[20].mxu0 }
 0x7f1   : > { %v7970_v4 = vsub.f32 %v15341_v50, %v8679_v21  ;;  %v7946_v13 = vpop.f32.mrb[21].mxu0 }
 0x7f2   : > { %v7969_v29 = vsub.f32 %v15342_v37, %v7946_v13 }
 0x7f3   : > { %v7978_v34 = vmul.f32 %v7970_v4, %v7970_v4 }
 0x7f4   : > { %v7977_v42 = vmul.f32 %v7969_v29, %v7969_v29 }
 0x7f6   : > { %8691 = vmatprep.mubr.msk.f32.mxu1 %vm361_vm0, %v7977_v42 }
 0x7f7   : > { %8692 = vmatmul.mubr.msk.f32.gmra.mrb[20].mxu1 %vm361_vm0, %v7978_v34 }
 0x852   : > { %v8687_v55 = vpop.f32.mrb[16].mxu1 }
 0x853   : > { %v8071_v22 = vpop.f32.mrb[17].mxu1  ;;  %v8077_v8 = vadd.f32 1e-06, %v8687_v55 }
 0x854   : > { %v8072_v17 = vadd.f32 1e-06, %v8071_v22  ;;  %v8540_v22 = vld [vmem:[%s14276_s6 + $0x1] ss:$0 sm:$0xff] }
 0x857   : > { %v8690_v61 = vpop.f32.mrb[18].mxu1 }
 0x858   : > { %v8081_v56 = vpop.f32.mrb[19].mxu1  ;;  %v8087_v41 = vadd.f32 1e-06, %v8690_v61 }
 0x859   : > { %v8082_v5 = vadd.f32 1e-06, %v8081_v56 }
 0x85a   : > { %8767 = vrsqrt.f32 %v8087_v41 }
 0x85b   : > { %8769 = vrsqrt.f32 %v8082_v5 }
 0x85c   : > { %8771 = vrsqrt.f32 %v8077_v8 }
 0x85d   : > { %8773 = vrsqrt.f32 %v8072_v17 }
 0x877   : > { %v8682_v20 = vpop.f32.mrb[22].mxu0 }
 0x878   : > { %v7972_v28 = vsub.f32 %v7835_v32, %v8682_v20  ;;  %v7956_v9 = vpop.f32.mrb[23].mxu0 }
 0x879   : > { %v7971_v16 = vsub.f32 %v13957_v38, %v7956_v9  ;;  %v8768_v38 = vpop.eup %8767 }
 0x87a   : > { %v7980_v54 = vmul.f32 %v7972_v28, %v7972_v28  ;;  %v8770_v19 = vpop.eup %8769  ;;  %v8121_v40 = vmul.f32 %v8768_v38, %v14106_v35 }
 0x87b   : > { %v7979_v49 = vmul.f32 %v7971_v16, %v7971_v16  ;;  %v8120_v14 = vmul.f32 %v8770_v19, %v14097_v39  ;;  %v8772_v7 = vpop.eup %8771 }
 0x87c   : > { %v8774_v63 = vpop.eup %8773  ;;  %v8134_v0 = vmul.f32 %v8537_v52, %v8121_v40  ;;  %v8119_v57 = vmul.f32 %v8772_v7, %v14080_v44 }
 0x87d   : > { %8694 = vmatprep.mubr.msk.f32.mxu1 %vm361_vm0, %v7979_v49  ;;  %v8133_v30 = vmul.f32 %v8537_v52, %v8120_v14  ;;  %v8118_v35 = vmul.f32 %v8774_v63, %v14085_v60 }
 0x87e   : > { %8695 = vmatmul.mubr.msk.f32.gmra.mrb[22].mxu1 %vm361_vm0, %v7980_v54  ;;  %v8147_v58 = vadd.f32 %v8538_v36, %v8134_v0  ;;  %v8132_v59 = vmul.f32 %v8537_v52, %v8119_v57 }
 0x87f   : > { %v8146_v39 = vadd.f32 %v8538_v36, %v8133_v30  ;;  %v8131_v51 = vmul.f32 %v8537_v52, %v8118_v35 }
 0x880   : > { %v8145_v26 = vadd.f32 %v8538_v36, %v8132_v59 }
 0x881   : > { %v8153_v23 = vpack.c.bf16 %v8147_v58, %v8146_v39  ;;  %v8144_v27 = vadd.f32 %v8538_v36, %v8131_v51  ;;  %v8734_v39 = vld [vmem:[%s14277_s7 + $0x18] sm:$0xff]  }
 0x883   : > { %v8152_v44 = vpack.c.bf16 %v8145_v26, %v8144_v27 }
 0x885   : > { %8699 = vmatprep.mubr.msk.bf16.mxu0 %vm361_vm0, %v8152_v44 }
 0x886   : > { %8700 = vmatmul.mubr.msk.bf16.vlgmr.msra.gmra.mrb[24].mxu0 %vm361_vm0, %v8153_v23 }
 0x8ca   : > { %v8693_v12 = vpop.f32.mrb[20].mxu1 }
 0x8cb   : > { %v8091_v2 = vpop.f32.mrb[21].mxu1  ;;  %v8097_v46 = vadd.f32 1e-06, %v8693_v12 }
 0x8cc   : > { %v8092_v33 = vadd.f32 1e-06, %v8091_v2 }
 0x8ce   : > { %8775 = vrsqrt.f32 %v8092_v33 }
 0x8cf   : > { %8777 = vrsqrt.f32 %v8097_v46 }
 0x8d8   : > { %v8776_v11 = vpop.eup %8775 }
 0x8d9   : > { %v8778_v10 = vpop.eup %8777  ;;  %v8122_v6 = vmul.f32 %v8776_v11, %v7969_v29 }
 0x8da   : > { %v8123_v18 = vmul.f32 %v8778_v10, %v7970_v4  ;;  %v8733_v10 = vld [vmem:[%s14277_s7 + $0x10] sm:$0xff]  }
 0x8db   : > { %v8135_v43 = vmul.f32 %v8537_v52, %v8122_v6  ;;  %8707 = vmatprep.subr.bf16.mxu1 %v8733_v10 }
 0x8dc   : > { %v8136_v62 = vmul.f32 %v8537_v52, %v8123_v18  ;;  %8708 = vmatpush3.bf16.msra.mxu1 %v8733_v10  ;;  %v8917_v10 = vld [vmem:[#allocation2 + $0x48] sm:$0x3f] }
 0x8dd   : > { %v8148_v1 = vadd.f32 %v8538_v36, %v8135_v43  ;;  %8709 = vmatprep.subr.bf16.mxu1 %v8734_v39 }
 0x8de   : > { %v8149_v53 = vadd.f32 %v8538_v36, %v8136_v62 }
 0x8e0   : > { %v8154_v45 = vpack.c.bf16 %v8149_v53, %v8148_v1  ;;  %8710 = vmatpush3.bf16.msra.mxu1 %v8734_v39 }
 0x8e2   : > { %8703 = vmatprep.mubr.msk.bf16.mxu0 %vm361_vm0, %v8154_v45 }
 0x951   : > { %v8696_v60 = vpop.f32.mrb[22].mxu1 }
 0x952   : > { %v8107_v32 = vadd.f32 1e-06, %v8696_v60  ;;  %v8101_v21 = vpop.f32.mrb[23].mxu1 }
 0x953   : > { %v8102_v50 = vadd.f32 1e-06, %v8101_v21 }
 0x954   : > { %8779 = vrsqrt.f32 %v8107_v32 }
 0x955   : > { %8781 = vrsqrt.f32 %v8102_v50 }
 0x959   : > { %v8701_v61 = vpop.f32.mrb[24].mxu0 }
 0x95a   : > { %v8221_v56 = vadd.f32 %v8701_v61, %v8540_v22  ;;  %v8212_v20 = vpop.f32.mrb[25].mxu0 }
 0x95b   : > { %v8213_v9 = vadd.f32 %v8540_v22, %v8212_v20  ;;  %v8702_v49 = vpop.f32.mrb[26].mxu0 }
 0x95c   : > { %v8253_v54 = vmul.f32 0.70710677, %v8221_v56  ;;  %v8224_v41 = vadd.f32 %v8702_v49, %v8540_v22  ;;  %v8245_v40 = vmul.f32 0.5, %v8221_v56  ;;  %v8910_v49 = vld [vmem:[#allocation2 + $0x50] sm:$0xff] }
 0x95e   : > { %v8780_v4 = vpop.eup %8779  ;;  %8783 = verf.f32 %v8253_v54  ;;  %v8254_v8 = vmul.f32 0.70710677, %v8224_v41  ;;  %v8246_v14 = vmul.f32 0.5, %v8224_v41  ;;  %v4464_v54 = vrot.slane %v8910_v49, 3  ;;  %v8911_v41 = vld [vmem:[#allocation2 + $0x58] sm:$0x3f] }
 0x95f   : > { %v8782_v13 = vpop.eup %8781  ;;  %v8125_v37 = vmul.f32 %v8780_v4, %v7972_v28  ;;  %v8215_v28 = vpop.f32.mrb[27].mxu0 }
 0x960   : > { %v8124_v29 = vmul.f32 %v8782_v13, %v7971_v16  ;;  %v8251_v16 = vmul.f32 0.70710677, %v8213_v9  ;;  %v8216_v5 = vadd.f32 %v8540_v22, %v8215_v28  ;;  %v4465_v28 = vrot.slane %v8911_v41, 3 }
 0x961   : > { %v8138_v42 = vmul.f32 %v8537_v52, %v8125_v37 }
 0x962   : > { %v8137_v34 = vmul.f32 %v8537_v52, %v8124_v29  ;;  %8785 = verf.f32 %v8251_v16  ;;  %v8252_v12 = vmul.f32 0.70710677, %v8216_v5  ;;  %v8243_v52 = vmul.f32 0.5, %v8213_v9  ;;  %v14208_v9 = vld [vmem:[%s14278_s8 + $0x1] ss:$0 sm:$0xff] }
 0x963   : > { %v8151_v3 = vadd.f32 %v8538_v36, %v8138_v42  ;;  %8787 = verf.f32 %v8254_v8  ;;  %v8244_v63 = vmul.f32 0.5, %v8216_v5  ;;  %v14213_v5 = vld [vmem:[%s14279_s9 + $0x1] ss:$0 sm:$0xff] }
 0x964   : > { %v8150_v15 = vadd.f32 %v8538_v36, %v8137_v34  ;;  %8789 = verf.f32 %v8252_v12  ;;  %v8912_v12 = vld [vmem:[#allocation2 + $0x30] sm:$0xff] }
 0x966   : > { %v8155_v55 = vpack.c.bf16 %v8151_v3, %v8150_v15 }
 0x968   : > { %8704 = vmatmul.mubr.msk.bf16.gmra.mrb[28].mxu0 %vm361_vm0, %v8155_v55  ;;  %v8784_v17 = vpop.eup %8783 }
 0x969   : > { %v8269_v33 = vadd.f32 1.0, %v8784_v17  ;;  %v4458_v17 = vrot.slane %v8912_v12, 3 }
 0x96b   : > { %v8277_v30 = vmul.f32 %v8269_v33, %v8245_v40 }
 0x96c   : > { %v8786_v2 = vpop.eup %8785 }
 0x96d   : > { %v8788_v46 = vpop.eup %8787  ;;  %v8267_v38 = vadd.f32 1.0, %v8786_v2  ;;  %v8913_v2 = vld [vmem:[#allocation2 + $0x38] sm:$0x3f] }
 0x96e   : > { %v8790_v19 = vpop.eup %8789  ;;  %v8270_v7 = vadd.f32 1.0, %v8788_v46  ;;  %v4459_v33 = vrot.slane %v8913_v2, 3 }
 0x96f   : > { %v8268_v0 = vadd.f32 1.0, %v8790_v19  ;;  %v8275_v57 = vmul.f32 %v8267_v38, %v8243_v52  ;;  %v8914_v19 = vld [vmem:[#allocation2 + $0x60] sm:$0xff] }
 0x970   : > { %v8278_v11 = vmul.f32 %v8270_v7, %v8246_v14  ;;  %v4467_v40 = vrot.slane %v8914_v19, 3  ;;  %v8915_v14 = vld [vmem:[#allocation2 + $0x68] sm:$0x3f] }
 0x971   : > { %v8276_v36 = vmul.f32 %v8268_v0, %v8244_v63  ;;  %v4468_v7 = vrot.slane %v8915_v14, 3 }
 0x972   : > { %v8284_v35 = vpack.c.bf16 %v8278_v11, %v8277_v30  ;;  %v8916_v30 = vld [vmem:[#allocation2 + $0x40] sm:$0xff] }
 0x973   : > { %v8283_v58 = vpack.c.bf16 %v8276_v36, %v8275_v57  ;;  %v4461_v11 = vrot.slane %v8916_v30, 3  ;;  %v4462_v57 = vrot.slane %v8917_v10, 3 }
 0x975   : > { %8711 = vmatprep.mubr.msk.bf16.mxu1 %vm4307_vm8, %v8283_v58 }
 0x976   : > { %8712 = vmatmul.mubr.msk.bf16.vlgmr.msra.gmra.mrb[24].mxu1 %vm4307_vm8, %v8284_v35  ;;  %v4466_v35 = vsel %vm452_vm4, %v4464_v54, %v4465_v28 }
 0xa3b   : > { %v8705_v6 = vpop.f32.mrb[28].mxu0 }
 0xa3c   : > { %v8237_v18 = vadd.f32 %v8705_v6, %v8540_v22  ;;  %v8228_v51 = vpop.f32.mrb[29].mxu0 }
 0xa3d   : > { %v8229_v59 = vadd.f32 %v8540_v22, %v8228_v51  ;;  %v8706_v23 = vpop.f32.mrb[30].mxu0 }
 0xa3e   : > { %v8257_v43 = vmul.f32 0.70710677, %v8237_v18  ;;  %v8240_v62 = vadd.f32 %v8706_v23, %v8540_v22  ;;  %v8231_v27 = vpop.f32.mrb[31].mxu0  ;;  %v8249_v13 = vmul.f32 0.5, %v8237_v18  ;;  %v4460_v18 = vsel %vm452_vm4, %v4458_v17, %v4459_v33 }
 0xa3f   : > { %v8255_v26 = vmul.f32 0.70710677, %v8229_v59  ;;  %v8232_v1 = vadd.f32 %v8540_v22, %v8231_v27  ;;  %v8247_v42 = vmul.f32 0.5, %v8229_v59  ;;  %v4469_v23 = vsel %vm452_vm4, %v4467_v40, %v4468_v7 }
 0xa40   : > { %8791 = verf.f32 %v8257_v43  ;;  %v8258_v53 = vmul.f32 0.70710677, %v8240_v62  ;;  %v8250_v37 = vmul.f32 0.5, %v8240_v62  ;;  %v4463_v27 = vsel %vm452_vm4, %v4461_v11, %v4462_v57 }
 0xa41   : > { %8793 = verf.f32 %v8255_v26  ;;  %v8256_v44 = vmul.f32 0.70710677, %v8232_v1  ;;  %v8248_v34 = vmul.f32 0.5, %v8232_v1  ;;  %v4476_v1 = vrot.slane %v14065_v25, 3 }
 0xa42   : > { %8795 = verf.f32 %v8258_v53  ;;  %v4477_v53 = vrot.slane %v13909_v24, 3 }
 0xa43   : > { %8797 = verf.f32 %v8256_v44 }
 0xa49   : > { %v8713_v16 = vpop.f32.mrb[24].mxu1 }
 0xa4a   : > { %v8792_v45 = vpop.eup %8791  ;;  %v8364_v8 = vadd.f32 %v8713_v16, %v14208_v9  ;;  %v8355_v46 = vpop.f32.mrb[25].mxu1 }
 0xa4b   : > { %v8794_v60 = vpop.eup %8793  ;;  %v8273_v32 = vadd.f32 1.0, %v8792_v45  ;;  %v8356_v38 = vadd.f32 %v14208_v9, %v8355_v46  ;;  %v8714_v52 = vpop.f32.mrb[26].mxu1 }
 0xa4c   : > { %v8796_v21 = vpop.eup %8795  ;;  %v8271_v50 = vadd.f32 1.0, %v8794_v60  ;;  %v8393_v63 = vmul.f32 %v14213_v5, %v8364_v8  ;;  %v8367_v0 = vadd.f32 %v8714_v52, %v14208_v9  ;;  %v8358_v36 = vpop.f32.mrb[27].mxu1  ;;  %v4470_v60 = vrot.slane %v14125_v48, 3 }
 0xa4d   : > { %v8798_v4 = vpop.eup %8797  ;;  %v8274_v29 = vadd.f32 1.0, %v8796_v21  ;;  %v8281_v15 = vmul.f32 %v8273_v32, %v8249_v13  ;;  %v8391_v58 = vmul.f32 %v14213_v5, %v8356_v38  ;;  %v8359_v39 = vadd.f32 %v14208_v9, %v8358_v36 }
 0xa4e   : > { %v8272_v3 = vadd.f32 1.0, %v8798_v4  ;;  %v8279_v22 = vmul.f32 %v8271_v50, %v8247_v42  ;;  %v8401_v6 = vadd.f32 %v8393_v63, %v4466_v35  ;;  %v8394_v51 = vmul.f32 %v14213_v5, %v8367_v0  ;;  %v8918_v4 = vld [vmem:[#allocation2 + $0xa0] sm:$0xff] }
 0xa4f   : > { %v8282_v55 = vmul.f32 %v8274_v29, %v8250_v37  ;;  %v8399_v59 = vadd.f32 %v8391_v58, %v4460_v18  ;;  %v8392_v43 = vmul.f32 %v14213_v5, %v8359_v39  ;;  %v4471_v32 = vrot.slane %v14129_v47, 3  ;;  %v8919_v37 = vld [vmem:[#allocation2 + $0xa8] sm:$0x3f] }
 0xa50   : > { %v8280_v61 = vmul.f32 %v8272_v3, %v8248_v34  ;;  %8409 = vst.msk [vmem:[%s14224_s18 + $0x10] sm:$0xff] %vm361_vm0, %v8401_v6  ;;  %v8402_v62 = vadd.f32 %v8394_v51, %v4469_v23  ;;  %v4479_v13 = vrot.slane %v8918_v4, 3  ;;  %v4480_v29 = vrot.slane %v8919_v37, 3  ;;  %v8920_v3 = vld [vmem:[#allocation2 + $0x88] sm:$0x3f] }
 0xa51   : > { %v8286_v56 = vpack.c.bf16 %v8282_v55, %v8281_v15  ;;  %8407 = vst.msk [vmem:[%s14224_s18] sm:$0xff] %vm361_vm0, %v8399_v59  ;;  %v8400_v26 = vadd.f32 %v8392_v43, %v4463_v27  ;;  %v4473_v34 = vrot.slane %v14136_v31, 3  ;;  %v4474_v48 = vrot.slane %v8920_v3, 3 }
 0xa52   : > { %v8285_v20 = vpack.c.bf16 %v8280_v61, %v8279_v22  ;;  %8410 = vst.msk [vmem:[%s14224_s18 + $0x18] sm:$0xff] %vm361_vm0, %v8402_v62  ;;  %v4478_v15 = vsel %vm452_vm4, %v4476_v1, %v4477_v53  ;;  %v4481_v31 = vsel %vm452_vm4, %v4479_v13, %v4480_v29 }
 0xa53   : > { %8408 = vst.msk [vmem:[%s14224_s18 + $0x8] sm:$0xff] %vm361_vm0, %v8400_v26  ;;  %v4475_v28 = vsel %vm452_vm4, %v4473_v34, %v4474_v48 }
 0xa54   : > { %8715 = vmatprep.mubr.msk.bf16.mxu1 %vm4307_vm8, %v8285_v20 }
 0xa55   : > { %8716 = vmatmul.mubr.msk.bf16.gmra.mrb[28].mxu1 %vm4307_vm8, %v8286_v56  ;;  %v4472_v56 = vsel %vm452_vm4, %v4470_v60, %v4471_v32 }
 0xb28   : > { %v8717_v44 = vpop.f32.mrb[28].mxu1 }
 0xb29   : > { %v8380_v45 = vadd.f32 %v8717_v44, %v14208_v9  ;;  %v8371_v21 = vpop.f32.mrb[29].mxu1 }
 0xb2a   : > { %v8372_v50 = vadd.f32 %v14208_v9, %v8371_v21  ;;  %v8718_v42 = vpop.f32.mrb[30].mxu1 }
 0xb2b   : > { %v8397_v25 = vmul.f32 %v14213_v5, %v8380_v45  ;;  %v8383_v24 = vadd.f32 %v8718_v42, %v14208_v9  ;;  %v8374_v47 = vpop.f32.mrb[31].mxu1 }
 0xb2c   : > { %v8395_v55 = vmul.f32 %v14213_v5, %v8372_v50  ;;  %v8375_v22 = vadd.f32 %v14208_v9, %v8374_v47 }
 0xb2d   : > { %v8405_v61 = vadd.f32 %v8397_v25, %v4478_v15  ;;  %v8398_v20 = vmul.f32 %v14213_v5, %v8383_v24 }
 0xb2e   : > { %v8403_v49 = vadd.f32 %v8395_v55, %v4472_v56  ;;  %v8396_v54 = vmul.f32 %v14213_v5, %v8375_v22 }
 0xb2f   : > { %8413 = vst.msk [vmem:[%s14224_s18 + $0x30] sm:$0xff] %vm361_vm0, %v8405_v61  ;;  %v8406_v41 = vadd.f32 %v8398_v20, %v4481_v31 }
 0xb30   : > { %8411 = vst.msk [vmem:[%s14224_s18 + $0x20] sm:$0xff] %vm361_vm0, %v8403_v49  ;;  %v8404_v16 = vadd.f32 %v8396_v54, %v4475_v28 }
 0xb31   : > { %8414 = vst.msk [vmem:[%s14224_s18 + $0x38] sm:$0xff] %vm361_vm0, %v8406_v41 }
 0xb32   : > { %8412 = vst.msk [vmem:[%s14224_s18 + $0x28] sm:$0xff] %vm361_vm0, %v8404_v16 }
 0xb33 PF: > { %s20_s13 = sadd.s32 1, %s8927_s13  }
 0xb34   : > { %p17_p4 = scmp.ge.s32.totalorder %s20_s13, 4  }
 0xb36   :  { %19 = sbr.rel (!%p17_p4) target bundleno = 1 (0x1), region = 94 }

</bundles_post_ra>
